<compile_context>
chip_gen: v5e
topology: v5e:2x2
jax: 0.10.0
libtpu: 0.0.40
codegen_flags: <defaults>
</compile_context>

<pallas_src>
import math

import jax
import jax.numpy as jnp
from jax.experimental import pallas as pl
from jax.experimental.pallas import tpu as pltpu

# ----------------------------- config (small FIM) -----------------------------
VOCAB = 64                   # num_words
NUM_FILTERS = 32             # num_filters == word_embedding_dim
WINDOW = 3                   # HDC window size (odd)
DILATIONS = (1, 2, 3)        # HDC dilation rates
L1 = 1 + len(DILATIONS)      # stacked levels
NUM_WORDS_TITLE = 12         # T (words per title)
N_CLICKED = 9                # num_clicked_news_a_user
K_PLUS_1 = 2                 # 1 + K candidate news
BATCH = 2

C3D_1_FILTERS = 32
C3D_2_FILTERS = 16


def _pool_out(n):            # MaxPool3d(kernel=3, stride=3) floor semantics
    return n // 3


_D2 = _pool_out(_pool_out(N_CLICKED))
_H2 = _pool_out(_pool_out(NUM_WORDS_TITLE))
FC_IN = C3D_2_FILTERS * _D2 * _H2 * _H2


# ============================ Kernel 1: encoder + matching ====================
def _encoder_matching_kernel(ids_ref, tpos_ref, emb_ref, w_ref, b_ref, out_ref):
    """Per grid step = one batch row b.

    ids_ref : (1, Mb, 1) int32   word ids, rows = [cand c=0..C-1 | clicked n=0..N-1] x T
    tpos_ref: (1, Mb, 1) int32   word position within its title (r % T)
    emb_ref : (VOCAB, F) bf16    embedding table (row 0 zero -> padding_idx=0)
    w_ref   : (3*L, F, F) bf16   conv1d tap weights, w_ref[3*i+j] = W_{layer i, tap j}
    b_ref   : (L, 1, F) f32      conv1d biases
    out_ref : (C, L1, T, N*T) bf16  scaled matching scores for this batch row
    """
    Mb = ids_ref.shape[1]
    vocab, F = emb_ref.shape
    C, _, T, NT = out_ref.shape

    ids = ids_ref[0]                                     # (Mb, 1) int32
    tpos = tpos_ref[0]                                   # (Mb, 1) int32

    # --- stage 0: embedding lookup as one-hot MXU matmul --------------------
    vocab_iota = jax.lax.broadcasted_iota(jnp.int32, (Mb, vocab), 1)
    onehot = jnp.where(vocab_iota == ids, 1.0, 0.0).astype(jnp.bfloat16)
    x = jnp.dot(onehot, emb_ref[...],
                preferred_element_type=jnp.float32).astype(jnp.bfloat16)
    levels = [x]                                         # level 0 = raw embedding

    # --- exact 0/1 shift-selection matrices built from iota -----------------
    row_i = jax.lax.broadcasted_iota(jnp.int32, (Mb, Mb), 0)
    col_i = jax.lax.broadcasted_iota(jnp.int32, (Mb, Mb), 1)
    diff = col_i - row_i

    def shifted(v, off):
        # out[r] = v[r + off] if the tap stays inside the same title, else 0
        valid = ((tpos + off) >= 0) & ((tpos + off) < T)                 # (Mb, 1)
        sel = jnp.where((diff == off) & valid, 1.0, 0.0).astype(jnp.bfloat16)
        return jnp.dot(sel, v,
                       preferred_element_type=jnp.float32).astype(jnp.bfloat16)

    # --- HDC: three dilated Conv1d(k=3, padding=d) + ReLU layers -------------
    for i, d in enumerate(DILATIONS):
        acc = jnp.dot(shifted(x, -d), w_ref[3 * i + 0],
                      preferred_element_type=jnp.float32)
        acc = acc + jnp.dot(x, w_ref[3 * i + 1],
                            preferred_element_type=jnp.float32)
        acc = acc + jnp.dot(shifted(x, d), w_ref[3 * i + 2],
                            preferred_element_type=jnp.float32)
        acc = jnp.maximum(acc + b_ref[i], 0.0)
        x = acc.astype(jnp.bfloat16)
        levels.append(x)

    # --- cross matching: candidates x all clicked titles of this batch row ---
    scale = 1.0 / math.sqrt(F)
    clk_lo = C * T
    for l, lev in enumerate(levels):
        clk = lev[clk_lo:clk_lo + NT, :]                 # (N*T, F) bf16
        for c in range(C):
            cand = lev[c * T:(c + 1) * T, :]             # (T, F) bf16
            s = jax.lax.dot_general(cand, clk, (((1,), (1,)), ((), ())),
                                    preferred_element_type=jnp.float32)
            out_ref[c, l] = (s * scale).astype(out_ref.dtype)


def encoder_matching(ids, tpos, emb_t, w_all, b_all):
    B, Mb, _ = ids.shape
    T = NUM_WORDS_TITLE
    NT = N_CLICKED * T
    return pl.pallas_call(
        _encoder_matching_kernel,
        out_shape=jax.ShapeDtypeStruct((B * K_PLUS_1, L1, T, NT), jnp.bfloat16),
        grid_spec=pltpu.PrefetchScalarGridSpec(
            num_scalar_prefetch=0,
            grid=(B,),
            in_specs=[
                pl.BlockSpec((1, Mb, 1), lambda b: (b, 0, 0)),
                pl.BlockSpec((1, Mb, 1), lambda b: (0, 0, 0)),
                pl.BlockSpec((VOCAB, NUM_FILTERS), lambda b: (0, 0)),
                pl.BlockSpec((3 * len(DILATIONS), NUM_FILTERS, NUM_FILTERS),
                             lambda b: (0, 0, 0)),
                pl.BlockSpec((len(DILATIONS), 1, NUM_FILTERS),
                             lambda b: (0, 0, 0)),
            ],
            out_specs=pl.BlockSpec((K_PLUS_1, L1, T, NT),
                                   lambda b: (b, 0, 0, 0)),
        ),
        compiler_params=pltpu.CompilerParams(dimension_semantics=("parallel",)),
    )(ids, tpos, emb_t, w_all, b_all)


# ============================ Kernel 2: lane-dense conv3d_0 matmul ============
def _conv_mm_kernel(w_ref, x_ref, b_ref, o_ref):
    # w: (O, K) bf16, x: (K, TN) bf16, b: (O, 1) f32 -> o: (O, TN) f32
    acc = jnp.dot(w_ref[...], x_ref[...], preferred_element_type=jnp.float32)
    o_ref[...] = jnp.maximum(acc + b_ref[...], 0.0).astype(o_ref.dtype)


def conv_matmul_t(w, xT, b, *, tile_n=None):
    """y^T = relu(w @ xT + b).  w:(O,K), xT:(K,M), b:(O,).  Lane-dense output."""
    O, K = w.shape
    K2, M = xT.shape
    assert K == K2
    if tile_n is None or tile_n >= M:
        tile_n = M
    grid_n = pl.cdiv(M, tile_n)
    return pl.pallas_call(
        _conv_mm_kernel,
        out_shape=jax.ShapeDtypeStruct((O, M), jnp.float32),
        grid_spec=pltpu.PrefetchScalarGridSpec(
            num_scalar_prefetch=0,
            grid=(grid_n,),
            in_specs=[
                pl.BlockSpec((O, K), lambda j: (0, 0)),
                pl.BlockSpec((K, tile_n), lambda j: (0, j)),
                pl.BlockSpec((O, 1), lambda j: (0, 0)),
            ],
            out_specs=pl.BlockSpec((O, tile_n), lambda j: (0, j)),
        ),
        compiler_params=pltpu.CompilerParams(dimension_semantics=("parallel",)),
    )(w.astype(jnp.bfloat16), xT.astype(jnp.bfloat16),
      b.astype(jnp.float32).reshape(O, 1))


def _conv3d0_tile_n(total):
    # v7x has 2 TensorCores per chip: split the lane axis (128-aligned tile,
    # ragged tail handled by masked stores).  v5e/v6e: single grid step.
    try:
        kind = jax.devices()[0].device_kind.lower()
    except Exception:
        kind = ""
    if "v7" in kind or "tpu7" in kind:
        half = -(-total // 2)
        return min(total, -(-half // 128) * 128)
    return total


# ============================ XLA glue (tiny tail ops) ========================
def conv3d_relu_xla(x, w, b):
    """PyTorch Conv3d(kernel=3, padding=1) + ReLU, channels-last NDHWC (tiny M)."""
    Bq, D, H, Wd, Cin = x.shape
    O = w.shape[0]
    xp = jnp.pad(x, ((0, 0), (1, 1), (1, 1), (1, 1), (0, 0)))
    pats = [xp[:, kd:kd + D, kh:kh + H, kw:kw + Wd, :]
            for kd in range(3) for kh in range(3) for kw in range(3)]
    p = jnp.stack(pats, axis=-2)                            # (Bq,D,H,W,27,Cin)
    xm = p.reshape(Bq * D * H * Wd, 27 * Cin)
    wm = jnp.transpose(w, (0, 2, 3, 4, 1)).reshape(O, 27 * Cin)
    y = jnp.maximum(xm @ wm.T + b, 0.0)
    return y.reshape(Bq, D, H, Wd, O)


def maxpool3d_3(x):
    """nn.MaxPool3d(kernel_size=3, stride=3) (floor), channels-last NDHWC."""
    B, D, H, W, C = x.shape
    Do, Ho, Wo = D // 3, H // 3, W // 3
    x = x[:, :Do * 3, :Ho * 3, :Wo * 3, :]
    x = x.reshape(B, Do, 3, Ho, 3, Wo, 3, C)
    return x.max(axis=(2, 4, 6))


# ============================ FIM modules =====================================
def aggregator(params, match):
    """match: (B*C, L1, T, N*T) bf16 scaled matching scores -> (B*C,) scores."""
    BC, L1_, T, NT = match.shape
    N = NT // T
    # Channel-first matching volume: (L1, BC, D=N, H=T_cand, W=T_clicked)
    vol = match.reshape(BC, L1_, T, N, T).transpose(1, 0, 3, 2, 4)

    # conv3d_0: XLA 27-tap im2col (rows = tap-major, channel-minor) feeding the
    # lane-dense fused Pallas matmul.
    # TODO(synk): fuse the 27-tap halo reads + first MaxPool3d into the Pallas
    # kernel so the (108, 5184) patch tensor never hits HBM (matters most on v5e).
    xp = jnp.pad(vol, ((0, 0), (0, 0), (1, 1), (1, 1), (1, 1)))
    pats = [xp[:, :, kd:kd + N, kh:kh + T, kw:kw + T]
            for kd in range(3) for kh in range(3) for kw in range(3)]
    xT = jnp.stack(pats, axis=0).reshape(27 * L1_, BC * N * T * T)   # (108, 5184)
    wm0 = jnp.transpose(params['conv3d_0_w'],
                        (0, 2, 3, 4, 1)).reshape(C3D_1_FILTERS, 27 * L1_)
    M3 = xT.shape[1]
    yT = conv_matmul_t(wm0, xT, params['conv3d_0_b'],
                       tile_n=_conv3d0_tile_n(M3))                   # (32, 5184) f32

    # MaxPool3d(3,3) on the channel-first layout (pure reshape + max, no transpose
    # of the big tensor needed).
    y = yT.reshape(C3D_1_FILTERS, BC, N, T, T)
    y = y.reshape(C3D_1_FILTERS, BC, N // 3, 3, T // 3, 3, T // 3, 3).max(axis=(3, 5, 7))

    # Tail: conv3d_1 (M=192) + pool + FC (M=4) stay in XLA; a pallas_call launch
    # would cost more than the compute.  Only 24 KB is transposed here.
    x1 = jnp.transpose(y, (1, 2, 3, 4, 0))                 # (BC, 3, 4, 4, 32)
    x1 = conv3d_relu_xla(x1, params['conv3d_1_w'], params['conv3d_1_b'])
    x1 = maxpool3d_3(x1)                                   # (BC, 1, 1, 1, 16)
    feat = x1.reshape(BC, -1)                              # (BC, FC_IN)
    score = feat @ params['fc_w'].T + params['fc_b']
    return score[:, 0]


def fim_forward(params, candidate_titles, clicked_titles):
    """candidate_titles: (1+K, B, T) int32, clicked_titles: (B, N, T) int32.
       Returns click scores of shape (B, 1+K)."""
    C, B, T = candidate_titles.shape
    N = clicked_titles.shape[1]
    Mb = (C + N) * T

    # Per-batch-row title id layout: [cand c=0..C-1 | clicked n=0..N-1], T words each.
    cand_bt = jnp.transpose(candidate_titles, (1, 0, 2)).reshape(B, C * T)
    clk_bt = clicked_titles.reshape(B, N * T)
    ids = jnp.concatenate([cand_bt, clk_bt], axis=1).reshape(B, Mb, 1).astype(jnp.int32)
    tpos = (jnp.arange(Mb, dtype=jnp.int32) % T).reshape(1, Mb, 1)

    emb_t = params['word_emb'].astype(jnp.bfloat16)
    # w_all[3*i + j] = conv1d_i weight for tap j, laid out (Cin, Cout)
    w_all = jnp.concatenate(
        [params[f'conv1d_{i}_w'].transpose(2, 1, 0) for i in range(len(DILATIONS))],
        axis=0).astype(jnp.bfloat16)                       # (9, F, F)
    b_all = jnp.stack([params[f'conv1d_{i}_b'] for i in range(len(DILATIONS))],
                      axis=0).reshape(len(DILATIONS), 1, NUM_FILTERS).astype(jnp.float32)

    # Fused encoder (embedding + HDC) + cross matching.  Row b*C + c of the
    # output is candidate c of batch row b vs. all clicked titles of b.
    match = encoder_matching(ids, tpos, emb_t, w_all, b_all)   # (B*C, L1, T, N*T) bf16
    scores = aggregator(params, match)                          # (B*C,)
    return scores.reshape(B, C)                                 # (batch, 1+K)


# ----------------------------- deterministic params ---------------------------
def init_params(key):
    ks = jax.random.split(key, 12)
    p = {}
    we = jax.random.normal(ks[0], (VOCAB, NUM_FILTERS), jnp.float32) * 0.1
    p['word_emb'] = we.at[0].set(0.0)                       # padding_idx=0
    cin = NUM_FILTERS
    for i, _ in enumerate(DILATIONS):
        p[f'conv1d_{i}_w'] = jax.random.normal(
            ks[1 + i], (NUM_FILTERS, cin, WINDOW), jnp.float32) / math.sqrt(cin * WINDOW)
        p[f'conv1d_{i}_b'] = jnp.zeros((NUM_FILTERS,), jnp.float32)
    p['conv3d_0_w'] = jax.random.normal(
        ks[6], (C3D_1_FILTERS, L1, 3, 3, 3), jnp.float32) / math.sqrt(L1 * 27)
    p['conv3d_0_b'] = jnp.zeros((C3D_1_FILTERS,), jnp.float32)
    p['conv3d_1_w'] = jax.random.normal(
        ks[7], (C3D_2_FILTERS, C3D_1_FILTERS, 3, 3, 3), jnp.float32) / math.sqrt(C3D_1_FILTERS * 27)
    p['conv3d_1_b'] = jnp.zeros((C3D_2_FILTERS,), jnp.float32)
    p['fc_w'] = jax.random.normal(ks[8], (1, FC_IN), jnp.float32) / math.sqrt(FC_IN)
    p['fc_b'] = jnp.zeros((1,), jnp.float32)
    return p


# ----------------------------- main --------------------------------------------
if __name__ == "__main__":
    key = jax.random.PRNGKey(0)
    kp, kc, kh = jax.random.split(key, 3)
    params = init_params(kp)

    candidate_titles = jax.random.randint(
        kc, (K_PLUS_1, BATCH, NUM_WORDS_TITLE), 0, VOCAB, dtype=jnp.int32)
    clicked_titles = jax.random.randint(
        kh, (BATCH, N_CLICKED, NUM_WORDS_TITLE), 0, VOCAB, dtype=jnp.int32)

    fwd = jax.jit(fim_forward)
    out = fwd(params, candidate_titles, clicked_titles)
    out = jax.block_until_ready(out)

    assert out.shape == (BATCH, K_PLUS_1)
    assert bool(jnp.all(jnp.isfinite(out)))
    print("KERNEL_OK")
</pallas_src>

<mosaic_0001>
module attributes {stable_mosaic.version = 11 : i64} {
  func.func @_encoder_matching_kernel(%arg0: i32, %arg1: memref<1x132x1xi32, #tpu.memory_space<vmem>>, %arg2: memref<1x132x1xi32, #tpu.memory_space<vmem>>, %arg3: memref<64x32xbf16, #tpu.memory_space<vmem>>, %arg4: memref<9x32x32xbf16, #tpu.memory_space<vmem>>, %arg5: memref<3x1x32xf32, #tpu.memory_space<vmem>>, %arg6: memref<2x4x12x108xbf16, #tpu.memory_space<vmem>>) attributes {dimension_semantics = [#tpu.dimension_semantics<parallel>], iteration_bounds = array<i64: 2>, scalar_prefetch = 0 : i64, scratch_operands = 0 : i64, tpu.core_type = #tpu.core_type<tc>, window_params = [{transform_indices = @transform_0, window_bounds = array<i64: 1, 132, 1>}, {pipeline_mode = #tpu.pipeline_mode<synchronous>, transform_indices = @transform_1, window_bounds = array<i64: 1, 132, 1>}, {pipeline_mode = #tpu.pipeline_mode<synchronous>, transform_indices = @transform_2, window_bounds = array<i64: 64, 32>}, {pipeline_mode = #tpu.pipeline_mode<synchronous>, transform_indices = @transform_3, window_bounds = array<i64: 9, 32, 32>}, {pipeline_mode = #tpu.pipeline_mode<synchronous>, transform_indices = @transform_4, window_bounds = array<i64: 3, 1, 32>}, {transform_indices = @transform_5, window_bounds = array<i64: 2, 4, 12, 108>}]} {
    %c0 = arith.constant 0 : index
    %c0_0 = arith.constant 0 : index
    %c0_1 = arith.constant 0 : index
    %0 = vector.load %arg1[%c0, %c0_0, %c0_1] : memref<1x132x1xi32, #tpu.memory_space<vmem>>, vector<1x132x1xi32>
    %1 = vector.shape_cast %0 : vector<1x132x1xi32> to vector<132x1xi32>
    %c0_2 = arith.constant 0 : index
    %c0_3 = arith.constant 0 : index
    %c0_4 = arith.constant 0 : index
    %2 = vector.load %arg2[%c0_2, %c0_3, %c0_4] : memref<1x132x1xi32, #tpu.memory_space<vmem>>, vector<1x132x1xi32>
    %3 = vector.shape_cast %2 : vector<1x132x1xi32> to vector<132x1xi32>
    %4 = tpu.iota {dimensions = array<i32: 1>} : vector<132x64xi32>
    %5 = vector.broadcast %1 : vector<132x1xi32> to vector<132x64xi32>
    %6 = arith.cmpi eq, %4, %5 : vector<132x64xi32>
    %cst = arith.constant 1.000000e+00 : f32
    %cst_5 = arith.constant 0.000000e+00 : f32
    %7 = vector.broadcast %cst : f32 to vector<132x64xf32>
    %8 = vector.broadcast %cst_5 : f32 to vector<132x64xf32>
    %9 = arith.select %6, %7, %8 : vector<132x64xi1>, vector<132x64xf32>
    %10 = arith.truncf %9 : vector<132x64xf32> to vector<132x64xbf16>
    %c0_6 = arith.constant 0 : index
    %c0_7 = arith.constant 0 : index
    %11 = vector.load %arg3[%c0_6, %c0_7] : memref<64x32xbf16, #tpu.memory_space<vmem>>, vector<64x32xbf16>
    %cst_8 = arith.constant dense<0.000000e+00> : vector<132x32xf32>
    %12 = tpu.matmul %10, %11, %cst_8 {dimension_numbers = #tpu.dot_dimension_numbers<[1], [0], [0], [1], [0, 0, 1, 1], [], []>} : vector<132x64xbf16>, vector<64x32xbf16>, vector<132x32xf32> -> vector<132x32xf32>
    %13 = arith.truncf %12 : vector<132x32xf32> to vector<132x32xbf16>
    %14 = tpu.iota {dimensions = array<i32: 0>} : vector<132x132xi32>
    %15 = tpu.iota {dimensions = array<i32: 1>} : vector<132x132xi32>
    %16 = arith.subi %15, %14 : vector<132x132xi32>
    %c-1_i32 = arith.constant -1 : i32
    %17 = vector.broadcast %c-1_i32 : i32 to vector<132x1xi32>
    %18 = arith.addi %3, %17 : vector<132x1xi32>
    %c0_i32 = arith.constant 0 : i32
    %19 = vector.broadcast %c0_i32 : i32 to vector<132x1xi32>
    %20 = arith.cmpi sge, %18, %19 : vector<132x1xi32>
    %c-1_i32_9 = arith.constant -1 : i32
    %21 = vector.broadcast %c-1_i32_9 : i32 to vector<132x1xi32>
    %22 = arith.addi %3, %21 : vector<132x1xi32>
    %c12_i32 = arith.constant 12 : i32
    %23 = vector.broadcast %c12_i32 : i32 to vector<132x1xi32>
    %24 = arith.cmpi slt, %22, %23 : vector<132x1xi32>
    %25 = arith.andi %20, %24 : vector<132x1xi1>
    %c-1_i32_10 = arith.constant -1 : i32
    %26 = vector.broadcast %c-1_i32_10 : i32 to vector<132x132xi32>
    %27 = arith.cmpi eq, %16, %26 : vector<132x132xi32>
    %28 = vector.broadcast %25 : vector<132x1xi1> to vector<132x132xi1>
    %29 = arith.andi %27, %28 : vector<132x132xi1>
    %cst_11 = arith.constant 1.000000e+00 : f32
    %cst_12 = arith.constant 0.000000e+00 : f32
    %30 = vector.broadcast %cst_11 : f32 to vector<132x132xf32>
    %31 = vector.broadcast %cst_12 : f32 to vector<132x132xf32>
    %32 = arith.select %29, %30, %31 : vector<132x132xi1>, vector<132x132xf32>
    %33 = arith.truncf %32 : vector<132x132xf32> to vector<132x132xbf16>
    %cst_13 = arith.constant dense<0.000000e+00> : vector<132x32xf32>
    %34 = tpu.matmul %33, %13, %cst_13 {dimension_numbers = #tpu.dot_dimension_numbers<[1], [0], [0], [1], [0, 0, 1, 1], [], []>} : vector<132x132xbf16>, vector<132x32xbf16>, vector<132x32xf32> -> vector<132x32xf32>
    %35 = arith.truncf %34 : vector<132x32xf32> to vector<132x32xbf16>
    %c0_14 = arith.constant 0 : index
    %c0_15 = arith.constant 0 : index
    %c0_16 = arith.constant 0 : index
    %36 = vector.load %arg4[%c0_14, %c0_15, %c0_16] : memref<9x32x32xbf16, #tpu.memory_space<vmem>>, vector<1x32x32xbf16>
    %37 = vector.shape_cast %36 : vector<1x32x32xbf16> to vector<32x32xbf16>
    %cst_17 = arith.constant dense<0.000000e+00> : vector<132x32xf32>
    %38 = tpu.matmul %35, %37, %cst_17 {dimension_numbers = #tpu.dot_dimension_numbers<[1], [0], [0], [1], [0, 0, 1, 1], [], []>} : vector<132x32xbf16>, vector<32x32xbf16>, vector<132x32xf32> -> vector<132x32xf32>
    %c1 = arith.constant 1 : index
    %c0_18 = arith.constant 0 : index
    %c0_19 = arith.constant 0 : index
    %39 = vector.load %arg4[%c1, %c0_18, %c0_19] : memref<9x32x32xbf16, #tpu.memory_space<vmem>>, vector<1x32x32xbf16>
    %40 = vector.shape_cast %39 : vector<1x32x32xbf16> to vector<32x32xbf16>
    %cst_20 = arith.constant dense<0.000000e+00> : vector<132x32xf32>
    %41 = tpu.matmul %13, %40, %cst_20 {dimension_numbers = #tpu.dot_dimension_numbers<[1], [0], [0], [1], [0, 0, 1, 1], [], []>} : vector<132x32xbf16>, vector<32x32xbf16>, vector<132x32xf32> -> vector<132x32xf32>
    %42 = arith.addf %38, %41 : vector<132x32xf32>
    %c1_i32 = arith.constant 1 : i32
    %43 = vector.broadcast %c1_i32 : i32 to vector<132x1xi32>
    %44 = arith.addi %3, %43 : vector<132x1xi32>
    %c0_i32_21 = arith.constant 0 : i32
    %45 = vector.broadcast %c0_i32_21 : i32 to vector<132x1xi32>
    %46 = arith.cmpi sge, %44, %45 : vector<132x1xi32>
    %c1_i32_22 = arith.constant 1 : i32
    %47 = vector.broadcast %c1_i32_22 : i32 to vector<132x1xi32>
    %48 = arith.addi %3, %47 : vector<132x1xi32>
    %c12_i32_23 = arith.constant 12 : i32
    %49 = vector.broadcast %c12_i32_23 : i32 to vector<132x1xi32>
    %50 = arith.cmpi slt, %48, %49 : vector<132x1xi32>
    %51 = arith.andi %46, %50 : vector<132x1xi1>
    %c1_i32_24 = arith.constant 1 : i32
    %52 = vector.broadcast %c1_i32_24 : i32 to vector<132x132xi32>
    %53 = arith.cmpi eq, %16, %52 : vector<132x132xi32>
    %54 = vector.broadcast %51 : vector<132x1xi1> to vector<132x132xi1>
    %55 = arith.andi %53, %54 : vector<132x132xi1>
    %cst_25 = arith.constant 1.000000e+00 : f32
    %cst_26 = arith.constant 0.000000e+00 : f32
    %56 = vector.broadcast %cst_25 : f32 to vector<132x132xf32>
    %57 = vector.broadcast %cst_26 : f32 to vector<132x132xf32>
    %58 = arith.select %55, %56, %57 : vector<132x132xi1>, vector<132x132xf32>
    %59 = arith.truncf %58 : vector<132x132xf32> to vector<132x132xbf16>
    %cst_27 = arith.constant dense<0.000000e+00> : vector<132x32xf32>
    %60 = tpu.matmul %59, %13, %cst_27 {dimension_numbers = #tpu.dot_dimension_numbers<[1], [0], [0], [1], [0, 0, 1, 1], [], []>} : vector<132x132xbf16>, vector<132x32xbf16>, vector<132x32xf32> -> vector<132x32xf32>
    %61 = arith.truncf %60 : vector<132x32xf32> to vector<132x32xbf16>
    %c2 = arith.constant 2 : index
    %c0_28 = arith.constant 0 : index
    %c0_29 = arith.constant 0 : index
    %62 = vector.load %arg4[%c2, %c0_28, %c0_29] : memref<9x32x32xbf16, #tpu.memory_space<vmem>>, vector<1x32x32xbf16>
    %63 = vector.shape_cast %62 : vector<1x32x32xbf16> to vector<32x32xbf16>
    %cst_30 = arith.constant dense<0.000000e+00> : vector<132x32xf32>
    %64 = tpu.matmul %61, %63, %cst_30 {dimension_numbers = #tpu.dot_dimension_numbers<[1], [0], [0], [1], [0, 0, 1, 1], [], []>} : vector<132x32xbf16>, vector<32x32xbf16>, vector<132x32xf32> -> vector<132x32xf32>
    %65 = arith.addf %42, %64 : vector<132x32xf32>
    %c0_31 = arith.constant 0 : index
    %c0_32 = arith.constant 0 : index
    %c0_33 = arith.constant 0 : index
    %66 = vector.load %arg5[%c0_31, %c0_32, %c0_33] : memref<3x1x32xf32, #tpu.memory_space<vmem>>, vector<1x1x32xf32>
    %67 = vector.shape_cast %66 : vector<1x1x32xf32> to vector<1x32xf32>
    %68 = vector.broadcast %67 : vector<1x32xf32> to vector<132x32xf32>
    %69 = arith.addf %65, %68 : vector<132x32xf32>
    %cst_34 = arith.constant 0.000000e+00 : f32
    %70 = vector.broadcast %cst_34 : f32 to vector<132x32xf32>
    %71 = arith.maximumf %69, %70 : vector<132x32xf32>
    %72 = arith.truncf %71 : vector<132x32xf32> to vector<132x32xbf16>
    %c-2_i32 = arith.constant -2 : i32
    %73 = vector.broadcast %c-2_i32 : i32 to vector<132x1xi32>
    %74 = arith.addi %3, %73 : vector<132x1xi32>
    %c0_i32_35 = arith.constant 0 : i32
    %75 = vector.broadcast %c0_i32_35 : i32 to vector<132x1xi32>
    %76 = arith.cmpi sge, %74, %75 : vector<132x1xi32>
    %c-2_i32_36 = arith.constant -2 : i32
    %77 = vector.broadcast %c-2_i32_36 : i32 to vector<132x1xi32>
    %78 = arith.addi %3, %77 : vector<132x1xi32>
    %c12_i32_37 = arith.constant 12 : i32
    %79 = vector.broadcast %c12_i32_37 : i32 to vector<132x1xi32>
    %80 = arith.cmpi slt, %78, %79 : vector<132x1xi32>
    %81 = arith.andi %76, %80 : vector<132x1xi1>
    %c-2_i32_38 = arith.constant -2 : i32
    %82 = vector.broadcast %c-2_i32_38 : i32 to vector<132x132xi32>
    %83 = arith.cmpi eq, %16, %82 : vector<132x132xi32>
    %84 = vector.broadcast %81 : vector<132x1xi1> to vector<132x132xi1>
    %85 = arith.andi %83, %84 : vector<132x132xi1>
    %cst_39 = arith.constant 1.000000e+00 : f32
    %cst_40 = arith.constant 0.000000e+00 : f32
    %86 = vector.broadcast %cst_39 : f32 to vector<132x132xf32>
    %87 = vector.broadcast %cst_40 : f32 to vector<132x132xf32>
    %88 = arith.select %85, %86, %87 : vector<132x132xi1>, vector<132x132xf32>
    %89 = arith.truncf %88 : vector<132x132xf32> to vector<132x132xbf16>
    %cst_41 = arith.constant dense<0.000000e+00> : vector<132x32xf32>
    %90 = tpu.matmul %89, %72, %cst_41 {dimension_numbers = #tpu.dot_dimension_numbers<[1], [0], [0], [1], [0, 0, 1, 1], [], []>} : vector<132x132xbf16>, vector<132x32xbf16>, vector<132x32xf32> -> vector<132x32xf32>
    %91 = arith.truncf %90 : vector<132x32xf32> to vector<132x32xbf16>
    %c3 = arith.constant 3 : index
    %c0_42 = arith.constant 0 : index
    %c0_43 = arith.constant 0 : index
    %92 = vector.load %arg4[%c3, %c0_42, %c0_43] : memref<9x32x32xbf16, #tpu.memory_space<vmem>>, vector<1x32x32xbf16>
    %93 = vector.shape_cast %92 : vector<1x32x32xbf16> to vector<32x32xbf16>
    %cst_44 = arith.constant dense<0.000000e+00> : vector<132x32xf32>
    %94 = tpu.matmul %91, %93, %cst_44 {dimension_numbers = #tpu.dot_dimension_numbers<[1], [0], [0], [1], [0, 0, 1, 1], [], []>} : vector<132x32xbf16>, vector<32x32xbf16>, vector<132x32xf32> -> vector<132x32xf32>
    %c4 = arith.constant 4 : index
    %c0_45 = arith.constant 0 : index
    %c0_46 = arith.constant 0 : index
    %95 = vector.load %arg4[%c4, %c0_45, %c0_46] : memref<9x32x32xbf16, #tpu.memory_space<vmem>>, vector<1x32x32xbf16>
    %96 = vector.shape_cast %95 : vector<1x32x32xbf16> to vector<32x32xbf16>
    %cst_47 = arith.constant dense<0.000000e+00> : vector<132x32xf32>
    %97 = tpu.matmul %72, %96, %cst_47 {dimension_numbers = #tpu.dot_dimension_numbers<[1], [0], [0], [1], [0, 0, 1, 1], [], []>} : vector<132x32xbf16>, vector<32x32xbf16>, vector<132x32xf32> -> vector<132x32xf32>
    %98 = arith.addf %94, %97 : vector<132x32xf32>
    %c2_i32 = arith.constant 2 : i32
    %99 = vector.broadcast %c2_i32 : i32 to vector<132x1xi32>
    %100 = arith.addi %3, %99 : vector<132x1xi32>
    %c0_i32_48 = arith.constant 0 : i32
    %101 = vector.broadcast %c0_i32_48 : i32 to vector<132x1xi32>
    %102 = arith.cmpi sge, %100, %101 : vector<132x1xi32>
    %c2_i32_49 = arith.constant 2 : i32
    %103 = vector.broadcast %c2_i32_49 : i32 to vector<132x1xi32>
    %104 = arith.addi %3, %103 : vector<132x1xi32>
    %c12_i32_50 = arith.constant 12 : i32
    %105 = vector.broadcast %c12_i32_50 : i32 to vector<132x1xi32>
    %106 = arith.cmpi slt, %104, %105 : vector<132x1xi32>
    %107 = arith.andi %102, %106 : vector<132x1xi1>
    %c2_i32_51 = arith.constant 2 : i32
    %108 = vector.broadcast %c2_i32_51 : i32 to vector<132x132xi32>
    %109 = arith.cmpi eq, %16, %108 : vector<132x132xi32>
    %110 = vector.broadcast %107 : vector<132x1xi1> to vector<132x132xi1>
    %111 = arith.andi %109, %110 : vector<132x132xi1>
    %cst_52 = arith.constant 1.000000e+00 : f32
    %cst_53 = arith.constant 0.000000e+00 : f32
    %112 = vector.broadcast %cst_52 : f32 to vector<132x132xf32>
    %113 = vector.broadcast %cst_53 : f32 to vector<132x132xf32>
    %114 = arith.select %111, %112, %113 : vector<132x132xi1>, vector<132x132xf32>
    %115 = arith.truncf %114 : vector<132x132xf32> to vector<132x132xbf16>
    %cst_54 = arith.constant dense<0.000000e+00> : vector<132x32xf32>
    %116 = tpu.matmul %115, %72, %cst_54 {dimension_numbers = #tpu.dot_dimension_numbers<[1], [0], [0], [1], [0, 0, 1, 1], [], []>} : vector<132x132xbf16>, vector<132x32xbf16>, vector<132x32xf32> -> vector<132x32xf32>
    %117 = arith.truncf %116 : vector<132x32xf32> to vector<132x32xbf16>
    %c5 = arith.constant 5 : index
    %c0_55 = arith.constant 0 : index
    %c0_56 = arith.constant 0 : index
    %118 = vector.load %arg4[%c5, %c0_55, %c0_56] : memref<9x32x32xbf16, #tpu.memory_space<vmem>>, vector<1x32x32xbf16>
    %119 = vector.shape_cast %118 : vector<1x32x32xbf16> to vector<32x32xbf16>
    %cst_57 = arith.constant dense<0.000000e+00> : vector<132x32xf32>
    %120 = tpu.matmul %117, %119, %cst_57 {dimension_numbers = #tpu.dot_dimension_numbers<[1], [0], [0], [1], [0, 0, 1, 1], [], []>} : vector<132x32xbf16>, vector<32x32xbf16>, vector<132x32xf32> -> vector<132x32xf32>
    %121 = arith.addf %98, %120 : vector<132x32xf32>
    %c1_58 = arith.constant 1 : index
    %c0_59 = arith.constant 0 : index
    %c0_60 = arith.constant 0 : index
    %122 = vector.load %arg5[%c1_58, %c0_59, %c0_60] : memref<3x1x32xf32, #tpu.memory_space<vmem>>, vector<1x1x32xf32>
    %123 = vector.shape_cast %122 : vector<1x1x32xf32> to vector<1x32xf32>
    %124 = vector.broadcast %123 : vector<1x32xf32> to vector<132x32xf32>
    %125 = arith.addf %121, %124 : vector<132x32xf32>
    %cst_61 = arith.constant 0.000000e+00 : f32
    %126 = vector.broadcast %cst_61 : f32 to vector<132x32xf32>
    %127 = arith.maximumf %125, %126 : vector<132x32xf32>
    %128 = arith.truncf %127 : vector<132x32xf32> to vector<132x32xbf16>
    %c-3_i32 = arith.constant -3 : i32
    %129 = vector.broadcast %c-3_i32 : i32 to vector<132x1xi32>
    %130 = arith.addi %3, %129 : vector<132x1xi32>
    %c0_i32_62 = arith.constant 0 : i32
    %131 = vector.broadcast %c0_i32_62 : i32 to vector<132x1xi32>
    %132 = arith.cmpi sge, %130, %131 : vector<132x1xi32>
    %c-3_i32_63 = arith.constant -3 : i32
    %133 = vector.broadcast %c-3_i32_63 : i32 to vector<132x1xi32>
    %134 = arith.addi %3, %133 : vector<132x1xi32>
    %c12_i32_64 = arith.constant 12 : i32
    %135 = vector.broadcast %c12_i32_64 : i32 to vector<132x1xi32>
    %136 = arith.cmpi slt, %134, %135 : vector<132x1xi32>
    %137 = arith.andi %132, %136 : vector<132x1xi1>
    %c-3_i32_65 = arith.constant -3 : i32
    %138 = vector.broadcast %c-3_i32_65 : i32 to vector<132x132xi32>
    %139 = arith.cmpi eq, %16, %138 : vector<132x132xi32>
    %140 = vector.broadcast %137 : vector<132x1xi1> to vector<132x132xi1>
    %141 = arith.andi %139, %140 : vector<132x132xi1>
    %cst_66 = arith.constant 1.000000e+00 : f32
    %cst_67 = arith.constant 0.000000e+00 : f32
    %142 = vector.broadcast %cst_66 : f32 to vector<132x132xf32>
    %143 = vector.broadcast %cst_67 : f32 to vector<132x132xf32>
    %144 = arith.select %141, %142, %143 : vector<132x132xi1>, vector<132x132xf32>
    %145 = arith.truncf %144 : vector<132x132xf32> to vector<132x132xbf16>
    %cst_68 = arith.constant dense<0.000000e+00> : vector<132x32xf32>
    %146 = tpu.matmul %145, %128, %cst_68 {dimension_numbers = #tpu.dot_dimension_numbers<[1], [0], [0], [1], [0, 0, 1, 1], [], []>} : vector<132x132xbf16>, vector<132x32xbf16>, vector<132x32xf32> -> vector<132x32xf32>
    %147 = arith.truncf %146 : vector<132x32xf32> to vector<132x32xbf16>
    %c6 = arith.constant 6 : index
    %c0_69 = arith.constant 0 : index
    %c0_70 = arith.constant 0 : index
    %148 = vector.load %arg4[%c6, %c0_69, %c0_70] : memref<9x32x32xbf16, #tpu.memory_space<vmem>>, vector<1x32x32xbf16>
    %149 = vector.shape_cast %148 : vector<1x32x32xbf16> to vector<32x32xbf16>
    %cst_71 = arith.constant dense<0.000000e+00> : vector<132x32xf32>
    %150 = tpu.matmul %147, %149, %cst_71 {dimension_numbers = #tpu.dot_dimension_numbers<[1], [0], [0], [1], [0, 0, 1, 1], [], []>} : vector<132x32xbf16>, vector<32x32xbf16>, vector<132x32xf32> -> vector<132x32xf32>
    %c7 = arith.constant 7 : index
    %c0_72 = arith.constant 0 : index
    %c0_73 = arith.constant 0 : index
    %151 = vector.load %arg4[%c7, %c0_72, %c0_73] : memref<9x32x32xbf16, #tpu.memory_space<vmem>>, vector<1x32x32xbf16>
    %152 = vector.shape_cast %151 : vector<1x32x32xbf16> to vector<32x32xbf16>
    %cst_74 = arith.constant dense<0.000000e+00> : vector<132x32xf32>
    %153 = tpu.matmul %128, %152, %cst_74 {dimension_numbers = #tpu.dot_dimension_numbers<[1], [0], [0], [1], [0, 0, 1, 1], [], []>} : vector<132x32xbf16>, vector<32x32xbf16>, vector<132x32xf32> -> vector<132x32xf32>
    %154 = arith.addf %150, %153 : vector<132x32xf32>
    %c3_i32 = arith.constant 3 : i32
    %155 = vector.broadcast %c3_i32 : i32 to vector<132x1xi32>
    %156 = arith.addi %3, %155 : vector<132x1xi32>
    %c0_i32_75 = arith.constant 0 : i32
    %157 = vector.broadcast %c0_i32_75 : i32 to vector<132x1xi32>
    %158 = arith.cmpi sge, %156, %157 : vector<132x1xi32>
    %c3_i32_76 = arith.constant 3 : i32
    %159 = vector.broadcast %c3_i32_76 : i32 to vector<132x1xi32>
    %160 = arith.addi %3, %159 : vector<132x1xi32>
    %c12_i32_77 = arith.constant 12 : i32
    %161 = vector.broadcast %c12_i32_77 : i32 to vector<132x1xi32>
    %162 = arith.cmpi slt, %160, %161 : vector<132x1xi32>
    %163 = arith.andi %158, %162 : vector<132x1xi1>
    %c3_i32_78 = arith.constant 3 : i32
    %164 = vector.broadcast %c3_i32_78 : i32 to vector<132x132xi32>
    %165 = arith.cmpi eq, %16, %164 : vector<132x132xi32>
    %166 = vector.broadcast %163 : vector<132x1xi1> to vector<132x132xi1>
    %167 = arith.andi %165, %166 : vector<132x132xi1>
    %cst_79 = arith.constant 1.000000e+00 : f32
    %cst_80 = arith.constant 0.000000e+00 : f32
    %168 = vector.broadcast %cst_79 : f32 to vector<132x132xf32>
    %169 = vector.broadcast %cst_80 : f32 to vector<132x132xf32>
    %170 = arith.select %167, %168, %169 : vector<132x132xi1>, vector<132x132xf32>
    %171 = arith.truncf %170 : vector<132x132xf32> to vector<132x132xbf16>
    %cst_81 = arith.constant dense<0.000000e+00> : vector<132x32xf32>
    %172 = tpu.matmul %171, %128, %cst_81 {dimension_numbers = #tpu.dot_dimension_numbers<[1], [0], [0], [1], [0, 0, 1, 1], [], []>} : vector<132x132xbf16>, vector<132x32xbf16>, vector<132x32xf32> -> vector<132x32xf32>
    %173 = arith.truncf %172 : vector<132x32xf32> to vector<132x32xbf16>
    %c8 = arith.constant 8 : index
    %c0_82 = arith.constant 0 : index
    %c0_83 = arith.constant 0 : index
    %174 = vector.load %arg4[%c8, %c0_82, %c0_83] : memref<9x32x32xbf16, #tpu.memory_space<vmem>>, vector<1x32x32xbf16>
    %175 = vector.shape_cast %174 : vector<1x32x32xbf16> to vector<32x32xbf16>
    %cst_84 = arith.constant dense<0.000000e+00> : vector<132x32xf32>
    %176 = tpu.matmul %173, %175, %cst_84 {dimension_numbers = #tpu.dot_dimension_numbers<[1], [0], [0], [1], [0, 0, 1, 1], [], []>} : vector<132x32xbf16>, vector<32x32xbf16>, vector<132x32xf32> -> vector<132x32xf32>
    %177 = arith.addf %154, %176 : vector<132x32xf32>
    %c2_85 = arith.constant 2 : index
    %c0_86 = arith.constant 0 : index
    %c0_87 = arith.constant 0 : index
    %178 = vector.load %arg5[%c2_85, %c0_86, %c0_87] : memref<3x1x32xf32, #tpu.memory_space<vmem>>, vector<1x1x32xf32>
    %179 = vector.shape_cast %178 : vector<1x1x32xf32> to vector<1x32xf32>
    %180 = vector.broadcast %179 : vector<1x32xf32> to vector<132x32xf32>
    %181 = arith.addf %177, %180 : vector<132x32xf32>
    %cst_88 = arith.constant 0.000000e+00 : f32
    %182 = vector.broadcast %cst_88 : f32 to vector<132x32xf32>
    %183 = arith.maximumf %181, %182 : vector<132x32xf32>
    %184 = arith.truncf %183 : vector<132x32xf32> to vector<132x32xbf16>
    %185 = vector.extract_strided_slice %13 {offsets = [24, 0], sizes = [108, 32], strides = [1, 1]} : vector<132x32xbf16> to vector<108x32xbf16>
    %186 = vector.extract_strided_slice %13 {offsets = [0, 0], sizes = [12, 32], strides = [1, 1]} : vector<132x32xbf16> to vector<12x32xbf16>
    %cst_89 = arith.constant dense<0.000000e+00> : vector<12x108xf32>
    %187 = tpu.matmul %186, %185, %cst_89 {dimension_numbers = #tpu.dot_dimension_numbers<[1], [1], [0], [0], [0, 0, 1, 0], [], []>} : vector<12x32xbf16>, vector<108x32xbf16>, vector<12x108xf32> -> vector<12x108xf32>
    %cst_90 = arith.constant 0.176776692 : f32
    %188 = vector.broadcast %cst_90 : f32 to vector<12x108xf32>
    %189 = arith.mulf %187, %188 : vector<12x108xf32>
    %190 = arith.truncf %189 : vector<12x108xf32> to vector<12x108xbf16>
    %c0_91 = arith.constant 0 : index
    %c0_92 = arith.constant 0 : index
    %c0_93 = arith.constant 0 : index
    %c0_94 = arith.constant 0 : index
    %191 = vector.load %arg6[%c0_91, %c0_92, %c0_93, %c0_94] : memref<2x4x12x108xbf16, #tpu.memory_space<vmem>>, vector<1x1x12x108xbf16>
    %192 = vector.shape_cast %191 : vector<1x1x12x108xbf16> to vector<12x108xbf16>
    %193 = vector.shape_cast %190 : vector<12x108xbf16> to vector<1x1x12x108xbf16>
    tpu.vector_store %arg6[%c0_91, %c0_92, %c0_93, %c0_94], %193 {strides = array<i32>} : memref<2x4x12x108xbf16, #tpu.memory_space<vmem>>, vector<1x1x12x108xbf16>,
    %194 = vector.extract_strided_slice %13 {offsets = [12, 0], sizes = [12, 32], strides = [1, 1]} : vector<132x32xbf16> to vector<12x32xbf16>
    %cst_95 = arith.constant dense<0.000000e+00> : vector<12x108xf32>
    %195 = tpu.matmul %194, %185, %cst_95 {dimension_numbers = #tpu.dot_dimension_numbers<[1], [1], [0], [0], [0, 0, 1, 0], [], []>} : vector<12x32xbf16>, vector<108x32xbf16>, vector<12x108xf32> -> vector<12x108xf32>
    %cst_96 = arith.constant 0.176776692 : f32
    %196 = vector.broadcast %cst_96 : f32 to vector<12x108xf32>
    %197 = arith.mulf %195, %196 : vector<12x108xf32>
    %198 = arith.truncf %197 : vector<12x108xf32> to vector<12x108xbf16>
    %c1_97 = arith.constant 1 : index
    %c0_98 = arith.constant 0 : index
    %c0_99 = arith.constant 0 : index
    %c0_100 = arith.constant 0 : index
    %199 = vector.load %arg6[%c1_97, %c0_98, %c0_99, %c0_100] : memref<2x4x12x108xbf16, #tpu.memory_space<vmem>>, vector<1x1x12x108xbf16>
    %200 = vector.shape_cast %199 : vector<1x1x12x108xbf16> to vector<12x108xbf16>
    %201 = vector.shape_cast %198 : vector<12x108xbf16> to vector<1x1x12x108xbf16>
    tpu.vector_store %arg6[%c1_97, %c0_98, %c0_99, %c0_100], %201 {strides = array<i32>} : memref<2x4x12x108xbf16, #tpu.memory_space<vmem>>, vector<1x1x12x108xbf16>,
    %202 = vector.extract_strided_slice %72 {offsets = [24, 0], sizes = [108, 32], strides = [1, 1]} : vector<132x32xbf16> to vector<108x32xbf16>
    %203 = vector.extract_strided_slice %72 {offsets = [0, 0], sizes = [12, 32], strides = [1, 1]} : vector<132x32xbf16> to vector<12x32xbf16>
    %cst_101 = arith.constant dense<0.000000e+00> : vector<12x108xf32>
    %204 = tpu.matmul %203, %202, %cst_101 {dimension_numbers = #tpu.dot_dimension_numbers<[1], [1], [0], [0], [0, 0, 1, 0], [], []>} : vector<12x32xbf16>, vector<108x32xbf16>, vector<12x108xf32> -> vector<12x108xf32>
    %cst_102 = arith.constant 0.176776692 : f32
    %205 = vector.broadcast %cst_102 : f32 to vector<12x108xf32>
    %206 = arith.mulf %204, %205 : vector<12x108xf32>
    %207 = arith.truncf %206 : vector<12x108xf32> to vector<12x108xbf16>
    %c0_103 = arith.constant 0 : index
    %c1_104 = arith.constant 1 : index
    %c0_105 = arith.constant 0 : index
    %c0_106 = arith.constant 0 : index
    %208 = vector.load %arg6[%c0_103, %c1_104, %c0_105, %c0_106] : memref<2x4x12x108xbf16, #tpu.memory_space<vmem>>, vector<1x1x12x108xbf16>
    %209 = vector.shape_cast %208 : vector<1x1x12x108xbf16> to vector<12x108xbf16>
    %210 = vector.shape_cast %207 : vector<12x108xbf16> to vector<1x1x12x108xbf16>
    tpu.vector_store %arg6[%c0_103, %c1_104, %c0_105, %c0_106], %210 {strides = array<i32>} : memref<2x4x12x108xbf16, #tpu.memory_space<vmem>>, vector<1x1x12x108xbf16>,
    %211 = vector.extract_strided_slice %72 {offsets = [12, 0], sizes = [12, 32], strides = [1, 1]} : vector<132x32xbf16> to vector<12x32xbf16>
    %cst_107 = arith.constant dense<0.000000e+00> : vector<12x108xf32>
    %212 = tpu.matmul %211, %202, %cst_107 {dimension_numbers = #tpu.dot_dimension_numbers<[1], [1], [0], [0], [0, 0, 1, 0], [], []>} : vector<12x32xbf16>, vector<108x32xbf16>, vector<12x108xf32> -> vector<12x108xf32>
    %cst_108 = arith.constant 0.176776692 : f32
    %213 = vector.broadcast %cst_108 : f32 to vector<12x108xf32>
    %214 = arith.mulf %212, %213 : vector<12x108xf32>
    %215 = arith.truncf %214 : vector<12x108xf32> to vector<12x108xbf16>
    %c1_109 = arith.constant 1 : index
    %c1_110 = arith.constant 1 : index
    %c0_111 = arith.constant 0 : index
    %c0_112 = arith.constant 0 : index
    %216 = vector.load %arg6[%c1_109, %c1_110, %c0_111, %c0_112] : memref<2x4x12x108xbf16, #tpu.memory_space<vmem>>, vector<1x1x12x108xbf16>
    %217 = vector.shape_cast %216 : vector<1x1x12x108xbf16> to vector<12x108xbf16>
    %218 = vector.shape_cast %215 : vector<12x108xbf16> to vector<1x1x12x108xbf16>
    tpu.vector_store %arg6[%c1_109, %c1_110, %c0_111, %c0_112], %218 {strides = array<i32>} : memref<2x4x12x108xbf16, #tpu.memory_space<vmem>>, vector<1x1x12x108xbf16>,
    %219 = vector.extract_strided_slice %128 {offsets = [24, 0], sizes = [108, 32], strides = [1, 1]} : vector<132x32xbf16> to vector<108x32xbf16>
    %220 = vector.extract_strided_slice %128 {offsets = [0, 0], sizes = [12, 32], strides = [1, 1]} : vector<132x32xbf16> to vector<12x32xbf16>
    %cst_113 = arith.constant dense<0.000000e+00> : vector<12x108xf32>
    %221 = tpu.matmul %220, %219, %cst_113 {dimension_numbers = #tpu.dot_dimension_numbers<[1], [1], [0], [0], [0, 0, 1, 0], [], []>} : vector<12x32xbf16>, vector<108x32xbf16>, vector<12x108xf32> -> vector<12x108xf32>
    %cst_114 = arith.constant 0.176776692 : f32
    %222 = vector.broadcast %cst_114 : f32 to vector<12x108xf32>
    %223 = arith.mulf %221, %222 : vector<12x108xf32>
    %224 = arith.truncf %223 : vector<12x108xf32> to vector<12x108xbf16>
    %c0_115 = arith.constant 0 : index
    %c2_116 = arith.constant 2 : index
    %c0_117 = arith.constant 0 : index
    %c0_118 = arith.constant 0 : index
    %225 = vector.load %arg6[%c0_115, %c2_116, %c0_117, %c0_118] : memref<2x4x12x108xbf16, #tpu.memory_space<vmem>>, vector<1x1x12x108xbf16>
    %226 = vector.shape_cast %225 : vector<1x1x12x108xbf16> to vector<12x108xbf16>
    %227 = vector.shape_cast %224 : vector<12x108xbf16> to vector<1x1x12x108xbf16>
    tpu.vector_store %arg6[%c0_115, %c2_116, %c0_117, %c0_118], %227 {strides = array<i32>} : memref<2x4x12x108xbf16, #tpu.memory_space<vmem>>, vector<1x1x12x108xbf16>,
    %228 = vector.extract_strided_slice %128 {offsets = [12, 0], sizes = [12, 32], strides = [1, 1]} : vector<132x32xbf16> to vector<12x32xbf16>
    %cst_119 = arith.constant dense<0.000000e+00> : vector<12x108xf32>
    %229 = tpu.matmul %228, %219, %cst_119 {dimension_numbers = #tpu.dot_dimension_numbers<[1], [1], [0], [0], [0, 0, 1, 0], [], []>} : vector<12x32xbf16>, vector<108x32xbf16>, vector<12x108xf32> -> vector<12x108xf32>
    %cst_120 = arith.constant 0.176776692 : f32
    %230 = vector.broadcast %cst_120 : f32 to vector<12x108xf32>
    %231 = arith.mulf %229, %230 : vector<12x108xf32>
    %232 = arith.truncf %231 : vector<12x108xf32> to vector<12x108xbf16>
    %c1_121 = arith.constant 1 : index
    %c2_122 = arith.constant 2 : index
    %c0_123 = arith.constant 0 : index
    %c0_124 = arith.constant 0 : index
    %233 = vector.load %arg6[%c1_121, %c2_122, %c0_123, %c0_124] : memref<2x4x12x108xbf16, #tpu.memory_space<vmem>>, vector<1x1x12x108xbf16>
    %234 = vector.shape_cast %233 : vector<1x1x12x108xbf16> to vector<12x108xbf16>
    %235 = vector.shape_cast %232 : vector<12x108xbf16> to vector<1x1x12x108xbf16>
    tpu.vector_store %arg6[%c1_121, %c2_122, %c0_123, %c0_124], %235 {strides = array<i32>} : memref<2x4x12x108xbf16, #tpu.memory_space<vmem>>, vector<1x1x12x108xbf16>,
    %236 = vector.extract_strided_slice %184 {offsets = [24, 0], sizes = [108, 32], strides = [1, 1]} : vector<132x32xbf16> to vector<108x32xbf16>
    %237 = vector.extract_strided_slice %184 {offsets = [0, 0], sizes = [12, 32], strides = [1, 1]} : vector<132x32xbf16> to vector<12x32xbf16>
    %cst_125 = arith.constant dense<0.000000e+00> : vector<12x108xf32>
    %238 = tpu.matmul %237, %236, %cst_125 {dimension_numbers = #tpu.dot_dimension_numbers<[1], [1], [0], [0], [0, 0, 1, 0], [], []>} : vector<12x32xbf16>, vector<108x32xbf16>, vector<12x108xf32> -> vector<12x108xf32>
    %cst_126 = arith.constant 0.176776692 : f32
    %239 = vector.broadcast %cst_126 : f32 to vector<12x108xf32>
    %240 = arith.mulf %238, %239 : vector<12x108xf32>
    %241 = arith.truncf %240 : vector<12x108xf32> to vector<12x108xbf16>
    %c0_127 = arith.constant 0 : index
    %c3_128 = arith.constant 3 : index
    %c0_129 = arith.constant 0 : index
    %c0_130 = arith.constant 0 : index
    %242 = vector.load %arg6[%c0_127, %c3_128, %c0_129, %c0_130] : memref<2x4x12x108xbf16, #tpu.memory_space<vmem>>, vector<1x1x12x108xbf16>
    %243 = vector.shape_cast %242 : vector<1x1x12x108xbf16> to vector<12x108xbf16>
    %244 = vector.shape_cast %241 : vector<12x108xbf16> to vector<1x1x12x108xbf16>
    tpu.vector_store %arg6[%c0_127, %c3_128, %c0_129, %c0_130], %244 {strides = array<i32>} : memref<2x4x12x108xbf16, #tpu.memory_space<vmem>>, vector<1x1x12x108xbf16>,
    %245 = vector.extract_strided_slice %184 {offsets = [12, 0], sizes = [12, 32], strides = [1, 1]} : vector<132x32xbf16> to vector<12x32xbf16>
    %cst_131 = arith.constant dense<0.000000e+00> : vector<12x108xf32>
    %246 = tpu.matmul %245, %236, %cst_131 {dimension_numbers = #tpu.dot_dimension_numbers<[1], [1], [0], [0], [0, 0, 1, 0], [], []>} : vector<12x32xbf16>, vector<108x32xbf16>, vector<12x108xf32> -> vector<12x108xf32>
    %cst_132 = arith.constant 0.176776692 : f32
    %247 = vector.broadcast %cst_132 : f32 to vector<12x108xf32>
    %248 = arith.mulf %246, %247 : vector<12x108xf32>
    %249 = arith.truncf %248 : vector<12x108xf32> to vector<12x108xbf16>
    %c1_133 = arith.constant 1 : index
    %c3_134 = arith.constant 3 : index
    %c0_135 = arith.constant 0 : index
    %c0_136 = arith.constant 0 : index
    %250 = vector.load %arg6[%c1_133, %c3_134, %c0_135, %c0_136] : memref<2x4x12x108xbf16, #tpu.memory_space<vmem>>, vector<1x1x12x108xbf16>
    %251 = vector.shape_cast %250 : vector<1x1x12x108xbf16> to vector<12x108xbf16>
    %252 = vector.shape_cast %249 : vector<12x108xbf16> to vector<1x1x12x108xbf16>
    tpu.vector_store %arg6[%c1_133, %c3_134, %c0_135, %c0_136], %252 {strides = array<i32>} : memref<2x4x12x108xbf16, #tpu.memory_space<vmem>>, vector<1x1x12x108xbf16>,
    return
  }
  func.func @transform_0(%arg0: i32) -> (i32, i32, i32) {
    %c0_i32 = arith.constant 0 : i32
    %c0_i32_0 = arith.constant 0 : i32
    %c0_i32_1 = arith.constant 0 : i32
    return %arg0, %c0_i32, %c0_i32_0 : i32, i32, i32
  }
  func.func @transform_1(%arg0: i32) -> (i32, i32, i32) {
    %c0_i32 = arith.constant 0 : i32
    %c0_i32_0 = arith.constant 0 : i32
    %c0_i32_1 = arith.constant 0 : i32
    %c0_i32_2 = arith.constant 0 : i32
    return %c0_i32, %c0_i32_0, %c0_i32_1 : i32, i32, i32
  }
  func.func @transform_2(%arg0: i32) -> (i32, i32) {
    %c0_i32 = arith.constant 0 : i32
    %c0_i32_0 = arith.constant 0 : i32
    %c0_i32_1 = arith.constant 0 : i32
    return %c0_i32, %c0_i32_0 : i32, i32
  }
  func.func @transform_3(%arg0: i32) -> (i32, i32, i32) {
    %c0_i32 = arith.constant 0 : i32
    %c0_i32_0 = arith.constant 0 : i32
    %c0_i32_1 = arith.constant 0 : i32
    %c0_i32_2 = arith.constant 0 : i32
    return %c0_i32, %c0_i32_0, %c0_i32_1 : i32, i32, i32
  }
  func.func @transform_4(%arg0: i32) -> (i32, i32, i32) {
    %c0_i32 = arith.constant 0 : i32
    %c0_i32_0 = arith.constant 0 : i32
    %c0_i32_1 = arith.constant 0 : i32
    %c0_i32_2 = arith.constant 0 : i32
    return %c0_i32, %c0_i32_0, %c0_i32_1 : i32, i32, i32
  }
  func.func @transform_5(%arg0: i32) -> (i32, i32, i32, i32) {
    %c0_i32 = arith.constant 0 : i32
    %c0_i32_0 = arith.constant 0 : i32
    %c0_i32_1 = arith.constant 0 : i32
    %c0_i32_2 = arith.constant 0 : i32
    return %arg0, %c0_i32, %c0_i32_0, %c0_i32_1 : i32, i32, i32, i32
  }
}

module attributes {stable_mosaic.version = 11 : i64} {
  func.func @_conv_mm_kernel(%arg0: i32, %arg1: memref<32x108xbf16, #tpu.memory_space<vmem>>, %arg2: memref<108x5184xbf16, #tpu.memory_space<vmem>>, %arg3: memref<32x1xf32, #tpu.memory_space<vmem>>, %arg4: memref<32x5184xf32, #tpu.memory_space<vmem>>) attributes {dimension_semantics = [#tpu.dimension_semantics<parallel>], iteration_bounds = array<i64: 1>, scalar_prefetch = 0 : i64, scratch_operands = 0 : i64, tpu.core_type = #tpu.core_type<tc>, window_params = [{pipeline_mode = #tpu.pipeline_mode<synchronous>, transform_indices = @transform_0, window_bounds = array<i64: 32, 108>}, {transform_indices = @transform_1, window_bounds = array<i64: 108, 5184>}, {pipeline_mode = #tpu.pipeline_mode<synchronous>, transform_indices = @transform_2, window_bounds = array<i64: 32, 1>}, {transform_indices = @transform_3, window_bounds = array<i64: 32, 5184>}]} {
    %c0 = arith.constant 0 : index
    %c0_0 = arith.constant 0 : index
    %0 = vector.load %arg1[%c0, %c0_0] : memref<32x108xbf16, #tpu.memory_space<vmem>>, vector<32x108xbf16>
    %c0_1 = arith.constant 0 : index
    %c0_2 = arith.constant 0 : index
    %1 = vector.load %arg2[%c0_1, %c0_2] : memref<108x5184xbf16, #tpu.memory_space<vmem>>, vector<108x5184xbf16>
    %cst = arith.constant dense<0.000000e+00> : vector<32x5184xf32>
    %2 = tpu.matmul %0, %1, %cst {dimension_numbers = #tpu.dot_dimension_numbers<[1], [0], [0], [1], [0, 0, 1, 1], [], []>} : vector<32x108xbf16>, vector<108x5184xbf16>, vector<32x5184xf32> -> vector<32x5184xf32>
    %c0_3 = arith.constant 0 : index
    %c0_4 = arith.constant 0 : index
    %3 = vector.load %arg3[%c0_3, %c0_4] : memref<32x1xf32, #tpu.memory_space<vmem>>, vector<32x1xf32>
    %4 = vector.broadcast %3 : vector<32x1xf32> to vector<32x5184xf32>
    %5 = arith.addf %2, %4 : vector<32x5184xf32>
    %cst_5 = arith.constant 0.000000e+00 : f32
    %6 = vector.broadcast %cst_5 : f32 to vector<32x5184xf32>
    %7 = arith.maximumf %5, %6 : vector<32x5184xf32>
    %c0_6 = arith.constant 0 : index
    %c0_7 = arith.constant 0 : index
    %8 = vector.load %arg4[%c0_6, %c0_7] : memref<32x5184xf32, #tpu.memory_space<vmem>>, vector<32x5184xf32>
    tpu.vector_store %arg4[%c0_6, %c0_7], %7 {strides = array<i32>} : memref<32x5184xf32, #tpu.memory_space<vmem>>, vector<32x5184xf32>,
    return
  }
  func.func @transform_0(%arg0: i32) -> (i32, i32) {
    %c0_i32 = arith.constant 0 : i32
    %c0_i32_0 = arith.constant 0 : i32
    %c0_i32_1 = arith.constant 0 : i32
    return %c0_i32, %c0_i32_0 : i32, i32
  }
  func.func @transform_1(%arg0: i32) -> (i32, i32) {
    %c0_i32 = arith.constant 0 : i32
    %c0_i32_0 = arith.constant 0 : i32
    return %c0_i32, %arg0 : i32, i32
  }
  func.func @transform_2(%arg0: i32) -> (i32, i32) {
    %c0_i32 = arith.constant 0 : i32
    %c0_i32_0 = arith.constant 0 : i32
    %c0_i32_1 = arith.constant 0 : i32
    return %c0_i32, %c0_i32_0 : i32, i32
  }
  func.func @transform_3(%arg0: i32) -> (i32, i32) {
    %c0_i32 = arith.constant 0 : i32
    %c0_i32_0 = arith.constant 0 : i32
    return %c0_i32, %arg0 : i32, i32
  }
}

</mosaic_0001>

<bundles_post_ra>
// kernel: fim_forward.2
= control target key start
LH: loop header
LB: loop body
LE: loop exit
PB: predicated region body
PF: predicated region fallthrough
CT: control target
= control target key end

     0   :  { %s5138_s18 = smov 0   ;;  %s6700_s0 = inlined_call_operand.vmem [shape: s32[2,132,1], index: 0, kind: input, shape index: {}]   ;;  %s6701_s1 = inlined_call_operand.vmem [shape: s32[1,132,1], index: 1, kind: input, shape index: {}]   ;;  %s6702_s2 = inlined_call_operand.vmem [shape: bf16[64,32], index: 2, kind: input, shape index: {}]   ;;  %s6703_s3 = inlined_call_operand.vmem [shape: bf16[9,32,32], index: 3, kind: input, shape index: {}]   ;;  %s6704_s4 = inlined_call_operand.vmem [shape: f32[3,1,32], index: 4, kind: input, shape index: {}]   ;;  %s6705_s5 = inlined_call_operand.vmem [shape: bf16[4,4,12,108], index: 5, kind: output, shape index: {}]  }
   0x1 LB: > { %s5144_s19 = sadd.s32 4294967295, %s5102_s18   ;;  %p4685_p0 = scmp.ge.s32.totalorder %s5102_s18, 1  ;;  %s5102_s18 = sphi %s5138_s18, %s15_s18  }
   0x2   : > { %p187_p1 = scmp.lt.s32.totalorder %s5102_s18, 3 }
   0x4   : > { %p188_p2 = pnand %p4685_p0, %p187_p1 }
   0x6   : > { %191 = sbr.rel (%p188_p2) target bundleno = 2198 (0x896), region = 40 }
   0xb   : > { %p216_p3 = scmp.lt.s32.totalorder %s5144_s19, 1  ;;  %v5104_v0 = vmov 0   ;;  %v5173_v13 = vld [vmem:[%s6701_s1] sm:$0xff]  ;;  %v5182_v18 = vld [vmem:[%s6701_s1 + $0x8] sm:$0xff]  ;;  %v5193_v25 = vld [vmem:[%s6701_s1 + $0x10] sm:$0xff]  ;;  %s4687_s26 = sshll.u32 %s5144_s19, 1 }
   0xc   : > { %5075 = vset.pattern.permute.xlu2 %v5104_v0  ;;  %5074 = vset.pattern.permute.xlu1 %v5104_v0  ;;  %v542_v14 = vadd.s32 4294967295, %v5173_v13  ;;  %v1207_v19 = vadd.s32 1, %v5182_v18  ;;  %v1206_v20 = vadd.s32 1, %v5173_v13  ;;  %v543_v21 = vadd.s32 4294967295, %v5182_v18  ;;  %v5198_v26 = vld [vmem:[%s6701_s1 + $0x18] sm:$0xff]  ;;  %v5209_v33 = vld [vmem:[%s6701_s1 + $0x28] sm:$0xff] }
   0xd   : > { %5073 = vset.pattern.permute.xlu0 %v5104_v0  ;;  %s217_s20 = scalar_select %p216_p3, %s5144_s19, 1  ;;  %v1208_v27 = vadd.s32 1, %v5193_v25  ;;  %v545_v28 = vadd.s32 4294967295, %v5198_v26  ;;  %v544_v29 = vadd.s32 4294967295, %v5193_v25  ;;  %v5214_v34 = vld [vmem:[%s6701_s1 + $0x20] sm:$0xff]  ;;  %v547_v35 = vadd.s32 4294967295, %v5209_v33 }
   0xe   : > { %vm559_vm0 = vcmp.ge.s32.totalorder %v542_v14, 0  ;;  %vm576_vm1 = vcmp.lt.s32.totalorder %v542_v14, 12  ;;  %vm1224_vm3 = vcmp.ge.s32.totalorder %v1207_v19, 0  ;;  %vm1241_vm4 = vcmp.lt.s32.totalorder %v1207_v19, 12  ;;  %v5225_v41 = vld [vmem:[%s6701_s1 + $0x30] sm:$0xff]  ;;  %v5236_v48 = vld [vmem:[%s6701_s1 + $0x38] sm:$0xff] }
   0xf   : > { %s5060_s21 = smul.u32 136, %s217_s20  ;;  %vm593_vm2 = vmand %vm559_vm0, %vm576_vm1  ;;  %vm1223_vm5 = vcmp.ge.s32.totalorder %v1206_v20, 0  ;;  %vm1240_vm6 = vcmp.lt.s32.totalorder %v1206_v20, 12  ;;  %vm560_vm7 = vcmp.ge.s32.totalorder %v543_v21, 0  ;;  %vm577_vm8 = vcmp.lt.s32.totalorder %v543_v21, 12  ;;  %v5247_v55 = vld [vmem:[%s6701_s1 + $0x40] sm:$0xff] }
  0x10   : > { %v644_v22 = vsel %vm593_vm2, 1, %v5104_v0  ;;  %vm1258_vm9 = vmand %vm1224_vm3, %vm1241_vm4  ;;  %vm1225_vm12 = vcmp.ge.s32.totalorder %v1208_v27, 0  ;;  %vm1242_vm13 = vcmp.lt.s32.totalorder %v1208_v27, 12  ;;  %vm562_vm14 = vcmp.ge.s32.totalorder %v545_v28, 0  ;;  %v5252_v56 = vld [vmem:[%s6701_s1 + $0x48] sm:$0xff]  ;;  %v5041_v60 = vld [vmem:[%s6702_s2 + $0x18] sm:$0xff] }
  0x11   : > { %s5156_s24 = scalar_lea.vmem %s6700_s0, %s5060_s21  ;;  %vm1257_vm10 = vmand %vm1223_vm5, %vm1240_vm6  ;;  %v1309_v30 = vsel %vm1258_vm9, 1, %v5104_v0  ;;  %vm579_vm15 = vcmp.lt.s32.totalorder %v545_v28, 12  ;;  %vm561_vm0 = vcmp.ge.s32.totalorder %v544_v29, 0  ;;  %vm578_vm1 = vcmp.lt.s32.totalorder %v544_v29, 12  ;;  %423 = vmatpush.bf16.msra.mxu0 %v5041_v60  ;;  %v5302_v21 = vld [vmem:[%s6701_s1 + $0x68] sm:$0xff]  ;;  %p222_p4 = scmp.lt.s32.totalorder %s4687_s26, 3 }
  0x12   : > { %v233_v1 = vld [vmem:[%s5156_s24 + $0x20] sm:$0xff]  ;;  %v231_v2 = vld [vmem:[%s5156_s24 + $0x10] sm:$0xff]  ;;  %v234_v4 = vld [vmem:[%s5156_s24 + $0x28] sm:$0xff]  ;;  %v1308_v31 = vsel %vm1257_vm10, 1, %v5104_v0  ;;  %v546_v36 = vadd.s32 4294967295, %v5214_v34  ;;  %v1209_v37 = vadd.s32 1, %v5198_v26 }
  0x13   : > { %v229_v3 = vld [vmem:[%s5156_s24] sm:$0xff]  ;;  %278 = vperm.xlu2 %5075, %v233_v1   ;;  %272 = vperm.xlu1 %5074, %v231_v2   ;;  %v232_v5 = vld [vmem:[%s5156_s24 + $0x18] sm:$0xff]  ;;  %v230_v6 = vld [vmem:[%s5156_s24 + $0x8] sm:$0xff]  ;;  %vm564_vm5 = vcmp.ge.s32.totalorder %v547_v35, 0  ;;  %vm581_vm6 = vcmp.lt.s32.totalorder %v547_v35, 12  ;;  %v548_v42 = vadd.s32 4294967295, %v5225_v41 }
  0x14   : > { %266 = vperm.xlu0 %5073, %v229_v3   ;;  %v237_v7 = vld [vmem:[%s5156_s24 + $0x40] sm:$0xff]  ;;  %v236_v8 = vld [vmem:[%s5156_s24 + $0x38] sm:$0xff]  ;;  %v235_v9 = vld [vmem:[%s5156_s24 + $0x30] sm:$0xff]  ;;  %vm1226_vm9 = vcmp.ge.s32.totalorder %v1209_v37, 0  ;;  %vm1243_vm10 = vcmp.lt.s32.totalorder %v1209_v37, 12  ;;  %v1211_v43 = vadd.s32 1, %v5209_v33 }
  0x15   : > { %v240_v10 = vld [vmem:[%s5156_s24 + $0x58] sm:$0xff]  ;;  %v239_v11 = vld [vmem:[%s5156_s24 + $0x50] sm:$0xff]  ;;  %v238_v12 = vld [vmem:[%s5156_s24 + $0x48] sm:$0xff]  ;;  %v1210_v44 = vadd.s32 1, %v5214_v34  ;;  %v1213_v49 = vadd.s32 1, %v5236_v48  ;;  %v1212_v50 = vadd.s32 1, %v5225_v41 }
  0x16   : > { %v243_v15 = vld [vmem:[%s5156_s24 + $0x70] sm:$0xff]  ;;  %v242_v16 = vld [vmem:[%s5156_s24 + $0x68] sm:$0xff]  ;;  %v241_v17 = vld [vmem:[%s5156_s24 + $0x60] sm:$0xff]  ;;  %v549_v51 = vadd.s32 4294967295, %v5236_v48  ;;  %v1214_v57 = vadd.s32 1, %v5247_v55  ;;  %v551_v58 = vadd.s32 4294967295, %v5252_v56 }
  0x17   : > { %v245_v23 = vld [vmem:[%s5156_s24 + $0x80] sm:$0xf]  ;;  %v244_v24 = vld [vmem:[%s5156_s24 + $0x78] sm:$0xff]  ;;  %vm594_vm11 = vmand %vm560_vm7, %vm577_vm8  ;;  %vm563_vm7 = vcmp.ge.s32.totalorder %v546_v36, 0  ;;  %vm580_vm8 = vcmp.lt.s32.totalorder %v546_v36, 12  ;;  %v550_v59 = vadd.s32 4294967295, %v5247_v55 }
  0x18   : > { %v645_v32 = vsel %vm594_vm11, 1, %v5104_v0  ;;  %vm1259_vm2 = vmand %vm1225_vm12, %vm1242_vm13  ;;  %v5266_v1 = vld [vmem:[%s6701_s1 + $0x58] sm:$0xff]  ;;  %v5271_v2 = vld [vmem:[%s6701_s1 + $0x50] sm:$0xff]  ;;  %s6856_s26 = smov (!%p222_p4, %s4687_s26), 3 }
  0x19   : > { %vm596_vm3 = vmand %vm562_vm14, %vm579_vm15  ;;  %v1310_v38 = vsel %vm1259_vm2, 1, %v5104_v0  ;;  %vm565_vm14 = vcmp.ge.s32.totalorder %v548_v42, 0  ;;  %vm582_vm15 = vcmp.lt.s32.totalorder %v548_v42, 12  ;;  %vm1227_vm2 = vcmp.ge.s32.totalorder %v1210_v44, 0  ;;  %s5037_s27 = sshll.u32 %s6856_s26, 5 }
  0x1a   : > { %vm595_vm4 = vmand %vm561_vm0, %vm578_vm1  ;;  %v647_v39 = vsel %vm596_vm3, 1, %v5104_v0  ;;  %vm1228_vm0 = vcmp.ge.s32.totalorder %v1211_v43, 0  ;;  %vm1245_vm1 = vcmp.lt.s32.totalorder %v1211_v43, 12  ;;  %vm1244_vm3 = vcmp.lt.s32.totalorder %v1210_v44, 12  ;;  %s6582_s30 = scalar_lea.vmem %s6705_s5, %s5037_s27 }
  0x1b   : > { %281 = vperm.xlu2 %5075, %v234_v4   ;;  %275 = vperm.xlu1 %5074, %v232_v5   ;;  %v646_v40 = vsel %vm595_vm4, 1, %v5104_v0  ;;  %vm598_vm11 = vmand %vm564_vm5, %vm581_vm6  ;;  %v553_v3 = vadd.s32 4294967295, %v5266_v1  ;;  %v552_v4 = vadd.s32 4294967295, %v5271_v2  ;;  %v5040_v5 = vld [vmem:[%s6702_s2 + $0x10] sm:$0xff]  ;;  %v1217_v14 = vadd.s32 1, %v5266_v1 }
  0x1c   : > { %269 = vperm.xlu0 %5073, %v230_v6   ;;  %vm597_vm12 = vmand %vm563_vm7, %vm580_vm8  ;;  %v649_v45 = vsel %vm598_vm11, 1, %v5104_v0  ;;  %vm1230_vm7 = vcmp.ge.s32.totalorder %v1213_v49, 0  ;;  %vm1247_vm8 = vcmp.lt.s32.totalorder %v1213_v49, 12  ;;  %vm566_vm11 = vcmp.ge.s32.totalorder %v549_v51, 0  ;;  %424 = vmatpush.bf16.msra.mxu0 %v5040_v5 }
  0x1d   : > { %vm1260_vm13 = vmand %vm1226_vm9, %vm1243_vm10  ;;  %v648_v46 = vsel %vm597_vm12, 1, %v5104_v0  ;;  %vm1229_vm9 = vcmp.ge.s32.totalorder %v1212_v50, 0  ;;  %vm1246_vm10 = vcmp.lt.s32.totalorder %v1212_v50, 12  ;;  %vm583_vm12 = vcmp.lt.s32.totalorder %v549_v51, 12 }
  0x1e   : > { %v1311_v47 = vsel %vm1260_vm13, 1, %v5104_v0  ;;  %vm599_vm4 = vmand %vm565_vm14, %vm582_vm15  ;;  %v1215_v6 = vadd.s32 1, %v5252_v56  ;;  %v263_v42 = vlaneseq  ;;  %v1795_v5 = vadd.s32 4294967294, %v5209_v33 }
  0x1f   : > { %vm1262_vm5 = vmand %vm1228_vm0, %vm1245_vm1  ;;  %v650_v52 = vsel %vm599_vm4, 1, %v5104_v0  ;;  %vm1231_vm0 = vcmp.ge.s32.totalorder %v1214_v57, 0  ;;  %vm1248_vm1 = vcmp.lt.s32.totalorder %v1214_v57, 12  ;;  %vm567_vm4 = vcmp.ge.s32.totalorder %v550_v59, 0 }
  0x20   : > { %vm1261_vm6 = vmand %vm1227_vm2, %vm1244_vm3  ;;  %v1313_v53 = vsel %vm1262_vm5, 1, %v5104_v0  ;;  %vm568_vm2 = vcmp.ge.s32.totalorder %v551_v58, 0  ;;  %vm585_vm3 = vcmp.lt.s32.totalorder %v551_v58, 12  ;;  %vm584_vm5 = vcmp.lt.s32.totalorder %v550_v59, 12 }
  0x21   : > { %v1312_v54 = vsel %vm1261_vm6, 1, %v5104_v0  ;;  %vm1264_vm13 = vmand %vm1230_vm7, %vm1247_vm8  ;;  %v5337_v50 = vand.u32 127, %v263_v42  ;;  %v1790_v57 = vadd.s32 4294967294, %v5173_v13  ;;  %v6711_v59 = vmov 0.0  }
  0x22   : > { %vm1263_vm14 = vmand %vm1229_vm9, %vm1246_vm10  ;;  %v1315_v61 = vsel %vm1264_vm13, 1, %v5104_v0  ;;  %vm570_vm9 = vcmp.ge.s32.totalorder %v553_v3, 0  ;;  %vm587_vm10 = vcmp.lt.s32.totalorder %v553_v3, 12  ;;  %vm1232_vm13 = vcmp.ge.s32.totalorder %v1215_v6, 0 }
  0x23   : > { %290 = vperm.xlu2 %5075, %v237_v7   ;;  %287 = vperm.xlu1 %5074, %v236_v8   ;;  %vm600_vm15 = vmand %vm566_vm11, %vm583_vm12  ;;  %v1314_v62 = vsel %vm1263_vm14, 1, %v5104_v0  ;;  %vm569_vm11 = vcmp.ge.s32.totalorder %v552_v4, 0  ;;  %vm586_vm12 = vcmp.lt.s32.totalorder %v552_v4, 12  ;;  %vm1249_vm14 = vcmp.lt.s32.totalorder %v1215_v6, 12 }
  0x24   : > { %284 = vperm.xlu0 %5073, %v235_v9   ;;  %v651_v63 = vsel %vm600_vm15, 1, %v5104_v0  ;;  %vm1265_vm6 = vmand %vm1231_vm0, %vm1248_vm1  ;;  %v5039_v9 = vld [vmem:[%s6702_s2 + $0x8] sm:$0xff]  ;;  %v1794_v6 = vadd.s32 4294967294, %v5214_v34 }
  0x25   : > { %vm602_vm7 = vmand %vm568_vm2, %vm585_vm3  ;;  %v1316_v7 = vsel %vm1265_vm6, 1, %v5104_v0  ;;  %425 = vmatpush.bf16.msra.mxu0 %v5039_v9 }
  0x26   : > { %vm601_vm8 = vmand %vm567_vm4, %vm584_vm5  ;;  %v653_v8 = vsel %vm602_vm7, 1, %v5104_v0  ;;  %vm1234_vm4 = vcmp.ge.s32.totalorder %v1217_v14, 0  ;;  %vm1251_vm5 = vcmp.lt.s32.totalorder %v1217_v14, 12  ;;  %v1798_v14 = vadd.s32 4294967294, %v5247_v55 }
  0x27   : > { %vm604_vm15 = vmand %vm570_vm9, %vm587_vm10 }
  0x28   : > { %vm603_vm0 = vmand %vm569_vm11, %vm586_vm12 }
  0x29   : > { %vm1266_vm1 = vmand %vm1232_vm13, %vm1249_vm14  ;;  %v654_v19 = vsel %vm603_vm0, 1, %v5104_v0 }
  0x2a   : > { %v1317_v20 = vsel %vm1266_vm1, 1, %v5104_v0  ;;  %vm1268_vm9 = vmand %vm1234_vm4, %vm1251_vm5 }
  0x2b   : > { %299 = vperm.xlu2 %5075, %v240_v10   ;;  %296 = vperm.xlu1 %5074, %v239_v11   ;;  %v652_v10 = vsel %vm601_vm8, 1, %v5104_v0  ;;  %v5288_v11 = vld [vmem:[%s6701_s1 + $0x60] sm:$0xff]  ;;  %v1319_v28 = vsel %vm1268_vm9, 1, %v5104_v0 }
  0x2c   : > { %293 = vperm.xlu0 %5073, %v238_v12   ;;  %v554_v12 = vadd.s32 4294967295, %v5288_v11 }
  0x2e   : > { %vm571_vm2 = vcmp.ge.s32.totalorder %v554_v12, 0  ;;  %vm588_vm3 = vcmp.lt.s32.totalorder %v554_v12, 12 }
  0x2f   : > { %vm605_vm8 = vmand %vm571_vm2, %vm588_vm3 }
  0x30   : > { %v656_v27 = vsel %vm605_vm8, 1, %v5104_v0 }
  0x33   : > { %308 = vperm.xlu2 %5075, %v243_v15   ;;  %305 = vperm.xlu1 %5074, %v242_v16   ;;  %v5038_v15 = vld [vmem:[%s6702_s2] sm:$0xff]  ;;  %v1216_v16 = vadd.s32 1, %v5271_v2 }
  0x34   : > { %302 = vperm.xlu0 %5073, %v241_v17   ;;  %v655_v17 = vsel %vm604_vm15, 1, %v5104_v0  ;;  %426 = vmatpush.bf16.msra.mxu0 %v5038_v15 }
  0x35   : > { %vm1233_vm6 = vcmp.ge.s32.totalorder %v1216_v16, 0  ;;  %vm1250_vm7 = vcmp.lt.s32.totalorder %v1216_v16, 12 }
  0x36   : > { %vm1267_vm10 = vmand %vm1233_vm6, %vm1250_vm7 }
  0x37   : > { %v1318_v29 = vsel %vm1267_vm10, 1, %v5104_v0 }
  0x3b   : > { %662 = vperm.xlu2 %5075, %v644_v22   ;;  %314 = vperm.xlu1 %5074, %v245_v23   ;;  %v1219_v22 = vadd.s32 1, %v5302_v21  ;;  %v1218_v23 = vadd.s32 1, %v5288_v11 }
  0x3c   : > { %311 = vperm.xlu0 %5073, %v244_v24   ;;  %v555_v24 = vadd.s32 4294967295, %v5302_v21 }
  0x3d   : > { %vm1236_vm11 = vcmp.ge.s32.totalorder %v1219_v22, 0  ;;  %vm1253_vm12 = vcmp.lt.s32.totalorder %v1219_v22, 12  ;;  %vm1235_vm13 = vcmp.ge.s32.totalorder %v1218_v23, 0  ;;  %vm1252_vm14 = vcmp.lt.s32.totalorder %v1218_v23, 12 }
  0x3e   : > { %vm572_vm15 = vcmp.ge.s32.totalorder %v555_v24, 0  ;;  %vm589_vm0 = vcmp.lt.s32.totalorder %v555_v24, 12  ;;  %vm1270_vm1 = vmand %vm1236_vm11, %vm1253_vm12 }
  0x3f   : > { %vm1269_vm2 = vmand %vm1235_vm13, %vm1252_vm14  ;;  %v1321_v37 = vsel %vm1270_vm1, 1, %v5104_v0 }
  0x40   : > { %vm606_vm3 = vmand %vm572_vm15, %vm589_vm0 }
  0x43   : > { %1329 = vperm.xlu2 %5075, %v1309_v30   ;;  %1326 = vperm.xlu1 %5074, %v1308_v31   ;;  %v5313_v30 = vld [vmem:[%s6701_s1 + $0x70] sm:$0xff]  ;;  %v5318_v31 = vld [vmem:[%s6701_s1 + $0x78] sm:$0xff] }
  0x44   : > { %665 = vperm.xlu0 %5073, %v645_v32   ;;  %v1220_v32 = vadd.s32 1, %v5313_v30  ;;  %v557_v35 = vadd.s32 4294967295, %v5318_v31  ;;  %v556_v36 = vadd.s32 4294967295, %v5313_v30 }
  0x46   : > { %vm1237_vm4 = vcmp.ge.s32.totalorder %v1220_v32, 0  ;;  %vm1254_vm5 = vcmp.lt.s32.totalorder %v1220_v32, 12  ;;  %vm574_vm6 = vcmp.ge.s32.totalorder %v557_v35, 0  ;;  %vm591_vm7 = vcmp.lt.s32.totalorder %v557_v35, 12 }
  0x47   : > { %vm573_vm8 = vcmp.ge.s32.totalorder %v556_v36, 0  ;;  %vm590_vm9 = vcmp.lt.s32.totalorder %v556_v36, 12  ;;  %vm1271_vm10 = vmand %vm1237_vm4, %vm1254_vm5  ;;  %v1799_v32 = vadd.s32 4294967294, %v5252_v56 }
  0x48   : > { %vm608_vm11 = vmand %vm574_vm6, %vm591_vm7 }
  0x49   : > { %vm607_vm12 = vmand %vm573_vm8, %vm590_vm9  ;;  %v659_v49 = vsel %vm608_vm11, 1, %v5104_v0  ;;  %vm391_vm8 = vcmask 523264  }
  0x4a   : > { %v658_v51 = vsel %vm607_vm12, 1, %v5104_v0 }
  0x4b   : > { %1332 = vperm.xlu2 %5075, %v1310_v38   ;;  %671 = vperm.xlu1 %5074, %v647_v39   ;;  %v1320_v38 = vsel %vm1269_vm2, 1, %v5104_v0  ;;  %v657_v39 = vsel %vm606_vm3, 1, %v5104_v0 }
  0x4c   : > { %668 = vperm.xlu0 %5073, %v646_v40   ;;  %v5329_v40 = vld [vmem:[%s6701_s1 + $0x80] sm:$0xf] }
  0x4d   : > { %v1222_v43 = vadd.s32 1, %v5329_v40 }
  0x4f   : > { %vm1239_vm13 = vcmp.ge.s32.totalorder %v1222_v43, 0  ;;  %vm1256_vm14 = vcmp.lt.s32.totalorder %v1222_v43, 12 }
  0x50   : > { %vm1273_vm3 = vmand %vm1239_vm13, %vm1256_vm14  ;;  %vm1807_vm13 = vcmp.ge.s32.totalorder %v1790_v57, 0  ;;  %vm1824_vm14 = vcmp.lt.s32.totalorder %v1790_v57, 12 }
  0x53   : > { %677 = vperm.xlu2 %5075, %v649_v45   ;;  %674 = vperm.xlu1 %5074, %v648_v46   ;;  %v558_v45 = vadd.s32 4294967295, %v5329_v40  ;;  %v1221_v46 = vadd.s32 1, %v5318_v31 }
  0x54   : > { %1335 = vperm.xlu0 %5073, %v1311_v47   ;;  %v1322_v47 = vsel %vm1271_vm10, 1, %v5104_v0 }
  0x55   : > { %vm575_vm15 = vcmp.ge.s32.totalorder %v558_v45, 0  ;;  %vm592_vm0 = vcmp.lt.s32.totalorder %v558_v45, 12  ;;  %vm1238_vm1 = vcmp.ge.s32.totalorder %v1221_v46, 0  ;;  %vm1255_vm2 = vcmp.lt.s32.totalorder %v1221_v46, 12 }
  0x56   : > { %vm609_vm5 = vmand %vm575_vm15, %vm592_vm0  ;;  %v1803_v45 = vadd.s32 4294967294, %v5302_v21  ;;  %v1802_v46 = vadd.s32 4294967294, %v5288_v11 }
  0x57   : > { %vm1272_vm6 = vmand %vm1238_vm1, %vm1255_vm2  ;;  %vm1812_vm2 = vcmp.ge.s32.totalorder %v1795_v5, 0 }
  0x58   : > { %v1323_v4 = vsel %vm1272_vm6, 1, %v5104_v0  ;;  %vm1841_vm1 = vmand %vm1807_vm13, %vm1824_vm14  ;;  %vm1815_vm14 = vcmp.ge.s32.totalorder %v1798_v14, 0 }
  0x5b   : > { %680 = vperm.xlu2 %5075, %v650_v52   ;;  %1341 = vperm.xlu1 %5074, %v1313_v53   ;;  %v1792_v52 = vadd.s32 4294967294, %v5193_v25 }
  0x5c   : > { %1338 = vperm.xlu0 %5073, %v1312_v54   ;;  %v1791_v54 = vadd.s32 4294967294, %v5182_v18 }
  0x5d   : > { %vm1809_vm9 = vcmp.ge.s32.totalorder %v1792_v52, 0  ;;  %vm1826_vm10 = vcmp.lt.s32.totalorder %v1792_v52, 12 }
  0x5e   : > { %vm1808_vm11 = vcmp.ge.s32.totalorder %v1791_v54, 0  ;;  %vm1825_vm12 = vcmp.lt.s32.totalorder %v1791_v54, 12  ;;  %vm1843_vm15 = vmand %vm1809_vm9, %vm1826_vm10  ;;  %v1806_v54 = vadd.s32 4294967294, %v5329_v40 }
  0x5f   : > { %vm1842_vm0 = vmand %vm1808_vm11, %vm1825_vm12 }
  0x60   : > { %v1893_v9 = vsel %vm1842_vm0, 1, %v5104_v0 }
  0x63   : > { %1347 = vperm.xlu2 %5075, %v1315_v61   ;;  %1344 = vperm.xlu1 %5074, %v1314_v62   ;;  %v1324_v62 = vsel %vm1273_vm3, 1, %v5104_v0  ;;  %vm1829_vm3 = vcmp.lt.s32.totalorder %v1795_v5, 12  ;;  %v2455_v5 = vadd.s32 2, %v5198_v26 }
  0x64   : > { %683 = vperm.xlu0 %5073, %v651_v63   ;;  %v660_v63 = vsel %vm609_vm5, 1, %v5104_v0  ;;  %vm1828_vm5 = vcmp.lt.s32.totalorder %v1794_v6, 12  ;;  %vm1846_vm11 = vmand %vm1812_vm2, %vm1829_vm3 }
  0x65   : > { %v1897_v22 = vsel %vm1846_vm11, 1, %v5104_v0 }
  0x6b   : > { %1350 = vperm.xlu2 %5075, %v1316_v7   ;;  %689 = vperm.xlu1 %5074, %v653_v8   ;;  %v1793_v7 = vadd.s32 4294967294, %v5198_v26  ;;  %v1894_v8 = vsel %vm1843_vm15, 1, %v5104_v0  ;;  %vm1832_vm15 = vcmp.lt.s32.totalorder %v1798_v14, 12  ;;  %v2458_v14 = vadd.s32 2, %v5225_v41 }
  0x6c   : > { %686 = vperm.xlu0 %5073, %v652_v10   ;;  %v1892_v10 = vsel %vm1841_vm1, 1, %v5104_v0 }
  0x6d   : > { %vm1810_vm9 = vcmp.ge.s32.totalorder %v1793_v7, 0  ;;  %vm1827_vm10 = vcmp.lt.s32.totalorder %v1793_v7, 12  ;;  %v2453_v7 = vadd.s32 2, %v5182_v18 }
  0x6e   : > { %vm1844_vm13 = vmand %vm1810_vm9, %vm1827_vm10 }
  0x73   : > { %695 = vperm.xlu2 %5075, %v655_v17   ;;  %692 = vperm.xlu1 %5074, %v654_v19   ;;  %v1797_v17 = vadd.s32 4294967294, %v5236_v48  ;;  %v279_v19 = vpop.permute.xlu2 %278 }
  0x74   : > { %1353 = vperm.xlu0 %5073, %v1317_v20   ;;  %v1796_v20 = vadd.s32 4294967294, %v5225_v41  ;;  %vm320_vm10 = vcmp.eq.s32.totalorder %v5337_v50, %v279_v19 }
  0x75   : > { %vm1814_vm0 = vcmp.ge.s32.totalorder %v1797_v17, 0  ;;  %vm1831_vm1 = vcmp.lt.s32.totalorder %v1797_v17, 12  ;;  %v2456_v17 = vadd.s32 2, %v5214_v34 }
  0x76   : > { %vm1813_vm2 = vcmp.ge.s32.totalorder %v1796_v20, 0  ;;  %vm1830_vm3 = vcmp.lt.s32.totalorder %v1796_v20, 12 }
  0x7b   : > { %698 = vperm.xlu2 %5075, %v656_v27   ;;  %1359 = vperm.xlu1 %5074, %v1319_v28   ;;  %v1895_v27 = vsel %vm1844_vm13, 1, %v5104_v0  ;;  %v1801_v28 = vadd.s32 4294967294, %v5266_v1  ;;  %v282_v36 = vpop.permute.xlu2 %281 }
  0x7c   : > { %1356 = vperm.xlu0 %5073, %v1318_v29   ;;  %v1800_v29 = vadd.s32 4294967294, %v5271_v2  ;;  %vm321_vm11 = vcmp.eq.s32.totalorder %v5337_v50, %v282_v36 }
  0x7d   : > { %vm1835_vm9 = vcmp.lt.s32.totalorder %v1801_v28, 12  ;;  %v338_v43 = vsel %vm321_vm11, 1.0, %v6711_v59 }
  0x7e   : > { %vm1834_vm13 = vcmp.lt.s32.totalorder %v1800_v29, 12 }
  0x83   : > { %1365 = vperm.xlu2 %5075, %v1321_v37   ;;  %1362 = vperm.xlu1 %5074, %v1320_v38   ;;  %v291_v20 = vpop.permute.xlu2 %290 }
  0x84   : > { %701 = vperm.xlu0 %5073, %v657_v39   ;;  %v337_v39 = vsel %vm320_vm10, 1.0, %v6711_v59 }
  0x85   : > { %v273_v58 = vpop.permute.xlu1 %272 }
  0x86   : > { %v267_v44 = vpop.permute.xlu0 %266  ;;  %vm318_vm6 = vcmp.eq.s32.totalorder %v5337_v50, %v273_v58 }
  0x87   : > { %vm316_vm4 = vcmp.eq.s32.totalorder %v5337_v50, %v267_v44  ;;  %v335_v15 = vsel %vm318_vm6, 1.0, %v6711_v59  ;;  %vm1847_vm6 = vmand %vm1813_vm2, %vm1830_vm3  ;;  %v1804_v44 = vadd.s32 4294967294, %v5313_v30 }
  0x88   : > { %v333_v60 = vsel %vm316_vm4, 1.0, %v6711_v59  ;;  %vm1811_vm4 = vcmp.ge.s32.totalorder %v1794_v6, 0  ;;  %v1898_v38 = vsel %vm1847_vm6, 1, %v5104_v0  ;;  %vm1837_vm6 = vcmp.lt.s32.totalorder %v1803_v45, 12 }
  0x89   : > { %vm1845_vm12 = vmand %vm1811_vm4, %vm1828_vm5  ;;  %vm1821_vm3 = vcmp.ge.s32.totalorder %v1804_v44, 0  ;;  %v2454_v6 = vadd.s32 2, %v5193_v25 }
  0x8a   : > { %v1896_v23 = vsel %vm1845_vm12, 1, %v5104_v0  ;;  %vm1849_vm4 = vmand %vm1815_vm14, %vm1832_vm15  ;;  %vm1817_vm12 = vcmp.ge.s32.totalorder %v1800_v29, 0  ;;  %vm1816_vm14 = vcmp.ge.s32.totalorder %v1799_v32, 0  ;;  %vm1833_vm15 = vcmp.lt.s32.totalorder %v1799_v32, 12 }
  0x8b   : > { %1368 = vperm.xlu2 %5075, %v1322_v47   ;;  %707 = vperm.xlu1 %5074, %v659_v49   ;;  %vm1848_vm5 = vmand %vm1814_vm0, %vm1831_vm1  ;;  %v1900_v35 = vsel %vm1849_vm4, 1, %v5104_v0  ;;  %v352_v47 = vpack.c.bf16 %v338_v43, %v337_v39  ;;  %vm1838_vm4 = vcmp.lt.s32.totalorder %v1804_v44, 12  ;;  %v2460_v29 = vadd.s32 2, %v5247_v55 }
  0x8c   : > { %704 = vperm.xlu0 %5073, %v658_v51   ;;  %v1899_v37 = vsel %vm1848_vm5, 1, %v5104_v0  ;;  %vm1851_vm1 = vmand %vm1817_vm12, %vm1834_vm13  ;;  %vm1820_vm5 = vcmp.ge.s32.totalorder %v1803_v45, 0  ;;  %v2459_v32 = vadd.s32 2, %v5236_v48  ;;  %v2464_v39 = vadd.s32 2, %v5288_v11 }
  0x8d   : > { %v276_v12 = vpop.permute.xlu1 %275  ;;  %vm1850_vm2 = vmand %vm1816_vm14, %vm1833_vm15  ;;  %v1902_v51 = vsel %vm1851_vm1, 1, %v5104_v0  ;;  %vm1823_vm1 = vcmp.ge.s32.totalorder %v1806_v54, 0  ;;  %v2463_v43 = vadd.s32 2, %v5266_v1  ;;  %v2462_v45 = vadd.s32 2, %v5271_v2 }
  0x8e   : > { %v270_v53 = vpop.permute.xlu0 %269  ;;  %v1901_v52 = vsel %vm1850_vm2, 1, %v5104_v0  ;;  %vm1855_vm10 = vmand %vm1821_vm3, %vm1838_vm4  ;;  %vm1840_vm2 = vcmp.lt.s32.totalorder %v1806_v54, 12  ;;  %v2466_v54 = vadd.s32 2, %v5313_v30 }
  0x8f   : > { %vm317_vm7 = vcmp.eq.s32.totalorder %v5337_v50, %v270_v53  ;;  %vm1854_vm11 = vmand %vm1820_vm5, %vm1837_vm6  ;;  %v2452_v53 = vadd.s32 2, %v5173_v13 }
  0x90   : > { %v334_v61 = vsel %vm317_vm7, 1.0, %v6711_v59  ;;  %vm319_vm7 = vcmp.eq.s32.totalorder %v5337_v50, %v276_v12  ;;  %vm1857_vm6 = vmand %vm1823_vm1, %vm1840_vm2  ;;  %vm2475_vm2 = vcmp.ge.s32.totalorder %v2458_v14, 0 }
  0x91   : > { %v350_v3 = vpack.c.bf16 %v334_v61, %v333_v60  ;;  %v336_v16 = vsel %vm319_vm7, 1.0, %v6711_v59  ;;  %vm1818_vm7 = vcmp.ge.s32.totalorder %v1801_v28, 0  ;;  %v1805_v60 = vadd.s32 4294967294, %v5318_v31 }
  0x92   : > { %v351_v24 = vpack.c.bf16 %v336_v16, %v335_v15  ;;  %vm1852_vm0 = vmand %vm1818_vm7, %vm1835_vm9  ;;  %vm1819_vm7 = vcmp.ge.s32.totalorder %v1802_v46, 0  ;;  %vm1836_vm9 = vcmp.lt.s32.totalorder %v1802_v46, 12  ;;  %v1906_v61 = vsel %vm1855_vm10, 1, %v5104_v0 }
  0x93   : > { %4706 = vmatmul.msk.bf16.vlgmr.msra.gmra.mxu0 %vm391_vm8, %v350_v3  ;;  %1374 = vperm.xlu2 %5075, %v1324_v62   ;;  %v1903_v49 = vsel %vm1852_vm0, 1, %v5104_v0  ;;  %vm1853_vm12 = vmand %vm1819_vm7, %vm1836_vm9  ;;  %v1905_v62 = vsel %vm1854_vm11, 1, %v5104_v0  ;;  %vm2469_vm13 = vcmp.ge.s32.totalorder %v2452_v53, 0  ;;  %vm2486_vm14 = vcmp.lt.s32.totalorder %v2452_v53, 12 }
  0x94   : > { %710 = vperm.xlu1 %5074, %v660_v63   ;;  %1371 = vperm.xlu0 %5073, %v1323_v4   ;;  %v1904_v63 = vsel %vm1853_vm12, 1, %v5104_v0  ;;  %vm1822_vm3 = vcmp.ge.s32.totalorder %v1805_v60, 0  ;;  %vm1839_vm4 = vcmp.lt.s32.totalorder %v1805_v60, 12  ;;  %vm2503_vm5 = vmand %vm2469_vm13, %vm2486_vm14  ;;  %vm2472_vm9 = vcmp.ge.s32.totalorder %v2455_v5, 0 }
  0x95   : > { %v288_v57 = vpop.permute.xlu1 %287  ;;  %vm1856_vm7 = vmand %vm1822_vm3, %vm1839_vm4  ;;  %vm2489_vm10 = vcmp.lt.s32.totalorder %v2455_v5, 12  ;;  %vm2471_vm11 = vcmp.ge.s32.totalorder %v2454_v6, 0  ;;  %vm2488_vm12 = vcmp.lt.s32.totalorder %v2454_v6, 12  ;;  %vm2470_vm13 = vcmp.ge.s32.totalorder %v2453_v7, 0 }
  0x96   : > { %v285_v58 = vpop.permute.xlu0 %284  ;;  %vm323_vm15 = vcmp.eq.s32.totalorder %v5337_v50, %v288_v57  ;;  %v1907_v12 = vsel %vm1856_vm7, 1, %v5104_v0  ;;  %vm2487_vm14 = vcmp.lt.s32.totalorder %v2453_v7, 12  ;;  %v2457_v15 = vadd.s32 2, %v5209_v33 }
  0x97   : > { %vm322_vm0 = vcmp.eq.s32.totalorder %v5337_v50, %v285_v58  ;;  %v340_v3 = vsel %vm323_vm15, 1.0, %v6711_v59  ;;  %vm2506_vm15 = vmand %vm2472_vm9, %vm2489_vm10  ;;  %vm2492_vm3 = vcmp.lt.s32.totalorder %v2458_v14, 12  ;;  %vm324_vm4 = vcmp.eq.s32.totalorder %v5337_v50, %v291_v20 }
  0x98   : > { %v339_v4 = vsel %vm322_vm0, 1.0, %v6711_v59  ;;  %vm2505_vm0 = vmand %vm2471_vm11, %vm2488_vm12  ;;  %v2557_v19 = vsel %vm2506_vm15, 1, %v5104_v0  ;;  %vm2491_vm7 = vcmp.lt.s32.totalorder %v2457_v15, 12  ;;  %vm2473_vm9 = vcmp.ge.s32.totalorder %v2456_v17, 0 }
  0x99   : > { %vm2504_vm1 = vmand %vm2470_vm13, %vm2487_vm14  ;;  %vm2490_vm10 = vcmp.lt.s32.totalorder %v2456_v17, 12  ;;  %v2461_v28 = vadd.s32 2, %v5252_v56  ;;  %v2467_v57 = vadd.s32 2, %v5318_v31  ;;  %v2465_v58 = vadd.s32 2, %v5302_v21 }
  0x9a   : > { %vm2509_vm11 = vmand %vm2475_vm2, %vm2492_vm3  ;;  %vm2476_vm2 = vcmp.ge.s32.totalorder %v2459_v32, 0  ;;  %vm2493_vm3 = vcmp.lt.s32.totalorder %v2459_v32, 12  ;;  %v2468_v7 = vadd.s32 2, %v5329_v40  ;;  %v3040_v14 = vadd.s32 4294967293, %v5198_v26 }
  0x9b   : > { %1916 = vperm.xlu2 %5075, %v1894_v8   ;;  %v353_v8 = vpack.c.bf16 %v340_v3, %v339_v4  ;;  %vm2507_vm13 = vmand %vm2473_vm9, %vm2490_vm10  ;;  %v2560_v36 = vsel %vm2509_vm11, 1, %v5104_v0  ;;  %vm2478_vm14 = vcmp.ge.s32.totalorder %v2461_v28, 0  ;;  %vm2495_vm15 = vcmp.lt.s32.totalorder %v2461_v28, 12  ;;  %v5045_v28 = vld [vmem:[%s6703_s3 + $0x18] sm:$0xff] }
  0x9c   : > { %1913 = vperm.xlu1 %5074, %v1893_v9   ;;  %1910 = vperm.xlu0 %5073, %v1892_v10   ;;  %v2554_v9 = vsel %vm2503_vm5, 1, %v5104_v0  ;;  %v1908_v10 = vsel %vm1857_vm6, 1, %v5104_v0  ;;  %vm2474_vm6 = vcmp.ge.s32.totalorder %v2457_v15, 0  ;;  %vm2498_vm9 = vcmp.lt.s32.totalorder %v2464_v39, 12 }
  0x9d   : > { %vm2508_vm12 = vmand %vm2474_vm6, %vm2491_vm7  ;;  %v297_v44 = vpop.permute.xlu1 %296  ;;  %vm2481_vm7 = vcmp.ge.s32.totalorder %v2464_v39, 0  ;;  %v3038_v3 = vadd.s32 4294967293, %v5182_v18  ;;  %v3037_v4 = vadd.s32 4294967293, %v5173_v13  ;;  %v3039_v15 = vadd.s32 4294967293, %v5193_v25  ;;  %1067 = vmatpush.bf16.msra.mxu3 %v5045_v28  ;;  %v5087_v28 = vld [vmem:[%s6701_s1 + $0x30] sm:$0xff] }
  0x9e   : > { %v294_v16 = vpop.permute.xlu0 %293  ;;  %vm2510_vm6 = vmand %vm2476_vm2, %vm2493_vm3  ;;  %vm326_vm11 = vcmp.eq.s32.totalorder %v5337_v50, %v297_v44  ;;  %vm2483_vm3 = vcmp.ge.s32.totalorder %v2466_v54, 0  ;;  %v3044_v25 = vadd.s32 4294967293, %v5236_v48  ;;  %v3043_v26 = vadd.s32 4294967293, %v5225_v41 }
  0x9f   : > { %vm325_vm5 = vcmp.eq.s32.totalorder %v5337_v50, %v294_v16  ;;  %v343_v53 = vsel %vm326_vm11, 1.0, %v6711_v59  ;;  %v3047_v48 = vadd.s32 4294967293, %v5271_v2  ;;  %v3046_v32 = vadd.s32 4294967293, %v5252_v56 }
  0xa0   : > { %v3049_v56 = vadd.s32 4294967293, %v5288_v11  ;;  %v3048_v44 = vadd.s32 4294967293, %v5266_v1  ;;  %v3053_v11 = vadd.s32 4294967293, %v5329_v40  ;;  %v5080_v40 = vld [vmem:[%s6701_s1 + $0x8] sm:$0xff] }
  0xa3   : > { %4707 = vmatmul.msk.bf16.gmra.mxu0 %vm391_vm8, %v351_v24  ;;  %1925 = vperm.xlu2 %5075, %v1897_v22   ;;  %v2556_v22 = vsel %vm2505_vm0, 1, %v5104_v0  ;;  %v341_v24 = vsel %vm324_vm4, 1.0, %v6711_v59  ;;  %vm2477_vm0 = vcmp.ge.s32.totalorder %v2460_v29, 0  ;;  %vm2512_vm4 = vmand %vm2478_vm14, %vm2495_vm15  ;;  %vm2479_vm14 = vcmp.ge.s32.totalorder %v2462_v45, 0 }
  0xa4   : > { %1922 = vperm.xlu1 %5074, %v1896_v23   ;;  %1919 = vperm.xlu0 %5073, %v1895_v27   ;;  %v2555_v23 = vsel %vm2504_vm1, 1, %v5104_v0  ;;  %v342_v27 = vsel %vm325_vm5, 1.0, %v6711_v59  ;;  %vm2494_vm1 = vcmp.lt.s32.totalorder %v2460_v29, 12  ;;  %v2563_v46 = vsel %vm2512_vm4, 1, %v5104_v0  ;;  %v5044_v29 = vld [vmem:[%s6703_s3 + $0x10] sm:$0xff] }
  0xa5   : > { %vm2511_vm5 = vmand %vm2477_vm0, %vm2494_vm1  ;;  %vm2496_vm15 = vcmp.lt.s32.totalorder %v2462_v45, 12  ;;  %vm2500_vm4 = vcmp.lt.s32.totalorder %v2466_v54, 12  ;;  %v306_v5 = vpop.permute.xlu1 %305  ;;  %1068 = vmatpush.bf16.msra.mxu3 %v5044_v29 }
  0xa6   : > { %vm2515_vm0 = vmand %vm2481_vm7, %vm2498_vm9  ;;  %vm2482_vm7 = vcmp.ge.s32.totalorder %v2465_v58, 0  ;;  %vm2499_vm9 = vcmp.lt.s32.totalorder %v2465_v58, 12  ;;  %v303_v6 = vpop.permute.xlu0 %302  ;;  %v3700_v58 = vadd.s32 3, %v5080_v40 }
  0xa7   : > { %vm2513_vm2 = vmand %vm2479_vm14, %vm2496_vm15  ;;  %vm3072_vm14 = vcmp.lt.s32.totalorder %v3038_v3, 12  ;;  %vm329_vm15 = vcmp.eq.s32.totalorder %v5337_v50, %v306_v5 }
  0xa8   : > { %v346_v13 = vsel %vm329_vm15, 1.0, %v6711_v59 }
  0xab   : > { %1934 = vperm.xlu2 %5075, %v1900_v35   ;;  %v354_v35 = vpack.c.bf16 %v342_v27, %v341_v24 }
  0xac   : > { %1931 = vperm.xlu1 %5074, %v1899_v37   ;;  %1928 = vperm.xlu0 %5073, %v1898_v38   ;;  %v2559_v37 = vsel %vm2508_vm12, 1, %v5104_v0  ;;  %v2558_v38 = vsel %vm2507_vm13, 1, %v5104_v0  ;;  %vm2480_vm12 = vcmp.ge.s32.totalorder %v2463_v43, 0  ;;  %vm2497_vm13 = vcmp.lt.s32.totalorder %v2463_v43, 12 }
  0xad   : > { %vm2514_vm1 = vmand %vm2480_vm12, %vm2497_vm13  ;;  %vm3055_vm13 = vcmp.ge.s32.totalorder %v3038_v3, 0  ;;  %v315_v2 = vpop.permute.xlu1 %314 }
  0xae   : > { %vm2516_vm12 = vmand %vm2482_vm7, %vm2499_vm9 }
  0xb3   : > { %4708 = vmatmul.msk.bf16.gmra.mxu0 %vm391_vm8, %v352_v47  ;;  %1943 = vperm.xlu2 %5075, %v1903_v49   ;;  %v300_v47 = vpop.permute.xlu2 %299  ;;  %v2562_v49 = vsel %vm2511_vm5, 1, %v5104_v0  ;;  %vm2484_vm5 = vcmp.ge.s32.totalorder %v2467_v57, 0 }
  0xb4   : > { %1940 = vperm.xlu1 %5074, %v1902_v51   ;;  %1937 = vperm.xlu0 %5073, %v1901_v52   ;;  %v2561_v51 = vsel %vm2510_vm6, 1, %v5104_v0  ;;  %vm327_vm10 = vcmp.eq.s32.totalorder %v5337_v50, %v300_v47  ;;  %vm2501_vm6 = vcmp.lt.s32.totalorder %v2467_v57, 12 }
  0xb5   : > { %v344_v52 = vsel %vm327_vm10, 1.0, %v6711_v59  ;;  %vm2517_vm10 = vmand %vm2483_vm3, %vm2500_vm4  ;;  %vm2485_vm3 = vcmp.ge.s32.totalorder %v2468_v7, 0  ;;  %vm2502_vm4 = vcmp.lt.s32.totalorder %v2468_v7, 12 }
  0xb6   : > { %v355_v60 = vpack.c.bf16 %v344_v52, %v343_v53  ;;  %vm2518_vm11 = vmand %vm2484_vm5, %vm2501_vm6 }
  0xb7   : > { %vm3089_vm5 = vmand %vm3055_vm13, %vm3072_vm14  ;;  %vm3056_vm13 = vcmp.ge.s32.totalorder %v3039_v15, 0  ;;  %vm3073_vm14 = vcmp.lt.s32.totalorder %v3039_v15, 12 }
  0xb8   : > { %vm2519_vm7 = vmand %vm2485_vm3, %vm2502_vm4  ;;  %v3140_v17 = vsel %vm3089_vm5, 1, %v5104_v0  ;;  %vm3078_vm3 = vcmp.lt.s32.totalorder %v3044_v25, 12  ;;  %vm3060_vm5 = vcmp.ge.s32.totalorder %v3043_v26, 0 }
  0xb9   : > { %v2570_v20 = vsel %vm2519_vm7, 1, %v5104_v0 }
  0xbb   : > { %1952 = vperm.xlu2 %5075, %v1906_v61   ;;  %v2566_v61 = vsel %vm2515_vm0, 1, %v5104_v0  ;;  %vm328_vm0 = vcmp.eq.s32.totalorder %v5337_v50, %v303_v6  ;;  %v309_v41 = vpop.permute.xlu2 %308 }
  0xbc   : > { %1949 = vperm.xlu1 %5074, %v1905_v62   ;;  %1946 = vperm.xlu0 %5073, %v1904_v63   ;;  %v2565_v62 = vsel %vm2514_vm1, 1, %v5104_v0  ;;  %v2564_v63 = vsel %vm2513_vm2, 1, %v5104_v0  ;;  %vm3054_vm1 = vcmp.ge.s32.totalorder %v3037_v4, 0  ;;  %vm3071_vm2 = vcmp.lt.s32.totalorder %v3037_v4, 12 }
  0xbd   : > { %v345_v18 = vsel %vm328_vm0, 1.0, %v6711_v59  ;;  %vm3088_vm6 = vmand %vm3054_vm1, %vm3071_vm2  ;;  %vm3061_vm2 = vcmp.ge.s32.totalorder %v3044_v25, 0 }
  0xbe   : > { %v356_v16 = vpack.c.bf16 %v346_v13, %v345_v18  ;;  %vm3090_vm1 = vmand %vm3056_vm13, %vm3073_vm14  ;;  %vm3064_vm14 = vcmp.ge.s32.totalorder %v3047_v48, 0  ;;  %v5083_v18 = vld [vmem:[%s6701_s1 + $0x20] sm:$0xff] }
  0xbf   : > { %v3141_v27 = vsel %vm3090_vm1, 1, %v5104_v0  ;;  %vm3080_vm1 = vcmp.lt.s32.totalorder %v3046_v32, 12 }
  0xc3   : > { %4709 = vmatmul.msk.bf16.gmra.mxu0 %vm391_vm8, %v353_v8  ;;  %2572 = vperm.xlu2 %5075, %v2554_v9   ;;  %v2568_v8 = vsel %vm2517_vm10, 1, %v5104_v0  ;;  %v2569_v9 = vsel %vm2518_vm11, 1, %v5104_v0  ;;  %vm3057_vm11 = vcmp.ge.s32.totalorder %v3040_v14, 0 }
  0xc4   : > { %1958 = vperm.xlu1 %5074, %v1908_v10   ;;  %1955 = vperm.xlu0 %5073, %v1907_v12   ;;  %v2567_v10 = vsel %vm2516_vm12, 1, %v5104_v0  ;;  %v3041_v12 = vadd.s32 4294967293, %v5214_v34  ;;  %vm3074_vm12 = vcmp.lt.s32.totalorder %v3040_v14, 12  ;;  %v312_v34 = vpop.permute.xlu0 %311  ;;  %v5084_v14 = vld [vmem:[%s6701_s1 + $0x18] sm:$0xff] }
  0xc5   : > { %vm3091_vm0 = vmand %vm3057_vm11, %vm3074_vm12  ;;  %vm331_vm4 = vcmp.eq.s32.totalorder %v5337_v50, %v312_v34  ;;  %v3702_v15 = vadd.s32 3, %v5084_v14 }
  0xc6   : > { %vm3058_vm9 = vcmp.ge.s32.totalorder %v3041_v12, 0  ;;  %vm3075_vm10 = vcmp.lt.s32.totalorder %v3041_v12, 12  ;;  %v3142_v24 = vsel %vm3091_vm0, 1, %v5104_v0  ;;  %vm3095_vm11 = vmand %vm3061_vm2, %vm3078_vm3  ;;  %vm3063_vm0 = vcmp.ge.s32.totalorder %v3046_v32, 0 }
  0xc7   : > { %vm3092_vm15 = vmand %vm3058_vm9, %vm3075_vm10  ;;  %vm330_vm10 = vcmp.eq.s32.totalorder %v5337_v50, %v309_v41  ;;  %v3703_v12 = vadd.s32 3, %v5083_v18  ;;  %v3705_v41 = vadd.s32 3, %v5087_v28 }
  0xcb   : > { %2581 = vperm.xlu2 %5075, %v2557_v19   ;;  %v3139_v19 = vsel %vm3088_vm6, 1, %v5104_v0  ;;  %vm3077_vm6 = vcmp.lt.s32.totalorder %v3043_v26, 12 }
  0xcc   : > { %2578 = vperm.xlu1 %5074, %v2556_v22   ;;  %2575 = vperm.xlu0 %5073, %v2555_v23   ;;  %v3042_v22 = vadd.s32 4294967293, %v5209_v33  ;;  %v3143_v23 = vsel %vm3092_vm15, 1, %v5104_v0  ;;  %v348_v33 = vsel %vm331_vm4, 1.0, %v6711_v59  ;;  %vm3094_vm12 = vmand %vm3060_vm5, %vm3077_vm6  ;;  %vm3081_vm15 = vcmp.lt.s32.totalorder %v3047_v48, 12 }
  0xcd   : > { %v3145_v39 = vsel %vm3094_vm12, 1, %v5104_v0  ;;  %vm3098_vm4 = vmand %vm3064_vm14, %vm3081_vm15  ;;  %vm3083_vm12 = vcmp.lt.s32.totalorder %v3049_v56, 12  ;;  %vm3082_vm14 = vcmp.lt.s32.totalorder %v3048_v44, 12 }
  0xce   : > { %vm3059_vm7 = vcmp.ge.s32.totalorder %v3042_v22, 0  ;;  %vm3076_vm9 = vcmp.lt.s32.totalorder %v3042_v22, 12  ;;  %vm3097_vm5 = vmand %vm3063_vm0, %vm3080_vm1  ;;  %v3149_v45 = vsel %vm3098_vm4, 1, %v5104_v0  ;;  %v5085_v22 = vld [vmem:[%s6701_s1 + $0x40] sm:$0xff] }
  0xcf   : > { %vm3093_vm13 = vmand %vm3059_vm7, %vm3076_vm9 }
  0xd0   : > { %v3144_v43 = vsel %vm3093_vm13, 1, %v5104_v0  ;;  %vm3065_vm13 = vcmp.ge.s32.totalorder %v3048_v44, 0 }
  0xd1   : > { %vm3099_vm1 = vmand %vm3065_vm13, %vm3082_vm14  ;;  %vm3717_vm13 = vcmp.ge.s32.totalorder %v3700_v58, 0  ;;  %vm3734_vm14 = vcmp.lt.s32.totalorder %v3700_v58, 12 }
  0xd2   : > { %v3150_v57 = vsel %vm3099_vm1, 1, %v5104_v0  ;;  %vm1034_vm1 = vcmask 261120  }
  0xd3   : > { %4710 = vmatmul.msk.bf16.gmra.mxu0 %vm391_vm8, %v354_v35  ;;  %2590 = vperm.xlu2 %5075, %v2560_v36   ;;  %v347_v35 = vsel %vm330_vm10, 1.0, %v6711_v59  ;;  %v3045_v36 = vadd.s32 4294967293, %v5247_v55  ;;  %v3050_v55 = vadd.s32 4294967293, %v5302_v21  ;;  %vm332_vm10 = vcmp.eq.s32.totalorder %v5337_v50, %v315_v2 }
  0xd4   : > { %2587 = vperm.xlu1 %5074, %v2559_v37   ;;  %2584 = vperm.xlu0 %5073, %v2558_v38   ;;  %v357_v37 = vpack.c.bf16 %v348_v33, %v347_v35  ;;  %v3146_v38 = vsel %vm3095_vm11, 1, %v5104_v0  ;;  %vm3066_vm11 = vcmp.ge.s32.totalorder %v3049_v56, 0  ;;  %v349_v1 = vsel %vm332_vm10, 1.0, %v6711_v59  ;;  %v5090_v56 = vld [vmem:[%s6701_s1 + $0x48] sm:$0xff] }
  0xd5   : > { %vm3062_vm2 = vcmp.ge.s32.totalorder %v3045_v36, 0  ;;  %vm3079_vm3 = vcmp.lt.s32.totalorder %v3045_v36, 12  ;;  %vm3067_vm7 = vcmp.ge.s32.totalorder %v3050_v55, 0  ;;  %vm3084_vm9 = vcmp.lt.s32.totalorder %v3050_v55, 12  ;;  %vm3100_vm0 = vmand %vm3066_vm11, %vm3083_vm12 }
  0xd6   : > { %vm3096_vm6 = vmand %vm3062_vm2, %vm3079_vm3  ;;  %v3052_v21 = vadd.s32 4294967293, %v5318_v31  ;;  %v3151_v54 = vsel %vm3100_vm0, 1, %v5104_v0  ;;  %vm3070_vm2 = vcmp.ge.s32.totalorder %v3053_v11, 0  ;;  %vm3087_vm3 = vcmp.lt.s32.totalorder %v3053_v11, 12 }
  0xd7   : > { %v3147_v47 = vsel %vm3096_vm6, 1, %v5104_v0  ;;  %vm3101_vm15 = vmand %vm3067_vm7, %vm3084_vm9  ;;  %v3708_v2 = vadd.s32 3, %v5090_v56 }
  0xd8   : > { %v3152_v53 = vsel %vm3101_vm15, 1, %v5104_v0  ;;  %vm3069_vm4 = vcmp.ge.s32.totalorder %v3052_v21, 0  ;;  %vm3104_vm9 = vmand %vm3070_vm2, %vm3087_vm3 }
  0xd9   : > { %v3155_v3 = vsel %vm3104_vm9, 1, %v5104_v0  ;;  %vm3751_vm3 = vmand %vm3717_vm13, %vm3734_vm14  ;;  %vm3737_vm9 = vcmp.lt.s32.totalorder %v3703_v12, 12 }
  0xdb   : > { %2599 = vperm.xlu2 %5075, %v2563_v46   ;;  %v3148_v46 = vsel %vm3097_vm5, 1, %v5104_v0  ;;  %vm3086_vm5 = vcmp.lt.s32.totalorder %v3052_v21, 12 }
  0xdc   : > { %2596 = vperm.xlu1 %5074, %v2562_v49   ;;  %2593 = vperm.xlu0 %5073, %v2561_v51   ;;  %v3051_v49 = vadd.s32 4294967293, %v5313_v30  ;;  %v358_v51 = vpack.c.bf16 %v349_v1, %v349_v1  ;;  %vm3103_vm10 = vmand %vm3069_vm4, %vm3086_vm5  ;;  %v5079_v30 = vld [vmem:[%s6701_s1 + $0x10] sm:$0xff] }
  0xdd   : > { %v3701_v31 = vadd.s32 3, %v5079_v30  ;;  %v3154_v4 = vsel %vm3103_vm10, 1, %v5104_v0  ;;  %vm3719_vm10 = vcmp.ge.s32.totalorder %v3702_v15, 0 }
  0xde   : > { %vm3068_vm6 = vcmp.ge.s32.totalorder %v3051_v49, 0  ;;  %vm3085_vm7 = vcmp.lt.s32.totalorder %v3051_v49, 12  ;;  %v5091_v49 = vld [vmem:[%s6701_s1 + $0x78] sm:$0xff] }
  0xdf   : > { %vm3102_vm11 = vmand %vm3068_vm6, %vm3085_vm7  ;;  %vm3735_vm12 = vcmp.lt.s32.totalorder %v3701_v31, 12  ;;  %vm3720_vm7 = vcmp.ge.s32.totalorder %v3703_v12, 0 }
  0xe0   : > { %v3153_v6 = vsel %vm3102_vm11, 1, %v5104_v0  ;;  %vm3736_vm11 = vcmp.lt.s32.totalorder %v3702_v15, 12 }
  0xe1   : > { %vm3753_vm13 = vmand %vm3719_vm10, %vm3736_vm11 }
  0xe2   : > { %v3804_v35 = vsel %vm3753_vm13, 1, %v5104_v0  ;;  %vm3742_vm13 = vcmp.lt.s32.totalorder %v3708_v2, 12 }
  0xe3   : > { %4711 = vmatmul.msk.bf16.gmra.mxu0 %vm391_vm8, %v355_v60  ;;  %2608 = vperm.xlu2 %5075, %v2566_v61   ;;  %v5081_v61 = vld [vmem:[%s6701_s1] sm:$0xff] }
  0xe4   : > { %2605 = vperm.xlu1 %5074, %v2565_v62   ;;  %2602 = vperm.xlu0 %5073, %v2564_v63   ;;  %v3699_v62 = vadd.s32 3, %v5081_v61 }
  0xe6   : > { %vm3716_vm15 = vcmp.ge.s32.totalorder %v3699_v62, 0  ;;  %vm3733_vm0 = vcmp.lt.s32.totalorder %v3699_v62, 12 }
  0xe7   : > { %vm3750_vm4 = vmand %vm3716_vm15, %vm3733_vm0 }
  0xe8   : > { %v3801_v25 = vsel %vm3750_vm4, 1, %v5104_v0  ;;  %vm3739_vm4 = vcmp.lt.s32.totalorder %v3705_v41, 12 }
  0xeb   : > { %2614 = vperm.xlu2 %5075, %v2568_v8  }
  0xec   : > { %2617 = vperm.xlu1 %5074, %v2569_v9   ;;  %2611 = vperm.xlu0 %5073, %v2567_v10   ;;  %v5082_v10 = vld [vmem:[%s6701_s1 + $0x28] sm:$0xff] }
  0xed   : > { %v3704_v13 = vadd.s32 3, %v5082_v10 }
  0xef   : > { %vm3721_vm5 = vcmp.ge.s32.totalorder %v3704_v13, 0  ;;  %vm3738_vm6 = vcmp.lt.s32.totalorder %v3704_v13, 12 }
  0xf3   : > { %4712 = vmatmul.msk.bf16.gmra.mxu0 %vm391_vm8, %v356_v16  ;;  %3160 = vperm.xlu2 %5075, %v3140_v17  }
  0xf4   : > { %3157 = vperm.xlu1 %5074, %v3139_v19   ;;  %2620 = vperm.xlu0 %5073, %v2570_v20   ;;  %v3802_v19 = vsel %vm3751_vm3, 1, %v5104_v0  ;;  %vm3722_vm3 = vcmp.ge.s32.totalorder %v3705_v41, 0 }
  0xfb   : > { %3169 = vperm.xlu2 %5075, %v3143_v23   ;;  %v3707_v23 = vadd.s32 3, %v5085_v22 }
  0xfc   : > { %3166 = vperm.xlu1 %5074, %v3142_v24   ;;  %3163 = vperm.xlu0 %5073, %v3141_v27   ;;  %v5086_v24 = vld [vmem:[%s6701_s1 + $0x38] sm:$0xff] }
  0xfd   : > { %v3706_v27 = vadd.s32 3, %v5086_v24  ;;  %vm3724_vm14 = vcmp.ge.s32.totalorder %v3707_v23, 0  ;;  %vm3741_vm15 = vcmp.lt.s32.totalorder %v3707_v23, 12 }
  0xff   : > { %vm3723_vm0 = vcmp.ge.s32.totalorder %v3706_v27, 0 }
 0x103   : > { %4713 = vmatmul.msk.bf16.gmra.mxu0 %vm391_vm8, %v357_v37  ;;  %3178 = vperm.xlu2 %5075, %v3146_v38   ;;  %v5088_v38 = vld [vmem:[%s6701_s1 + $0x58] sm:$0xff] }
 0x104   : > { %3175 = vperm.xlu1 %5074, %v3145_v39   ;;  %3172 = vperm.xlu0 %5073, %v3144_v43   ;;  %v3710_v39 = vadd.s32 3, %v5088_v38  ;;  %v5089_v43 = vld [vmem:[%s6701_s1 + $0x50] sm:$0xff] }
 0x105   : > { %v3709_v55 = vadd.s32 3, %v5089_v43 }
 0x106   : > { %vm3744_vm10 = vcmp.lt.s32.totalorder %v3710_v39, 12 }
 0x107   : > { %vm3726_vm11 = vcmp.ge.s32.totalorder %v3709_v55, 0 }
 0x10b   : > { %3187 = vperm.xlu2 %5075, %v3149_v45  }
 0x10c   : > { %3184 = vperm.xlu1 %5074, %v3148_v46   ;;  %3181 = vperm.xlu0 %5073, %v3147_v47  }
 0x110   : > { %v428_v52 = vpop.f32.mrf.mxu0 }
 0x111   : > { %v472_v60 = vpack.c.bf16 %v428_v52, %v428_v52  ;;  %v5092_v52 = vld [vmem:[%s6701_s1 + $0x68] sm:$0xff] }
 0x113   : > { %4714 = vmatmul.msk.bf16.gmra.mxu0 %vm391_vm8, %v358_v51  ;;  %3196 = vperm.xlu2 %5075, %v3152_v53   ;;  %vm3718_vm8 = vcmp.ge.s32.totalorder %v3701_v31, 0  ;;  %v832_v7 = vunpack.c.l.b16 %v472_v60  ;;  %v3714_v51 = vadd.s32 3, %v5091_v49  ;;  %v3712_v53 = vadd.s32 3, %v5092_v52 }
 0x114   : > { %3193 = vperm.xlu1 %5074, %v3151_v54   ;;  %3190 = vperm.xlu0 %5073, %v3150_v57   ;;  %vm3752_vm2 = vmand %vm3718_vm8, %vm3735_vm12  ;;  %v5093_v54 = vld [vmem:[%s6701_s1 + $0x60] sm:$0xff] }
 0x115   : > { %v3803_v17 = vsel %vm3752_vm2, 1, %v5104_v0  ;;  %vm3755_vm8 = vmand %vm3721_vm5, %vm3738_vm6  ;;  %vm3740_vm2 = vcmp.lt.s32.totalorder %v3706_v27, 12  ;;  %v3711_v57 = vadd.s32 3, %v5093_v54  ;;  %v5043_v54 = vld [vmem:[%s6703_s3 + $0x8] sm:$0xff] }
 0x116   : > { %vm3754_vm12 = vmand %vm3720_vm7, %vm3737_vm9  ;;  %v3806_v48 = vsel %vm3755_vm8, 1, %v5104_v0  ;;  %vm3727_vm9 = vcmp.ge.s32.totalorder %v3710_v39, 0  ;;  %vm3743_vm8 = vcmp.lt.s32.totalorder %v3709_v55, 12 }
 0x117   : > { %v3805_v29 = vsel %vm3754_vm12, 1, %v5104_v0  ;;  %vm3758_vm5 = vmand %vm3724_vm14, %vm3741_vm15  ;;  %vm3725_vm12 = vcmp.ge.s32.totalorder %v3708_v2, 0 }
 0x118   : > { %v430_v63 = vpop.f32.mrf.mxu0  ;;  %vm3757_vm6 = vmand %vm3723_vm0, %vm3740_vm2  ;;  %v3809_v45 = vsel %vm3758_vm5, 1, %v5104_v0  ;;  %vm3731_vm2 = vcmp.ge.s32.totalorder %v3714_v51, 0  ;;  %vm3746_vm5 = vcmp.lt.s32.totalorder %v3712_v53, 12 }
 0x119   : > { %v473_v5 = vpack.c.bf16 %v430_v63, %v430_v63  ;;  %vm3756_vm7 = vmand %vm3722_vm3, %vm3739_vm4  ;;  %v3808_v46 = vsel %vm3757_vm6, 1, %v5104_v0  ;;  %vm3748_vm3 = vcmp.lt.s32.totalorder %v3714_v51, 12  ;;  %vm3729_vm4 = vcmp.ge.s32.totalorder %v3712_v53, 0  ;;  %v5094_v63 = vld [vmem:[%s6701_s1 + $0x80] sm:$0xf] }
 0x11a   : > { %v3807_v1 = vsel %vm3756_vm7, 1, %v5104_v0  ;;  %vm3761_vm14 = vmand %vm3727_vm9, %vm3744_vm10  ;;  %vm3728_vm6 = vcmp.ge.s32.totalorder %v3711_v57, 0  ;;  %vm3745_vm7 = vcmp.lt.s32.totalorder %v3711_v57, 12 }
 0x11b   : > { %v5503_v8 = vunpack.c.l.b16 %v473_v5  ;;  %3205 = vperm.xlu2 %5075, %v3155_v3   ;;  %vm3760_vm15 = vmand %vm3726_vm11, %vm3743_vm8  ;;  %v3812_v31 = vsel %vm3761_vm14, 1, %v5104_v0  ;;  %v3715_v3 = vadd.s32 3, %v5094_v63 }
 0x11c   : > { %3202 = vperm.xlu1 %5074, %v3154_v4   ;;  %3199 = vperm.xlu0 %5073, %v3153_v6   ;;  %vm3759_vm0 = vmand %vm3725_vm12, %vm3742_vm13  ;;  %v3811_v40 = vsel %vm3760_vm15, 1, %v5104_v0  ;;  %v5095_v4 = vld [vmem:[%s6701_s1 + $0x70] sm:$0xff] }
 0x11d   : > { %6755 = vst [vmem:[#allocation2_spill] sm:$0xff] %v5503_v8  ;;  %v5506_v9 = vpack.c.b16 %v5503_v8, %v832_v7  ;;  %v3810_v60 = vsel %vm3759_vm0, 1, %v5104_v0  ;;  %vm3765_vm9 = vmand %vm3731_vm2, %vm3748_vm3  ;;  %v3713_v5 = vadd.s32 3, %v5095_v4  ;;  %vm3732_vm8 = vcmp.ge.s32.totalorder %v3715_v3, 0 }
 0x11e   : > { %vm3763_vm10 = vmand %vm3729_vm4, %vm3746_vm5  ;;  %v3816_v7 = vsel %vm3765_vm9, 1, %v5104_v0  ;;  %vm3749_vm12 = vcmp.lt.s32.totalorder %v3715_v3, 12  ;;  %vm6710_vm2 = vcmask 1041408  }
 0x11f   : > { %6756 = vst [vmem:[#allocation3_spill] sm:$0xff] %v5506_v9  ;;  %4746 = vmatmul.msk.bf16.vlgmr.msra.gmra.mxu3 %vm1034_vm1, %v5506_v9  ;;  %vm3762_vm11 = vmand %vm3728_vm6, %vm3745_vm7  ;;  %v3814_v13 = vsel %vm3763_vm10, 1, %v5104_v0  ;;  %vm3730_vm13 = vcmp.ge.s32.totalorder %v3713_v5, 0  ;;  %vm3747_vm14 = vcmp.lt.s32.totalorder %v3713_v5, 12 }
 0x120   : > { %v433_v16 = vpop.f32.mrf.mxu0  ;;  %v3813_v18 = vsel %vm3762_vm11, 1, %v5104_v0  ;;  %vm3766_vm15 = vmand %vm3732_vm8, %vm3749_vm12 }
 0x121   : > { %v474_v20 = vpack.c.bf16 %v433_v16, %v433_v16  ;;  %vm3764_vm0 = vmand %vm3730_vm13, %vm3747_vm14 }
 0x123   : > { %v5522_v26 = vunpack.c.l.b16 %v474_v20  ;;  %3825 = vperm.xlu2 %5075, %v3803_v17   ;;  %v3817_v17 = vsel %vm3766_vm15, 1, %v5104_v0 }
 0x124   : > { %3822 = vperm.xlu1 %5074, %v3802_v19   ;;  %3819 = vperm.xlu0 %5073, %v3801_v25   ;;  %v3815_v19 = vsel %vm3764_vm0, 1, %v5104_v0 }
 0x125   : > { %6757 = vst [vmem:[#allocation4_spill] sm:$0xff] %v5522_v26 }
 0x128   : > { %v435_v33 = vpop.f32.mrf.mxu0 }
 0x129   : > { %v475_v32 = vpack.c.bf16 %v435_v33, %v435_v33 }
 0x12b   : > { %v5538_v36 = vunpack.c.l.b16 %v475_v32  ;;  %3834 = vperm.xlu2 %5075, %v3806_v48  }
 0x12c   : > { %3831 = vperm.xlu1 %5074, %v3805_v29   ;;  %3828 = vperm.xlu0 %5073, %v3804_v35  }
 0x12d   : > { %6758 = vst [vmem:[#allocation5_spill] sm:$0xff] %v5538_v36  ;;  %v5542_v37 = vpack.c.b16 %v5538_v36, %v5522_v26 }
 0x12f   : > { %4747 = vmatmul.msk.bf16.gmra.mxu3 %vm1034_vm1, %v5542_v37 }
 0x130   : > { %v438_v44 = vpop.f32.mrf.mxu0 }
 0x131   : > { %v476_v47 = vpack.c.bf16 %v438_v44, %v438_v44 }
 0x133   : > { %v5558_v11 = vunpack.c.l.b16 %v476_v47  ;;  %3843 = vperm.xlu2 %5075, %v3809_v45  }
 0x134   : > { %3840 = vperm.xlu1 %5074, %v3808_v46   ;;  %3837 = vperm.xlu0 %5073, %v3807_v1  }
 0x135   : > { %6759 = vst [vmem:[#allocation6_spill] sm:$0xff] %v5558_v11 }
 0x138   : > { %v440_v30 = vpop.f32.mrf.mxu0 }
 0x139   : > { %v477_v58 = vpack.c.bf16 %v440_v30, %v440_v30 }
 0x13b   : > { %v5574_v61 = vunpack.c.l.b16 %v477_v58  ;;  %3852 = vperm.xlu2 %5075, %v3812_v31  }
 0x13c   : > { %3849 = vperm.xlu1 %5074, %v3811_v40   ;;  %3846 = vperm.xlu0 %5073, %v3810_v60  }
 0x13d   : > { %6760 = vst [vmem:[#allocation7_spill] sm:$0xff] %v5574_v61  ;;  %v5578_v62 = vpack.c.b16 %v5574_v61, %v5558_v11 }
 0x13f   : > { %4748 = vmatmul.msk.bf16.gmra.mxu3 %vm1034_vm1, %v5578_v62 }
 0x140   : > { %v443_v6 = vpop.f32.mrf.mxu0 }
 0x141   : > { %v478_v10 = vpack.c.bf16 %v443_v6, %v443_v6 }
 0x143   : > { %v5591_v12 = vunpack.c.l.b16 %v478_v10  ;;  %3864 = vperm.xlu2 %5075, %v3816_v7   ;;  %v666_v7 = vpop.permute.xlu0 %665  ;;  %v6706_v10 = vmov 0.0|0.0  }
 0x144   : > { %3858 = vperm.xlu1 %5074, %v3814_v13   ;;  %3855 = vperm.xlu0 %5073, %v3813_v18   ;;  %v5651_v13 = vshrl.u32 %v263_v42, 7  ;;  %v663_v18 = vpop.permute.xlu2 %662  ;;  %vm713_vm6 = vcmp.eq.s32.totalorder %v666_v7, 1 }
 0x145   : > { %6761 = vst [vmem:[#allocation8_spill] sm:$0xff] %v5591_v12  ;;  %vm712_vm4 = vcmp.eq.s32.totalorder %v663_v18, 1 }
 0x146   : > { %v497_v7 = vadd.s32 56, %v5651_v13  ;;  %v503_v21 = vadd.s32 104, %v5651_v13 }
 0x148   : > { %v445_v15 = vpop.f32.mrf.mxu0  ;;  %v5816_v45 = vsub.s32 %v5337_v50, %v503_v21 }
 0x149   : > { %v479_v16 = vpack.c.bf16 %v445_v15, %v445_v15  ;;  %v491_v15 = vadd.s32 8, %v5651_v13 }
 0x14a   : > { %6782 = vst [vmem:[#allocation25_spill] sm:$0xff] %v5816_v45 }
 0x14b   : > { %v5597_v20 = vunpack.c.l.b16 %v479_v16  ;;  %v5659_v16 = vsub.s32 %v5337_v50, %v5651_v13  ;;  %v5666_v42 = vsub.s32 %v5337_v50, %v491_v15 }
 0x14c   : > { %3867 = vperm.xlu1 %5074, %v3817_v17   ;;  %3861 = vperm.xlu0 %5073, %v3815_v19   ;;  %v669_v19 = vpop.permute.xlu0 %668 }
 0x14d   : > { %6762 = vst [vmem:[#allocation9_spill] sm:$0xff] %v5597_v20  ;;  %v5601_v25 = vpack.c.b16 %v5597_v20, %v5591_v12  ;;  %vm610_vm3 = vcmp.eq.s32.totalorder %v5659_v16, 4294967295  ;;  %vm612_vm5 = vcmp.eq.s32.totalorder %v5666_v42, 4294967295  ;;  %vm1274_vm7 = vcmp.eq.s32.totalorder %v5659_v16, 1 }
 0x14e   : > { %vm5673_vm10 = vmand %vm610_vm3, %vm712_vm4  ;;  %vm1276_vm11 = vcmp.eq.s32.totalorder %v5666_v42, 1 }
 0x14f   : > { %4749 = vmatmul.msk.bf16.gmra.mxu3 %vm1034_vm1, %v5601_v25  ;;  %vm731_vm12 = vmand %vm612_vm5, %vm713_vm6  ;;  %vm714_vm6 = vcmp.eq.s32.totalorder %v669_v19, 1 }
 0x150   : > { %v448_v22 = vpop.f32.mrf.mxu0  ;;  %vm4715_vm15 = vmpackc.low %vm731_vm12, %vm5673_vm10 }
 0x151   : > { %v480_v23 = vpack.c.bf16 %v448_v22, %v448_v22  ;;  %v1327_v22 = vpop.permute.xlu1 %1326 }
 0x152   : > { %vm1376_vm9 = vcmp.eq.s32.totalorder %v1327_v22, 1 }
 0x153   : > { %v5605_v24 = vunpack.c.l.b16 %v480_v23  ;;  %vm1393_vm13 = vmand %vm1274_vm7, %vm1376_vm9 }
 0x155   : > { %6763 = vst [vmem:[#allocation10_spill] sm:$0xff] %v5605_v24 }
 0x158   : > { %v450_v28 = vpop.f32.mrf.mxu0 }
 0x159   : > { %v481_v0 = vpack.c.bf16 %v450_v28, %v450_v28  ;;  %v1336_v28 = vpop.permute.xlu0 %1335 }
 0x15a   : > { %vm1379_vm9 = vcmp.eq.s32.totalorder %v1336_v28, 1 }
 0x15b   : > { %v5609_v41 = vunpack.c.l.b16 %v481_v0  ;;  %v6708_v0 = vmov 1.0|1.0  }
 0x15d   : > { %6764 = vst [vmem:[#allocation11_spill] sm:$0xff] %v5609_v41  ;;  %v853_v33 = vpack.c.b16 %v5609_v41, %v5605_v24 }
 0x15f   : > { %4750 = vmatmul.msk.bf16.gmra.mxu3 %vm1034_vm1, %v853_v33 }
 0x160   : > { %v453_v48 = vpop.f32.mrf.mxu0 }
 0x161   : > { %v482_v29 = vpack.c.bf16 %v453_v48, %v453_v48  ;;  %v492_v48 = vadd.s32 16, %v5651_v13 }
 0x163   : > { %v5614_v32 = vunpack.c.l.b16 %v482_v29 }
 0x165   : > { %6765 = vst [vmem:[#allocation12_spill] sm:$0xff] %v5614_v32 }
 0x168   : > { %v455_v38 = vpop.f32.mrf.mxu0 }
 0x169   : > { %v483_v39 = vpack.c.bf16 %v455_v38, %v455_v38 }
 0x16b   : > { %v5618_v43 = vunpack.c.l.b16 %v483_v39 }
 0x16d   : > { %6766 = vst [vmem:[#allocation13_spill] sm:$0xff] %v5618_v43  ;;  %v854_v55 = vpack.c.b16 %v5618_v43, %v5614_v32 }
 0x16f   : > { %4751 = vmatmul.msk.bf16.gmra.mxu3 %vm1034_vm1, %v854_v55 }
 0x170   : > { %v458_v56 = vpop.f32.mrf.mxu0 }
 0x171   : > { %v484_v2 = vpack.c.bf16 %v458_v56, %v458_v56  ;;  %v1339_v56 = vpop.permute.xlu0 %1338 }
 0x173   : > { %v5623_v44 = vunpack.c.l.b16 %v484_v2 }
 0x175   : > { %6767 = vst [vmem:[#allocation14_spill] sm:$0xff] %v5623_v44 }
 0x178   : > { %v460_v46 = vpop.f32.mrf.mxu0 }
 0x179   : > { %v485_v47 = vpack.c.bf16 %v460_v46, %v460_v46 }
 0x17b   : > { %v5627_v1 = vunpack.c.l.b16 %v485_v47 }
 0x17d   : > { %6768 = vst [vmem:[#allocation15_spill] sm:$0xff] %v5627_v1  ;;  %v855_v49 = vpack.c.b16 %v5627_v1, %v5623_v44 }
 0x17f   : > { %4752 = vmatmul.msk.bf16.gmra.mxu3 %vm1034_vm1, %v855_v49 }
 0x180   : > { %v463_v51 = vpop.f32.mrf.mxu0 }
 0x181   : > { %v486_v52 = vpack.c.bf16 %v463_v51, %v463_v51  ;;  %v495_v51 = vadd.s32 40, %v5651_v13 }
 0x183   : > { %v5632_v53 = vunpack.c.l.b16 %v486_v52 }
 0x185   : > { %6769 = vst [vmem:[#allocation16_spill] sm:$0xff] %v5632_v53 }
 0x188   : > { %v465_v57 = vpop.f32.mrf.mxu0 }
 0x189   : > { %v487_v30 = vpack.c.bf16 %v465_v57, %v465_v57  ;;  %v684_v57 = vpop.permute.xlu0 %683 }
 0x18b   : > { %v5636_v31 = vunpack.c.l.b16 %v487_v30 }
 0x18d   : > { %6770 = vst [vmem:[#allocation17_spill] sm:$0xff] %v5636_v31  ;;  %v856_v40 = vpack.c.b16 %v5636_v31, %v5632_v53 }
 0x18f   : > { %898 = vmatpush.bf16.msra.mxu1 %v856_v40  ;;  %4753 = vmatmul.msk.bf16.gmra.mxu3 %vm1034_vm1, %v856_v40 }
 0x190   : > { %1506 = vmatpush.bf16.msrb.mxu3 %v856_v40  ;;  %v468_v58 = vpop.f32.mrf.mxu0 }
 0x191   : > { %v488_v60 = vpack.c.bf16 %v468_v58, %v468_v58  ;;  %v5716_v58 = vsub.s32 %v5337_v50, %v495_v51 }
 0x193   : > { %v5641_v63 = vunpack.c.l.b16 %v488_v60  ;;  %899 = vmatpush.bf16.msra.mxu1 %v855_v49 }
 0x194   : > { %1507 = vmatpush.bf16.msrb.mxu3 %v855_v49  ;;  %v494_v49 = vadd.s32 32, %v5651_v13 }
 0x195   : > { %6771 = vst [vmem:[#allocation18_spill] sm:$0xff] %v5641_v63  ;;  %v857_v4 = vpack.c.b16 %v5641_v63, %v5641_v63 }
 0x196   : > { %v5711_v52 = vsub.s32 %v5337_v50, %v494_v49 }
 0x197   : > { %900 = vmatpush.bf16.msra.mxu1 %v854_v55  ;;  %v896_v5 = vsel %vm6710_vm2, %v857_v4, 0 }
 0x198   : > { %1508 = vmatpush.bf16.msrb.mxu3 %v854_v55  ;;  %v470_v6 = vpop.f32.mrf.mxu0  ;;  %958 = vmatpush.bf16.msra.mxu2 %v896_v5  ;;  %v5696_v55 = vsub.s32 %v5337_v50, %v492_v48  ;;  %v499_v48 = vadd.s32 72, %v5651_v13 }
 0x199   : > { %1566 = vmatpush.bf16.msrb.mxu0 %v896_v5  ;;  %v687_v5 = vpop.permute.xlu0 %686  ;;  %v496_v6 = vadd.s32 48, %v5651_v13 }
 0x19a   : > { %vm614_vm5 = vcmp.eq.s32.totalorder %v5696_v55, 4294967295  ;;  %vm1278_vm10 = vcmp.eq.s32.totalorder %v5696_v55, 1 }
 0x19b   : > { %901 = vmatpush.bf16.msra.mxu1 %v853_v33  ;;  %959 = vmatmul.bf16.vlgmr.msra.gmra.mxu2 %v6706_v10  ;;  %vm733_vm12 = vmand %vm614_vm5, %vm714_vm6  ;;  %vm1284_vm5 = vcmp.eq.s32.totalorder %v5716_v58, 1  ;;  %v5731_v15 = vsub.s32 %v5337_v50, %v496_v6 }
 0x19c   : > { %1509 = vmatpush.bf16.msrb.mxu3 %v853_v33  ;;  %1567 = vmatmul.bf16.vlgmr.msrb.gmra.mxu0 %v6706_v10  ;;  %v672_v33 = vpop.permute.xlu1 %671 }
 0x19d   : > { %vm715_vm4 = vcmp.eq.s32.totalorder %v672_v33, 1  ;;  %1159 = vmatpush.bf16.msrb.mxu2 %v5043_v54 }
 0x19f   : > { %902 = vmatpush.bf16.msra.mxu1 %v5601_v25  ;;  %4754 = vmatmul.msk.bf16.gmra.mxu3 %vm1034_vm1, %v857_v4 }
 0x1a0   : > { %1510 = vmatpush.bf16.msrb.mxu3 %v5601_v25  ;;  %v1330_v25 = vpop.permute.xlu2 %1329 }
 0x1a1   : > { %vm1377_vm8 = vcmp.eq.s32.totalorder %v1330_v25, 1  ;;  %v5736_v25 = vsub.s32 %v5337_v50, %v497_v7 }
 0x1a2   : > { %v5661_v17 = vpop.f32.mrf.mxu3  ;;  %vm1395_vm14 = vmand %vm1276_vm11, %vm1377_vm8 }
 0x1a3   : > { %903 = vmatpush.bf16.msra.mxu1 %v5578_v62  ;;  %vm4772_vm0 = vmpackc.low %vm1395_vm14, %vm1393_vm13 }
 0x1a4   : > { %1511 = vmatpush.bf16.msrb.mxu3 %v5578_v62  ;;  %v675_v2 = vpop.permute.xlu1 %674  ;;  %v1354_v62 = vpop.permute.xlu0 %1353 }
 0x1a7   : > { %904 = vmatpush.bf16.msra.mxu1 %v5542_v37 }
 0x1a8   : > { %1512 = vmatpush.bf16.msrb.mxu3 %v5542_v37  ;;  %v493_v37 = vadd.s32 24, %v5651_v13  ;;  %v1333_v39 = vpop.permute.xlu2 %1332 }
 0x1a9   : > { %vm1378_vm11 = vcmp.eq.s32.totalorder %v1333_v39, 1 }
 0x1aa   : > { %v5678_v23 = vpop.f32.mrf.mxu3  ;;  %v5691_v29 = vsub.s32 %v5337_v50, %v493_v37  ;;  %vm1397_vm14 = vmand %vm1278_vm10, %vm1378_vm11  ;;  %vm620_vm10 = vcmp.eq.s32.totalorder %v5716_v58, 4294967295 }
 0x1ab   : > { %905 = vmatpush.bf16.msra.mxu1 %v5506_v9  ;;  %964 = vmatmul.bf16.gmra.mxu2 %v6706_v10 }
 0x1ac   : > { %1513 = vmatpush.bf16.msrb.mxu3 %v5506_v9  ;;  %1572 = vmatmul.bf16.gmra.mxu0 %v6706_v10  ;;  %vm616_vm3 = vcmp.eq.s32.totalorder %v5691_v29, 4294967295  ;;  %vm1280_vm7 = vcmp.eq.s32.totalorder %v5691_v29, 1  ;;  %v1342_v40 = vpop.permute.xlu1 %1341  ;;  %v1357_v39 = vpop.permute.xlu0 %1356  ;;  %v6790_v9 = vmov 0.0|0.0  }
 0x1ad   : > { %vm735_vm8 = vmand %vm616_vm3, %vm715_vm4  ;;  %vm618_vm3 = vcmp.eq.s32.totalorder %v5711_v52, 4294967295  ;;  %vm716_vm4 = vcmp.eq.s32.totalorder %v675_v2, 1  ;;  %vm1381_vm6 = vcmp.eq.s32.totalorder %v1342_v40, 1  ;;  %v5751_v2 = vsub.s32 %v5337_v50, %v499_v48 }
 0x1ae   : > { %4716 = vmatmul.msk.bf16.vlgmr.msra.gmra.mxu1 %vm4715_vm15, %v6708_v0  ;;  %vm1399_vm13 = vmand %vm1280_vm7, %vm1379_vm9  ;;  %vm1282_vm7 = vcmp.eq.s32.totalorder %v5711_v52, 1  ;;  %vm1380_vm9 = vcmp.eq.s32.totalorder %v1339_v56, 1  ;;  %v498_v56 = vadd.s32 64, %v5651_v13 }
 0x1af   : > { %4773 = vmatmul.msk.bf16.vlgmr.msrb.gmra.mxu3 %vm4772_vm0, %v6708_v0  ;;  %vm4717_vm15 = vmpackc.low %vm735_vm8, %vm733_vm12  ;;  %6774 = vst [vmem:[#allocation19_spill] sm:$0xff] %v5751_v2 }
 0x1b0   : > { %v678_v47 = vpop.permute.xlu2 %677  ;;  %vm4774_vm0 = vmpackc.low %vm1399_vm13, %vm1397_vm14  ;;  %v5756_v49 = vsub.s32 %v5337_v50, %v498_v56 }
 0x1b1   : > { %vm717_vm11 = vcmp.eq.s32.totalorder %v678_v47, 1  ;;  %vm737_vm8 = vmand %vm618_vm3, %vm716_vm4  ;;  %vm622_vm3 = vcmp.eq.s32.totalorder %v5731_v15, 4294967295 }
 0x1b2   : > { %v5693_v38 = vpop.f32.mrf.mxu3  ;;  %vm1403_vm12 = vmand %vm1284_vm5, %vm1381_vm6  ;;  %vm624_vm5 = vcmp.eq.s32.totalorder %v5736_v25, 4294967295  ;;  %vm719_vm6 = vcmp.eq.s32.totalorder %v684_v57, 1  ;;  %6775 = vst [vmem:[#allocation20_spill] sm:$0xff] %v5756_v49 }
 0x1b3   : > { %vm1401_vm13 = vmand %vm1282_vm7, %vm1380_vm9  ;;  %vm1286_vm7 = vcmp.eq.s32.totalorder %v5731_v15, 1 }
 0x1b4   : > { %vm739_vm14 = vmand %vm620_vm10, %vm717_vm11  ;;  %v1345_v18 = vpop.permute.xlu1 %1344  ;;  %vm1288_vm11 = vcmp.eq.s32.totalorder %v5736_v25, 1  ;;  %v5762_v40 = vpop.permute.xlu0 %701 }
 0x1b5   : > { %vm1382_vm9 = vcmp.eq.s32.totalorder %v1345_v18, 1  ;;  %v501_v18 = vadd.s32 88, %v5651_v13 }
 0x1b8   : > { %v681_v60 = vpop.permute.xlu2 %680 }
 0x1b9   : > { %vm718_vm4 = vcmp.eq.s32.totalorder %v681_v60, 1 }
 0x1ba   : > { %v5702_v46 = vpop.f32.mrf.mxu3  ;;  %vm741_vm10 = vmand %vm622_vm3, %vm718_vm4  ;;  %vm628_vm3 = vcmp.eq.s32.totalorder %v5751_v2, 4294967295 }
 0x1bb   : > { %969 = vmatmul.bf16.gmra.mxu2 %v6706_v10 }
 0x1bc   : > { %1577 = vmatmul.bf16.gmra.mxu0 %v6706_v10  ;;  %v690_v28 = vpop.permute.xlu1 %689 }
 0x1bd   : > { %vm721_vm4 = vcmp.eq.s32.totalorder %v690_v28, 1  ;;  %v5777_v28 = vpop.permute.xlu0 %704 }
 0x1be   : > { %4718 = vmatmul.msk.bf16.gmra.mxu1 %vm4717_vm15, %v6708_v0  ;;  %vm4719_vm15 = vmpackc.low %vm739_vm14, %vm737_vm8 }
 0x1bf   : > { %4775 = vmatmul.msk.bf16.gmra.mxu3 %vm4774_vm0, %v6708_v0  ;;  %vm4776_vm0 = vmpackc.low %vm1403_vm12, %vm1401_vm13 }
 0x1c0   : > { %v1348_v19 = vpop.permute.xlu2 %1347  ;;  %vm743_vm12 = vmand %vm624_vm5, %vm719_vm6  ;;  %vm626_vm5 = vcmp.eq.s32.totalorder %v5756_v49, 4294967295  ;;  %vm720_vm6 = vcmp.eq.s32.totalorder %v687_v5, 1  ;;  %v500_v5 = vadd.s32 80, %v5651_v13 }
 0x1c1   : > { %vm1383_vm8 = vcmp.eq.s32.totalorder %v1348_v19, 1  ;;  %vm1405_vm13 = vmand %vm1286_vm7, %vm1382_vm9  ;;  %vm1292_vm7 = vcmp.eq.s32.totalorder %v5751_v2, 1  ;;  %vm1385_vm9 = vcmp.eq.s32.totalorder %v1354_v62, 1 }
 0x1c2   : > { %v5713_v30 = vpop.f32.mrf.mxu3  ;;  %vm1407_vm14 = vmand %vm1288_vm11, %vm1383_vm8  ;;  %v5773_v19 = vsub.s32 %v5337_v50, %v500_v5 }
 0x1c3   : > { %vm747_vm8 = vmand %vm628_vm3, %vm721_vm4 }
 0x1c4   : > { %v693_v51 = vpop.permute.xlu1 %692  ;;  %6776 = vst [vmem:[#allocation21_spill] sm:$0xff] %v5773_v19  ;;  %vm630_vm3 = vcmp.eq.s32.totalorder %v5773_v19, 4294967295 }
 0x1c5   : > { %vm722_vm4 = vcmp.eq.s32.totalorder %v693_v51, 1  ;;  %v507_v51 = vadd.s32 128, %v5337_v50  ;;  %v5801_v34 = vpop.permute.xlu0 %1371 }
 0x1c8   : > { %v1351_v33 = vpop.permute.xlu2 %1350 }
 0x1c9   : > { %vm1384_vm11 = vcmp.eq.s32.totalorder %v1351_v33, 1  ;;  %v5780_v33 = vsub.s32 %v5337_v50, %v501_v18 }
 0x1ca   : > { %v5722_v4 = vpop.f32.mrf.mxu3 }
 0x1cb   : > { %974 = vmatmul.bf16.gmra.mxu2 %v6706_v10  ;;  %6777 = vst [vmem:[#allocation22_spill] sm:$0xff] %v5780_v33 }
 0x1cc   : > { %1582 = vmatmul.bf16.gmra.mxu0 %v6706_v10  ;;  %v1360_v6 = vpop.permute.xlu1 %1359 }
 0x1ce   : > { %4720 = vmatmul.msk.bf16.gmra.mxu1 %vm4719_vm15, %v6708_v0  ;;  %vm4721_vm15 = vmpackc.low %vm743_vm12, %vm741_vm10  ;;  %vm1290_vm10 = vcmp.eq.s32.totalorder %v5756_v49, 1 }
 0x1cf   : > { %4777 = vmatmul.msk.bf16.gmra.mxu3 %vm4776_vm0, %v6708_v0  ;;  %vm4778_vm0 = vmpackc.low %vm1407_vm14, %vm1405_vm13 }
 0x1d0   : > { %v696_v57 = vpop.permute.xlu2 %695  ;;  %vm745_vm12 = vmand %vm626_vm5, %vm720_vm6  ;;  %vm1296_vm5 = vcmp.eq.s32.totalorder %v5780_v33, 1  ;;  %vm1387_vm6 = vcmp.eq.s32.totalorder %v1360_v6, 1  ;;  %v505_v6 = vadd.s32 120, %v5651_v13 }
 0x1d1   : > { %vm1411_vm13 = vmand %vm1292_vm7, %vm1385_vm9  ;;  %vm1294_vm7 = vcmp.eq.s32.totalorder %v5773_v19, 1  ;;  %vm1386_vm9 = vcmp.eq.s32.totalorder %v1357_v39, 1 }
 0x1d2   : > { %v5733_v22 = vpop.f32.mrf.mxu3  ;;  %vm1409_vm14 = vmand %vm1290_vm10, %vm1384_vm11  ;;  %vm632_vm10 = vcmp.eq.s32.totalorder %v5780_v33, 4294967295  ;;  %vm723_vm11 = vcmp.eq.s32.totalorder %v696_v57, 1  ;;  %v5796_v39 = vsub.s32 %v507_v51, %v505_v6  ;;  %v502_v57 = vadd.s32 96, %v5651_v13 }
 0x1d4   : > { %v1363_v56 = vpop.permute.xlu1 %1362  ;;  %6780 = vst [vmem:[#allocation23_spill] sm:$0xff] %v5796_v39  ;;  %v5809_v14 = vsub.s32 %v5337_v50, %v502_v57 }
 0x1d6   : > { %6781 = vst [vmem:[#allocation24_spill] sm:$0xff] %v5809_v14 }
 0x1d8   : > { %v699_v7 = vpop.permute.xlu2 %698 }
 0x1da   : > { %v5742_v37 = vpop.f32.mrf.mxu3 }
 0x1db   : > { %979 = vmatmul.bf16.gmra.mxu2 %v6706_v10 }
 0x1dc   : > { %1587 = vmatmul.bf16.gmra.mxu0 %v6706_v10  ;;  %v708_v27 = vpop.permute.xlu1 %707 }
 0x1de   : > { %4722 = vmatmul.msk.bf16.gmra.mxu1 %vm4721_vm15, %v6708_v0  ;;  %vm4723_vm15 = vmpackc.low %vm747_vm8, %vm745_vm12 }
 0x1df   : > { %4779 = vmatmul.msk.bf16.gmra.mxu3 %vm4778_vm0, %v6708_v0  ;;  %vm4780_vm0 = vmpackc.low %vm1411_vm13, %vm1409_vm14 }
 0x1e0   : > { %vm5786_vm8 = vmand %vm630_vm3, %vm722_vm4  ;;  %v1366_v5 = vpop.permute.xlu2 %1365  ;;  %vm1305_vm3 = vcmp.eq.s32.totalorder %v5796_v39, 1  ;;  %vm1391_vm4 = vcmp.eq.s32.totalorder %v5801_v34, 1 }
 0x1e1   : > { %vm1415_vm12 = vmand %vm1296_vm5, %vm1387_vm6  ;;  %vm634_vm6 = vcmp.eq.s32.totalorder %v5809_v14, 4294967295 }
 0x1e2   : > { %v5753_v47 = vpop.f32.mrf.mxu3  ;;  %vm1413_vm13 = vmand %vm1294_vm7, %vm1386_vm9  ;;  %vm724_vm7 = vcmp.eq.s32.totalorder %v699_v7, 1  ;;  %vm636_vm9 = vcmp.eq.s32.totalorder %v5816_v45, 4294967295  ;;  %v506_v7 = vadd.s32 128, %v5651_v13 }
 0x1e3   : > { %vm751_vm14 = vmand %vm632_vm10, %vm723_vm11  ;;  %vm725_vm10 = vcmp.eq.s32.totalorder %v5762_v40, 1  ;;  %vm1298_vm11 = vcmp.eq.s32.totalorder %v5809_v14, 1 }
 0x1e4   : > { %vm1424_vm5 = vmand %vm1305_vm3, %vm1391_vm4  ;;  %v5837_v54 = vsub.s32 %v507_v51, %v506_v7  ;;  %v5850_v51 = vsub.s32 %v5337_v50, %v505_v6 }
 0x1e5   : > { %v1458_v57 = vsel %vm1424_vm5, 1.0, %v6711_v59 }
 0x1e6   : > { %v1476_v3 = vpack.c.bf16 %v1458_v57, %v6711_v59  ;;  %6785 = vst [vmem:[#allocation26_spill] sm:$0xff] %v5837_v54  ;;  %v504_v57 = vadd.s32 112, %v5651_v13 }
 0x1e7   : > { %6786 = vst [vmem:[#allocation27_spill] sm:$0xff] %v5850_v51 }
 0x1e8   : > { %v1369_v35 = vpop.permute.xlu2 %1368 }
 0x1ea   : > { %v5764_v60 = vpop.f32.mrf.mxu3 }
 0x1eb   : > { %984 = vmatmul.bf16.gmra.mxu2 %v6706_v10 }
 0x1ec   : > { %1592 = vmatmul.bf16.gmra.mxu0 %v6706_v10 }
 0x1ee   : > { %4724 = vmatmul.msk.bf16.gmra.mxu1 %vm4723_vm15, %v6708_v0  ;;  %vm4725_vm15 = vmpackc.low %vm751_vm14, %vm5786_vm8  ;;  %vm1388_vm8 = vcmp.eq.s32.totalorder %v1363_v56, 1  ;;  %vm1389_vm14 = vcmp.eq.s32.totalorder %v1366_v5, 1  ;;  %v711_v56 = vpop.permute.xlu1 %710 }
 0x1ef   : > { %4781 = vmatmul.msk.bf16.gmra.mxu3 %vm4780_vm0, %v6708_v0  ;;  %vm4782_vm0 = vmpackc.low %vm1415_vm12, %vm1413_vm13  ;;  %vm1300_vm13 = vcmp.eq.s32.totalorder %v5816_v45, 1 }
 0x1f0   : > { %vm5826_vm12 = vmand %vm634_vm6, %vm724_vm7  ;;  %v1375_v5 = vpop.permute.xlu2 %1374 }
 0x1f1   : > { %vm1417_vm3 = vmand %vm1298_vm11, %vm1388_vm8  ;;  %vm1307_vm11 = vcmp.eq.s32.totalorder %v5837_v54, 1  ;;  %vm1392_vm8 = vcmp.eq.s32.totalorder %v1375_v5, 1  ;;  %v5042_v5 = vld [vmem:[%s6703_s3] sm:$0xff] }
 0x1f2   : > { %v5775_v62 = vpop.f32.mrf.mxu3  ;;  %vm1419_vm5 = vmand %vm1300_vm13, %vm1389_vm14  ;;  %vm640_vm14 = vcmp.eq.s32.totalorder %v5850_v51, 4294967295  ;;  %1160 = vmatpush.bf16.msrb.mxu2 %v5042_v5 }
 0x1f3   : > { %vm4784_vm7 = vmpackc.low %vm1419_vm5, %vm1417_vm3  ;;  %vm726_vm5 = vcmp.eq.s32.totalorder %v5777_v28, 1  ;;  %v6788_v28 = vmov 1.0|1.0  }
 0x1f4   : > { %vm1426_vm13 = vmand %vm1307_vm11, %vm1392_vm8 }
 0x1f5   : > { %v1460_v6 = vsel %vm1426_vm13, 1.0, %v6711_v59 }
 0x1fa   : > { %v5790_v18 = vpop.f32.mrf.mxu3 }
 0x1fb   : > { %989 = vmatmul.bf16.gmra.mxu2 %v6706_v10 }
 0x1fc   : > { %1597 = vmatmul.bf16.gmra.mxu0 %v6706_v10 }
 0x1fe   : > { %4726 = vmatmul.msk.bf16.gmra.mxu1 %vm4725_vm15, %v6708_v0  ;;  %vm866_vm15 = vcmask 31744  }
 0x1ff   : > { %4783 = vmatmul.msk.bf16.gmra.mxu3 %vm4782_vm0, %v6708_v0  ;;  %vm755_vm0 = vmand %vm636_vm9, %vm725_vm10  ;;  %vm643_vm9 = vcmp.eq.s32.totalorder %v5837_v54, 4294967295  ;;  %vm728_vm10 = vcmp.eq.s32.totalorder %v711_v56, 1 }
 0x200   : > { %vm4727_vm6 = vmpackc.low %vm755_vm0, %vm5826_vm12  ;;  %vm727_vm0 = vcmp.eq.s32.totalorder %v708_v27, 1 }
 0x201   : > { %vm762_vm12 = vmand %vm643_vm9, %vm728_vm10  ;;  %vm1390_vm9 = vcmp.eq.s32.totalorder %v1369_v35, 1  ;;  %v5046_v35 = vld [vmem:[%s6703_s3 + $0x20] sm:$0xff] }
 0x202   : > { %v5811_v48 = vpop.f32.mrf.mxu3  ;;  %v796_v13 = vsel %vm762_vm12, 1.0, %v6711_v59  ;;  %vm759_vm11 = vmand %vm640_vm14, %vm727_vm0 }
 0x203   : > { %v814_v27 = vpack.c.bf16 %v796_v13, %v796_v13 }
 0x20a   : > { %v5833_v40 = vpop.f32.mrf.mxu3 }
 0x20b   : > { %994 = vmatmul.bf16.gmra.mxu2 %v6706_v10  ;;  %v5856_v10 = vsub.s32 %v5337_v50, %v504_v57 }
 0x20c   : > { %4788 = vmatmul.msk.bf16.gmra.mxu0 %vm866_vm15, %v1476_v3  ;;  %v5047_v3 = vld [vmem:[%s6703_s3 + $0x28] sm:$0xff] }
 0x20d   : > { %1671 = vmatpush.bf16.msrb.mxu1 %v5047_v3  ;;  %6787 = vst [vmem:[#allocation28_spill] sm:$0xff] %v5856_v10  ;;  %vm638_vm3 = vcmp.eq.s32.totalorder %v5856_v10, 4294967295  ;;  %v1478_v3 = vpack.c.bf16 %v1460_v6, %v1460_v6  ;;  %v5882_v6 = vsub.s32 %v5337_v50, %v506_v7 }
 0x20e   : > { %4728 = vmatmul.msk.bf16.gmra.mxu1 %vm4727_vm6, %v6708_v0  ;;  %vm1304_vm6 = vcmp.eq.s32.totalorder %v5850_v51, 1  ;;  %vm757_vm8 = vmand %vm638_vm3, %vm726_vm5 }
 0x20f   : > { %4785 = vmatmul.msk.bf16.gmra.mxu3 %vm4784_vm7, %v6708_v0  ;;  %vm1302_vm7 = vcmp.eq.s32.totalorder %v5856_v10, 1  ;;  %vm1423_vm12 = vmand %vm1304_vm6, %vm1391_vm4  ;;  %6789 = vst [vmem:[#allocation29_spill] sm:$0xff] %v5882_v6  ;;  %vm642_vm4 = vcmp.eq.s32.totalorder %v5882_v6, 4294967295  ;;  %vm1858_vm6 = vcmp.eq.s32.totalorder %v5659_v16, 4294967294 }
 0x210   : > { %vm1421_vm13 = vmand %vm1302_vm7, %vm1390_vm9 }
 0x211   : > { %vm4729_vm2 = vmpackc.low %vm759_vm11, %vm757_vm8  ;;  %1672 = vmatpush.bf16.msrb.mxu1 %v5046_v35 }
 0x212   : > { %v5852_v21 = vpop.f32.mrf.mxu3  ;;  %vm4786_vm14 = vmpackc.low %vm1423_vm12, %vm1421_vm13  ;;  %vm1864_vm12 = vcmp.eq.s32.totalorder %v5691_v29, 4294967294 }
 0x213   : > { %vm761_vm0 = vmand %vm642_vm4, %vm728_vm10  ;;  %vm1860_vm10 = vcmp.eq.s32.totalorder %v5666_v42, 4294967294 }
 0x214   : > { %vm4731_vm3 = vmpackc.low %vm761_vm0, %vm761_vm0 }
 0x219   : > { %v1568_v57 = vpop.f32.mrf.mxu0 }
 0x21a   : > { %v5868_v0 = vpop.f32.mrf.mxu3 }
 0x21b   : > { %4733 = vmatmul.msk.bf16.gmra.mxu2 %vm866_vm15, %v814_v27 }
 0x21c   : > { %4789 = vmatmul.msk.bf16.gmra.mxu0 %vm866_vm15, %v1478_v3 }
 0x21e   : > { %4730 = vmatmul.msk.bf16.gmra.mxu1 %vm4729_vm2, %v6788_v28  ;;  %v960_v13 = vpop.f32.mrf.mxu2  ;;  %vm6800_vm2 = vcmask 1041408  }
 0x21f   : > { %4787 = vmatmul.msk.bf16.gmra.mxu3 %vm4786_vm14, %v6788_v28  ;;  %vm1862_vm14 = vcmp.eq.s32.totalorder %v5696_v55, 4294967294 }
 0x221   : > { %v1570_v5 = vpop.f32.mrf.mxu0 }
 0x222   : > { %v5879_v34 = vpop.f32.mrf.mxu3 }
 0x226   : > { %v962_v27 = vpop.f32.mrf.mxu2 }
 0x229   : > { %v1573_v3 = vpop.f32.mrf.mxu0 }
 0x22a   : > { %v1112_v59 = vpop.f32.mrf.mxu3 }
 0x22b   : > { %v907_v8 = vpop.f32.mrf.mxu1 }
 0x22c   : > { %v961_v61 = vadd.f32 %v960_v13, %v907_v8 }
 0x22e   : > { %4732 = vmatmul.msk.bf16.gmra.mxu1 %vm4731_vm3, %v6788_v28  ;;  %v965_v26 = vpop.f32.mrf.mxu2 }
 0x22f   : > { %1554 = vmatmul.bf16.gmra.mxu3 %v6790_v9 }
 0x231   : > { %v1575_v35 = vpop.f32.mrf.mxu0 }
 0x232   : > { %v1515_v36 = vpop.f32.mrf.mxu3 }
 0x233   : > { %v909_v11 = vpop.f32.mrf.mxu1  ;;  %v1569_v24 = vadd.f32 %v1568_v57, %v1515_v36 }
 0x234   : > { %v963_v50 = vadd.f32 %v962_v27, %v909_v11 }
 0x236   : > { %v1004_v7 = vpack.c.bf16 %v963_v50, %v961_v61  ;;  %v967_v12 = vpop.f32.mrf.mxu2 }
 0x238   : > { %4763 = vmatmul.msk.bf16.vlgmr.msrb.gmra.mxu2 %vm1034_vm1, %v1004_v7 }
 0x239   : > { %v1578_v20 = vpop.f32.mrf.mxu0 }
 0x23a   : > { %v1517_v56 = vpop.f32.mrf.mxu3 }
 0x23b   : > { %v1571_v59 = vadd.f32 %v1570_v5, %v1517_v56  ;;  %v912_v41 = vpop.f32.mrf.mxu1 }
 0x23c   : > { %v966_v31 = vadd.f32 %v965_v26, %v912_v41 }
 0x23d   : > { %v1612_v32 = vpack.c.bf16 %v1571_v59, %v1569_v24 }
 0x23e   : > { %v970_v43 = vpop.f32.mrf.mxu2 }
 0x23f   : > { %4802 = vmatmul.msk.bf16.vlgmr.msrb.gmra.mxu1 %vm1034_vm1, %v1612_v32 }
 0x241   : > { %v1580_v44 = vpop.f32.mrf.mxu0 }
 0x242   : > { %v1520_v1 = vpop.f32.mrf.mxu3 }
 0x243   : > { %v914_v53 = vpop.f32.mrf.mxu1  ;;  %v1574_v27 = vadd.f32 %v1573_v3, %v1520_v1 }
 0x244   : > { %v968_v63 = vadd.f32 %v967_v12, %v914_v53 }
 0x246   : > { %v1005_v8 = vpack.c.bf16 %v968_v63, %v966_v31  ;;  %v972_v11 = vpop.f32.mrf.mxu2 }
 0x248   : > { %4764 = vmatmul.msk.bf16.gmra.mxu2 %vm1034_vm1, %v1005_v8 }
 0x249   : > { %v1583_v61 = vpop.f32.mrf.mxu0 }
 0x24a   : > { %v1522_v13 = vpop.f32.mrf.mxu3 }
 0x24b   : > { %v1576_v50 = vadd.f32 %v1575_v35, %v1522_v13  ;;  %v917_v36 = vpop.f32.mrf.mxu1 }
 0x24c   : > { %v971_v56 = vadd.f32 %v970_v43, %v917_v36 }
 0x24d   : > { %v1613_v57 = vpack.c.bf16 %v1576_v50, %v1574_v27 }
 0x24e   : > { %v975_v5 = vpop.f32.mrf.mxu2 }
 0x24f   : > { %4803 = vmatmul.msk.bf16.gmra.mxu1 %vm1034_vm1, %v1613_v57 }
 0x251   : > { %v1585_v24 = vpop.f32.mrf.mxu0 }
 0x252   : > { %v1525_v32 = vpop.f32.mrf.mxu3 }
 0x253   : > { %v919_v7 = vpop.f32.mrf.mxu1  ;;  %v1579_v31 = vadd.f32 %v1578_v20, %v1525_v32 }
 0x254   : > { %v973_v59 = vadd.f32 %v972_v11, %v919_v7 }
 0x256   : > { %v1006_v26 = vpack.c.bf16 %v973_v59, %v971_v56  ;;  %v977_v12 = vpop.f32.mrf.mxu2 }
 0x258   : > { %4765 = vmatmul.msk.bf16.gmra.mxu2 %vm1034_vm1, %v1006_v26 }
 0x259   : > { %v1588_v41 = vpop.f32.mrf.mxu0 }
 0x25a   : > { %v1527_v53 = vpop.f32.mrf.mxu3 }
 0x25b   : > { %v1581_v63 = vadd.f32 %v1580_v44, %v1527_v53  ;;  %v922_v1 = vpop.f32.mrf.mxu1 }
 0x25c   : > { %v976_v50 = vadd.f32 %v975_v5, %v922_v1 }
 0x25d   : > { %v1614_v3 = vpack.c.bf16 %v1581_v63, %v1579_v31 }
 0x25e   : > { %v980_v35 = vpop.f32.mrf.mxu2 }
 0x25f   : > { %4804 = vmatmul.msk.bf16.gmra.mxu1 %vm1034_vm1, %v1614_v3 }
 0x261   : > { %v1590_v8 = vpop.f32.mrf.mxu0 }
 0x262   : > { %v1530_v13 = vpop.f32.mrf.mxu3 }
 0x263   : > { %v924_v27 = vpop.f32.mrf.mxu1  ;;  %v1584_v56 = vadd.f32 %v1583_v61, %v1530_v13 }
 0x264   : > { %v978_v57 = vadd.f32 %v977_v12, %v924_v27 }
 0x266   : > { %v1007_v43 = vpack.c.bf16 %v978_v57, %v976_v50  ;;  %v982_v11 = vpop.f32.mrf.mxu2 }
 0x268   : > { %4766 = vmatmul.msk.bf16.gmra.mxu2 %vm1034_vm1, %v1007_v43 }
 0x269   : > { %v1593_v36 = vpop.f32.mrf.mxu0 }
 0x26a   : > { %v1532_v7 = vpop.f32.mrf.mxu3 }
 0x26b   : > { %v1586_v59 = vadd.f32 %v1585_v24, %v1532_v7  ;;  %v927_v20 = vpop.f32.mrf.mxu1 }
 0x26c   : > { %v981_v63 = vadd.f32 %v980_v35, %v927_v20 }
 0x26d   : > { %v1615_v44 = vpack.c.bf16 %v1586_v59, %v1584_v56 }
 0x26e   : > { %v985_v32 = vpop.f32.mrf.mxu2 }
 0x26f   : > { %4805 = vmatmul.msk.bf16.gmra.mxu1 %vm1034_vm1, %v1615_v44 }
 0x271   : > { %v1595_v26 = vpop.f32.mrf.mxu0 }
 0x272   : > { %v1535_v53 = vpop.f32.mrf.mxu3 }
 0x273   : > { %v929_v31 = vpop.f32.mrf.mxu1  ;;  %v1589_v50 = vadd.f32 %v1588_v41, %v1535_v53 }
 0x274   : > { %v983_v3 = vadd.f32 %v982_v11, %v929_v31 }
 0x276   : > { %v1008_v5 = vpack.c.bf16 %v983_v3, %v981_v63  ;;  %v987_v12 = vpop.f32.mrf.mxu2 }
 0x278   : > { %4767 = vmatmul.msk.bf16.gmra.mxu2 %vm1034_vm1, %v1008_v5 }
 0x279   : > { %v1598_v1 = vpop.f32.mrf.mxu0 }
 0x27a   : > { %v1537_v27 = vpop.f32.mrf.mxu3 }
 0x27b   : > { %v1591_v57 = vadd.f32 %v1590_v8, %v1537_v27  ;;  %v932_v61 = vpop.f32.mrf.mxu1 }
 0x27c   : > { %v986_v59 = vadd.f32 %v985_v32, %v932_v61 }
 0x27d   : > { %v1616_v24 = vpack.c.bf16 %v1591_v57, %v1589_v50 }
 0x27e   : > { %v990_v13 = vpop.f32.mrf.mxu2 }
 0x27f   : > { %4806 = vmatmul.msk.bf16.gmra.mxu1 %vm1034_vm1, %v1616_v24 }
 0x281   : > { %v1600_v43 = vpop.f32.mrf.mxu0 }
 0x282   : > { %v1540_v7 = vpop.f32.mrf.mxu3 }
 0x283   : > { %v934_v56 = vpop.f32.mrf.mxu1  ;;  %v1594_v63 = vadd.f32 %v1593_v36, %v1540_v7 }
 0x284   : > { %v988_v44 = vadd.f32 %v987_v12, %v934_v56 }
 0x286   : > { %v1009_v35 = vpack.c.bf16 %v988_v44, %v986_v59  ;;  %v992_v11 = vpop.f32.mrf.mxu2 }
 0x288   : > { %4768 = vmatmul.msk.bf16.gmra.mxu2 %vm1034_vm1, %v1009_v35 }
 0x289   : > { %v1603_v20 = vpop.f32.mrf.mxu0 }
 0x28a   : > { %v1542_v31 = vpop.f32.mrf.mxu3 }
 0x28b   : > { %v1596_v3 = vadd.f32 %v1595_v26, %v1542_v31  ;;  %v937_v41 = vpop.f32.mrf.mxu1 }
 0x28c   : > { %v991_v57 = vadd.f32 %v990_v13, %v937_v41 }
 0x28d   : > { %v1617_v8 = vpack.c.bf16 %v1596_v3, %v1594_v63 }
 0x28e   : > { %v995_v53 = vpop.f32.mrf.mxu2 }
 0x28f   : > { %4807 = vmatmul.msk.bf16.gmra.mxu1 %vm1034_vm1, %v1617_v8 }
 0x291   : > { %v1605_v5 = vpop.f32.mrf.mxu0 }
 0x292   : > { %v1545_v27 = vpop.f32.mrf.mxu3 }
 0x293   : > { %v939_v50 = vpop.f32.mrf.mxu1  ;;  %v1599_v59 = vadd.f32 %v1598_v1, %v1545_v27 }
 0x294   : > { %v993_v24 = vadd.f32 %v992_v11, %v939_v50 }
 0x296   : > { %v1010_v32 = vpack.c.bf16 %v993_v24, %v991_v57  ;;  %v997_v12 = vpop.f32.mrf.mxu2 }
 0x298   : > { %4769 = vmatmul.msk.bf16.gmra.mxu2 %vm1034_vm1, %v1010_v32 }
 0x299   : > { %v1608_v61 = vpop.f32.mrf.mxu0 }
 0x29a   : > { %v1547_v56 = vpop.f32.mrf.mxu3 }
 0x29b   : > { %v1601_v44 = vadd.f32 %v1600_v43, %v1547_v56  ;;  %v942_v36 = vpop.f32.mrf.mxu1  ;;  %v5051_v43 = vld [vmem:[%s6703_s3 + $0x48] sm:$0xff] }
 0x29c   : > { %v996_v3 = vadd.f32 %v995_v53, %v942_v36  ;;  %2313 = vmatpush.bf16.msra.mxu0 %v5051_v43 }
 0x29d   : > { %v1618_v26 = vpack.c.bf16 %v1601_v44, %v1599_v59 }
 0x29e   : > { %v1000_v7 = vpop.f32.mrf.mxu2 }
 0x29f   : > { %4808 = vmatmul.msk.bf16.gmra.mxu1 %vm1034_vm1, %v1618_v26 }
 0x2a1   : > { %v1610_v35 = vpop.f32.mrf.mxu0 }
 0x2a2   : > { %v1550_v31 = vpop.f32.mrf.mxu3 }
 0x2a3   : > { %v944_v63 = vpop.f32.mrf.mxu1  ;;  %v1604_v50 = vadd.f32 %v1603_v20, %v1550_v31  ;;  %v5050_v20 = vld [vmem:[%s6703_s3 + $0x40] sm:$0xff] }
 0x2a4   : > { %v998_v8 = vadd.f32 %v997_v12, %v944_v63  ;;  %2314 = vmatpush.bf16.msra.mxu0 %v5050_v20 }
 0x2a6   : > { %v1011_v13 = vpack.c.bf16 %v998_v8, %v996_v3  ;;  %v1002_v11 = vpop.f32.mrf.mxu2 }
 0x2a8   : > { %4770 = vmatmul.msk.bf16.gmra.mxu2 %vm1034_vm1, %v1011_v13 }
 0x2aa   : > { %v1552_v41 = vpop.f32.mrf.mxu3 }
 0x2ab   : > { %v1606_v57 = vadd.f32 %v1605_v5, %v1552_v41  ;;  %v947_v24 = vpop.f32.mrf.mxu1 }
 0x2ac   : > { %v1001_v27 = vadd.f32 %v1000_v7, %v947_v24  ;;  %v5915_v7 = vld [vmem:[%s6704_s4] ss:$0 sm:$0xff] }
 0x2ad   : > { %v1619_v1 = vpack.c.bf16 %v1606_v57, %v1604_v50 }
 0x2ae   : > { %v1012_v12 = vpack.c.bf16 %v1001_v27, %v1001_v27 }
 0x2af   : > { %4809 = vmatmul.msk.bf16.gmra.mxu1 %vm1034_vm1, %v1619_v1 }
 0x2b2   : > { %v1555_v32 = vpop.f32.mrf.mxu3 }
 0x2b3   : > { %v949_v53 = vpop.f32.mrf.mxu1  ;;  %v1609_v56 = vadd.f32 %v1608_v61, %v1555_v32 }
 0x2b5   : > { %v1620_v26 = vpack.c.bf16 %v1609_v56, %v1609_v56 }
 0x2b8   : > { %4771 = vmatmul.msk.bf16.gmra.mxu2 %vm1034_vm1, %v1012_v12 }
 0x2ba   : > { %v1557_v59 = vpop.f32.mrf.mxu3 }
 0x2bb   : > { %v1162_v5 = vpop.f32.mrf.mxu2 }
 0x2bc   : > { %v1163_v44 = vadd.f32 %v1162_v5, %v5661_v17  ;;  %v1674_v36 = vpop.f32.mrf.mxu1 }
 0x2be   : > { %v1718_v35 = vadd.f32 %v1674_v36, %v1163_v44 }
 0x2bf   : > { %4810 = vmatmul.msk.bf16.gmra.mxu1 %vm1034_vm1, %v1620_v26 }
 0x2c0   : > { %v1739_v61 = vadd.f32 %v5915_v7, %v1718_v35 }
 0x2c2   : > { %v1756_v8 = vmax.f32 %v1739_v61, 0.0 }
 0x2c3   : > { %v1164_v31 = vpop.f32.mrf.mxu2 }
 0x2c4   : > { %v1165_v63 = vadd.f32 %v1164_v31, %v5678_v23  ;;  %v1676_v3 = vpop.f32.mrf.mxu1  ;;  %v1773_v11 = vpack.c.bf16 %v1756_v8, %v1756_v8 }
 0x2c6   : > { %v1719_v13 = vadd.f32 %v1676_v3, %v1165_v63  ;;  %v2080_v43 = vunpack.c.l.b16 %v1773_v11 }
 0x2c8   : > { %v1740_v17 = vadd.f32 %v5915_v7, %v1719_v13 }
 0x2ca   : > { %v1757_v41 = vmax.f32 %v1740_v17, 0.0 }
 0x2cb   : > { %v1167_v50 = vpop.f32.mrf.mxu2 }
 0x2cc   : > { %v1774_v57 = vpack.c.bf16 %v1757_v41, %v1757_v41  ;;  %v1168_v24 = vadd.f32 %v1167_v50, %v5693_v38  ;;  %v1679_v1 = vpop.f32.mrf.mxu1 }
 0x2ce   : > { %v2081_v27 = vunpack.c.l.b16 %v1774_v57  ;;  %v1720_v32 = vadd.f32 %v1679_v1, %v1168_v24 }
 0x2d0   : > { %v5922_v53 = vpack.c.b16 %v2081_v27, %v2080_v43  ;;  %v1741_v12 = vadd.f32 %v5915_v7, %v1720_v32 }
 0x2d2   : > { %6791 = vst [vmem:[#allocation30_spill] sm:$0xff] %v5922_v53  ;;  %v1758_v23 = vmax.f32 %v1741_v12, 0.0  ;;  %4846 = vmatmul.msk.bf16.vlgmr.msra.gmra.mxu0 %vm1034_vm1, %v5922_v53 }
 0x2d3   : > { %v1169_v56 = vpop.f32.mrf.mxu2 }
 0x2d4   : > { %v1775_v59 = vpack.c.bf16 %v1758_v23, %v1758_v23  ;;  %v1170_v20 = vadd.f32 %v1169_v56, %v5702_v46  ;;  %v1681_v5 = vpop.f32.mrf.mxu1 }
 0x2d6   : > { %v2082_v44 = vunpack.c.l.b16 %v1775_v59  ;;  %v1721_v36 = vadd.f32 %v1681_v5, %v1170_v20 }
 0x2d8   : > { %v5928_v38 = vpack.c.b16 %v2082_v44, %v2081_v27  ;;  %v1742_v26 = vadd.f32 %v5915_v7, %v1721_v36 }
 0x2da   : > { %6792 = vst [vmem:[#allocation31_spill] sm:$0xff] %v5928_v38  ;;  %v1759_v35 = vmax.f32 %v1742_v26, 0.0 }
 0x2db   : > { %v1172_v61 = vpop.f32.mrf.mxu2 }
 0x2dc   : > { %v1776_v31 = vpack.c.bf16 %v1759_v35, %v1759_v35  ;;  %v1173_v63 = vadd.f32 %v1172_v61, %v5713_v30  ;;  %v1684_v3 = vpop.f32.mrf.mxu1 }
 0x2de   : > { %v2083_v8 = vunpack.c.l.b16 %v1776_v31  ;;  %v1722_v13 = vadd.f32 %v1684_v3, %v1173_v63 }
 0x2e0   : > { %v5932_v17 = vpack.c.b16 %v2083_v8, %v2082_v44  ;;  %v1743_v11 = vadd.f32 %v5915_v7, %v1722_v13 }
 0x2e2   : > { %v1760_v46 = vmax.f32 %v1743_v11, 0.0  ;;  %4847 = vmatmul.msk.bf16.gmra.mxu0 %vm1034_vm1, %v5932_v17 }
 0x2e3   : > { %v1174_v41 = vpop.f32.mrf.mxu2 }
 0x2e4   : > { %v1777_v50 = vpack.c.bf16 %v1760_v46, %v1760_v46  ;;  %v1175_v57 = vadd.f32 %v1174_v41, %v5722_v4  ;;  %v1686_v24 = vpop.f32.mrf.mxu1 }
 0x2e6   : > { %v2084_v1 = vunpack.c.l.b16 %v1777_v50  ;;  %v1723_v43 = vadd.f32 %v1686_v24, %v1175_v57 }
 0x2e8   : > { %v1744_v30 = vadd.f32 %v5915_v7, %v1723_v43  ;;  %v5939_v27 = vpack.c.b16 %v2084_v1, %v2083_v8 }
 0x2ea   : > { %6793 = vst [vmem:[#allocation32_spill] sm:$0xff] %v5939_v27  ;;  %v1761_v32 = vmax.f32 %v1744_v30, 0.0 }
 0x2eb   : > { %v1177_v12 = vpop.f32.mrf.mxu2 }
 0x2ec   : > { %v1778_v23 = vpack.c.bf16 %v1761_v32, %v1761_v32  ;;  %v1178_v56 = vadd.f32 %v1177_v12, %v5733_v22  ;;  %v1689_v59 = vpop.f32.mrf.mxu1 }
 0x2ee   : > { %v2085_v20 = vunpack.c.l.b16 %v1778_v23  ;;  %v1724_v5 = vadd.f32 %v1689_v59, %v1178_v56 }
 0x2f0   : > { %v5942_v44 = vpack.c.b16 %v2085_v20, %v2084_v1  ;;  %v1745_v36 = vadd.f32 %v5915_v7, %v1724_v5 }
 0x2f2   : > { %v1762_v4 = vmax.f32 %v1745_v36, 0.0  ;;  %4848 = vmatmul.msk.bf16.gmra.mxu0 %vm1034_vm1, %v5942_v44 }
 0x2f3   : > { %v1179_v26 = vpop.f32.mrf.mxu2 }
 0x2f4   : > { %v1779_v35 = vpack.c.bf16 %v1762_v4, %v1762_v4  ;;  %v1180_v61 = vadd.f32 %v1179_v26, %v5742_v37  ;;  %v1691_v31 = vpop.f32.mrf.mxu1 }
 0x2f6   : > { %v2086_v63 = vunpack.c.l.b16 %v1779_v35  ;;  %v1725_v3 = vadd.f32 %v1691_v31, %v1180_v61 }
 0x2f8   : > { %v1746_v22 = vadd.f32 %v5915_v7, %v1725_v3  ;;  %v5949_v8 = vpack.c.b16 %v2086_v63, %v2085_v20 }
 0x2fa   : > { %6794 = vst [vmem:[#allocation33_spill] sm:$0xff] %v5949_v8  ;;  %v1763_v13 = vmax.f32 %v1746_v22, 0.0  ;;  %v6808_v8 = vld [vmem:[#allocation14_spill] sm:$0xff] }
 0x2fb   : > { %v1182_v11 = vpop.f32.mrf.mxu2 }
 0x2fc   : > { %v1780_v46 = vpack.c.bf16 %v1763_v13, %v1763_v13  ;;  %v1183_v41 = vadd.f32 %v1182_v11, %v5753_v47  ;;  %v1694_v50 = vpop.f32.mrf.mxu1 }
 0x2fe   : > { %v2087_v57 = vunpack.c.l.b16 %v1780_v46  ;;  %v1726_v24 = vadd.f32 %v1694_v50, %v1183_v41 }
 0x300   : > { %v5952_v1 = vpack.c.b16 %v2087_v57, %v2086_v63  ;;  %v1747_v43 = vadd.f32 %v5915_v7, %v1726_v24 }
 0x302   : > { %v1764_v37 = vmax.f32 %v1747_v43, 0.0  ;;  %4849 = vmatmul.msk.bf16.gmra.mxu0 %vm1034_vm1, %v5952_v1 }
 0x303   : > { %v1184_v30 = vpop.f32.mrf.mxu2 }
 0x304   : > { %v1781_v32 = vpack.c.bf16 %v1764_v37, %v1764_v37  ;;  %v1185_v12 = vadd.f32 %v1184_v30, %v5764_v60  ;;  %v1696_v23 = vpop.f32.mrf.mxu1 }
 0x306   : > { %v2088_v56 = vunpack.c.l.b16 %v1781_v32  ;;  %v1727_v59 = vadd.f32 %v1696_v23, %v1185_v12 }
 0x308   : > { %v1748_v47 = vadd.f32 %v5915_v7, %v1727_v59  ;;  %v5959_v20 = vpack.c.b16 %v2088_v56, %v2087_v57 }
 0x30a   : > { %6795 = vst [vmem:[#allocation34_spill] sm:$0xff] %v5959_v20  ;;  %v1765_v5 = vmax.f32 %v1748_v47, 0.0  ;;  %v6809_v20 = vld [vmem:[#allocation13_spill] sm:$0xff] }
 0x30b   : > { %v1187_v36 = vpop.f32.mrf.mxu2 }
 0x30c   : > { %v1782_v4 = vpack.c.bf16 %v1765_v5, %v1765_v5  ;;  %v1188_v26 = vadd.f32 %v1187_v36, %v5775_v62  ;;  %v1699_v35 = vpop.f32.mrf.mxu1 }
 0x30e   : > { %v2089_v61 = vunpack.c.l.b16 %v1782_v4  ;;  %v1728_v31 = vadd.f32 %v1699_v35, %v1188_v26 }
 0x310   : > { %v5962_v63 = vpack.c.b16 %v2089_v61, %v2088_v56  ;;  %v1749_v3 = vadd.f32 %v5915_v7, %v1728_v31 }
 0x312   : > { %v1766_v60 = vmax.f32 %v1749_v3, 0.0  ;;  %4850 = vmatmul.msk.bf16.gmra.mxu0 %vm1034_vm1, %v5962_v63 }
 0x313   : > { %v1189_v22 = vpop.f32.mrf.mxu2 }
 0x314   : > { %v1783_v13 = vpack.c.bf16 %v1766_v60, %v1766_v60  ;;  %v1190_v11 = vadd.f32 %v1189_v22, %v5790_v18  ;;  %v1701_v46 = vpop.f32.mrf.mxu1 }
 0x316   : > { %v2090_v41 = vunpack.c.l.b16 %v1783_v13  ;;  %v1729_v50 = vadd.f32 %v1701_v46, %v1190_v11 }
 0x318   : > { %v1750_v62 = vadd.f32 %v5915_v7, %v1729_v50  ;;  %v5969_v57 = vpack.c.b16 %v2090_v41, %v2089_v61 }
 0x31a   : > { %6796 = vst [vmem:[#allocation35_spill] sm:$0xff] %v5969_v57  ;;  %v1767_v24 = vmax.f32 %v1750_v62, 0.0  ;;  %v6810_v57 = vpack.c.b16 %v6808_v8, %v6809_v20 }
 0x31b   : > { %v1192_v43 = vpop.f32.mrf.mxu2 }
 0x31c   : > { %v1784_v37 = vpack.c.bf16 %v1767_v24, %v1767_v24  ;;  %v1193_v30 = vadd.f32 %v1192_v43, %v5811_v48  ;;  %v1704_v32 = vpop.f32.mrf.mxu1 }
 0x31e   : > { %v2091_v12 = vunpack.c.l.b16 %v1784_v37  ;;  %v1730_v23 = vadd.f32 %v1704_v32, %v1193_v30 }
 0x320   : > { %v5972_v56 = vpack.c.b16 %v2091_v12, %v2090_v41  ;;  %v1751_v59 = vadd.f32 %v5915_v7, %v1730_v23 }
 0x322   : > { %v1768_v18 = vmax.f32 %v1751_v59, 0.0  ;;  %4851 = vmatmul.msk.bf16.gmra.mxu0 %vm1034_vm1, %v5972_v56 }
 0x323   : > { %v1194_v47 = vpop.f32.mrf.mxu2 }
 0x324   : > { %v1785_v5 = vpack.c.bf16 %v1768_v18, %v1768_v18  ;;  %v1195_v36 = vadd.f32 %v1194_v47, %v5833_v40  ;;  %v1706_v4 = vpop.f32.mrf.mxu1 }
 0x326   : > { %v2092_v26 = vunpack.c.l.b16 %v1785_v5  ;;  %v1731_v35 = vadd.f32 %v1706_v4, %v1195_v36 }
 0x328   : > { %v1752_v48 = vadd.f32 %v5915_v7, %v1731_v35  ;;  %v5979_v61 = vpack.c.b16 %v2092_v26, %v2091_v12 }
 0x32a   : > { %6797 = vst [vmem:[#allocation36_spill] sm:$0xff] %v5979_v61  ;;  %v1769_v31 = vmax.f32 %v1752_v48, 0.0  ;;  %v6178_v61 = vsel %vm1034_vm1, %v6810_v57, 0 }
 0x32b   : > { %v1197_v3 = vpop.f32.mrf.mxu2 }
 0x32c   : > { %v1786_v60 = vpack.c.bf16 %v1769_v31, %v1769_v31  ;;  %v1198_v22 = vadd.f32 %v1197_v3, %v5852_v21  ;;  %v1709_v13 = vpop.f32.mrf.mxu1 }
 0x32e   : > { %v2093_v11 = vunpack.c.l.b16 %v1786_v60  ;;  %v1732_v46 = vadd.f32 %v1709_v13, %v1198_v22 }
 0x330   : > { %v2103_v41 = vpack.c.b16 %v2093_v11, %v2092_v26  ;;  %v1753_v50 = vadd.f32 %v5915_v7, %v1732_v46  ;;  %v1911_v46 = vpop.permute.xlu0 %1910 }
 0x331   : > { %vm1960_vm7 = vcmp.eq.s32.totalorder %v1911_v46, 1  ;;  %v5049_v46 = vld [vmem:[%s6703_s3 + $0x38] sm:$0xff] }
 0x332   : > { %v1770_v62 = vmax.f32 %v1753_v50, 0.0  ;;  %4852 = vmatmul.msk.bf16.gmra.mxu0 %vm1034_vm1, %v2103_v41  ;;  %vm1977_vm11 = vmand %vm1858_vm6, %vm1960_vm7  ;;  %vm1868_vm6 = vcmp.eq.s32.totalorder %v5716_v58, 4294967294  ;;  %2405 = vmatpush.bf16.msra.mxu1 %v5049_v46 }
 0x333   : > { %v1199_v40 = vpop.f32.mrf.mxu2 }
 0x334   : > { %v1787_v24 = vpack.c.bf16 %v1770_v62, %v1770_v62  ;;  %v1200_v43 = vadd.f32 %v1199_v40, %v5868_v0  ;;  %v1711_v37 = vpop.f32.mrf.mxu1 }
 0x336   : > { %v2094_v30 = vunpack.c.l.b16 %v1787_v24  ;;  %v1733_v32 = vadd.f32 %v1711_v37, %v1200_v43  ;;  %v1917_v43 = vpop.permute.xlu2 %1916 }
 0x337   : > { %vm1962_vm4 = vcmp.eq.s32.totalorder %v1917_v43, 1 }
 0x338   : > { %v1754_v12 = vadd.f32 %v5915_v7, %v1733_v32  ;;  %v5986_v23 = vpack.c.b16 %v2094_v30, %v2093_v11  ;;  %v1914_v11 = vpop.permute.xlu1 %1913  ;;  %v1920_v40 = vpop.permute.xlu0 %1919  ;;  %vm1981_vm3 = vmand %vm1862_vm14, %vm1962_vm4  ;;  %vm1870_vm14 = vcmp.eq.s32.totalorder %v5731_v15, 4294967294 }
 0x339   : > { %vm1961_vm5 = vcmp.eq.s32.totalorder %v1914_v11, 1  ;;  %vm1963_vm13 = vcmp.eq.s32.totalorder %v1920_v40, 1 }
 0x33a   : > { %6798 = vst [vmem:[#allocation37_spill] sm:$0xff] %v5986_v23  ;;  %v1771_v21 = vmax.f32 %v1754_v12, 0.0  ;;  %vm1979_vm9 = vmand %vm1860_vm10, %vm1961_vm5  ;;  %vm1866_vm10 = vcmp.eq.s32.totalorder %v5711_v52, 4294967294  ;;  %v6814_v23 = vld [vmem:[#allocation10_spill] sm:$0xff] }
 0x33b   : > { %v1202_v59 = vpop.f32.mrf.mxu2  ;;  %vm4811_vm8 = vmpackc.low %vm1979_vm9, %vm1977_vm11 }
 0x33c   : > { %v1788_v18 = vpack.c.bf16 %v1771_v21, %v1771_v21  ;;  %v1203_v47 = vadd.f32 %v1202_v59, %v5879_v34  ;;  %v1714_v5 = vpop.f32.mrf.mxu1  ;;  %vm1983_vm0 = vmand %vm1864_vm12, %vm1963_vm13  ;;  %vm1872_vm12 = vcmp.eq.s32.totalorder %v5736_v25, 4294967294 }
 0x33e   : > { %v2095_v36 = vunpack.c.l.b16 %v1788_v18  ;;  %v1734_v4 = vadd.f32 %v1714_v5, %v1203_v47 }
 0x340   : > { %v2104_v26 = vpack.c.b16 %v2095_v36, %v2094_v30  ;;  %v1755_v35 = vadd.f32 %v5915_v7, %v1734_v4 }
 0x342   : > { %v1772_v48 = vmax.f32 %v1755_v35, 0.0  ;;  %2144 = vmatpush.bf16.msra.mxu2 %v2104_v26  ;;  %4853 = vmatmul.msk.bf16.gmra.mxu0 %vm1034_vm1, %v2104_v26 }
 0x343   : > { %v1204_v0 = vpop.f32.mrf.mxu2 }
 0x344   : > { %v1789_v31 = vpack.c.bf16 %v1772_v48, %v1772_v48  ;;  %v1716_v3 = vpop.f32.mrf.mxu1 }
 0x346   : > { %v2096_v60 = vunpack.c.l.b16 %v1789_v31  ;;  %2145 = vmatpush.bf16.msra.mxu2 %v2103_v41 }
 0x348   : > { %v2105_v22 = vpack.c.b16 %v2096_v60, %v2096_v60  ;;  %v5991_v13 = vpack.c.b16 %v2096_v60, %v2095_v36 }
 0x34a   : > { %6799 = vst [vmem:[#allocation38_spill] sm:$0xff] %v5991_v13  ;;  %2146 = vmatpush.bf16.msra.mxu2 %v5972_v56  ;;  %v2142_v34 = vsel %vm6800_vm2, %v2105_v22, 0  ;;  %vm4813_vm2 = vmpackc.low %vm1983_vm0, %vm1981_vm3  ;;  %v6815_v13 = vld [vmem:[#allocation9_spill] sm:$0xff] }
 0x34b   : > { %2204 = vmatpush.bf16.msra.mxu3 %v2142_v34 }
 0x34e   : > { %2147 = vmatpush.bf16.msra.mxu2 %v5962_v63  ;;  %2205 = vmatmul.bf16.vlgmr.msra.gmra.mxu3 %v6790_v9 }
 0x34f   : > { %2812 = vmatpush.bf16.msrb.mxu3 %v2142_v34  ;;  %v5997_v7 = vpop.f32.mrf.mxu0  ;;  %v6801_v34 = vmov 0.0  }
 0x352   : > { %2148 = vmatpush.bf16.msra.mxu2 %v5952_v1  ;;  %4854 = vmatmul.msk.bf16.gmra.mxu0 %vm1034_vm1, %v2105_v22 }
 0x356   : > { %2149 = vmatpush.bf16.msra.mxu2 %v5942_v44 }
 0x357   : > { %v6002_v50 = vpop.f32.mrf.mxu0 }
 0x35a   : > { %2150 = vmatpush.bf16.msra.mxu2 %v5932_v17 }
 0x35e   : > { %2151 = vmatpush.bf16.msra.mxu2 %v5922_v53  ;;  %2210 = vmatmul.bf16.gmra.mxu3 %v6790_v9 }
 0x35f   : > { %v6009_v62 = vpop.f32.mrf.mxu0 }
 0x361   : > { %4812 = vmatmul.msk.bf16.vlgmr.msra.gmra.mxu2 %vm4811_vm8, %v6788_v28 }
 0x362   : > { %2752 = vmatpush.bf16.msrb.mxu2 %v2104_v26 }
 0x366   : > { %2753 = vmatpush.bf16.msrb.mxu2 %v2103_v41 }
 0x367   : > { %v6012_v24 = vpop.f32.mrf.mxu0 }
 0x36a   : > { %2754 = vmatpush.bf16.msrb.mxu2 %v5972_v56  ;;  %v1923_v56 = vpop.permute.xlu1 %1922 }
 0x36b   : > { %vm1964_vm5 = vcmp.eq.s32.totalorder %v1923_v56, 1  ;;  %v5048_v56 = vld [vmem:[%s6703_s3 + $0x30] sm:$0xff] }
 0x36c   : > { %vm1985_vm9 = vmand %vm1866_vm10, %vm1964_vm5  ;;  %vm1876_vm10 = vcmp.eq.s32.totalorder %v5751_v2, 4294967294  ;;  %2406 = vmatpush.bf16.msra.mxu1 %v5048_v56 }
 0x36e   : > { %2755 = vmatpush.bf16.msrb.mxu2 %v5962_v63  ;;  %2215 = vmatmul.bf16.gmra.mxu3 %v6790_v9  ;;  %v1926_v63 = vpop.permute.xlu2 %1925 }
 0x36f   : > { %v6019_v37 = vpop.f32.mrf.mxu0  ;;  %vm1965_vm7 = vcmp.eq.s32.totalorder %v1926_v63, 1 }
 0x370   : > { %vm1987_vm11 = vmand %vm1868_vm6, %vm1965_vm7  ;;  %vm1874_vm6 = vcmp.eq.s32.totalorder %v5756_v49, 4294967294 }
 0x371   : > { %4814 = vmatmul.msk.bf16.gmra.mxu2 %vm4813_vm2, %v6788_v28  ;;  %vm4815_vm8 = vmpackc.low %vm1987_vm11, %vm1985_vm9 }
 0x372   : > { %2756 = vmatpush.bf16.msrb.mxu2 %v5952_v1 }
 0x376   : > { %2757 = vmatpush.bf16.msrb.mxu2 %v5942_v44  ;;  %v1932_v44 = vpop.permute.xlu1 %1931  ;;  %v1935_v59 = vpop.permute.xlu2 %1934 }
 0x377   : > { %v6024_v41 = vpop.f32.mrf.mxu0  ;;  %vm1967_vm13 = vcmp.eq.s32.totalorder %v1932_v44, 1  ;;  %vm1968_vm7 = vcmp.eq.s32.totalorder %v1935_v59, 1 }
 0x378   : > { %vm1991_vm0 = vmand %vm1872_vm12, %vm1967_vm13  ;;  %vm1878_vm12 = vcmp.eq.s32.totalorder %v5773_v19, 4294967294 }
 0x379   : > { %vm1993_vm11 = vmand %vm1874_vm6, %vm1968_vm7  ;;  %vm1882_vm6 = vcmp.eq.s32.totalorder %v5809_v14, 4294967294 }
 0x37a   : > { %2758 = vmatpush.bf16.msrb.mxu2 %v5932_v17  ;;  %v1929_v17 = vpop.permute.xlu0 %1928 }
 0x37b   : > { %vm1966_vm4 = vcmp.eq.s32.totalorder %v1929_v17, 1 }
 0x37c   : > { %vm1989_vm3 = vmand %vm1870_vm14, %vm1966_vm4  ;;  %vm1880_vm14 = vcmp.eq.s32.totalorder %v5780_v33, 4294967294 }
 0x37d   : > { %vm4817_vm2 = vmpackc.low %vm1991_vm0, %vm1989_vm3 }
 0x37e   : > { %2759 = vmatpush.bf16.msrb.mxu2 %v5922_v53  ;;  %2220 = vmatmul.bf16.gmra.mxu3 %v6790_v9  ;;  %v1941_v47 = vpop.permute.xlu1 %1940  ;;  %v1944_v36 = vpop.permute.xlu2 %1943 }
 0x37f   : > { %v6031_v1 = vpop.f32.mrf.mxu0  ;;  %vm1970_vm13 = vcmp.eq.s32.totalorder %v1941_v47, 1  ;;  %vm1971_vm4 = vcmp.eq.s32.totalorder %v1944_v36, 1 }
 0x380   : > { %vm1997_vm0 = vmand %vm1878_vm12, %vm1970_vm13  ;;  %vm1891_vm12 = vcmp.eq.s32.totalorder %v5837_v54, 4294967294 }
 0x381   : > { %4816 = vmatmul.msk.bf16.gmra.mxu2 %vm4815_vm8, %v6788_v28  ;;  %vm1999_vm3 = vmand %vm1880_vm14, %vm1971_vm4  ;;  %vm1888_vm4 = vcmp.eq.s32.totalorder %v5850_v51, 4294967294 }
 0x382   : > { %v1938_v12 = vpop.permute.xlu0 %1937 }
 0x383   : > { %vm1969_vm5 = vcmp.eq.s32.totalorder %v1938_v12, 1 }
 0x384   : > { %vm1995_vm9 = vmand %vm1876_vm10, %vm1969_vm5  ;;  %vm1884_vm10 = vcmp.eq.s32.totalorder %v5816_v45, 4294967294 }
 0x385   : > { %vm4819_vm8 = vmpackc.low %vm1995_vm9, %vm1993_vm11 }
 0x386   : > { %v1950_v26 = vpop.permute.xlu1 %1949  ;;  %v1953_v22 = vpop.permute.xlu2 %1952 }
 0x387   : > { %v6034_v30 = vpop.f32.mrf.mxu0  ;;  %vm1973_vm5 = vcmp.eq.s32.totalorder %v1950_v26, 1 }
 0x388   : > { %vm2003_vm9 = vmand %vm1884_vm10, %vm1973_vm5 }
 0x38a   : > { %v1947_v35 = vpop.permute.xlu0 %1946 }
 0x38b   : > { %vm1972_vm7 = vcmp.eq.s32.totalorder %v1947_v35, 1 }
 0x38c   : > { %vm2001_vm11 = vmand %vm1882_vm6, %vm1972_vm7  ;;  %vm1890_vm7 = vcmp.eq.s32.totalorder %v5882_v6, 4294967294  ;;  %v6816_v6 = vpack.c.b16 %v6814_v23, %v6815_v13 }
 0x38e   : > { %2225 = vmatmul.bf16.gmra.mxu3 %v6790_v9  ;;  %v1959_v31 = vpop.permute.xlu1 %1958  ;;  %v2573_v36 = vpop.permute.xlu2 %2572 }
 0x38f   : > { %v6039_v32 = vpop.f32.mrf.mxu0  ;;  %vm1976_vm13 = vcmp.eq.s32.totalorder %v1959_v31, 1 }
 0x390   : > { %vm2010_vm14 = vmand %vm1891_vm12, %vm1976_vm13 }
 0x391   : > { %4818 = vmatmul.msk.bf16.gmra.mxu2 %vm4817_vm2, %v6788_v28  ;;  %vm4821_vm2 = vmpackc.low %vm1999_vm3, %vm1997_vm0  ;;  %v2044_v11 = vsel %vm2010_vm14, 1.0, %v6801_v34  ;;  %vm1886_vm3 = vcmp.eq.s32.totalorder %v5856_v10, 4294967294  ;;  %vm2520_vm14 = vcmp.eq.s32.totalorder %v5659_v16, 2 }
 0x392   : > { %v1956_v3 = vpop.permute.xlu0 %1955  ;;  %v2062_v40 = vpack.c.bf16 %v2044_v11, %v2044_v11 }
 0x393   : > { %vm1975_vm0 = vcmp.eq.s32.totalorder %v1956_v3, 1 }
 0x394   : > { %vm2007_vm10 = vmand %vm1888_vm4, %vm1975_vm0  ;;  %vm2622_vm4 = vcmp.eq.s32.totalorder %v2573_v36, 1 }
 0x396   : > { %v2582_v56 = vpop.permute.xlu2 %2581 }
 0x397   : > { %v6042_v21 = vpop.f32.mrf.mxu0 }
 0x39a   : > { %v2576_v47 = vpop.permute.xlu0 %2575 }
 0x39b   : > { %vm2623_vm12 = vcmp.eq.s32.totalorder %v2576_v47, 1 }
 0x39e   : > { %2230 = vmatmul.bf16.gmra.mxu3 %v6790_v9 }
 0x39f   : > { %v6047_v18 = vpop.f32.mrf.mxu0 }
 0x3a1   : > { %4820 = vmatmul.msk.bf16.gmra.mxu2 %vm4819_vm8, %v6788_v28  ;;  %vm4823_vm8 = vmpackc.low %vm2003_vm9, %vm2001_vm11 }
 0x3a2   : > { %vm2009_vm9 = vmand %vm1890_vm7, %vm1976_vm13 }
 0x3a3   : > { %vm4827_vm11 = vmpackc.low %vm2009_vm9, %vm2009_vm9 }
 0x3a4   : > { %vm2639_vm13 = vmand %vm2520_vm14, %vm2622_vm4  ;;  %vm2528_vm14 = vcmp.eq.s32.totalorder %v5711_v52, 2 }
 0x3a7   : > { %v6050_v5 = vpop.f32.mrf.mxu0 }
 0x3ae   : > { %2235 = vmatmul.bf16.gmra.mxu3 %v6790_v9 }
 0x3af   : > { %v6055_v4 = vpop.f32.mrf.mxu0 }
 0x3b1   : > { %4822 = vmatmul.msk.bf16.gmra.mxu2 %vm4821_vm2, %v6788_v28  ;;  %vm1974_vm2 = vcmp.eq.s32.totalorder %v1953_v22, 1 }
 0x3b2   : > { %vm2005_vm5 = vmand %vm1886_vm3, %vm1974_vm2  ;;  %vm2524_vm2 = vcmp.eq.s32.totalorder %v5696_v55, 2 }
 0x3b3   : > { %vm4825_vm6 = vmpackc.low %vm2007_vm10, %vm2005_vm5  ;;  %vm2526_vm5 = vcmp.eq.s32.totalorder %v5691_v29, 2 }
 0x3b7   : > { %v6058_v48 = vpop.f32.mrf.mxu0 }
 0x3be   : > { %2240 = vmatmul.bf16.gmra.mxu3 %v6790_v9 }
 0x3bf   : > { %v6063_v0 = vpop.f32.mrf.mxu0 }
 0x3c1   : > { %4824 = vmatmul.msk.bf16.gmra.mxu2 %vm4823_vm8, %v6788_v28  ;;  %vm2522_vm8 = vcmp.eq.s32.totalorder %v5666_v42, 2 }
 0x3c2   : > { %vm2641_vm0 = vmand %vm2522_vm8, %vm2623_vm12  ;;  %vm2530_vm8 = vcmp.eq.s32.totalorder %v5716_v58, 2 }
 0x3c3   : > { %vm4872_vm3 = vmpackc.low %vm2641_vm0, %vm2639_vm13 }
 0x3c7   : > { %v6068_v60 = vpop.f32.mrf.mxu0 }
 0x3ce   : > { %4829 = vmatmul.msk.bf16.gmra.mxu3 %vm866_vm15, %v2062_v40  ;;  %v2579_v40 = vpop.permute.xlu1 %2578 }
 0x3cf   : > { %v6077_v43 = vpop.f32.mrf.mxu0  ;;  %vm2624_vm10 = vcmp.eq.s32.totalorder %v2579_v40, 1 }
 0x3d0   : > { %vm2643_vm7 = vmand %vm2524_vm2, %vm2624_vm10  ;;  %vm2534_vm2 = vcmp.eq.s32.totalorder %v5736_v25, 2 }
 0x3d1   : > { %4826 = vmatmul.msk.bf16.gmra.mxu2 %vm4825_vm6, %v6788_v28  ;;  %v2206_v63 = vpop.f32.mrf.mxu3  ;;  %vm2625_vm6 = vcmp.eq.s32.totalorder %v2582_v56, 1 }
 0x3d2   : > { %vm2645_vm9 = vmand %vm2526_vm5, %vm2625_vm6  ;;  %vm2532_vm5 = vcmp.eq.s32.totalorder %v5731_v15, 2 }
 0x3d7   : > { %v2358_v44 = vpop.f32.mrf.mxu0 }
 0x3d9   : > { %v2208_v17 = vpop.f32.mrf.mxu3 }
 0x3de   : > { %2813 = vmatmul.bf16.vlgmr.msrb.gmra.mxu3 %v6790_v9 }
 0x3e1   : > { %4828 = vmatmul.msk.bf16.gmra.mxu2 %vm4827_vm11, %v6788_v28  ;;  %v2211_v12 = vpop.f32.mrf.mxu3  ;;  %vm4874_vm11 = vmpackc.low %vm2645_vm9, %vm2643_vm7 }
 0x3e4   : > { %v2153_v59 = vpop.f32.mrf.mxu2 }
 0x3e5   : > { %v2207_v31 = vadd.f32 %v2206_v63, %v2153_v59 }
 0x3e9   : > { %v2213_v26 = vpop.f32.mrf.mxu3 }
 0x3ec   : > { %v2155_v35 = vpop.f32.mrf.mxu2 }
 0x3ed   : > { %v2209_v3 = vadd.f32 %v2208_v17, %v2155_v35 }
 0x3ee   : > { %2818 = vmatmul.bf16.gmra.mxu3 %v6790_v9 }
 0x3ef   : > { %v2250_v22 = vpack.c.bf16 %v2209_v3, %v2207_v31  ;;  %v2588_v31 = vpop.permute.xlu1 %2587  ;;  %v2585_v3 = vpop.permute.xlu0 %2584 }
 0x3f0   : > { %vm2627_vm12 = vcmp.eq.s32.totalorder %v2588_v31, 1  ;;  %vm2626_vm4 = vcmp.eq.s32.totalorder %v2585_v3, 1 }
 0x3f1   : > { %v2216_v11 = vpop.f32.mrf.mxu3  ;;  %4863 = vmatmul.msk.bf16.vlgmr.msra.gmra.mxu1 %vm1034_vm1, %v2250_v22  ;;  %4873 = vmatmul.msk.bf16.vlgmr.msrb.gmra.mxu2 %vm4872_vm3, %v6788_v28  ;;  %vm2649_vm0 = vmand %vm2530_vm8, %vm2627_vm12  ;;  %vm2536_vm8 = vcmp.eq.s32.totalorder %v5756_v49, 2 }
 0x3f2   : > { %vm2647_vm13 = vmand %vm2528_vm14, %vm2626_vm4  ;;  %vm2538_vm14 = vcmp.eq.s32.totalorder %v5751_v2, 2 }
 0x3f3   : > { %vm4876_vm3 = vmpackc.low %vm2649_vm0, %vm2647_vm13 }
 0x3f4   : > { %v2158_v46 = vpop.f32.mrf.mxu2 }
 0x3f5   : > { %v2212_v17 = vadd.f32 %v2211_v12, %v2158_v46 }
 0x3f9   : > { %v2218_v44 = vpop.f32.mrf.mxu3 }
 0x3fc   : > { %v2160_v63 = vpop.f32.mrf.mxu2 }
 0x3fd   : > { %v2214_v59 = vadd.f32 %v2213_v26, %v2160_v63 }
 0x3fe   : > { %2823 = vmatmul.bf16.gmra.mxu3 %v6790_v9 }
 0x3ff   : > { %v2251_v47 = vpack.c.bf16 %v2214_v59, %v2212_v17  ;;  %v2594_v17 = vpop.permute.xlu0 %2593  ;;  %v2591_v59 = vpop.permute.xlu2 %2590 }
 0x400   : > { %vm2629_vm10 = vcmp.eq.s32.totalorder %v2594_v17, 1  ;;  %vm2628_vm6 = vcmp.eq.s32.totalorder %v2591_v59, 1 }
 0x401   : > { %v2221_v36 = vpop.f32.mrf.mxu3  ;;  %4864 = vmatmul.msk.bf16.gmra.mxu1 %vm1034_vm1, %v2251_v47  ;;  %4875 = vmatmul.msk.bf16.gmra.mxu2 %vm4874_vm11, %v6788_v28  ;;  %vm2653_vm7 = vmand %vm2534_vm2, %vm2629_vm10  ;;  %vm2542_vm2 = vcmp.eq.s32.totalorder %v5780_v33, 2 }
 0x402   : > { %vm2651_vm9 = vmand %vm2532_vm5, %vm2628_vm6  ;;  %vm2540_vm5 = vcmp.eq.s32.totalorder %v5773_v19, 2 }
 0x403   : > { %vm4878_vm11 = vmpackc.low %vm2653_vm7, %vm2651_vm9 }
 0x404   : > { %v2163_v35 = vpop.f32.mrf.mxu2 }
 0x405   : > { %v2217_v26 = vadd.f32 %v2216_v11, %v2163_v35 }
 0x409   : > { %v2223_v22 = vpop.f32.mrf.mxu3 }
 0x40c   : > { %v2165_v12 = vpop.f32.mrf.mxu2 }
 0x40d   : > { %v2219_v46 = vadd.f32 %v2218_v44, %v2165_v12 }
 0x40e   : > { %2828 = vmatmul.bf16.gmra.mxu3 %v6790_v9 }
 0x40f   : > { %v2252_v40 = vpack.c.bf16 %v2219_v46, %v2217_v26  ;;  %v2597_v26 = vpop.permute.xlu1 %2596  ;;  %v2600_v46 = vpop.permute.xlu2 %2599 }
 0x410   : > { %vm2630_vm12 = vcmp.eq.s32.totalorder %v2597_v26, 1  ;;  %vm2631_vm4 = vcmp.eq.s32.totalorder %v2600_v46, 1 }
 0x411   : > { %v2226_v56 = vpop.f32.mrf.mxu3  ;;  %4865 = vmatmul.msk.bf16.gmra.mxu1 %vm1034_vm1, %v2252_v40  ;;  %4877 = vmatmul.msk.bf16.gmra.mxu2 %vm4876_vm3, %v6788_v28  ;;  %vm2655_vm0 = vmand %vm2536_vm8, %vm2630_vm12  ;;  %vm2551_vm8 = vcmp.eq.s32.totalorder %v5796_v39, 2 }
 0x412   : > { %vm2657_vm13 = vmand %vm2538_vm14, %vm2631_vm4  ;;  %vm2546_vm4 = vcmp.eq.s32.totalorder %v5816_v45, 2 }
 0x413   : > { %vm4880_vm3 = vmpackc.low %vm2657_vm13, %vm2655_vm0  ;;  %vm2544_vm13 = vcmp.eq.s32.totalorder %v5809_v14, 2 }
 0x414   : > { %v2168_v63 = vpop.f32.mrf.mxu2 }
 0x415   : > { %v2222_v44 = vadd.f32 %v2221_v36, %v2168_v63 }
 0x419   : > { %v2228_v47 = vpop.f32.mrf.mxu3 }
 0x41c   : > { %v2170_v11 = vpop.f32.mrf.mxu2 }
 0x41d   : > { %v2224_v35 = vadd.f32 %v2223_v22, %v2170_v11 }
 0x41e   : > { %2833 = vmatmul.bf16.gmra.mxu3 %v6790_v9 }
 0x41f   : > { %v2253_v31 = vpack.c.bf16 %v2224_v35, %v2222_v44  ;;  %v2606_v44 = vpop.permute.xlu1 %2605  ;;  %v2603_v35 = vpop.permute.xlu0 %2602 }
 0x420   : > { %vm2633_vm10 = vcmp.eq.s32.totalorder %v2606_v44, 1  ;;  %vm2632_vm6 = vcmp.eq.s32.totalorder %v2603_v35, 1 }
 0x421   : > { %v2231_v3 = vpop.f32.mrf.mxu3  ;;  %4866 = vmatmul.msk.bf16.gmra.mxu1 %vm1034_vm1, %v2253_v31  ;;  %4879 = vmatmul.msk.bf16.gmra.mxu2 %vm4878_vm11, %v6788_v28  ;;  %vm2661_vm7 = vmand %vm2542_vm2, %vm2633_vm10 }
 0x422   : > { %vm2659_vm9 = vmand %vm2540_vm5, %vm2632_vm6  ;;  %vm2553_vm6 = vcmp.eq.s32.totalorder %v5837_v54, 2 }
 0x423   : > { %vm4882_vm11 = vmpackc.low %vm2661_vm7, %vm2659_vm9 }
 0x424   : > { %v2173_v12 = vpop.f32.mrf.mxu2 }
 0x425   : > { %v2227_v22 = vadd.f32 %v2226_v56, %v2173_v12 }
 0x427   : > { %v2618_v46 = vpop.permute.xlu1 %2617 }
 0x428   : > { %vm2637_vm12 = vcmp.eq.s32.totalorder %v2618_v46, 1  ;;  %v5054_v46 = vld [vmem:[%s6703_s3 + $0x60] sm:$0xff] }
 0x429   : > { %v2233_v40 = vpop.f32.mrf.mxu3  ;;  %vm2670_vm14 = vmand %vm2551_vm8, %vm2637_vm12  ;;  %vm2548_vm8 = vcmp.eq.s32.totalorder %v5856_v10, 2  ;;  %v6197_v10 = vsel %vm1034_vm1, %v6816_v6, 0 }
 0x42c   : > { %v2175_v36 = vpop.f32.mrf.mxu2 }
 0x42d   : > { %v2229_v63 = vadd.f32 %v2228_v47, %v2175_v36 }
 0x42e   : > { %2838 = vmatmul.bf16.gmra.mxu3 %v6790_v9 }
 0x42f   : > { %v2254_v17 = vpack.c.bf16 %v2229_v63, %v2227_v22  ;;  %v2612_v63 = vpop.permute.xlu0 %2611 }
 0x430   : > { %vm2635_vm0 = vcmp.eq.s32.totalorder %v2612_v63, 1  ;;  %v5053_v63 = vld [vmem:[%s6703_s3 + $0x58] sm:$0xff] }
 0x431   : > { %v2236_v59 = vpop.f32.mrf.mxu3  ;;  %4867 = vmatmul.msk.bf16.gmra.mxu1 %vm1034_vm1, %v2254_v17  ;;  %4881 = vmatmul.msk.bf16.gmra.mxu2 %vm4880_vm3, %v6788_v28  ;;  %v2609_v17 = vpop.permute.xlu2 %2608  ;;  %vm2665_vm2 = vmand %vm2546_vm4, %vm2635_vm0 }
 0x432   : > { %vm2634_vm3 = vcmp.eq.s32.totalorder %v2609_v17, 1  ;;  %2917 = vmatpush.bf16.msrb.mxu0 %v5053_v63 }
 0x433   : > { %vm2663_vm10 = vmand %vm2544_vm13, %vm2634_vm3  ;;  %vm3105_vm3 = vcmp.eq.s32.totalorder %v5659_v16, 4294967293 }
 0x434   : > { %v2178_v11 = vpop.f32.mrf.mxu2  ;;  %vm4884_vm5 = vmpackc.low %vm2665_vm2, %vm2663_vm10  ;;  %vm3107_vm10 = vcmp.eq.s32.totalorder %v5666_v42, 4294967293 }
 0x435   : > { %v2232_v47 = vadd.f32 %v2231_v3, %v2178_v11  ;;  %v2704_v3 = vsel %vm2670_vm14, 1.0, %v6801_v34 }
 0x436   : > { %v2722_v11 = vpack.c.bf16 %v2704_v3, %v6801_v34  ;;  %v5052_v3 = vld [vmem:[%s6703_s3 + $0x50] sm:$0xff] }
 0x437   : > { %2918 = vmatpush.bf16.msrb.mxu0 %v5052_v3 }
 0x439   : > { %v2238_v31 = vpop.f32.mrf.mxu3 }
 0x43c   : > { %v2180_v56 = vpop.f32.mrf.mxu2 }
 0x43d   : > { %v2234_v12 = vadd.f32 %v2233_v40, %v2180_v56 }
 0x43e   : > { %2843 = vmatmul.bf16.gmra.mxu3 %v6790_v9 }
 0x43f   : > { %v2255_v26 = vpack.c.bf16 %v2234_v12, %v2232_v47  ;;  %v2621_v12 = vpop.permute.xlu0 %2620 }
 0x440   : > { %vm2638_vm7 = vcmp.eq.s32.totalorder %v2621_v12, 1  ;;  %v5055_v12 = vld [vmem:[%s6703_s3 + $0x68] sm:$0xff] }
 0x441   : > { %v2241_v36 = vpop.f32.mrf.mxu3  ;;  %4868 = vmatmul.msk.bf16.gmra.mxu1 %vm1034_vm1, %v2255_v26  ;;  %4883 = vmatmul.msk.bf16.gmra.mxu2 %vm4882_vm11, %v6788_v28  ;;  %vm2672_vm9 = vmand %vm2553_vm6, %vm2638_vm7  ;;  %vm2550_vm11 = vcmp.eq.s32.totalorder %v5850_v51, 2  ;;  %v6822_v51 = vld [vmem:[#allocation6_spill] sm:$0xff] }
 0x442   : > { %vm2669_vm4 = vmand %vm2550_vm11, %vm2637_vm12  ;;  %3652 = vmatpush.bf16.msra.mxu0 %v5055_v12  ;;  %vm6826_vm12 = vcmask 1041408   ;;  %vm3111_vm11 = vcmp.eq.s32.totalorder %v5691_v29, 4294967293 }
 0x444   : > { %v2183_v22 = vpop.f32.mrf.mxu2 }
 0x445   : > { %v2237_v35 = vadd.f32 %v2236_v59, %v2183_v22  ;;  %v2706_v22 = vsel %vm2672_vm9, 1.0, %v6801_v34  ;;  %v6823_v34 = vld [vmem:[#allocation5_spill] sm:$0xff] }
 0x446   : > { %3653 = vmatpush.bf16.msra.mxu0 %v5054_v46  ;;  %v6824_v54 = vpack.c.b16 %v6822_v51, %v6823_v34 }
 0x448   : > { %v6216_v45 = vsel %vm1034_vm1, %v6824_v54, 0 }
 0x449   : > { %v2243_v40 = vpop.f32.mrf.mxu3 }
 0x44c   : > { %v2185_v44 = vpop.f32.mrf.mxu2 }
 0x44d   : > { %v2239_v56 = vadd.f32 %v2238_v31, %v2185_v44  ;;  %v2615_v31 = vpop.permute.xlu2 %2614 }
 0x44e   : > { %4888 = vmatmul.msk.bf16.gmra.mxu3 %vm866_vm15, %v2722_v11  ;;  %vm2636_vm14 = vcmp.eq.s32.totalorder %v2615_v31, 1  ;;  %v2724_v11 = vpack.c.bf16 %v2706_v22, %v2706_v22 }
 0x44f   : > { %v2256_v47 = vpack.c.bf16 %v2239_v56, %v2237_v35  ;;  %vm2667_vm0 = vmand %vm2548_vm8, %vm2636_vm14  ;;  %vm3109_vm14 = vcmp.eq.s32.totalorder %v5696_v55, 4294967293 }
 0x450   : > { %vm4886_vm13 = vmpackc.low %vm2669_vm4, %vm2667_vm0 }
 0x451   : > { %v2246_v26 = vpop.f32.mrf.mxu3  ;;  %4869 = vmatmul.msk.bf16.gmra.mxu1 %vm1034_vm1, %v2256_v47  ;;  %4885 = vmatmul.msk.bf16.gmra.mxu2 %vm4884_vm5, %v6788_v28 }
 0x454   : > { %v2188_v59 = vpop.f32.mrf.mxu2 }
 0x455   : > { %v2242_v35 = vadd.f32 %v2241_v36, %v2188_v59 }
 0x459   : > { %v2248_v17 = vpop.f32.mrf.mxu3 }
 0x45c   : > { %v2190_v44 = vpop.f32.mrf.mxu2 }
 0x45d   : > { %v2244_v56 = vadd.f32 %v2243_v40, %v2190_v44 }
 0x45e   : > { %4889 = vmatmul.msk.bf16.gmra.mxu3 %vm866_vm15, %v2724_v11 }
 0x45f   : > { %v2257_v47 = vpack.c.bf16 %v2244_v56, %v2242_v35 }
 0x461   : > { %4870 = vmatmul.msk.bf16.gmra.mxu1 %vm1034_vm1, %v2257_v47  ;;  %4887 = vmatmul.msk.bf16.gmra.mxu2 %vm4886_vm13, %v6788_v28  ;;  %v2814_v63 = vpop.f32.mrf.mxu3 }
 0x464   : > { %v2193_v36 = vpop.f32.mrf.mxu2 }
 0x465   : > { %v2247_v59 = vadd.f32 %v2246_v26, %v2193_v36  ;;  %v6802_v36 = vld [vmem:[#allocation18_spill] sm:$0xff] }
 0x466   : > { %6817 = vst [vmem:[#allocation18_spill] sm:$0xff] %v6197_v10 }
 0x467   : > { %v2258_v17 = vpack.c.bf16 %v2247_v59, %v2247_v59  ;;  %v6803_v59 = vld [vmem:[#allocation17_spill] sm:$0xff] }
 0x469   : > { %v2816_v40 = vpop.f32.mrf.mxu3 }
 0x46c   : > { %v2195_v31 = vpop.f32.mrf.mxu2 }
 0x46d   : > { %v6804_v31 = vpack.c.b16 %v6802_v36, %v6803_v59 }
 0x46e   : > { %v6146_v22 = vpop.f32.mrf.mxu1 }
 0x471   : > { %4871 = vmatmul.msk.bf16.gmra.mxu1 %vm1034_vm1, %v2258_v17  ;;  %2800 = vmatmul.bf16.gmra.mxu2 %v6790_v9  ;;  %v2819_v3 = vpop.f32.mrf.mxu3  ;;  %v6159_v17 = vsel %vm1034_vm1, %v6804_v31, 0 }
 0x474   : > { %v2761_v11 = vpop.f32.mrf.mxu2 }
 0x475   : > { %v2815_v47 = vadd.f32 %v2814_v63, %v2761_v11  ;;  %v6805_v63 = vld [vmem:[#allocation16_spill] sm:$0xff] }
 0x476   : > { %v6150_v44 = vpop.f32.mrf.mxu1  ;;  %6825 = vst [vmem:[#allocation16_spill] sm:$0xff] %v6216_v45 }
 0x479   : > { %v2821_v35 = vpop.f32.mrf.mxu3 }
 0x47c   : > { %v2763_v56 = vpop.f32.mrf.mxu2 }
 0x47d   : > { %v2817_v12 = vadd.f32 %v2816_v40, %v2763_v56  ;;  %v6806_v40 = vld [vmem:[#allocation15_spill] sm:$0xff] }
 0x47e   : > { %v6152_v38 = vpop.f32.mrf.mxu1  ;;  %v6807_v11 = vpack.c.b16 %v6805_v63, %v6806_v40 }
 0x47f   : > { %v2858_v46 = vpack.c.bf16 %v2817_v12, %v2815_v47 }
 0x480   : > { %v6168_v56 = vsel %vm1034_vm1, %v6807_v11, 0 }
 0x481   : > { %v2824_v26 = vpop.f32.mrf.mxu3  ;;  %4902 = vmatmul.msk.bf16.vlgmr.msrb.gmra.mxu0 %vm1034_vm1, %v2858_v46 }
 0x482   : > { %4313 = vmatpush.bf16.xpose.msrb.mxu0 %v6159_v17 }
 0x484   : > { %v2766_v53 = vpop.f32.mrf.mxu2 }
 0x485   : > { %v2820_v12 = vadd.f32 %v2819_v3, %v2766_v53  ;;  %v6811_v53 = vld [vmem:[#allocation12_spill] sm:$0xff]  ;;  %v6812_v3 = vld [vmem:[#allocation11_spill] sm:$0xff] }
 0x486   : > { %v6162_v39 = vpop.f32.mrf.mxu1 }
 0x489   : > { %v2826_v27 = vpop.f32.mrf.mxu3 }
 0x48a   : > { %4314 = vmatpush.bf16.xpose.msrb.mxu0 %v6168_v56 }
 0x48c   : > { %v2768_v47 = vpop.f32.mrf.mxu2 }
 0x48d   : > { %v2822_v46 = vadd.f32 %v2821_v35, %v2768_v47  ;;  %v6813_v35 = vpack.c.b16 %v6811_v53, %v6812_v3 }
 0x48e   : > { %v6171_v36 = vpop.f32.mrf.mxu1 }
 0x48f   : > { %v2859_v59 = vpack.c.bf16 %v2822_v46, %v2820_v12  ;;  %v6187_v47 = vsel %vm1034_vm1, %v6813_v35, 0 }
 0x491   : > { %v2829_v31 = vpop.f32.mrf.mxu3  ;;  %4903 = vmatmul.msk.bf16.gmra.mxu0 %vm1034_vm1, %v2859_v59 }
 0x492   : > { %4315 = vmatpush.bf16.xpose.msrb.mxu0 %v6178_v61 }
 0x494   : > { %v2771_v63 = vpop.f32.mrf.mxu2 }
 0x495   : > { %v2825_v46 = vadd.f32 %v2824_v26, %v2771_v63  ;;  %v6818_v26 = vld [vmem:[#allocation8_spill] sm:$0xff] }
 0x496   : > { %v6181_v40 = vpop.f32.mrf.mxu1 }
 0x499   : > { %v2831_v11 = vpop.f32.mrf.mxu3 }
 0x49a   : > { %4316 = vmatpush.bf16.xpose.msrb.mxu0 %v6187_v47 }
 0x49c   : > { %v2773_v12 = vpop.f32.mrf.mxu2 }
 0x49d   : > { %v2827_v8 = vadd.f32 %v2826_v27, %v2773_v12  ;;  %v6819_v27 = vld [vmem:[#allocation7_spill] sm:$0xff] }
 0x49e   : > { %v6190_v20 = vpop.f32.mrf.mxu1  ;;  %v6820_v63 = vpack.c.b16 %v6818_v26, %v6819_v27 }
 0x49f   : > { %v2860_v57 = vpack.c.bf16 %v2827_v8, %v2825_v46 }
 0x4a0   : > { %v6206_v12 = vsel %vm1034_vm1, %v6820_v63, 0 }
 0x4a1   : > { %v2834_v59 = vpop.f32.mrf.mxu3  ;;  %4904 = vmatmul.msk.bf16.gmra.mxu0 %vm1034_vm1, %v2860_v57  ;;  %6821 = vst [vmem:[#allocation17_spill] sm:$0xff] %v6206_v12 }
 0x4a2   : > { %4317 = vmatpush.bf16.xpose.msrb.mxu0 %v6197_v10 }
 0x4a4   : > { %v2776_v53 = vpop.f32.mrf.mxu2 }
 0x4a5   : > { %v2830_v8 = vadd.f32 %v2829_v31, %v2776_v53 }
 0x4a6   : > { %v6200_v3 = vpop.f32.mrf.mxu1 }
 0x4a9   : > { %v2836_v35 = vpop.f32.mrf.mxu3 }
 0x4aa   : > { %4318 = vmatpush.bf16.xpose.msrb.mxu0 %v6206_v12 }
 0x4ac   : > { %v2778_v46 = vpop.f32.mrf.mxu2 }
 0x4ad   : > { %v2832_v23 = vadd.f32 %v2831_v11, %v2778_v46 }
 0x4ae   : > { %v6209_v13 = vpop.f32.mrf.mxu1 }
 0x4af   : > { %v2861_v6 = vpack.c.bf16 %v2832_v23, %v2830_v8 }
 0x4b1   : > { %v2839_v57 = vpop.f32.mrf.mxu3  ;;  %4905 = vmatmul.msk.bf16.gmra.mxu0 %vm1034_vm1, %v2861_v6 }
 0x4b2   : > { %4319 = vmatpush.bf16.xpose.msrb.mxu0 %v6216_v45 }
 0x4b4   : > { %v2781_v26 = vpop.f32.mrf.mxu2 }
 0x4b5   : > { %v2835_v11 = vadd.f32 %v2834_v59, %v2781_v26 }
 0x4b6   : > { %v6219_v27 = vpop.f32.mrf.mxu1 }
 0x4b9   : > { %v2841_v63 = vpop.f32.mrf.mxu3 }
 0x4bc   : > { %v2783_v31 = vpop.f32.mrf.mxu2 }
 0x4bd   : > { %v2837_v53 = vadd.f32 %v2836_v35, %v2783_v31 }
 0x4be   : > { %v6221_v46 = vpop.f32.mrf.mxu1 }
 0x4bf   : > { %v2862_v8 = vpack.c.bf16 %v2837_v53, %v2835_v11 }
 0x4c1   : > { %v2844_v23 = vpop.f32.mrf.mxu3  ;;  %4906 = vmatmul.msk.bf16.gmra.mxu0 %vm1034_vm1, %v2862_v8 }
 0x4c4   : > { %v2786_v6 = vpop.f32.mrf.mxu2 }
 0x4c5   : > { %v2840_v14 = vadd.f32 %v2839_v57, %v2786_v6 }
 0x4c6   : > { %v6224_v51 = vpop.f32.mrf.mxu1 }
 0x4c9   : > { %v2846_v54 = vpop.f32.mrf.mxu3 }
 0x4cc   : > { %v2788_v34 = vpop.f32.mrf.mxu2 }
 0x4cd   : > { %v2842_v45 = vadd.f32 %v2841_v63, %v2788_v34 }
 0x4ce   : > { %v6226_v19 = vpop.f32.mrf.mxu1 }
 0x4cf   : > { %v2863_v33 = vpack.c.bf16 %v2842_v45, %v2840_v14 }
 0x4d1   : > { %v2849_v12 = vpop.f32.mrf.mxu3  ;;  %4907 = vmatmul.msk.bf16.gmra.mxu0 %vm1034_vm1, %v2863_v33 }
 0x4d4   : > { %v2791_v59 = vpop.f32.mrf.mxu2 }
 0x4d5   : > { %v2845_v11 = vadd.f32 %v2844_v23, %v2791_v59  ;;  %v5057_v23 = vld [vmem:[%s6703_s3 + $0x78] sm:$0xff] }
 0x4d6   : > { %v6229_v35 = vpop.f32.mrf.mxu1  ;;  %3560 = vmatpush.bf16.msra.mxu3 %v5057_v23 }
 0x4d9   : > { %v2851_v26 = vpop.f32.mrf.mxu3 }
 0x4dc   : > { %v2793_v31 = vpop.f32.mrf.mxu2 }
 0x4dd   : > { %v2847_v53 = vadd.f32 %v2846_v54, %v2793_v31  ;;  %v5056_v31 = vld [vmem:[%s6703_s3 + $0x70] sm:$0xff] }
 0x4de   : > { %v6231_v8 = vpop.f32.mrf.mxu1  ;;  %3561 = vmatpush.bf16.msra.mxu3 %v5056_v31 }
 0x4df   : > { %v2864_v10 = vpack.c.bf16 %v2847_v53, %v2845_v11 }
 0x4e1   : > { %v2854_v49 = vpop.f32.mrf.mxu3  ;;  %4908 = vmatmul.msk.bf16.gmra.mxu0 %vm1034_vm1, %v2864_v10 }
 0x4e4   : > { %v2796_v57 = vpop.f32.mrf.mxu2 }
 0x4e5   : > { %v2850_v6 = vadd.f32 %v2849_v12, %v2796_v57  ;;  %v2409_v12 = vadd.f32 %v6146_v22, %v5997_v7  ;;  %v6250_v57 = vld [vmem:[%s6704_s4 + $0x1] ss:$0 sm:$0xff] }
 0x4e6   : > { %v6234_v63 = vpop.f32.mrf.mxu1 }
 0x4e9   : > { %v2856_v14 = vpop.f32.mrf.mxu3 }
 0x4ea   : > { %v2411_v14 = vadd.f32 %v6150_v44, %v6002_v50  ;;  %v2416_v44 = vadd.f32 %v6162_v39, %v6012_v24 }
 0x4ec   : > { %v2798_v45 = vpop.f32.mrf.mxu2 }
 0x4ed   : > { %v2852_v33 = vadd.f32 %v2851_v26, %v2798_v45 }
 0x4ee   : > { %v6236_v34 = vpop.f32.mrf.mxu1 }
 0x4ef   : > { %v2865_v2 = vpack.c.bf16 %v2852_v33, %v2850_v6 }
 0x4f1   : > { %4909 = vmatmul.msk.bf16.gmra.mxu0 %vm1034_vm1, %v2865_v2 }
 0x4f4   : > { %v2801_v54 = vpop.f32.mrf.mxu2 }
 0x4f5   : > { %v2855_v10 = vadd.f32 %v2854_v49, %v2801_v54  ;;  %v2414_v54 = vadd.f32 %v6152_v38, %v6009_v62 }
 0x4f6   : > { %v2450_v59 = vpop.f32.mrf.mxu1 }
 0x4f7   : > { %v2866_v53 = vpack.c.bf16 %v2855_v10, %v2855_v10 }
 0x4fc   : > { %v2803_v11 = vpop.f32.mrf.mxu2 }
 0x4fe   : > { %v2920_v26 = vpop.f32.mrf.mxu0 }
 0x4ff   : > { %v2964_v2 = vadd.f32 %v2920_v26, %v2409_v12 }
 0x501   : > { %4910 = vmatmul.msk.bf16.gmra.mxu0 %vm1034_vm1, %v2866_v53  ;;  %v2986_v49 = vadd.f32 %v6250_v57, %v2964_v2 }
 0x503   : > { %v3003_v6 = vmax.f32 %v2986_v49, 0.0 }
 0x505   : > { %v3020_v22 = vpack.c.bf16 %v3003_v6, %v3003_v6 }
 0x506   : > { %v2922_v45 = vpop.f32.mrf.mxu0 }
 0x507   : > { %v2965_v33 = vadd.f32 %v2922_v45, %v2411_v14  ;;  %v3327_v31 = vunpack.c.l.b16 %v3020_v22 }
 0x509   : > { %v2987_v7 = vadd.f32 %v6250_v57, %v2965_v33  ;;  %v2419_v33 = vadd.f32 %v6171_v36, %v6019_v37 }
 0x50b   : > { %v3004_v23 = vmax.f32 %v2987_v7, 0.0 }
 0x50d   : > { %v3021_v59 = vpack.c.bf16 %v3004_v23, %v3004_v23 }
 0x50e   : > { %v2925_v10 = vpop.f32.mrf.mxu0 }
 0x50f   : > { %v3328_v11 = vunpack.c.l.b16 %v3021_v59  ;;  %v2966_v12 = vadd.f32 %v2925_v10, %v2414_v54  ;;  %v2421_v10 = vadd.f32 %v6181_v40, %v6024_v41 }
 0x511   : > { %v6259_v26 = vpack.c.b16 %v3328_v11, %v3327_v31  ;;  %v2988_v53 = vadd.f32 %v6250_v57, %v2966_v12 }
 0x513   : > { %v3005_v50 = vmax.f32 %v2988_v53, 0.0  ;;  %4947 = vmatmul.msk.bf16.vlgmr.msra.gmra.mxu3 %vm1034_vm1, %v6259_v26 }
 0x515   : > { %v3022_v2 = vpack.c.bf16 %v3005_v50, %v3005_v50 }
 0x516   : > { %v2927_v49 = vpop.f32.mrf.mxu0 }
 0x517   : > { %v3329_v14 = vunpack.c.l.b16 %v3022_v2  ;;  %v2967_v38 = vadd.f32 %v2927_v49, %v2416_v44  ;;  %v2424_v44 = vadd.f32 %v6190_v20, %v6031_v1 }
 0x519   : > { %v6266_v62 = vpack.c.b16 %v3329_v14, %v3328_v11  ;;  %v2989_v45 = vadd.f32 %v6250_v57, %v2967_v38 }
 0x51b   : > { %v3006_v6 = vmax.f32 %v2989_v45, 0.0 }
 0x51d   : > { %v3023_v7 = vpack.c.bf16 %v3006_v6, %v3006_v6  ;;  %v2426_v6 = vadd.f32 %v6200_v3, %v6034_v30 }
 0x51e   : > { %v2930_v22 = vpop.f32.mrf.mxu0 }
 0x51f   : > { %v3330_v23 = vunpack.c.l.b16 %v3023_v7  ;;  %v2968_v54 = vadd.f32 %v2930_v22, %v2419_v33 }
 0x521   : > { %v6271_v59 = vpack.c.b16 %v3330_v23, %v3329_v14  ;;  %v2990_v39 = vadd.f32 %v6250_v57, %v2968_v54 }
 0x523   : > { %v3007_v24 = vmax.f32 %v2990_v39, 0.0  ;;  %4948 = vmatmul.msk.bf16.gmra.mxu3 %vm1034_vm1, %v6271_v59  ;;  %v2429_v39 = vadd.f32 %v6209_v13, %v6039_v32 }
 0x525   : > { %v3024_v31 = vpack.c.bf16 %v3007_v24, %v3007_v24 }
 0x526   : > { %v2932_v11 = vpop.f32.mrf.mxu0 }
 0x527   : > { %v3331_v12 = vunpack.c.l.b16 %v3024_v31  ;;  %v2969_v53 = vadd.f32 %v2932_v11, %v2421_v10 }
 0x529   : > { %v2991_v37 = vadd.f32 %v6250_v57, %v2969_v53  ;;  %v6279_v36 = vpack.c.b16 %v3331_v12, %v3330_v23  ;;  %v2431_v53 = vadd.f32 %v6219_v27, %v6042_v21 }
 0x52b   : > { %v3008_v50 = vmax.f32 %v2991_v37, 0.0 }
 0x52d   : > { %v3025_v2 = vpack.c.bf16 %v3008_v50, %v3008_v50 }
 0x52e   : > { %v2935_v49 = vpop.f32.mrf.mxu0 }
 0x52f   : > { %v3332_v14 = vunpack.c.l.b16 %v3025_v2  ;;  %v2970_v38 = vadd.f32 %v2935_v49, %v2424_v44 }
 0x531   : > { %v6283_v45 = vpack.c.b16 %v3332_v14, %v3331_v12  ;;  %v2992_v41 = vadd.f32 %v6250_v57, %v2970_v38 }
 0x533   : > { %v3009_v40 = vmax.f32 %v2992_v41, 0.0  ;;  %4949 = vmatmul.msk.bf16.gmra.mxu3 %vm1034_vm1, %v6283_v45 }
 0x535   : > { %v3026_v33 = vpack.c.bf16 %v3009_v40, %v3009_v40 }
 0x536   : > { %v2937_v7 = vpop.f32.mrf.mxu0 }
 0x537   : > { %v3333_v22 = vunpack.c.l.b16 %v3026_v33  ;;  %v2971_v23 = vadd.f32 %v2937_v7, %v2426_v6  ;;  %v2436_v7 = vadd.f32 %v6224_v51, %v6050_v5 }
 0x539   : > { %v2993_v1 = vadd.f32 %v6250_v57, %v2971_v23  ;;  %v6291_v20 = vpack.c.b16 %v3333_v22, %v3332_v14  ;;  %v2434_v14 = vadd.f32 %v6221_v46, %v6047_v18 }
 0x53b   : > { %v3010_v54 = vmax.f32 %v2993_v1, 0.0 }
 0x53d   : > { %v3027_v24 = vpack.c.bf16 %v3010_v54, %v3010_v54 }
 0x53e   : > { %v2940_v10 = vpop.f32.mrf.mxu0 }
 0x53f   : > { %v3334_v31 = vunpack.c.l.b16 %v3027_v24  ;;  %v2972_v11 = vadd.f32 %v2940_v10, %v2429_v39  ;;  %v2439_v24 = vadd.f32 %v6226_v19, %v6055_v4 }
 0x541   : > { %v6295_v12 = vpack.c.b16 %v3334_v31, %v3333_v22  ;;  %v2994_v30 = vadd.f32 %v6250_v57, %v2972_v11 }
 0x543   : > { %v3011_v3 = vmax.f32 %v2994_v30, 0.0  ;;  %4950 = vmatmul.msk.bf16.gmra.mxu3 %vm1034_vm1, %v6295_v12 }
 0x545   : > { %v3028_v37 = vpack.c.bf16 %v3011_v3, %v3011_v3 }
 0x546   : > { %v2942_v50 = vpop.f32.mrf.mxu0 }
 0x547   : > { %v3335_v44 = vunpack.c.l.b16 %v3028_v37  ;;  %v2973_v2 = vadd.f32 %v2942_v50, %v2431_v53  ;;  %v2441_v53 = vadd.f32 %v6229_v35, %v6058_v48  ;;  %v2446_v35 = vadd.f32 %v6234_v63, %v6068_v60 }
 0x549   : > { %v2995_v32 = vadd.f32 %v6250_v57, %v2973_v2  ;;  %v6303_v13 = vpack.c.b16 %v3335_v44, %v3334_v31 }
 0x54b   : > { %v3012_v49 = vmax.f32 %v2995_v32, 0.0 }
 0x54d   : > { %v3029_v38 = vpack.c.bf16 %v3012_v49, %v3012_v49  ;;  %v2444_v49 = vadd.f32 %v6231_v8, %v6063_v0 }
 0x54e   : > { %v2945_v41 = vpop.f32.mrf.mxu0 }
 0x54f   : > { %v3336_v40 = vunpack.c.l.b16 %v3029_v38  ;;  %v2974_v6 = vadd.f32 %v2945_v41, %v2434_v14 }
 0x551   : > { %v6307_v33 = vpack.c.b16 %v3336_v40, %v3335_v44  ;;  %v2996_v21 = vadd.f32 %v6250_v57, %v2974_v6 }
 0x553   : > { %v3013_v27 = vmax.f32 %v2996_v21, 0.0  ;;  %4951 = vmatmul.msk.bf16.gmra.mxu3 %vm1034_vm1, %v6307_v33 }
 0x555   : > { %v3030_v22 = vpack.c.bf16 %v3013_v27, %v3013_v27 }
 0x556   : > { %v2947_v23 = vpop.f32.mrf.mxu0 }
 0x557   : > { %v3337_v1 = vunpack.c.l.b16 %v3030_v22  ;;  %v2975_v54 = vadd.f32 %v2947_v23, %v2436_v7 }
 0x559   : > { %v2997_v18 = vadd.f32 %v6250_v57, %v2975_v54  ;;  %v6315_v46 = vpack.c.b16 %v3337_v1, %v3336_v40  ;;  %v2449_v54 = vadd.f32 %v6236_v34, %v6077_v43 }
 0x55b   : > { %v3014_v39 = vmax.f32 %v2997_v18, 0.0 }
 0x55d   : > { %v3031_v10 = vpack.c.bf16 %v3014_v39, %v3014_v39 }
 0x55e   : > { %v2950_v31 = vpop.f32.mrf.mxu0 }
 0x55f   : > { %v3338_v11 = vunpack.c.l.b16 %v3031_v10  ;;  %v2976_v30 = vadd.f32 %v2950_v31, %v2439_v24 }
 0x561   : > { %v6319_v3 = vpack.c.b16 %v3338_v11, %v3337_v1  ;;  %v2998_v5 = vadd.f32 %v6250_v57, %v2976_v30 }
 0x563   : > { %v3015_v51 = vmax.f32 %v2998_v5, 0.0  ;;  %4952 = vmatmul.msk.bf16.gmra.mxu3 %vm1034_vm1, %v6319_v3 }
 0x565   : > { %v3032_v37 = vpack.c.bf16 %v3015_v51, %v3015_v51 }
 0x566   : > { %v2952_v50 = vpop.f32.mrf.mxu0 }
 0x567   : > { %v3339_v44 = vunpack.c.l.b16 %v3032_v37  ;;  %v2977_v2 = vadd.f32 %v2952_v50, %v2441_v53  ;;  %v3161_v37 = vpop.permute.xlu2 %3160 }
 0x568   : > { %vm3208_vm5 = vcmp.eq.s32.totalorder %v3161_v37, 1 }
 0x569   : > { %v2999_v19 = vadd.f32 %v6250_v57, %v2977_v2  ;;  %v6327_v4 = vpack.c.b16 %v3339_v44, %v3338_v11  ;;  %vm3226_vm7 = vmand %vm3107_vm10, %vm3208_vm5  ;;  %vm3113_vm10 = vcmp.eq.s32.totalorder %v5711_v52, 4294967293 }
 0x56b   : > { %v3016_v32 = vmax.f32 %v2999_v19, 0.0  ;;  %v3164_v19 = vpop.permute.xlu0 %3163 }
 0x56c   : > { %vm3209_vm4 = vcmp.eq.s32.totalorder %v3164_v19, 1 }
 0x56d   : > { %v3033_v14 = vpack.c.bf16 %v3016_v32, %v3016_v32  ;;  %vm3228_vm13 = vmand %vm3109_vm14, %vm3209_vm4  ;;  %vm3119_vm14 = vcmp.eq.s32.totalorder %v5736_v25, 4294967293 }
 0x56e   : > { %v2955_v38 = vpop.f32.mrf.mxu0 }
 0x56f   : > { %v3340_v41 = vunpack.c.l.b16 %v3033_v14  ;;  %v2978_v40 = vadd.f32 %v2955_v38, %v2444_v49  ;;  %v3170_v14 = vpop.permute.xlu2 %3169 }
 0x570   : > { %vm3211_vm5 = vcmp.eq.s32.totalorder %v3170_v14, 1 }
 0x571   : > { %v3350_v6 = vpack.c.b16 %v3340_v41, %v3339_v44  ;;  %v3000_v21 = vadd.f32 %v6250_v57, %v2978_v40  ;;  %v6827_v40 = vld [vmem:[#allocation19_spill] sm:$0xff] }
 0x573   : > { %v3017_v48 = vmax.f32 %v3000_v21, 0.0  ;;  %4953 = vmatmul.msk.bf16.gmra.mxu3 %vm1034_vm1, %v3350_v6  ;;  %v3173_v49 = vpop.permute.xlu0 %3172 }
 0x575   : > { %v3034_v27 = vpack.c.bf16 %v3017_v48, %v3017_v48 }
 0x576   : > { %v2957_v7 = vpop.f32.mrf.mxu0 }
 0x577   : > { %v3341_v22 = vunpack.c.l.b16 %v3034_v27  ;;  %v2979_v23 = vadd.f32 %v2957_v7, %v2446_v35  ;;  %v6831_v7 = vld [vmem:[#allocation22_spill] sm:$0xff] }
 0x579   : > { %v3001_v1 = vadd.f32 %v6250_v57, %v2979_v23  ;;  %v6336_v0 = vpack.c.b16 %v3341_v22, %v3340_v41  ;;  %v6833_v23 = vld [vmem:[#allocation16_spill] sm:$0xff] }
 0x57b   : > { %v3018_v8 = vmax.f32 %v3001_v1, 0.0  ;;  %v3182_v41 = vpop.permute.xlu0 %3181 }
 0x57d   : > { %v3035_v18 = vpack.c.bf16 %v3018_v8, %v3018_v8 }
 0x57e   : > { %v2960_v39 = vpop.f32.mrf.mxu0 }
 0x57f   : > { %v3342_v24 = vunpack.c.l.b16 %v3035_v18  ;;  %v2980_v10 = vadd.f32 %v2960_v39, %v2449_v54  ;;  %v6834_v39 = vld [vmem:[#allocation24_spill] sm:$0xff] }
 0x581   : > { %v3351_v31 = vpack.c.b16 %v3342_v24, %v3341_v22  ;;  %v3002_v11 = vadd.f32 %v6250_v57, %v2980_v10  ;;  %v3158_v57 = vpop.permute.xlu1 %3157  ;;  %v6832_v22 = vld [vmem:[#allocation21_spill] sm:$0xff] }
 0x582   : > { %vm3207_vm2 = vcmp.eq.s32.totalorder %v3158_v57, 1  ;;  %v6839_v57 = vld [vmem:[#allocation28_spill] sm:$0xff] }
 0x583   : > { %v3019_v60 = vmax.f32 %v3002_v11, 0.0  ;;  %3391 = vmatpush.bf16.msrb.mxu1 %v3351_v31  ;;  %4954 = vmatmul.msk.bf16.gmra.mxu3 %vm1034_vm1, %v3351_v31  ;;  %vm3224_vm6 = vmand %vm3105_vm3, %vm3207_vm2  ;;  %vm3115_vm3 = vcmp.eq.s32.totalorder %v5716_v58, 4294967293  ;;  %vm3212_vm2 = vcmp.eq.s32.totalorder %v3173_v49, 1  ;;  %v3191_v35 = vpop.permute.xlu0 %3190  ;;  %v6836_v11 = vld [vmem:[#allocation26_spill] sm:$0xff] }
 0x584   : > { %vm4912_vm9 = vmpackc.low %vm3226_vm7, %vm3224_vm6 }
 0x585   : > { %v3036_v63 = vpack.c.bf16 %v3019_v60, %v3019_v60  ;;  %vm3234_vm6 = vmand %vm3115_vm3, %vm3212_vm2  ;;  %vm3123_vm3 = vcmp.eq.s32.totalorder %v6827_v40, 4294967293 }
 0x586   : > { %v2962_v30 = vpop.f32.mrf.mxu0  ;;  %vm3232_vm7 = vmand %vm3113_vm10, %vm3211_vm5  ;;  %vm3215_vm5 = vcmp.eq.s32.totalorder %v3182_v41, 1 }
 0x587   : > { %v3343_v5 = vunpack.c.l.b16 %v3036_v63  ;;  %3392 = vmatpush.bf16.msrb.mxu1 %v3350_v6 }
 0x589   : > { %v3352_v51 = vpack.c.b16 %v3343_v5, %v3343_v5  ;;  %v6342_v53 = vpack.c.b16 %v3343_v5, %v3342_v24  ;;  %v3167_v2 = vpop.permute.xlu1 %3166  ;;  %v6835_v24 = vld [vmem:[#allocation25_spill] sm:$0xff]  ;;  %v6837_v5 = vmov 0.0  }
 0x58a   : > { %vm3210_vm8 = vcmp.eq.s32.totalorder %v3167_v2, 1 }
 0x58b   : > { %3393 = vmatpush.bf16.msrb.mxu1 %v6319_v3  ;;  %v3389_v43 = vsel %vm6826_vm12, %v3352_v51, 0  ;;  %vm3230_vm0 = vmand %vm3111_vm11, %vm3210_vm8  ;;  %vm3117_vm11 = vcmp.eq.s32.totalorder %v5731_v15, 4294967293  ;;  %v3200_v30 = vpop.permute.xlu0 %3199 }
 0x58c   : > { %3451 = vmatpush.bf16.msra.mxu2 %v3389_v43  ;;  %vm4914_vm12 = vmpackc.low %vm3230_vm0, %vm3228_vm13 }
 0x58f   : > { %3394 = vmatpush.bf16.msrb.mxu1 %v6307_v33  ;;  %3452 = vmatmul.bf16.vlgmr.msra.gmra.mxu2 %v6790_v9 }
 0x590   : > { %4059 = vmatpush.bf16.msrb.mxu2 %v3389_v43  ;;  %v6838_v43 = vld [vmem:[#allocation27_spill] sm:$0xff] }
 0x593   : > { %3395 = vmatpush.bf16.msrb.mxu1 %v6295_v12  ;;  %4955 = vmatmul.msk.bf16.gmra.mxu3 %vm1034_vm1, %v3352_v51 }
 0x596   : > { %v6350_v34 = vpop.f32.mrf.mxu3 }
 0x597   : > { %3396 = vmatpush.bf16.msrb.mxu1 %v6283_v45 }
 0x59b   : > { %3397 = vmatpush.bf16.msrb.mxu1 %v6271_v59 }
 0x59e   : > { %v6356_v50 = vpop.f32.mrf.mxu3 }
 0x59f   : > { %3398 = vmatpush.bf16.msrb.mxu1 %v6259_v26  ;;  %3457 = vmatmul.bf16.gmra.mxu2 %v6790_v9 }
 0x5a2   : > { %4913 = vmatmul.msk.bf16.vlgmr.msrb.gmra.mxu1 %vm4912_vm9, %v6788_v28  ;;  %vm4916_vm9 = vmpackc.low %vm3234_vm6, %vm3232_vm7 }
 0x5a3   : > { %3999 = vmatpush.bf16.msra.mxu1 %v3351_v31 }
 0x5a6   : > { %v6361_v44 = vpop.f32.mrf.mxu3 }
 0x5a7   : > { %4000 = vmatpush.bf16.msra.mxu1 %v3350_v6  ;;  %v6828_v6 = vld [vmem:[#allocation20_spill] sm:$0xff] }
 0x5a8   : > { %vm3121_vm10 = vcmp.eq.s32.totalorder %v6828_v6, 4294967293 }
 0x5a9   : > { %vm3240_vm7 = vmand %vm3121_vm10, %vm3215_vm5  ;;  %vm3131_vm10 = vcmp.eq.s32.totalorder %v6835_v24, 4294967293 }
 0x5ab   : > { %4001 = vmatpush.bf16.msra.mxu1 %v6319_v3 }
 0x5ae   : > { %v6367_v32 = vpop.f32.mrf.mxu3 }
 0x5af   : > { %4002 = vmatpush.bf16.msra.mxu1 %v6307_v33  ;;  %3462 = vmatmul.bf16.gmra.mxu2 %v6790_v9  ;;  %v3179_v33 = vpop.permute.xlu2 %3178 }
 0x5b0   : > { %vm3214_vm4 = vcmp.eq.s32.totalorder %v3179_v33, 1 }
 0x5b1   : > { %vm3238_vm13 = vmand %vm3119_vm14, %vm3214_vm4  ;;  %vm3125_vm14 = vcmp.eq.s32.totalorder %v6832_v22, 4294967293 }
 0x5b2   : > { %4915 = vmatmul.msk.bf16.gmra.mxu1 %vm4914_vm12, %v6788_v28 }
 0x5b3   : > { %4003 = vmatpush.bf16.msra.mxu1 %v6295_v12 }
 0x5b6   : > { %v6373_v3 = vpop.f32.mrf.mxu3 }
 0x5b7   : > { %4004 = vmatpush.bf16.msra.mxu1 %v6283_v45  ;;  %v3176_v45 = vpop.permute.xlu1 %3175  ;;  %v3188_v27 = vpop.permute.xlu2 %3187 }
 0x5b8   : > { %vm3213_vm8 = vcmp.eq.s32.totalorder %v3176_v45, 1  ;;  %vm3217_vm4 = vcmp.eq.s32.totalorder %v3188_v27, 1  ;;  %v6840_v45 = vld [vmem:[#allocation29_spill] sm:$0xff] }
 0x5b9   : > { %vm3236_vm0 = vmand %vm3117_vm11, %vm3213_vm8  ;;  %vm3127_vm11 = vcmp.eq.s32.totalorder %v6831_v7, 4294967293  ;;  %vm3218_vm8 = vcmp.eq.s32.totalorder %v3191_v35, 1  ;;  %v3820_v35 = vpop.permute.xlu0 %3819 }
 0x5ba   : > { %vm4918_vm12 = vmpackc.low %vm3238_vm13, %vm3236_vm0 }
 0x5bb   : > { %4005 = vmatpush.bf16.msra.mxu1 %v6271_v59  ;;  %vm3246_vm0 = vmand %vm3127_vm11, %vm3218_vm8  ;;  %vm3138_vm11 = vcmp.eq.s32.totalorder %v6836_v11, 4294967293 }
 0x5bc   : > { %vm3244_vm13 = vmand %vm3125_vm14, %vm3217_vm4  ;;  %vm3135_vm4 = vcmp.eq.s32.totalorder %v6838_v43, 4294967293 }
 0x5be   : > { %v6380_v12 = vpop.f32.mrf.mxu3 }
 0x5bf   : > { %4006 = vmatpush.bf16.msra.mxu1 %v6259_v26  ;;  %3467 = vmatmul.bf16.gmra.mxu2 %v6790_v9  ;;  %v3185_v38 = vpop.permute.xlu1 %3184  ;;  %v3197_v54 = vpop.permute.xlu2 %3196 }
 0x5c0   : > { %vm3216_vm2 = vcmp.eq.s32.totalorder %v3185_v38, 1  ;;  %vm3220_vm5 = vcmp.eq.s32.totalorder %v3197_v54, 1 }
 0x5c1   : > { %vm3242_vm6 = vmand %vm3123_vm3, %vm3216_vm2  ;;  %vm3129_vm3 = vcmp.eq.s32.totalorder %v6834_v39, 4294967293 }
 0x5c2   : > { %4917 = vmatmul.msk.bf16.gmra.mxu1 %vm4916_vm9, %v6788_v28  ;;  %vm4920_vm9 = vmpackc.low %vm3242_vm6, %vm3240_vm7 }
 0x5c3   : > { %4340 = vmatpush.bf16.xpose.msrb.mxu1 %v6159_v17  ;;  %vm3250_vm7 = vmand %vm3131_vm10, %vm3220_vm5  ;;  %vm3137_vm5 = vcmp.eq.s32.totalorder %v6840_v45, 4294967293 }
 0x5c6   : > { %v6385_v59 = vpop.f32.mrf.mxu3 }
 0x5c7   : > { %v3194_v18 = vpop.permute.xlu1 %3193  ;;  %v3206_v31 = vpop.permute.xlu2 %3205 }
 0x5c8   : > { %vm3219_vm2 = vcmp.eq.s32.totalorder %v3194_v18, 1  ;;  %vm3223_vm8 = vcmp.eq.s32.totalorder %v3206_v31, 1  ;;  %v6841_v31 = vld [vmem:[#allocation38_spill] sm:$0xff] }
 0x5c9   : > { %vm3248_vm6 = vmand %vm3129_vm3, %vm3219_vm2 }
 0x5ca   : > { %vm3257_vm14 = vmand %vm3138_vm11, %vm3223_vm8 }
 0x5cb   : > { %4341 = vmatpush.bf16.xpose.msrb.mxu1 %v6168_v56  ;;  %v3291_v51 = vsel %vm3257_vm14, 1.0, %v6837_v5  ;;  %vm3869_vm14 = vcmp.eq.s32.totalorder %v3820_v35, 1 }
 0x5cc   : > { %v3309_v37 = vpack.c.bf16 %v3291_v51, %v3291_v51 }
 0x5ce   : > { %v6390_v17 = vpop.f32.mrf.mxu3 }
 0x5cf   : > { %3472 = vmatmul.bf16.gmra.mxu2 %v6790_v9  ;;  %v3203_v63 = vpop.permute.xlu1 %3202 }
 0x5d2   : > { %4919 = vmatmul.msk.bf16.gmra.mxu1 %vm4918_vm12, %v6788_v28  ;;  %vm4922_vm12 = vmpackc.low %vm3246_vm0, %vm3244_vm13  ;;  %vm3222_vm0 = vcmp.eq.s32.totalorder %v3203_v63, 1  ;;  %vm3133_vm13 = vcmp.eq.s32.totalorder %v6839_v57, 4294967293  ;;  %v4386_v63 = vsel %vm1034_vm1, %v6841_v31, 0 }
 0x5d3   : > { %4342 = vmatpush.bf16.xpose.msrb.mxu1 %v6178_v61  ;;  %v6829_v61 = vld [vmem:[#allocation18_spill] sm:$0xff]  ;;  %vm3254_vm3 = vmand %vm3135_vm4, %vm3222_vm0 }
 0x5d6   : > { %v6395_v56 = vpop.f32.mrf.mxu3 }
 0x5db   : > { %4343 = vmatpush.bf16.xpose.msrb.mxu1 %v6187_v47  ;;  %v6830_v47 = vld [vmem:[#allocation17_spill] sm:$0xff] }
 0x5de   : > { %v6400_v21 = vpop.f32.mrf.mxu3 }
 0x5df   : > { %3477 = vmatmul.bf16.gmra.mxu2 %v6790_v9 }
 0x5e2   : > { %4921 = vmatmul.msk.bf16.gmra.mxu1 %vm4920_vm9, %v6788_v28  ;;  %vm4924_vm9 = vmpackc.low %vm3250_vm7, %vm3248_vm6 }
 0x5e3   : > { %4344 = vmatpush.bf16.xpose.msrb.mxu1 %v6829_v61  ;;  %vm3256_vm6 = vmand %vm3137_vm5, %vm3223_vm8  ;;  %v3823_v61 = vpop.permute.xlu1 %3822  ;;  %vm3767_vm8 = vcmp.eq.s32.totalorder %v5659_v16, 3 }
 0x5e4   : > { %vm4928_vm7 = vmpackc.low %vm3256_vm6, %vm3256_vm6  ;;  %vm3870_vm11 = vcmp.eq.s32.totalorder %v3823_v61, 1 }
 0x5e5   : > { %vm3886_vm0 = vmand %vm3767_vm8, %vm3869_vm14  ;;  %vm3777_vm8 = vcmp.eq.s32.totalorder %v5716_v58, 3 }
 0x5e6   : > { %v6405_v48 = vpop.f32.mrf.mxu3 }
 0x5eb   : > { %4345 = vmatpush.bf16.xpose.msrb.mxu1 %v6830_v47 }
 0x5ee   : > { %v6410_v1 = vpop.f32.mrf.mxu3 }
 0x5ef   : > { %3482 = vmatmul.bf16.gmra.mxu2 %v6790_v9 }
 0x5f2   : > { %4923 = vmatmul.msk.bf16.gmra.mxu1 %vm4922_vm12, %v6788_v28  ;;  %vm3221_vm12 = vcmp.eq.s32.totalorder %v3200_v30, 1 }
 0x5f3   : > { %4346 = vmatpush.bf16.xpose.msrb.mxu1 %v6833_v23  ;;  %vm3252_vm2 = vmand %vm3133_vm13, %vm3221_vm12  ;;  %vm3773_vm12 = vcmp.eq.s32.totalorder %v5691_v29, 3  ;;  %v6844_v29 = vld [vmem:[#allocation35_spill] sm:$0xff] }
 0x5f4   : > { %vm4926_vm10 = vmpackc.low %vm3254_vm3, %vm3252_vm2  ;;  %vm3771_vm2 = vcmp.eq.s32.totalorder %v5696_v55, 3 }
 0x5f6   : > { %v6414_v8 = vpop.f32.mrf.mxu3 }
 0x5fe   : > { %v6418_v10 = vpop.f32.mrf.mxu3 }
 0x5ff   : > { %3487 = vmatmul.bf16.gmra.mxu2 %v6790_v9 }
 0x602   : > { %4925 = vmatmul.msk.bf16.gmra.mxu1 %vm4924_vm9, %v6788_v28  ;;  %vm3769_vm9 = vcmp.eq.s32.totalorder %v5666_v42, 3  ;;  %v6842_v42 = vld [vmem:[#allocation37_spill] sm:$0xff] }
 0x603   : > { %vm3888_vm4 = vmand %vm3769_vm9, %vm3870_vm11  ;;  %v4383_v16 = vsel %vm1034_vm1, %v6842_v42, 0  ;;  %vm3775_vm9 = vcmp.eq.s32.totalorder %v5711_v52, 3  ;;  %v6846_v52 = vld [vmem:[#allocation33_spill] sm:$0xff] }
 0x604   : > { %vm4973_vm13 = vmpackc.low %vm3888_vm4, %vm3886_vm0 }
 0x606   : > { %v6423_v60 = vpop.f32.mrf.mxu3 }
 0x60e   : > { %v6429_v2 = vpop.f32.mrf.mxu3 }
 0x60f   : > { %4930 = vmatmul.msk.bf16.gmra.mxu2 %vm866_vm15, %v3309_v37 }
 0x612   : > { %4927 = vmatmul.msk.bf16.gmra.mxu1 %vm4926_vm10, %v6788_v28  ;;  %v3453_v19 = vpop.f32.mrf.mxu2 }
 0x616   : > { %v6433_v49 = vpop.f32.mrf.mxu3 }
 0x61a   : > { %v3455_v14 = vpop.f32.mrf.mxu2 }
 0x61e   : > { %v3605_v33 = vpop.f32.mrf.mxu3 }
 0x61f   : > { %v3400_v38 = vpop.f32.mrf.mxu1  ;;  %4060 = vmatmul.bf16.vlgmr.msrb.gmra.mxu2 %v6790_v9  ;;  %v3826_v33 = vpop.permute.xlu2 %3825 }
 0x620   : > { %v3454_v27 = vadd.f32 %v3453_v19, %v3400_v38  ;;  %v3829_v19 = vpop.permute.xlu0 %3828  ;;  %vm3871_vm10 = vcmp.eq.s32.totalorder %v3826_v33, 1 }
 0x621   : > { %vm3872_vm3 = vcmp.eq.s32.totalorder %v3829_v19, 1  ;;  %vm3890_vm6 = vmand %vm3771_vm2, %vm3871_vm10  ;;  %vm3779_vm2 = vcmp.eq.s32.totalorder %v5731_v15, 3 }
 0x622   : > { %4929 = vmatmul.msk.bf16.gmra.mxu1 %vm4928_vm7, %v6788_v28  ;;  %v3458_v41 = vpop.f32.mrf.mxu2  ;;  %vm3892_vm5 = vmand %vm3773_vm12, %vm3872_vm3  ;;  %vm3781_vm12 = vcmp.eq.s32.totalorder %v5736_v25, 3 }
 0x623   : > { %vm4975_vm7 = vmpackc.low %vm3892_vm5, %vm3890_vm6 }
 0x627   : > { %v3402_v47 = vpop.f32.mrf.mxu1 }
 0x628   : > { %v3456_v23 = vadd.f32 %v3455_v14, %v3402_v47  ;;  %v6843_v47 = vld [vmem:[#allocation36_spill] sm:$0xff] }
 0x629   : > { %v4380_v35 = vsel %vm1034_vm1, %v6843_v47, 0 }
 0x62a   : > { %v3497_v54 = vpack.c.bf16 %v3456_v23, %v3454_v27  ;;  %v3460_v18 = vpop.f32.mrf.mxu2  ;;  %v4377_v23 = vsel %vm1034_vm1, %v6844_v29, 0 }
 0x62c   : > { %4964 = vmatmul.msk.bf16.vlgmr.msra.gmra.mxu0 %vm1034_vm1, %v3497_v54 }
 0x62d   : > { %4389 = vmatpush.bf16.xpose.msra.mxu0 %v4386_v63 }
 0x62f   : > { %v3405_v30 = vpop.f32.mrf.mxu1  ;;  %4065 = vmatmul.bf16.gmra.mxu2 %v6790_v9 }
 0x630   : > { %v3459_v14 = vadd.f32 %v3458_v41, %v3405_v30 }
 0x632   : > { %v3463_v51 = vpop.f32.mrf.mxu2  ;;  %4974 = vmatmul.msk.bf16.vlgmr.msra.gmra.mxu1 %vm4973_vm13, %v6788_v28 }
 0x633   : > { %4415 = vmatpush.bf16.xpose.msra.mxu1 %v4386_v63  ;;  %v3835_v63 = vpop.permute.xlu2 %3834 }
 0x634   : > { %vm3874_vm14 = vcmp.eq.s32.totalorder %v3835_v63, 1 }
 0x635   : > { %4390 = vmatpush.bf16.xpose.msra.mxu0 %v4383_v16  ;;  %vm3896_vm0 = vmand %vm3777_vm8, %vm3874_vm14  ;;  %vm3783_vm8 = vcmp.eq.s32.totalorder %v6828_v6, 3 }
 0x637   : > { %v3407_v37 = vpop.f32.mrf.mxu1 }
 0x638   : > { %v3461_v45 = vadd.f32 %v3460_v18, %v3407_v37  ;;  %v3832_v18 = vpop.permute.xlu1 %3831 }
 0x639   : > { %vm3873_vm11 = vcmp.eq.s32.totalorder %v3832_v18, 1 }
 0x63a   : > { %v3498_v38 = vpack.c.bf16 %v3461_v45, %v3459_v14  ;;  %v3465_v61 = vpop.f32.mrf.mxu2  ;;  %vm3894_vm4 = vmand %vm3775_vm9, %vm3873_vm11  ;;  %v4371_v14 = vsel %vm1034_vm1, %v6846_v52, 0  ;;  %vm3785_vm9 = vcmp.eq.s32.totalorder %v6827_v40, 3 }
 0x63b   : > { %4416 = vmatpush.bf16.xpose.msra.mxu1 %v4383_v16  ;;  %v6845_v16 = vld [vmem:[#allocation34_spill] sm:$0xff]  ;;  %vm4977_vm13 = vmpackc.low %vm3896_vm0, %vm3894_vm4 }
 0x63c   : > { %4965 = vmatmul.msk.bf16.gmra.mxu0 %vm1034_vm1, %v3498_v38  ;;  %v4374_v37 = vsel %vm1034_vm1, %v6845_v16, 0  ;;  %v3838_v38 = vpop.permute.xlu0 %3837 }
 0x63d   : > { %4391 = vmatpush.bf16.xpose.msra.mxu0 %v4380_v35  ;;  %vm3875_vm10 = vcmp.eq.s32.totalorder %v3838_v38, 1  ;;  %v6848_v38 = vld [vmem:[#allocation23_spill] sm:$0xff] }
 0x63e   : > { %vm3898_vm6 = vmand %vm3779_vm2, %vm3875_vm10  ;;  %vm3789_vm2 = vcmp.eq.s32.totalorder %v6831_v7, 3 }
 0x63f   : > { %v3410_v27 = vpop.f32.mrf.mxu1  ;;  %4070 = vmatmul.bf16.gmra.mxu2 %v6790_v9 }
 0x640   : > { %v3464_v31 = vadd.f32 %v3463_v51, %v3410_v27  ;;  %v3841_v45 = vpop.permute.xlu1 %3840  ;;  %v6847_v27 = vld [vmem:[#allocation32_spill] sm:$0xff] }
 0x641   : > { %vm3876_vm3 = vcmp.eq.s32.totalorder %v3841_v45, 1  ;;  %v4368_v29 = vsel %vm1034_vm1, %v6847_v27, 0 }
 0x642   : > { %v3468_v41 = vpop.f32.mrf.mxu2  ;;  %4976 = vmatmul.msk.bf16.gmra.mxu1 %vm4975_vm7, %v6788_v28  ;;  %vm3900_vm5 = vmand %vm3781_vm12, %vm3876_vm3  ;;  %vm3787_vm12 = vcmp.eq.s32.totalorder %v6832_v22, 3 }
 0x643   : > { %4417 = vmatpush.bf16.xpose.msra.mxu1 %v4380_v35  ;;  %vm4979_vm7 = vmpackc.low %vm3900_vm5, %vm3898_vm6 }
 0x644   : > { %v3847_v15 = vpop.permute.xlu0 %3846 }
 0x645   : > { %4392 = vmatpush.bf16.xpose.msra.mxu0 %v4377_v23  ;;  %vm3878_vm11 = vcmp.eq.s32.totalorder %v3847_v15, 1 }
 0x646   : > { %vm3904_vm4 = vmand %vm3785_vm9, %vm3878_vm11  ;;  %vm3798_vm9 = vcmp.eq.s32.totalorder %v6848_v38, 3 }
 0x647   : > { %v3412_v54 = vpop.f32.mrf.mxu1 }
 0x648   : > { %v3466_v55 = vadd.f32 %v3465_v61, %v3412_v54 }
 0x64a   : > { %v3499_v30 = vpack.c.bf16 %v3466_v55, %v3464_v31  ;;  %v3470_v42 = vpop.f32.mrf.mxu2  ;;  %v3844_v31 = vpop.permute.xlu2 %3843 }
 0x64b   : > { %4418 = vmatpush.bf16.xpose.msra.mxu1 %v4377_v23  ;;  %vm3877_vm14 = vcmp.eq.s32.totalorder %v3844_v31, 1 }
 0x64c   : > { %4966 = vmatmul.msk.bf16.gmra.mxu0 %vm1034_vm1, %v3499_v30  ;;  %vm3902_vm0 = vmand %vm3783_vm8, %vm3877_vm14  ;;  %vm3793_vm14 = vcmp.eq.s32.totalorder %v6835_v24, 3 }
 0x64d   : > { %4393 = vmatpush.bf16.xpose.msra.mxu0 %v4374_v37 }
 0x64f   : > { %v3415_v19 = vpop.f32.mrf.mxu1  ;;  %4075 = vmatmul.bf16.gmra.mxu2 %v6790_v9 }
 0x650   : > { %v3469_v58 = vadd.f32 %v3468_v41, %v3415_v19  ;;  %v3850_v19 = vpop.permute.xlu1 %3849 }
 0x651   : > { %vm3879_vm3 = vcmp.eq.s32.totalorder %v3850_v19, 1 }
 0x652   : > { %v3473_v51 = vpop.f32.mrf.mxu2  ;;  %4978 = vmatmul.msk.bf16.gmra.mxu1 %vm4977_vm13, %v6788_v28  ;;  %vm4981_vm13 = vmpackc.low %vm3904_vm4, %vm3902_vm0  ;;  %v3853_v16 = vpop.permute.xlu2 %3852  ;;  %vm3791_vm0 = vcmp.eq.s32.totalorder %v6834_v39, 3 }
 0x653   : > { %4419 = vmatpush.bf16.xpose.msra.mxu1 %v4374_v37  ;;  %vm3880_vm10 = vcmp.eq.s32.totalorder %v3853_v16, 1  ;;  %vm3906_vm5 = vmand %vm3787_vm12, %vm3879_vm3 }
 0x654   : > { %vm3908_vm6 = vmand %vm3789_vm2, %vm3880_vm10  ;;  %vm3800_vm10 = vcmp.eq.s32.totalorder %v6836_v11, 3 }
 0x655   : > { %4394 = vmatpush.bf16.xpose.msra.mxu0 %v4371_v14 }
 0x657   : > { %v3417_v33 = vpop.f32.mrf.mxu1 }
 0x658   : > { %v3471_v61 = vadd.f32 %v3470_v42, %v3417_v33  ;;  %v3859_v22 = vpop.permute.xlu1 %3858 }
 0x659   : > { %vm3882_vm4 = vcmp.eq.s32.totalorder %v3859_v22, 1 }
 0x65a   : > { %v3500_v47 = vpack.c.bf16 %v3471_v61, %v3469_v58  ;;  %v3475_v35 = vpop.f32.mrf.mxu2  ;;  %v3865_v45 = vpop.permute.xlu2 %3864  ;;  %vm3912_vm12 = vmand %vm3793_vm14, %vm3882_vm4 }
 0x65b   : > { %4420 = vmatpush.bf16.xpose.msra.mxu1 %v4371_v14  ;;  %vm3884_vm11 = vcmp.eq.s32.totalorder %v3865_v45, 1  ;;  %v3856_v61 = vpop.permute.xlu0 %3855 }
 0x65c   : > { %4967 = vmatmul.msk.bf16.gmra.mxu0 %vm1034_vm1, %v3500_v47  ;;  %vm3917_vm8 = vmand %vm3798_vm9, %vm3884_vm11 }
 0x65d   : > { %4395 = vmatpush.bf16.xpose.msra.mxu0 %v4368_v29 }
 0x65f   : > { %v3420_v23 = vpop.f32.mrf.mxu1  ;;  %4080 = vmatmul.bf16.gmra.mxu2 %v6790_v9 }
 0x660   : > { %v3474_v54 = vadd.f32 %v3473_v51, %v3420_v23  ;;  %v5059_v23 = vld [vmem:[%s6703_s3 + $0x88] sm:$0xff]  ;;  %v3868_v24 = vpop.permute.xlu1 %3867 }
 0x661   : > { %4164 = vmatpush.bf16.msrb.mxu3 %v5059_v23 }
 0x662   : > { %v3478_v25 = vpop.f32.mrf.mxu2  ;;  %4980 = vmatmul.msk.bf16.gmra.mxu1 %vm4979_vm7, %v6788_v28  ;;  %vm4983_vm7 = vmpackc.low %vm3908_vm6, %vm3906_vm5  ;;  %vm3885_vm5 = vcmp.eq.s32.totalorder %v3868_v24, 1 }
 0x663   : > { %4421 = vmatpush.bf16.xpose.msra.mxu1 %v4368_v29  ;;  %vm3919_vm6 = vmand %vm3800_vm10, %vm3885_vm5 }
 0x667   : > { %v3422_v41 = vpop.f32.mrf.mxu1 }
 0x668   : > { %v3476_v18 = vadd.f32 %v3475_v35, %v3422_v41  ;;  %v3951_v35 = vsel %vm3917_vm8, 1.0, %v6837_v5  ;;  %vm3797_vm8 = vcmp.eq.s32.totalorder %v6838_v43, 3 }
 0x669   : > { %vm3916_vm4 = vmand %vm3797_vm8, %vm3884_vm11  ;;  %vm4332_vm11 = vcmask 877568  }
 0x66a   : > { %v3501_v55 = vpack.c.bf16 %v3476_v18, %v3474_v54  ;;  %v3480_v63 = vpop.f32.mrf.mxu2  ;;  %v3862_v54 = vpop.permute.xlu0 %3861 }
 0x66b   : > { %vm3883_vm9 = vcmp.eq.s32.totalorder %v3862_v54, 1 }
 0x66c   : > { %4968 = vmatmul.msk.bf16.gmra.mxu0 %vm1034_vm1, %v3501_v55  ;;  %v3953_v55 = vsel %vm3919_vm6, 1.0, %v6837_v5 }
 0x66d   : > { %v3971_v11 = vpack.c.bf16 %v3953_v55, %v3953_v55 }
 0x66f   : > { %v3425_v30 = vpop.f32.mrf.mxu1  ;;  %4085 = vmatmul.bf16.gmra.mxu2 %v6790_v9 }
 0x670   : > { %v3479_v51 = vadd.f32 %v3478_v25, %v3425_v30  ;;  %v3969_v25 = vpack.c.bf16 %v3951_v35, %v6837_v5 }
 0x672   : > { %v3483_v42 = vpop.f32.mrf.mxu2  ;;  %4982 = vmatmul.msk.bf16.gmra.mxu1 %vm4981_vm13, %v6788_v28  ;;  %vm3881_vm13 = vcmp.eq.s32.totalorder %v3856_v61, 1  ;;  %v4461_v61 = vsel %vm1034_vm1, %v6342_v53, 0 }
 0x673   : > { %vm3910_vm3 = vmand %vm3791_vm0, %vm3881_vm13 }
 0x674   : > { %vm4985_vm2 = vmpackc.low %vm3912_vm12, %vm3910_vm3 }
 0x677   : > { %v3427_v37 = vpop.f32.mrf.mxu1 }
 0x678   : > { %v3481_v40 = vadd.f32 %v3480_v63, %v3427_v37 }
 0x67a   : > { %v3502_v52 = vpack.c.bf16 %v3481_v40, %v3479_v51  ;;  %v3485_v14 = vpop.f32.mrf.mxu2 }
 0x67c   : > { %4969 = vmatmul.msk.bf16.gmra.mxu0 %vm1034_vm1, %v3502_v52 }
 0x67f   : > { %v3430_v6 = vpop.f32.mrf.mxu1  ;;  %4090 = vmatmul.bf16.gmra.mxu2 %v6790_v9 }
 0x680   : > { %v3484_v7 = vadd.f32 %v3483_v42, %v3430_v6  ;;  %v5058_v42 = vld [vmem:[%s6703_s3 + $0x80] sm:$0xff] }
 0x681   : > { %4165 = vmatpush.bf16.msrb.mxu3 %v5058_v42 }
 0x682   : > { %v3488_v33 = vpop.f32.mrf.mxu2  ;;  %4984 = vmatmul.msk.bf16.gmra.mxu1 %vm4983_vm7, %v6788_v28  ;;  %vm3795_vm7 = vcmp.eq.s32.totalorder %v6839_v57, 3 }
 0x683   : > { %vm3914_vm14 = vmand %vm3795_vm7, %vm3883_vm9 }
 0x684   : > { %vm4987_vm0 = vmpackc.low %vm3916_vm4, %vm3914_vm14 }
 0x687   : > { %v3432_v58 = vpop.f32.mrf.mxu1 }
 0x688   : > { %v3486_v47 = vadd.f32 %v3485_v14, %v3432_v58  ;;  %v6849_v58 = vld [vmem:[#allocation3_spill] sm:$0xff] }
 0x68a   : > { %v3503_v27 = vpack.c.bf16 %v3486_v47, %v3484_v7  ;;  %v3490_v29 = vpop.f32.mrf.mxu2  ;;  %v6850_v47 = vld [vmem:[#allocation4_spill] sm:$0xff] }
 0x68c   : > { %4970 = vmatmul.msk.bf16.gmra.mxu0 %vm1034_vm1, %v3503_v27 }
 0x68f   : > { %v3435_v41 = vpop.f32.mrf.mxu1  ;;  %4989 = vmatmul.msk.bf16.gmra.mxu2 %vm866_vm15, %v3969_v25  ;;  %v4458_v25 = vsel %vm1034_vm1, %v6336_v0, 0  ;;  %v6854_v0 = vld [vmem:[#allocation31_spill] sm:$0xff] }
 0x690   : > { %v3489_v18 = vadd.f32 %v3488_v33, %v3435_v41 }
 0x692   : > { %v3493_v15 = vpop.f32.mrf.mxu2  ;;  %4986 = vmatmul.msk.bf16.gmra.mxu1 %vm4985_vm2, %v6788_v28 }
 0x697   : > { %v3437_v39 = vpop.f32.mrf.mxu1 }
 0x698   : > { %v3491_v31 = vadd.f32 %v3490_v29, %v3437_v39 }
 0x69a   : > { %v3504_v63 = vpack.c.bf16 %v3491_v31, %v3489_v18  ;;  %v3495_v30 = vpop.f32.mrf.mxu2  ;;  %v6853_v18 = vld [vmem:[#allocation30_spill] sm:$0xff]  ;;  %v4455_v31 = vsel %vm1034_vm1, %v6327_v4, 0 }
 0x69c   : > { %4971 = vmatmul.msk.bf16.gmra.mxu0 %vm1034_vm1, %v3504_v63  ;;  %v4410_v63 = vrot.slane %v6854_v0, 2 }
 0x69f   : > { %v3440_v16 = vpop.f32.mrf.mxu1  ;;  %4990 = vmatmul.msk.bf16.gmra.mxu2 %vm866_vm15, %v3971_v11  ;;  %v4452_v11 = vsel %vm1034_vm1, %v6315_v46, 0  ;;  %v4446_v46 = vsel %vm1034_vm1, %v6291_v20, 0  ;;  %vm4330_vm15 = vcmask 879616  }
 0x6a0   : > { %v3494_v37 = vadd.f32 %v3493_v15, %v3440_v16 }
 0x6a2   : > { %4988 = vmatmul.msk.bf16.gmra.mxu1 %vm4987_vm0, %v6788_v28  ;;  %v4061_v5 = vpop.f32.mrf.mxu2  ;;  %v3505_v51 = vpack.c.bf16 %v3494_v37, %v3494_v37 }
 0x6a7   : > { %v3442_v19 = vpop.f32.mrf.mxu1 }
 0x6a9   : > { %v6506_v57 = vpop.f32.mrf.mxu0 }
 0x6aa   : > { %v4063_v40 = vpop.f32.mrf.mxu2 }
 0x6ac   : > { %4972 = vmatmul.msk.bf16.gmra.mxu0 %vm1034_vm1, %v3505_v51 }
 0x6af   : > { %v4008_v43 = vpop.f32.mrf.mxu1 }
 0x6b0   : > { %v4062_v45 = vadd.f32 %v4061_v5, %v4008_v43 }
 0x6b1   : > { %v6509_v52 = vpop.f32.mrf.mxu0 }
 0x6b2   : > { %4047 = vmatmul.bf16.gmra.mxu1 %v6790_v9  ;;  %v4066_v14 = vpop.f32.mrf.mxu2  ;;  %v6851_v9 = vld [vmem:[#allocation2_spill] sm:$0xff] }
 0x6b3   : > { %v6852_v35 = vpack.c.b16 %v6850_v47, %v6851_v9 }
 0x6b5   : > { %v4335_v27 = vrot.slane %v6852_v35, 2  ;;  %v4485_v35 = vrot.slane %v6266_v62, 2 }
 0x6b7   : > { %v4010_v6 = vpop.f32.mrf.mxu1 }
 0x6b8   : > { %v4064_v33 = vadd.f32 %v4063_v40, %v4010_v6  ;;  %v4449_v40 = vsel %vm1034_vm1, %v6303_v13, 0  ;;  %v4443_v13 = vsel %vm1034_vm1, %v6279_v36, 0 }
 0x6b9   : > { %v6512_v38 = vpop.f32.mrf.mxu0 }
 0x6ba   : > { %v4105_v28 = vpack.c.bf16 %v4064_v33, %v4062_v45  ;;  %v4068_v22 = vpop.f32.mrf.mxu2 }
 0x6bc   : > { %5003 = vmatmul.msk.bf16.vlgmr.msrb.gmra.mxu3 %vm1034_vm1, %v4105_v28  ;;  %5013 = vmatmul.msk.bf16.vlgmr.msrb.gmra.mxu0 %vm1034_vm1, %v6849_v58 }
 0x6bd   : > { %4464 = vmatpush.bf16.xpose.msrb.mxu0 %v4461_v61 }
 0x6bf   : > { %v4013_v7 = vpop.f32.mrf.mxu1 }
 0x6c0   : > { %v4067_v24 = vadd.f32 %v4066_v14, %v4013_v7 }
 0x6c1   : > { %v6522_v29 = vpop.f32.mrf.mxu0 }
 0x6c2   : > { %v4071_v23 = vpop.f32.mrf.mxu2  ;;  %5014 = vmatmul.msk.bf16.vlgmr.msrb.gmra.mxu1 %vm1034_vm1, %v4335_v27 }
 0x6c3   : > { %4490 = vmatpush.bf16.xpose.msrb.mxu1 %v4461_v61 }
 0x6c5   : > { %4465 = vmatpush.bf16.xpose.msrb.mxu0 %v4458_v25 }
 0x6c7   : > { %v4015_v41 = vpop.f32.mrf.mxu1 }
 0x6c8   : > { %v4069_v15 = vadd.f32 %v4068_v22, %v4015_v41 }
 0x6c9   : > { %v6527_v53 = vpop.f32.mrf.mxu0 }
 0x6ca   : > { %v4106_v39 = vpack.c.bf16 %v4069_v15, %v4067_v24  ;;  %v4073_v54 = vpop.f32.mrf.mxu2 }
 0x6cb   : > { %4491 = vmatpush.bf16.xpose.msrb.mxu1 %v4458_v25 }
 0x6cc   : > { %5004 = vmatmul.msk.bf16.gmra.mxu3 %vm1034_vm1, %v4106_v39  ;;  %5017 = vmatmul.msk.bf16.vlgmr.msra.gmra.mxu0 %vm1034_vm1, %v6853_v18 }
 0x6cd   : > { %4466 = vmatpush.bf16.xpose.msrb.mxu0 %v4455_v31 }
 0x6cf   : > { %v4018_v55 = vpop.f32.mrf.mxu1 }
 0x6d0   : > { %v4072_v5 = vadd.f32 %v4071_v23, %v4018_v55 }
 0x6d1   : > { %v6535_v30 = vpop.f32.mrf.mxu0 }
 0x6d2   : > { %v4076_v42 = vpop.f32.mrf.mxu2  ;;  %5020 = vmatmul.msk.bf16.vlgmr.msra.gmra.mxu1 %vm1034_vm1, %v4410_v63 }
 0x6d3   : > { %4492 = vmatpush.bf16.xpose.msrb.mxu1 %v4455_v31 }
 0x6d5   : > { %4467 = vmatpush.bf16.xpose.msrb.mxu0 %v4452_v11 }
 0x6d7   : > { %v4020_v16 = vpop.f32.mrf.mxu1 }
 0x6d8   : > { %v4074_v37 = vadd.f32 %v4073_v54, %v4020_v16 }
 0x6d9   : > { %v6540_v19 = vpop.f32.mrf.mxu0 }
 0x6da   : > { %v4107_v4 = vpack.c.bf16 %v4074_v37, %v4072_v5  ;;  %v4078_v51 = vpop.f32.mrf.mxu2 }
 0x6db   : > { %4493 = vmatpush.bf16.xpose.msrb.mxu1 %v4452_v11 }
 0x6dc   : > { %5005 = vmatmul.msk.bf16.gmra.mxu3 %vm1034_vm1, %v4107_v4 }
 0x6dd   : > { %4468 = vmatpush.bf16.xpose.msrb.mxu0 %v4449_v40 }
 0x6df   : > { %v4023_v43 = vpop.f32.mrf.mxu1 }
 0x6e0   : > { %v4077_v33 = vadd.f32 %v4076_v42, %v4023_v43 }
 0x6e1   : > { %v6545_v14 = vpop.f32.mrf.mxu0 }
 0x6e2   : > { %v4081_v6 = vpop.f32.mrf.mxu2 }
 0x6e3   : > { %4494 = vmatpush.bf16.xpose.msrb.mxu1 %v4449_v40 }
 0x6e5   : > { %4469 = vmatpush.bf16.xpose.msrb.mxu0 %v4446_v46 }
 0x6e7   : > { %v4025_v45 = vpop.f32.mrf.mxu1 }
 0x6e8   : > { %v4079_v28 = vadd.f32 %v4078_v51, %v4025_v45 }
 0x6e9   : > { %v6549_v22 = vpop.f32.mrf.mxu0 }
 0x6ea   : > { %v4108_v58 = vpack.c.bf16 %v4079_v28, %v4077_v33  ;;  %v4083_v61 = vpop.f32.mrf.mxu2 }
 0x6eb   : > { %4495 = vmatpush.bf16.xpose.msrb.mxu1 %v4446_v46 }
 0x6ec   : > { %5006 = vmatmul.msk.bf16.gmra.mxu3 %vm1034_vm1, %v4108_v58 }
 0x6ed   : > { %4470 = vmatpush.bf16.xpose.msrb.mxu0 %v4443_v13 }
 0x6ef   : > { %v4028_v7 = vpop.f32.mrf.mxu1 }
 0x6f0   : > { %v4082_v27 = vadd.f32 %v4081_v6, %v4028_v7 }
 0x6f1   : > { %v6554_v47 = vpop.f32.mrf.mxu0 }
 0x6f2   : > { %v4086_v9 = vpop.f32.mrf.mxu2 }
 0x6f3   : > { %4496 = vmatpush.bf16.xpose.msrb.mxu1 %v4443_v13 }
 0x6f4   : > { %5023 = vmatmul.msk.bf16.vlgmr.msrb.gmra.mxu0 %vm1034_vm1, %v6259_v26 }
 0x6f7   : > { %v4030_v20 = vpop.f32.mrf.mxu1 }
 0x6f8   : > { %v4084_v23 = vadd.f32 %v4083_v61, %v4030_v20 }
 0x6f9   : > { %v6559_v25 = vpop.f32.mrf.mxu0 }
 0x6fa   : > { %v4109_v41 = vpack.c.bf16 %v4084_v23, %v4082_v27  ;;  %5026 = vmatmul.msk.bf16.vlgmr.msrb.gmra.mxu1 %vm1034_vm1, %v4485_v35  ;;  %v4088_v36 = vpop.f32.mrf.mxu2 }
 0x6fc   : > { %5007 = vmatmul.msk.bf16.gmra.mxu3 %vm1034_vm1, %v4109_v41 }
 0x6ff   : > { %v4033_v24 = vpop.f32.mrf.mxu1 }
 0x700   : > { %v4087_v18 = vadd.f32 %v4086_v9, %v4033_v24 }
 0x701   : > { %v6563_v15 = vpop.f32.mrf.mxu0 }
 0x702   : > { %v4091_v39 = vpop.f32.mrf.mxu2 }
 0x707   : > { %v4035_v54 = vpop.f32.mrf.mxu1 }
 0x708   : > { %v4089_v26 = vadd.f32 %v4088_v36, %v4035_v54  ;;  %v3656_v36 = vadd.f32 %v6506_v57, %v6350_v34  ;;  %v3658_v57 = vadd.f32 %v6509_v52, %v6356_v50  ;;  %v3661_v50 = vadd.f32 %v6512_v38, %v6361_v44 }
 0x709   : > { %v6565_v31 = vpop.f32.mrf.mxu0  ;;  %v3663_v38 = vadd.f32 %v6522_v29, %v6367_v32 }
 0x70a   : > { %v4110_v62 = vpack.c.bf16 %v4089_v26, %v4087_v18  ;;  %v4093_v55 = vpop.f32.mrf.mxu2  ;;  %v6592_v18 = vld [vmem:[%s6704_s4 + $0x2] ss:$0 sm:$0xff] }
 0x70c   : > { %5008 = vmatmul.msk.bf16.gmra.mxu3 %vm1034_vm1, %v4110_v62 }
 0x70f   : > { %v4038_v0 = vpop.f32.mrf.mxu1 }
 0x710   : > { %v4092_v16 = vadd.f32 %v4091_v39, %v4038_v0 }
 0x711   : > { %v6568_v63 = vpop.f32.mrf.mxu0 }
 0x712   : > { %v4096_v42 = vpop.f32.mrf.mxu2 }
 0x717   : > { %v4040_v11 = vpop.f32.mrf.mxu1 }
 0x718   : > { %v4094_v5 = vadd.f32 %v4093_v55, %v4040_v11 }
 0x719   : > { %v6570_v37 = vpop.f32.mrf.mxu0 }
 0x71a   : > { %v4111_v4 = vpack.c.bf16 %v4094_v5, %v4092_v16  ;;  %v4098_v51 = vpop.f32.mrf.mxu2 }
 0x71c   : > { %5009 = vmatmul.msk.bf16.gmra.mxu3 %vm1034_vm1, %v4111_v4 }
 0x71f   : > { %v4043_v40 = vpop.f32.mrf.mxu1 }
 0x720   : > { %v4097_v45 = vadd.f32 %v4096_v42, %v4043_v40 }
 0x721   : > { %v6573_v43 = vpop.f32.mrf.mxu0 }
 0x722   : > { %v4101_v6 = vpop.f32.mrf.mxu2 }
 0x727   : > { %v4045_v46 = vpop.f32.mrf.mxu1 }
 0x728   : > { %v4099_v33 = vadd.f32 %v4098_v51, %v4045_v46 }
 0x729   : > { %v6575_v28 = vpop.f32.mrf.mxu0 }
 0x72a   : > { %v4112_v58 = vpack.c.bf16 %v4099_v33, %v4097_v45  ;;  %v4103_v61 = vpop.f32.mrf.mxu2 }
 0x72c   : > { %5010 = vmatmul.msk.bf16.gmra.mxu3 %vm1034_vm1, %v4112_v58 }
 0x72f   : > { %v4048_v13 = vpop.f32.mrf.mxu1 }
 0x730   : > { %v4102_v9 = vadd.f32 %v4101_v6, %v4048_v13 }
 0x731   : > { %v3697_v7 = vpop.f32.mrf.mxu0 }
 0x732   : > { %v4113_v27 = vpack.c.bf16 %v4102_v9, %v4102_v9 }
 0x737   : > { %v4050_v20 = vpop.f32.mrf.mxu1 }
 0x739   : > { %v4321_v35 = vpop.f32.mrf.mxu0 }
 0x73a   : > { %v4326_v23 = vmul.f32 0.17677669, %v4321_v35 }
 0x73c   : > { %v4328_v41 = vpack.c.bf16 %v4326_v23, %v4326_v23  ;;  %5011 = vmatmul.msk.bf16.gmra.mxu3 %vm1034_vm1, %v4113_v27 }
 0x73e   : > { %4331 = vst.msk [vmem:[%s6582_s30] sm:$0xf] %vm4330_vm15, %v4328_v41 }
 0x73f   : > { %v4167_v24 = vpop.f32.mrf.mxu3  ;;  %v4348_v39 = vpop.f32.mrf.mxu1 }
 0x740   : > { %v4211_v54 = vadd.f32 %v4167_v24, %v3656_v36  ;;  %v4353_v26 = vmul.f32 0.17677669, %v4348_v39 }
 0x741   : > { %v4323_v62 = vpop.f32.mrf.mxu0 }
 0x742   : > { %v4355_v55 = vpack.c.bf16 %v4353_v26, %v4353_v26  ;;  %v4327_v0 = vmul.f32 0.17677669, %v4323_v62  ;;  %v4233_v42 = vadd.f32 %v6592_v18, %v4211_v54 }
 0x744   : > { %5015 = vst.msk [vmem:[%s6582_s30 + $0x20] sm:$0xf] %vm4330_vm15, %v4355_v55  ;;  %v4329_v34 = vpack.c.bf16 %v4327_v0, %v4327_v0  ;;  %v4250_v5 = vmax.f32 %v4233_v42, 0.0 }
 0x746   : > { %4333 = vst.msk [vmem:[%s6582_s30 + $0x4] sm:$0x3] %vm4332_vm11, %v4329_v34  ;;  %v4267_v33 = vpack.c.bf16 %v4250_v5, %v4250_v5  ;;  %v3666_v5 = vadd.f32 %v6527_v53, %v6373_v3  ;;  %v3671_v53 = vadd.f32 %v6540_v19, %v6385_v59 }
 0x747   : > { %v4169_v11 = vpop.f32.mrf.mxu3  ;;  %v4350_v16 = vpop.f32.mrf.mxu1 }
 0x748   : > { %v4212_v4 = vadd.f32 %v4169_v11, %v3658_v57  ;;  %v4354_v51 = vmul.f32 0.17677669, %v4350_v16  ;;  %v4512_v9 = vunpack.c.l.b16 %v4267_v33 }
 0x749   : > { %v4397_v40 = vpop.f32.mrf.mxu0 }
 0x74a   : > { %v4234_v6 = vadd.f32 %v6592_v18, %v4212_v4  ;;  %v4356_v46 = vpack.c.bf16 %v4354_v51, %v4354_v51  ;;  %v4402_v45 = vmul.f32 0.17677669, %v4397_v40 }
 0x74c   : > { %v4251_v58 = vmax.f32 %v4234_v6, 0.0  ;;  %5016 = vst.msk [vmem:[%s6582_s30 + $0x24] sm:$0x3] %vm4332_vm11, %v4356_v46  ;;  %v4404_v61 = vpack.c.bf16 %v4402_v45, %v4402_v45  ;;  %v3668_v46 = vadd.f32 %v6535_v30, %v6380_v12 }
 0x74e   : > { %v4268_v52 = vpack.c.bf16 %v4251_v58, %v4251_v58  ;;  %5018 = vst.msk [vmem:[%s6582_s30 + $0x8] sm:$0xf] %vm4330_vm15, %v4404_v61 }
 0x74f   : > { %v4172_v13 = vpop.f32.mrf.mxu3  ;;  %v4423_v7 = vpop.f32.mrf.mxu1 }
 0x750   : > { %v4513_v20 = vunpack.c.l.b16 %v4268_v52  ;;  %v4213_v35 = vadd.f32 %v4172_v13, %v3661_v50  ;;  %v4428_v27 = vmul.f32 0.17677669, %v4423_v7 }
 0x751   : > { %v4399_v23 = vpop.f32.mrf.mxu0 }
 0x752   : > { %v6608_v41 = vpack.c.b16 %v4513_v20, %v4512_v9  ;;  %v4235_v36 = vadd.f32 %v6592_v18, %v4213_v35  ;;  %v4430_v24 = vpack.c.bf16 %v4428_v27, %v4428_v27  ;;  %v4403_v39 = vmul.f32 0.17677669, %v4399_v23 }
 0x754   : > { %v4252_v54 = vmax.f32 %v4235_v36, 0.0  ;;  %5021 = vst.msk [vmem:[%s6582_s30 + $0x28] sm:$0xf] %vm4330_vm15, %v4430_v24  ;;  %v4405_v44 = vpack.c.bf16 %v4403_v39, %v4403_v39  ;;  %v3673_v36 = vadd.f32 %v6545_v14, %v6390_v17 }
 0x756   : > { %v4269_v26 = vpack.c.bf16 %v4252_v54, %v4252_v54  ;;  %5019 = vst.msk [vmem:[%s6582_s30 + $0xc] sm:$0x3] %vm4332_vm11, %v4405_v44 }
 0x757   : > { %v4174_v62 = vpop.f32.mrf.mxu3  ;;  %v4425_v55 = vpop.f32.mrf.mxu1 }
 0x758   : > { %v4596_v0 = vunpack.c.l.b16 %v4269_v26  ;;  %v4214_v42 = vadd.f32 %v4174_v62, %v3663_v38  ;;  %v4429_v34 = vmul.f32 0.17677669, %v4425_v55 }
 0x75a   : > { %v6617_v57 = vpack.c.b16 %v4596_v0, %v4513_v20  ;;  %v4431_v11 = vpack.c.bf16 %v4429_v34, %v4429_v34  ;;  %v4236_v16 = vadd.f32 %v6592_v18, %v4214_v42  ;;  %v3676_v42 = vadd.f32 %v6549_v22, %v6395_v56 }
 0x75c   : > { %5022 = vst.msk [vmem:[%s6582_s30 + $0x2c] sm:$0x3] %vm4332_vm11, %v4431_v11  ;;  %v4253_v32 = vmax.f32 %v4236_v16, 0.0 }
 0x75e   : > { %v4270_v40 = vpack.c.bf16 %v4253_v32, %v4253_v32 }
 0x75f   : > { %v4177_v4 = vpop.f32.mrf.mxu3 }
 0x760   : > { %v4215_v29 = vadd.f32 %v4177_v4, %v3666_v5  ;;  %v4529_v58 = vunpack.c.l.b16 %v4270_v40 }
 0x762   : > { %v4237_v51 = vadd.f32 %v6592_v18, %v4215_v29 }
 0x764   : > { %v4254_v6 = vmax.f32 %v4237_v51, 0.0 }
 0x766   : > { %v4271_v45 = vpack.c.bf16 %v4254_v6, %v4254_v6  ;;  %v3678_v6 = vadd.f32 %v6554_v47, %v6400_v21  ;;  %v3683_v21 = vadd.f32 %v6563_v15, %v6410_v1  ;;  %v3688_v1 = vadd.f32 %v6568_v63, %v6418_v10 }
 0x767   : > { %v4179_v33 = vpop.f32.mrf.mxu3  ;;  %v3693_v10 = vadd.f32 %v6573_v43, %v6429_v2 }
 0x768   : > { %v4530_v61 = vunpack.c.l.b16 %v4271_v45  ;;  %v4216_v50 = vadd.f32 %v4179_v33, %v3668_v46 }
 0x76a   : > { %v6627_v52 = vpack.c.b16 %v4530_v61, %v4529_v58  ;;  %v4238_v3 = vadd.f32 %v6592_v18, %v4216_v50  ;;  %v3681_v50 = vadd.f32 %v6559_v25, %v6405_v48  ;;  %v3686_v48 = vadd.f32 %v6565_v31, %v6414_v8 }
 0x76b   : > { %v3691_v8 = vadd.f32 %v6570_v37, %v6423_v60  ;;  %v3696_v60 = vadd.f32 %v6575_v28, %v6433_v49 }
 0x76c   : > { %v4255_v7 = vmax.f32 %v4238_v3, 0.0 }
 0x76e   : > { %v4272_v30 = vpack.c.bf16 %v4255_v7, %v4255_v7 }
 0x76f   : > { %v4182_v13 = vpop.f32.mrf.mxu3 }
 0x770   : > { %v4217_v9 = vadd.f32 %v4182_v13, %v3671_v53  ;;  %v4531_v19 = vunpack.c.l.b16 %v4272_v30 }
 0x771   : > { %v4472_v20 = vpop.f32.mrf.mxu0 }
 0x772   : > { %v4239_v35 = vadd.f32 %v6592_v18, %v4217_v9  ;;  %v4477_v12 = vmul.f32 0.17677669, %v4472_v20 }
 0x774   : > { %v4256_v27 = vmax.f32 %v4239_v35, 0.0  ;;  %v4479_v23 = vpack.c.bf16 %v4477_v12, %v4477_v12 }
 0x776   : > { %v4273_v24 = vpack.c.bf16 %v4256_v27, %v4256_v27  ;;  %5024 = vst.msk [vmem:[%s6582_s30 + $0x10] sm:$0xf] %vm4330_vm15, %v4479_v23 }
 0x777   : > { %v4498_v39 = vpop.f32.mrf.mxu1  ;;  %v4184_v59 = vpop.f32.mrf.mxu3 }
 0x778   : > { %v4532_v54 = vunpack.c.l.b16 %v4273_v24  ;;  %v4503_v44 = vmul.f32 0.17677669, %v4498_v39  ;;  %v4218_v38 = vadd.f32 %v4184_v59, %v3673_v36 }
 0x779   : > { %v4474_v26 = vpop.f32.mrf.mxu0 }
 0x77a   : > { %v4505_v62 = vpack.c.bf16 %v4503_v44, %v4503_v44  ;;  %v4478_v55 = vmul.f32 0.17677669, %v4474_v26  ;;  %v6637_v0 = vpack.c.b16 %v4532_v54, %v4531_v19  ;;  %v4240_v17 = vadd.f32 %v6592_v18, %v4218_v38 }
 0x77c   : > { %5027 = vst.msk [vmem:[%s6582_s30 + $0x30] sm:$0xf] %vm4330_vm15, %v4505_v62  ;;  %v4480_v14 = vpack.c.bf16 %v4478_v55, %v4478_v55  ;;  %v4257_v16 = vmax.f32 %v4240_v17, 0.0 }
 0x77e   : > { %5025 = vst.msk [vmem:[%s6582_s30 + $0x14] sm:$0x3] %vm4332_vm11, %v4480_v14  ;;  %v4274_v51 = vpack.c.bf16 %v4257_v16, %v4257_v16 }
 0x77f   : > { %v4500_v34 = vpop.f32.mrf.mxu1  ;;  %v4187_v11 = vpop.f32.mrf.mxu3 }
 0x780   : > { %v4504_v5 = vmul.f32 0.17677669, %v4500_v34  ;;  %v4219_v4 = vadd.f32 %v4187_v11, %v3676_v42  ;;  %v4533_v56 = vunpack.c.l.b16 %v4274_v51 }
 0x782   : > { %v4506_v32 = vpack.c.bf16 %v4504_v5, %v4504_v5  ;;  %v4241_v29 = vadd.f32 %v6592_v18, %v4219_v4 }
 0x784   : > { %5028 = vst.msk [vmem:[%s6582_s30 + $0x34] sm:$0x3] %vm4332_vm11, %v4506_v32  ;;  %v4258_v40 = vmax.f32 %v4241_v29, 0.0 }
 0x786   : > { %v4275_v46 = vpack.c.bf16 %v4258_v40, %v4258_v40 }
 0x787   : > { %v4189_v45 = vpop.f32.mrf.mxu3 }
 0x788   : > { %v4534_v22 = vunpack.c.l.b16 %v4275_v46  ;;  %v4220_v33 = vadd.f32 %v4189_v45, %v3678_v6 }
 0x78a   : > { %v6651_v58 = vpack.c.b16 %v4534_v22, %v4533_v56  ;;  %v4242_v61 = vadd.f32 %v6592_v18, %v4220_v33 }
 0x78c   : > { %v4259_v53 = vmax.f32 %v4242_v61, 0.0 }
 0x78e   : > { %v4276_v9 = vpack.c.bf16 %v4259_v53, %v4259_v53 }
 0x78f   : > { %v4192_v3 = vpop.f32.mrf.mxu3 }
 0x790   : > { %v4221_v13 = vadd.f32 %v4192_v3, %v3681_v50  ;;  %v4535_v12 = vunpack.c.l.b16 %v4276_v9  ;;  %v4598_v9 = vrot.slane %v6617_v57, 2 }
 0x792   : > { %v4243_v7 = vadd.f32 %v6592_v18, %v4221_v13  ;;  %v4557_v13 = vsel %vm1034_vm1, %v6637_v0, 0 }
 0x794   : > { %v4260_v20 = vmax.f32 %v4243_v7, 0.0  ;;  %v4554_v7 = vsel %vm1034_vm1, %v6627_v52, 0 }
 0x796   : > { %v4277_v47 = vpack.c.bf16 %v4260_v20, %v4260_v20 }
 0x797   : > { %v4194_v35 = vpop.f32.mrf.mxu3 }
 0x798   : > { %v4536_v30 = vunpack.c.l.b16 %v4277_v47  ;;  %v4222_v27 = vadd.f32 %v4194_v35, %v3683_v21 }
 0x79a   : > { %v4546_v23 = vpack.c.b16 %v4536_v30, %v4535_v12  ;;  %v4244_v36 = vadd.f32 %v6592_v18, %v4222_v27 }
 0x79c   : > { %v4261_v24 = vmax.f32 %v4244_v36, 0.0  ;;  %v4563_v28 = vsel %vm1034_vm1, %v4546_v23, 0 }
 0x79e   : > { %v4278_v19 = vpack.c.bf16 %v4261_v24, %v4261_v24 }
 0x79f   : > { %v4197_v25 = vpop.f32.mrf.mxu3 }
 0x7a0   : > { %v4223_v39 = vadd.f32 %v4197_v25, %v3686_v48  ;;  %v4537_v38 = vunpack.c.l.b16 %v4278_v19 }
 0x7a2   : > { %v4245_v59 = vadd.f32 %v6592_v18, %v4223_v39 }
 0x7a4   : > { %v4262_v54 = vmax.f32 %v4245_v59, 0.0 }
 0x7a6   : > { %v4279_v15 = vpack.c.bf16 %v4262_v54, %v4262_v54 }
 0x7a7   : > { %v4199_v44 = vpop.f32.mrf.mxu3 }
 0x7a8   : > { %v4538_v26 = vunpack.c.l.b16 %v4279_v15  ;;  %v4224_v62 = vadd.f32 %v4199_v44, %v3688_v1 }
 0x7aa   : > { %v4547_v55 = vpack.c.b16 %v4538_v26, %v4537_v38  ;;  %v4246_v17 = vadd.f32 %v6592_v18, %v4224_v62 }
 0x7ac   : > { %v4263_v14 = vmax.f32 %v4246_v17, 0.0  ;;  %v4566_v49 = vsel %vm1034_vm1, %v4547_v55, 0 }
 0x7ae   : > { %v4280_v11 = vpack.c.bf16 %v4263_v14, %v4263_v14 }
 0x7af   : > { %v4202_v31 = vpop.f32.mrf.mxu3 }
 0x7b0   : > { %v4225_v42 = vadd.f32 %v4202_v31, %v3691_v8  ;;  %v4539_v4 = vunpack.c.l.b16 %v4280_v11 }
 0x7b2   : > { %v4247_v34 = vadd.f32 %v6592_v18, %v4225_v42 }
 0x7b4   : > { %v4264_v16 = vmax.f32 %v4247_v34, 0.0 }
 0x7b6   : > { %v4281_v63 = vpack.c.bf16 %v4264_v16, %v4264_v16 }
 0x7b7   : > { %v4204_v5 = vpop.f32.mrf.mxu3 }
 0x7b8   : > { %v4540_v32 = vunpack.c.l.b16 %v4281_v63  ;;  %v4226_v29 = vadd.f32 %v4204_v5, %v3693_v10 }
 0x7ba   : > { %v4548_v51 = vpack.c.b16 %v4540_v32, %v4539_v4  ;;  %v4248_v40 = vadd.f32 %v6592_v18, %v4226_v29 }
 0x7bc   : > { %v4265_v6 = vmax.f32 %v4248_v40, 0.0  ;;  %v4569_v53 = vsel %vm1034_vm1, %v4548_v51, 0 }
 0x7be   : > { %v4282_v56 = vpack.c.bf16 %v4265_v6, %v4265_v6 }
 0x7bf   : > { %v4207_v37 = vpop.f32.mrf.mxu3 }
 0x7c0   : > { %v4227_v46 = vadd.f32 %v4207_v37, %v3696_v60  ;;  %v4541_v43 = vunpack.c.l.b16 %v4282_v56 }
 0x7c2   : > { %v4249_v45 = vadd.f32 %v6592_v18, %v4227_v46  ;;  %v4560_v18 = vsel %vm1034_vm1, %v6651_v58, 0 }
 0x7c4   : > { %v4266_v22 = vmax.f32 %v4249_v45, 0.0 }
 0x7c6   : > { %v4283_v33 = vpack.c.bf16 %v4266_v22, %v4266_v22 }
 0x7c7   : > { %v4209_v2 = vpop.f32.mrf.mxu3 }
 0x7c8   : > { %v4542_v61 = vunpack.c.l.b16 %v4283_v33 }
 0x7ca   : > { %v4549_v50 = vpack.c.b16 %v4542_v61, %v4541_v43 }
 0x7cc   : > { %v4572_v3 = vsel %vm1034_vm1, %v4549_v50, 0 }
 0x7cd   : > { %4575 = vmatpush.bf16.xpose.msra.mxu2 %v4572_v3  ;;  %4603 = vmatpush.bf16.xpose.msra.mxu3 %v4572_v3 }
 0x7d5   : > { %4576 = vmatpush.bf16.xpose.msra.mxu2 %v4569_v53  ;;  %4604 = vmatpush.bf16.xpose.msra.mxu3 %v4569_v53 }
 0x7dd   : > { %4577 = vmatpush.bf16.xpose.msra.mxu2 %v4566_v49  ;;  %4605 = vmatpush.bf16.xpose.msra.mxu3 %v4566_v49 }
 0x7e5   : > { %4578 = vmatpush.bf16.xpose.msra.mxu2 %v4563_v28  ;;  %4606 = vmatpush.bf16.xpose.msra.mxu3 %v4563_v28 }
 0x7ed   : > { %4579 = vmatpush.bf16.xpose.msra.mxu2 %v4560_v18  ;;  %4607 = vmatpush.bf16.xpose.msra.mxu3 %v4560_v18 }
 0x7f5   : > { %4580 = vmatpush.bf16.xpose.msra.mxu2 %v4557_v13  ;;  %4608 = vmatpush.bf16.xpose.msra.mxu3 %v4557_v13 }
 0x7fd   : > { %4581 = vmatpush.bf16.xpose.msra.mxu2 %v4554_v7  ;;  %4609 = vmatpush.bf16.xpose.msra.mxu3 %v4554_v7 }
 0x804   : > { %5029 = vmatmul.msk.bf16.vlgmr.msra.gmra.mxu2 %vm1034_vm1, %v6608_v41  ;;  %5032 = vmatmul.msk.bf16.vlgmr.msra.gmra.mxu3 %vm1034_vm1, %v4598_v9 }
 0x887   : > { %v4583_v58 = vpop.f32.mrf.mxu2  ;;  %v4611_v20 = vpop.f32.mrf.mxu3 }
 0x888   : > { %v4588_v0 = vmul.f32 0.17677669, %v4583_v58  ;;  %v4616_v21 = vmul.f32 0.17677669, %v4611_v20 }
 0x88a   : > { %v4590_v47 = vpack.c.bf16 %v4588_v0, %v4588_v0  ;;  %v4618_v35 = vpack.c.bf16 %v4616_v21, %v4616_v21 }
 0x88c   : > { %5030 = vst.msk [vmem:[%s6582_s30 + $0x18] sm:$0xf] %vm4330_vm15, %v4590_v47 }
 0x88d   : > { %5033 = vst.msk [vmem:[%s6582_s30 + $0x38] sm:$0xf] %vm4330_vm15, %v4618_v35 }
 0x88f   : > { %v4585_v52 = vpop.f32.mrf.mxu2  ;;  %v4613_v12 = vpop.f32.mrf.mxu3 }
 0x890   : > { %v4589_v57 = vmul.f32 0.17677669, %v4585_v52  ;;  %v4617_v30 = vmul.f32 0.17677669, %v4613_v12 }
 0x892   : > { %v4591_v27 = vpack.c.bf16 %v4589_v57, %v4589_v57  ;;  %v4619_v41 = vpack.c.bf16 %v4617_v30, %v4617_v30 }
 0x894   : > { %5031 = vst.msk [vmem:[%s6582_s30 + $0x1c] sm:$0x3] %vm4332_vm11, %v4591_v27 }
 0x895   : > { %5034 = vst.msk [vmem:[%s6582_s30 + $0x3c] sm:$0x3] %vm4332_vm11, %v4619_v41 }
 0x896 PF: > { %s15_s18 = sadd.s32 1, %s5102_s18  }
 0x897   : > { %p12_p5 = scmp.ge.s32.totalorder %s15_s18, 4  }
 0x899   :  { %14 = sbr.rel (!%p12_p5) target bundleno = 1 (0x1), region = 87 }

// kernel: fim_forward.3
= control target key start
LH: loop header
LB: loop body
LE: loop exit
PB: predicated region body
PF: predicated region fallthrough
CT: control target
= control target key end

     0   :  { %vm1755_vm0 = vcmask 1045504   ;;  %v4532_v29 = vmov 0   ;;  %vm1748_vm1 = vcmask 883712   ;;  %vm2862_vm2 = vcmask 523264   ;;  %s7186_s1 = inlined_call_operand.vmem [shape: bf16[108,5184], index: 1, kind: input, shape index: {}]   ;;  %s7187_s2 = inlined_call_operand.vmem [shape: f32[32,1], index: 2, kind: input, shape index: {}]   ;;  %s7188_s0 = inlined_call_operand.vmem [shape: bf16[32,108], index: 0, kind: input, shape index: {}]   ;;  %s7189_s3 = inlined_call_operand.vmem [shape: f32[32,5184], index: 3, kind: output, shape index: {}]  }
   0x1   :  { %v3985_v0 = vld [vmem:[%s7186_s1 + $0x7b0] sm:$0xf]  ;;  %v4497_v1 = vld [vmem:[%s7186_s1 + $0x850] sm:$0x30]  ;;  %v3987_v4 = vld [vmem:[%s7186_s1 + $0x854] sm:$0x30]  ;;  %4526 = vset.pattern.permute.xlu0 %v4532_v29  ;;  %4527 = vset.pattern.permute.xlu1 %v4532_v29 }
   0x2   :  { %v4477_v2 = vld [vmem:[%s7186_s1 + $0x7b4] sm:$0xf]  ;;  %v3986_v3 = vor.u32 %v4497_v1, %v3985_v0  ;;  %v3993_v5 = vld [vmem:[%s7186_s1 + $0x7b8] sm:$0xf]  ;;  %v4498_v6 = vld [vmem:[%s7186_s1 + $0x858] sm:$0x30] }
   0x3   :  { %v3990_v7 = vor.u32 %v4477_v2, %v3987_v4  ;;  %v3994_v8 = vor.u32 %v4498_v6, %v3993_v5  ;;  %v4478_v9 = vld [vmem:[%s7186_s1 + $0x7bc] sm:$0xf]  ;;  %v3995_v10 = vld [vmem:[%s7186_s1 + $0x85c] sm:$0x30]  ;;  %v3821_v11 = vld [vmem:[%s7186_s1 + $0x668] sm:$0xf] }
   0x4   :  { %v1757_v12 = vsel %vm1755_vm0, %v3986_v3, 0  ;;  %v3998_v13 = vor.u32 %v4478_v9, %v3995_v10  ;;  %v4456_v14 = vld [vmem:[%s7186_s1 + $0x708] sm:$0xf0]  ;;  %v3823_v19 = vld [vmem:[%s7186_s1 + $0x70c] sm:$0xf0] }
   0x5   :  { %v4436_v15 = vld [vmem:[%s7186_s1 + $0x66c] sm:$0xf]  ;;  %1880 = vmatpush.bf16.msra.mxu0 %v1757_v12  ;;  %v1760_v16 = vsel %vm1755_vm0, %v3990_v7, 0  ;;  %v1763_v17 = vsel %vm1755_vm0, %v3994_v8, 0  ;;  %v3822_v18 = vor.u32 %v4456_v14, %v3821_v11  ;;  %v3829_v20 = vld [vmem:[%s7186_s1 + $0x670] sm:$0xf] }
   0x6   :  { %1899 = vmatpush.bf16.msra.mxu1 %v1760_v16  ;;  %1918 = vmatpush.bf16.msra.mxu2 %v1763_v17  ;;  %v1766_v21 = vsel %vm1755_vm0, %v3998_v13, 0  ;;  %v3826_v22 = vor.u32 %v4436_v15, %v3823_v19  ;;  %v4457_v23 = vld [vmem:[%s7186_s1 + $0x710] sm:$0xf0]  ;;  %v3831_v26 = vld [vmem:[%s7186_s1 + $0x714] sm:$0xf0] }
   0x7   :  { %v4437_v24 = vld [vmem:[%s7186_s1 + $0x674] sm:$0xf]  ;;  %1937 = vmatpush.bf16.msra.mxu3 %v1766_v21  ;;  %v3830_v25 = vor.u32 %v4457_v23, %v3829_v20  ;;  %v3657_v27 = vld [vmem:[%s7186_s1 + $0x520] sm:$0xf]  ;;  %v4415_v28 = vld [vmem:[%s7186_s1 + $0x5c0] sm:$0xf0] }
   0x8   :  { %v3834_v30 = vor.u32 %v4437_v24, %v3831_v26  ;;  %v4395_v31 = vld [vmem:[%s7186_s1 + $0x524] sm:$0xf]  ;;  %v3659_v32 = vld [vmem:[%s7186_s1 + $0x5c4] sm:$0xf0]  ;;  %v3658_v34 = vor.u32 %v4415_v28, %v3657_v27  ;;  %v4416_v35 = vld [vmem:[%s7186_s1 + $0x5c8] sm:$0xf0] }
   0x9   :  { %v3665_v33 = vld [vmem:[%s7186_s1 + $0x528] sm:$0xf]  ;;  %1881 = vmatpush.bf16.msra.mxu0 %v3822_v18  ;;  %v4396_v36 = vld [vmem:[%s7186_s1 + $0x52c] sm:$0xf]  ;;  %v3667_v37 = vld [vmem:[%s7186_s1 + $0x5cc] sm:$0xf0]  ;;  %v3662_v38 = vor.u32 %v4395_v31, %v3659_v32 }
   0xa   :  { %1900 = vmatpush.bf16.msra.mxu1 %v3826_v22  ;;  %1919 = vmatpush.bf16.msra.mxu2 %v3830_v25  ;;  %v3666_v39 = vor.u32 %v4416_v35, %v3665_v33  ;;  %v3493_v40 = vld [vmem:[%s7186_s1 + $0x3d8] sm:$0xf]  ;;  %v4374_v41 = vld [vmem:[%s7186_s1 + $0x478] sm:$0xf0]  ;;  %v3670_v43 = vor.u32 %v4396_v36, %v3667_v37  ;;  %v3495_v44 = vld [vmem:[%s7186_s1 + $0x47c] sm:$0xf0] }
   0xb   :  { %v4354_v42 = vld [vmem:[%s7186_s1 + $0x3dc] sm:$0xf]  ;;  %1938 = vmatpush.bf16.msra.mxu3 %v3834_v30  ;;  %v3501_v45 = vld [vmem:[%s7186_s1 + $0x3e0] sm:$0xf]  ;;  %v4375_v46 = vld [vmem:[%s7186_s1 + $0x480] sm:$0xf0]  ;;  %v3494_v49 = vor.u32 %v4374_v41, %v3493_v40 }
   0xc   :  { %v4355_v47 = vld [vmem:[%s7186_s1 + $0x3e4] sm:$0xf]  ;;  %v3503_v48 = vld [vmem:[%s7186_s1 + $0x484] sm:$0xf0]  ;;  %v3498_v50 = vor.u32 %v4354_v42, %v3495_v44  ;;  %v3502_v51 = vor.u32 %v4375_v46, %v3501_v45  ;;  %v3329_v52 = vld [vmem:[%s7186_s1 + $0x290] sm:$0xf] }
   0xd   :  { %1882 = vmatpush.bf16.msra.mxu0 %v3658_v34  ;;  %v4333_v53 = vld [vmem:[%s7186_s1 + $0x330] sm:$0xf0]  ;;  %v3506_v55 = vor.u32 %v4355_v47, %v3503_v48  ;;  %v3331_v56 = vld [vmem:[%s7186_s1 + $0x334] sm:$0xf0]  ;;  %v4334_v58 = vld [vmem:[%s7186_s1 + $0x338] sm:$0xf0] }
   0xe   :  { %1901 = vmatpush.bf16.msra.mxu1 %v3662_v38  ;;  %1920 = vmatpush.bf16.msra.mxu2 %v3666_v39  ;;  %v4313_v54 = vld [vmem:[%s7186_s1 + $0x294] sm:$0xf]  ;;  %v3337_v57 = vld [vmem:[%s7186_s1 + $0x298] sm:$0xf]  ;;  %v4314_v59 = vld [vmem:[%s7186_s1 + $0x29c] sm:$0xf]  ;;  %v3330_v61 = vor.u32 %v4333_v53, %v3329_v52 }
   0xf   :  { %1939 = vmatpush.bf16.msra.mxu3 %v3670_v43  ;;  %v3339_v60 = vld [vmem:[%s7186_s1 + $0x33c] sm:$0xf0]  ;;  %v3165_v62 = vld [vmem:[%s7186_s1 + $0x148] sm:$0xf]  ;;  %v3334_v63 = vor.u32 %v4313_v54, %v3331_v56  ;;  %v3338_v0 = vor.u32 %v4334_v58, %v3337_v57  ;;  %v4292_v1 = vld [vmem:[%s7186_s1 + $0x1e8] sm:$0xf0] }
  0x10   :  { %v4272_v2 = vld [vmem:[%s7186_s1 + $0x14c] sm:$0xf]  ;;  %v3167_v3 = vld [vmem:[%s7186_s1 + $0x1ec] sm:$0xf0]  ;;  %v3342_v4 = vor.u32 %v4314_v59, %v3339_v60  ;;  %v4293_v6 = vld [vmem:[%s7186_s1 + $0x1f0] sm:$0xf0]  ;;  %v3166_v11 = vor.u32 %v4292_v1, %v3165_v62 }
  0x11   :  { %1883 = vmatpush.bf16.msra.mxu0 %v3494_v49  ;;  %v3173_v5 = vld [vmem:[%s7186_s1 + $0x150] sm:$0xf]  ;;  %v4273_v7 = vld [vmem:[%s7186_s1 + $0x154] sm:$0xf]  ;;  %v3175_v8 = vld [vmem:[%s7186_s1 + $0x1f4] sm:$0xf0]  ;;  %v3170_v15 = vor.u32 %v4272_v2, %v3167_v3 }
  0x12   :  { %1902 = vmatpush.bf16.msra.mxu1 %v3498_v50  ;;  %1921 = vmatpush.bf16.msra.mxu2 %v3502_v51  ;;  %v3001_v9 = vld [vmem:[%s7186_s1] sm:$0xf]  ;;  %v4251_v10 = vld [vmem:[%s7186_s1 + $0xa0] sm:$0xf0]  ;;  %v3174_v16 = vor.u32 %v4293_v6, %v3173_v5  ;;  %v3003_v17 = vld [vmem:[%s7186_s1 + $0xa4] sm:$0xf0]  ;;  %v3178_v20 = vor.u32 %v4273_v7, %v3175_v8 }
  0x13   :  { %1940 = vmatpush.bf16.msra.mxu3 %v3506_v55  ;;  %v4231_v12 = vld [vmem:[%s7186_s1 + $0x4] sm:$0xf]  ;;  %v4001_v13 = vld [vmem:[%s7186_s1 + $0x7c0] sm:$0xf]  ;;  %v4003_v19 = vld [vmem:[%s7186_s1 + $0x864] sm:$0x30]  ;;  %v3002_v28 = vor.u32 %v4251_v10, %v3001_v9 }
  0x14   :  { %v4499_v14 = vld [vmem:[%s7186_s1 + $0x860] sm:$0x30]  ;;  %v3009_v21 = vld [vmem:[%s7186_s1 + $0x8] sm:$0xf]  ;;  %v4252_v22 = vld [vmem:[%s7186_s1 + $0xa8] sm:$0xf0]  ;;  %v3006_v32 = vor.u32 %v4231_v12, %v3003_v17 }
  0x15   :  { %1884 = vmatpush.bf16.msra.mxu0 %v3330_v61  ;;  %v4479_v18 = vld [vmem:[%s7186_s1 + $0x7c4] sm:$0xf]  ;;  %v4232_v23 = vld [vmem:[%s7186_s1 + $0xc] sm:$0xf]  ;;  %v3011_v24 = vld [vmem:[%s7186_s1 + $0xac] sm:$0xf0]  ;;  %v4002_v25 = vor.u32 %v4499_v14, %v4001_v13  ;;  %v3010_v33 = vor.u32 %v4252_v22, %v3009_v21 }
  0x16   :  { %1903 = vmatpush.bf16.msra.mxu1 %v3334_v63  ;;  %1922 = vmatpush.bf16.msra.mxu2 %v3338_v0  ;;  %v4009_v26 = vld [vmem:[%s7186_s1 + $0x7c8] sm:$0xf]  ;;  %v4500_v27 = vld [vmem:[%s7186_s1 + $0x868] sm:$0x30]  ;;  %v4006_v29 = vor.u32 %v4479_v18, %v4003_v19  ;;  %v4011_v31 = vld [vmem:[%s7186_s1 + $0x86c] sm:$0x30]  ;;  %v3014_v35 = vor.u32 %v4232_v23, %v3011_v24 }
  0x17   :  { %1941 = vmatpush.bf16.msra.mxu3 %v3342_v4  ;;  %v4480_v30 = vld [vmem:[%s7186_s1 + $0x7cc] sm:$0xf]  ;;  %v313_v34 = vld [vmem:[%s7187_s2] sm:$0xff]  ;;  %v4010_v36 = vor.u32 %v4500_v27, %v4009_v26  ;;  %v1769_v38 = vsel %vm1755_vm0, %v4002_v25, 0  ;;  %v3837_v39 = vld [vmem:[%s7186_s1 + $0x678] sm:$0xf] }
  0x18   :  { %319 = vperm.xlu0 %4526, %v313_v34   ;;  %v4755_v37 = vld [vmem:[%s7188_s0] sm:$0xff]  ;;  %v4458_v40 = vld [vmem:[%s7186_s1 + $0x718] sm:$0xf0]  ;;  %v4014_v41 = vor.u32 %v4480_v30, %v4011_v31  ;;  %v1772_v42 = vsel %vm1755_vm0, %v4006_v29, 0  ;;  %v3673_v45 = vld [vmem:[%s7186_s1 + $0x530] sm:$0xf] }
  0x19   :  { %1885 = vmatpush.bf16.msra.mxu0 %v3166_v11  ;;  %v4438_v43 = vld [vmem:[%s7186_s1 + $0x67c] sm:$0xf]  ;;  %v3839_v44 = vld [vmem:[%s7186_s1 + $0x71c] sm:$0xf0]  ;;  %v4417_v46 = vld [vmem:[%s7186_s1 + $0x5d0] sm:$0xf0]  ;;  %v3838_v47 = vor.u32 %v4458_v40, %v3837_v39 }
  0x1a   :  { %1904 = vmatpush.bf16.msra.mxu1 %v3170_v15  ;;  %1923 = vmatpush.bf16.msra.mxu2 %v3174_v16  ;;  %v1775_v48 = vsel %vm1755_vm0, %v4010_v36, 0  ;;  %v3845_v49 = vld [vmem:[%s7186_s1 + $0x680] sm:$0xf]  ;;  %v4459_v50 = vld [vmem:[%s7186_s1 + $0x720] sm:$0xf0]  ;;  %v3842_v51 = vor.u32 %v4438_v43, %v3839_v44  ;;  %v1778_v52 = vsel %vm1755_vm0, %v4014_v41, 0  ;;  %v3674_v60 = vor.u32 %v4417_v46, %v3673_v45 }
  0x1b   :  { %1942 = vmatpush.bf16.msra.mxu3 %v3178_v20  ;;  %v4439_v53 = vld [vmem:[%s7186_s1 + $0x684] sm:$0xf]  ;;  %v3847_v54 = vld [vmem:[%s7186_s1 + $0x724] sm:$0xf0]  ;;  %v4397_v55 = vld [vmem:[%s7186_s1 + $0x534] sm:$0xf]  ;;  %v3846_v58 = vor.u32 %v4459_v50, %v3845_v49 }
  0x1c   :  { %v3675_v56 = vld [vmem:[%s7186_s1 + $0x5d4] sm:$0xf0]  ;;  %v314_v57 = vld [vmem:[%s7187_s2 + $0x8] sm:$0xff]  ;;  %v3850_v61 = vor.u32 %v4439_v53, %v3847_v54  ;;  %v4418_v0 = vld [vmem:[%s7186_s1 + $0x5d8] sm:$0xf0] }
  0x1d   :  { %1886 = vmatpush.bf16.msra.mxu0 %v3002_v28  ;;  %v3509_v59 = vld [vmem:[%s7186_s1 + $0x3e8] sm:$0xf]  ;;  %v4376_v62 = vld [vmem:[%s7186_s1 + $0x488] sm:$0xf0]  ;;  %v3681_v63 = vld [vmem:[%s7186_s1 + $0x538] sm:$0xf]  ;;  %v3678_v1 = vor.u32 %v4397_v55, %v3675_v56 }
  0x1e   :  { %1905 = vmatpush.bf16.msra.mxu1 %v3006_v32  ;;  %1924 = vmatpush.bf16.msra.mxu2 %v3010_v33  ;;  %v4398_v2 = vld [vmem:[%s7186_s1 + $0x53c] sm:$0xf]  ;;  %v3683_v3 = vld [vmem:[%s7186_s1 + $0x5dc] sm:$0xf0]  ;;  %v315_v4 = vld [vmem:[%s7187_s2 + $0x10] sm:$0xff]  ;;  %v3682_v7 = vor.u32 %v4418_v0, %v3681_v63  ;;  %v3510_v8 = vor.u32 %v4376_v62, %v3509_v59 }
  0x1f   :  { %1943 = vmatpush.bf16.msra.mxu3 %v3014_v35  ;;  %v4356_v5 = vld [vmem:[%s7186_s1 + $0x3ec] sm:$0xf]  ;;  %v3511_v6 = vld [vmem:[%s7186_s1 + $0x48c] sm:$0xf0]  ;;  %329 = vperm.xlu1 %4527, %v315_v4   ;;  %v3686_v9 = vor.u32 %v4398_v2, %v3683_v3  ;;  %v3345_v10 = vld [vmem:[%s7186_s1 + $0x2a0] sm:$0xf] }
  0x20   :  { %4147 = vmatmul.msk.bf16.vlgmr.msra.gmra.mxu0 %vm1748_vm1, %v4755_v37  ;;  %324 = vperm.xlu0 %4526, %v314_v57   ;;  %v3517_v11 = vld [vmem:[%s7186_s1 + $0x3f0] sm:$0xf]  ;;  %v4377_v12 = vld [vmem:[%s7186_s1 + $0x490] sm:$0xf0]  ;;  %v3514_v13 = vor.u32 %v4356_v5, %v3511_v6  ;;  %v4335_v14 = vld [vmem:[%s7186_s1 + $0x340] sm:$0xf0] }
  0x21   :  { %1956 = vmatpush.bf16.msrb.mxu0 %v1769_v38  ;;  %4149 = vmatmul.msk.bf16.vlgmr.msra.gmra.mxu1 %vm1748_vm1, %v4755_v37  ;;  %v4357_v15 = vld [vmem:[%s7186_s1 + $0x3f4] sm:$0xf]  ;;  %v3519_v16 = vld [vmem:[%s7186_s1 + $0x494] sm:$0xf0]  ;;  %v4315_v17 = vld [vmem:[%s7186_s1 + $0x2a4] sm:$0xf]  ;;  %v3518_v20 = vor.u32 %v4377_v12, %v3517_v11  ;;  %v3346_v23 = vor.u32 %v4335_v14, %v3345_v10 }
  0x22   :  { %1975 = vmatpush.bf16.msrb.mxu1 %v1772_v42  ;;  %4151 = vmatmul.msk.bf16.vlgmr.msra.gmra.mxu2 %vm1748_vm1, %v4755_v37  ;;  %v3347_v18 = vld [vmem:[%s7186_s1 + $0x344] sm:$0xf0]  ;;  %v3181_v21 = vld [vmem:[%s7186_s1 + $0x158] sm:$0xf]  ;;  %v3522_v24 = vor.u32 %v4357_v15, %v3519_v16  ;;  %v4294_v25 = vld [vmem:[%s7186_s1 + $0x1f8] sm:$0xf0] }
  0x23   :  { %4153 = vmatmul.msk.bf16.vlgmr.msra.gmra.mxu3 %vm1748_vm1, %v4755_v37  ;;  %1994 = vmatpush.bf16.msrb.mxu2 %v1775_v48  ;;  %v4862_v19 = vld [vmem:[%s7188_s0 + $0x8] sm:$0xff]  ;;  %v316_v22 = vld [vmem:[%s7187_s2 + $0x18] sm:$0xff]  ;;  %v3350_v28 = vor.u32 %v4315_v17, %v3347_v18  ;;  %v3355_v31 = vld [vmem:[%s7186_s1 + $0x34c] sm:$0xf0]  ;;  %v3182_v40 = vor.u32 %v4294_v25, %v3181_v21 }
  0x24   :  { %2013 = vmatpush.bf16.msrb.mxu3 %v1778_v52  ;;  %v3353_v26 = vld [vmem:[%s7186_s1 + $0x2a8] sm:$0xf]  ;;  %v4336_v27 = vld [vmem:[%s7186_s1 + $0x348] sm:$0xf0]  ;;  %v4274_v29 = vld [vmem:[%s7186_s1 + $0x15c] sm:$0xf] }
  0x25   :  { %1957 = vmatpush.bf16.msrb.mxu0 %v3838_v47  ;;  %v4316_v30 = vld [vmem:[%s7186_s1 + $0x2ac] sm:$0xf]  ;;  %v3183_v32 = vld [vmem:[%s7186_s1 + $0x1fc] sm:$0xf0]  ;;  %v4295_v34 = vld [vmem:[%s7186_s1 + $0x200] sm:$0xf0]  ;;  %v3354_v35 = vor.u32 %v4336_v27, %v3353_v26 }
  0x26   :  { %1976 = vmatpush.bf16.msrb.mxu1 %v3842_v51  ;;  %v3189_v33 = vld [vmem:[%s7186_s1 + $0x160] sm:$0xf]  ;;  %v4275_v36 = vld [vmem:[%s7186_s1 + $0x164] sm:$0xf]  ;;  %v4017_v38 = vld [vmem:[%s7186_s1 + $0x7d0] sm:$0xf]  ;;  %v3358_v41 = vor.u32 %v4316_v30, %v3355_v31  ;;  %v3186_v45 = vor.u32 %v4274_v29, %v3183_v32 }
  0x27   :  { %1995 = vmatpush.bf16.msrb.mxu2 %v3846_v58  ;;  %334 = vperm.xlu1 %4527, %v316_v22   ;;  %v4501_v39 = vld [vmem:[%s7186_s1 + $0x870] sm:$0x30]  ;;  %v3191_v42 = vld [vmem:[%s7186_s1 + $0x204] sm:$0xf0]  ;;  %v4019_v44 = vld [vmem:[%s7186_s1 + $0x874] sm:$0x30]  ;;  %v3190_v53 = vor.u32 %v4295_v34, %v3189_v33 }
  0x28   :  { %2014 = vmatpush.bf16.msrb.mxu3 %v3850_v61  ;;  %v4481_v43 = vld [vmem:[%s7186_s1 + $0x7d4] sm:$0xf]  ;;  %v3017_v46 = vld [vmem:[%s7186_s1 + $0x10] sm:$0xf]  ;;  %v3019_v49 = vld [vmem:[%s7186_s1 + $0xb4] sm:$0xf0]  ;;  %v4018_v50 = vor.u32 %v4501_v39, %v4017_v38  ;;  %v3194_v57 = vor.u32 %v4275_v36, %v3191_v42 }
  0x29   :  { %1958 = vmatpush.bf16.msrb.mxu0 %v3674_v60  ;;  %v4253_v47 = vld [vmem:[%s7186_s1 + $0xb0] sm:$0xf0]  ;;  %v4025_v51 = vld [vmem:[%s7186_s1 + $0x7d8] sm:$0xf]  ;;  %v4502_v52 = vld [vmem:[%s7186_s1 + $0x878] sm:$0x30]  ;;  %v4022_v54 = vor.u32 %v4481_v43, %v4019_v44 }
  0x2a   :  { %1977 = vmatpush.bf16.msrb.mxu1 %v3678_v1  ;;  %v4233_v48 = vld [vmem:[%s7186_s1 + $0x14] sm:$0xf]  ;;  %v4482_v55 = vld [vmem:[%s7186_s1 + $0x7dc] sm:$0xf]  ;;  %v4027_v56 = vld [vmem:[%s7186_s1 + $0x87c] sm:$0x30]  ;;  %v3018_v58 = vor.u32 %v4253_v47, %v3017_v46  ;;  %v4026_v0 = vor.u32 %v4502_v52, %v4025_v51 }
  0x2b   :  { %1996 = vmatpush.bf16.msrb.mxu2 %v3682_v7  ;;  %v3025_v59 = vld [vmem:[%s7186_s1 + $0x18] sm:$0xf]  ;;  %v4254_v60 = vld [vmem:[%s7186_s1 + $0xb8] sm:$0xf0]  ;;  %v3022_v61 = vor.u32 %v4233_v48, %v3019_v49  ;;  %v3027_v63 = vld [vmem:[%s7186_s1 + $0xbc] sm:$0xf0]  ;;  %v4030_v4 = vor.u32 %v4482_v55, %v4027_v56 }
  0x2c   :  { %2015 = vmatpush.bf16.msrb.mxu3 %v3686_v9  ;;  %v4234_v62 = vld [vmem:[%s7186_s1 + $0x1c] sm:$0xf]  ;;  %v1781_v1 = vsel %vm1755_vm0, %v4018_v50, 0  ;;  %v3853_v2 = vld [vmem:[%s7186_s1 + $0x688] sm:$0xf]  ;;  %v3026_v5 = vor.u32 %v4254_v60, %v3025_v59  ;;  %v1784_v6 = vsel %vm1755_vm0, %v4022_v54, 0 }
  0x2d   :  { %1959 = vmatpush.bf16.msrb.mxu0 %v3510_v8  ;;  %v4460_v3 = vld [vmem:[%s7186_s1 + $0x728] sm:$0xf0]  ;;  %v3855_v8 = vld [vmem:[%s7186_s1 + $0x72c] sm:$0xf0]  ;;  %v3030_v9 = vor.u32 %v4234_v62, %v3027_v63  ;;  %v1787_v11 = vsel %vm1755_vm0, %v4026_v0, 0  ;;  %v1790_v15 = vsel %vm1755_vm0, %v4030_v4, 0 }
  0x2e   :  { %1978 = vmatpush.bf16.msrb.mxu1 %v3514_v13  ;;  %v4440_v7 = vld [vmem:[%s7186_s1 + $0x68c] sm:$0xf]  ;;  %v3854_v10 = vor.u32 %v4460_v3, %v3853_v2  ;;  %v3861_v12 = vld [vmem:[%s7186_s1 + $0x690] sm:$0xf]  ;;  %v4461_v13 = vld [vmem:[%s7186_s1 + $0x730] sm:$0xf0] }
  0x2f   :  { %1997 = vmatpush.bf16.msrb.mxu2 %v3518_v20  ;;  %v3858_v14 = vor.u32 %v4440_v7, %v3855_v8  ;;  %v4441_v16 = vld [vmem:[%s7186_s1 + $0x694] sm:$0xf]  ;;  %v3863_v17 = vld [vmem:[%s7186_s1 + $0x734] sm:$0xf0]  ;;  %v3689_v18 = vld [vmem:[%s7186_s1 + $0x540] sm:$0xf]  ;;  %v3862_v22 = vor.u32 %v4461_v13, %v3861_v12 }
  0x30   :  { %2016 = vmatpush.bf16.msrb.mxu3 %v3522_v24  ;;  %4148 = vmatmul.msk.bf16.gmra.mxu0 %vm1748_vm1, %v4862_v19  ;;  %v4419_v20 = vld [vmem:[%s7186_s1 + $0x5e0] sm:$0xf0]  ;;  %v3866_v24 = vor.u32 %v4441_v16, %v3863_v17  ;;  %v3697_v25 = vld [vmem:[%s7186_s1 + $0x548] sm:$0xf]  ;;  %v4420_v26 = vld [vmem:[%s7186_s1 + $0x5e8] sm:$0xf0] }
  0x31   :  { %1960 = vmatpush.bf16.msrb.mxu0 %v3346_v23  ;;  %4150 = vmatmul.msk.bf16.gmra.mxu1 %vm1748_vm1, %v4862_v19  ;;  %v4399_v21 = vld [vmem:[%s7186_s1 + $0x544] sm:$0xf]  ;;  %v3691_v23 = vld [vmem:[%s7186_s1 + $0x5e4] sm:$0xf0]  ;;  %v4400_v27 = vld [vmem:[%s7186_s1 + $0x54c] sm:$0xf]  ;;  %v3690_v29 = vor.u32 %v4419_v20, %v3689_v18  ;;  %v3698_v34 = vor.u32 %v4420_v26, %v3697_v25 }
  0x32   :  { %1979 = vmatpush.bf16.msrb.mxu1 %v3350_v28  ;;  %4152 = vmatmul.msk.bf16.gmra.mxu2 %vm1748_vm1, %v4862_v19  ;;  %v3699_v28 = vld [vmem:[%s7186_s1 + $0x5ec] sm:$0xf0]  ;;  %v3694_v30 = vor.u32 %v4399_v21, %v3691_v23  ;;  %v3525_v31 = vld [vmem:[%s7186_s1 + $0x3f8] sm:$0xf]  ;;  %v4378_v32 = vld [vmem:[%s7186_s1 + $0x498] sm:$0xf0] }
  0x33   :  { %4154 = vmatmul.msk.bf16.gmra.mxu3 %vm1748_vm1, %v4862_v19  ;;  %1998 = vmatpush.bf16.msrb.mxu2 %v3354_v35  ;;  %v4358_v33 = vld [vmem:[%s7186_s1 + $0x3fc] sm:$0xf]  ;;  %v3527_v35 = vld [vmem:[%s7186_s1 + $0x49c] sm:$0xf0]  ;;  %v3702_v36 = vor.u32 %v4400_v27, %v3699_v28  ;;  %v4379_v39 = vld [vmem:[%s7186_s1 + $0x4a0] sm:$0xf0]  ;;  %v3526_v42 = vor.u32 %v4378_v32, %v3525_v31 }
  0x34   :  { %2017 = vmatpush.bf16.msrb.mxu3 %v3358_v41  ;;  %v3533_v38 = vld [vmem:[%s7186_s1 + $0x400] sm:$0xf]  ;;  %v3535_v41 = vld [vmem:[%s7186_s1 + $0x4a4] sm:$0xf0]  ;;  %v3530_v43 = vor.u32 %v4358_v33, %v3527_v35  ;;  %v3361_v44 = vld [vmem:[%s7186_s1 + $0x2b0] sm:$0xf] }
  0x35   :  { %1961 = vmatpush.bf16.msrb.mxu0 %v3182_v40  ;;  %v4359_v40 = vld [vmem:[%s7186_s1 + $0x404] sm:$0xf]  ;;  %v4317_v46 = vld [vmem:[%s7186_s1 + $0x2b4] sm:$0xf]  ;;  %v3534_v47 = vor.u32 %v4379_v39, %v3533_v38  ;;  %v3363_v48 = vld [vmem:[%s7186_s1 + $0x354] sm:$0xf0] }
  0x36   :  { %1980 = vmatpush.bf16.msrb.mxu1 %v3186_v45  ;;  %v4337_v45 = vld [vmem:[%s7186_s1 + $0x350] sm:$0xf0]  ;;  %v3538_v49 = vor.u32 %v4359_v40, %v3535_v41  ;;  %v3369_v50 = vld [vmem:[%s7186_s1 + $0x2b8] sm:$0xf]  ;;  %v4338_v51 = vld [vmem:[%s7186_s1 + $0x358] sm:$0xf0]  ;;  %v3366_v56 = vor.u32 %v4317_v46, %v3363_v48 }
  0x37   :  { %1999 = vmatpush.bf16.msrb.mxu2 %v3190_v53  ;;  %v4318_v52 = vld [vmem:[%s7186_s1 + $0x2bc] sm:$0xf]  ;;  %v3371_v53 = vld [vmem:[%s7186_s1 + $0x35c] sm:$0xf0]  ;;  %v3362_v54 = vor.u32 %v4337_v45, %v3361_v44  ;;  %v3197_v55 = vld [vmem:[%s7186_s1 + $0x168] sm:$0xf]  ;;  %v3370_v60 = vor.u32 %v4338_v51, %v3369_v50 }
  0x38   :  { %2018 = vmatpush.bf16.msrb.mxu3 %v3194_v57  ;;  %v4296_v57 = vld [vmem:[%s7186_s1 + $0x208] sm:$0xf0]  ;;  %v3199_v59 = vld [vmem:[%s7186_s1 + $0x20c] sm:$0xf0]  ;;  %v4297_v63 = vld [vmem:[%s7186_s1 + $0x210] sm:$0xf0] }
  0x39   :  { %1962 = vmatpush.bf16.msrb.mxu0 %v3018_v58  ;;  %v4276_v58 = vld [vmem:[%s7186_s1 + $0x16c] sm:$0xf]  ;;  %v3205_v62 = vld [vmem:[%s7186_s1 + $0x170] sm:$0xf]  ;;  %v4277_v0 = vld [vmem:[%s7186_s1 + $0x174] sm:$0xf]  ;;  %v3198_v4 = vor.u32 %v4296_v57, %v3197_v55 }
  0x3a   :  { %1981 = vmatpush.bf16.msrb.mxu1 %v3022_v61  ;;  %v3374_v61 = vor.u32 %v4318_v52, %v3371_v53  ;;  %v3033_v2 = vld [vmem:[%s7186_s1 + $0x20] sm:$0xf]  ;;  %v4255_v3 = vld [vmem:[%s7186_s1 + $0xc0] sm:$0xf0]  ;;  %v3041_v7 = vld [vmem:[%s7186_s1 + $0x28] sm:$0xf]  ;;  %v3206_v12 = vor.u32 %v4297_v63, %v3205_v62 }
  0x3b   :  { %2000 = vmatpush.bf16.msrb.mxu2 %v3026_v5  ;;  %v4235_v5 = vld [vmem:[%s7186_s1 + $0x24] sm:$0xf]  ;;  %v4033_v8 = vld [vmem:[%s7186_s1 + $0x7e0] sm:$0xf]  ;;  %v4035_v13 = vld [vmem:[%s7186_s1 + $0x884] sm:$0x30] }
  0x3c   :  { %2019 = vmatpush.bf16.msrb.mxu3 %v3030_v9  ;;  %v4503_v9 = vld [vmem:[%s7186_s1 + $0x880] sm:$0x30]  ;;  %v4256_v17 = vld [vmem:[%s7186_s1 + $0xc8] sm:$0xf0]  ;;  %v4043_v20 = vld [vmem:[%s7186_s1 + $0x88c] sm:$0x30] }
  0x3d   :  { %2032 = vmatpush.bf16.msra.mxu0 %v1781_v1  ;;  %v3207_v1 = vld [vmem:[%s7186_s1 + $0x214] sm:$0xf0]  ;;  %v4484_v18 = vld [vmem:[%s7186_s1 + $0x7ec] sm:$0xf]  ;;  %v4034_v23 = vor.u32 %v4503_v9, %v4033_v8  ;;  %v3042_v28 = vor.u32 %v4256_v17, %v3041_v7  ;;  %v4462_v32 = vld [vmem:[%s7186_s1 + $0x738] sm:$0xf0] }
  0x3e   :  { %2051 = vmatpush.bf16.msra.mxu1 %v1784_v6  ;;  %v3035_v6 = vld [vmem:[%s7186_s1 + $0xc4] sm:$0xf0]  ;;  %v3210_v16 = vor.u32 %v4277_v0, %v3207_v1  ;;  %v4236_v21 = vld [vmem:[%s7186_s1 + $0x2c] sm:$0xf]  ;;  %v3869_v31 = vld [vmem:[%s7186_s1 + $0x698] sm:$0xf] }
  0x3f   :  { %2070 = vmatpush.bf16.msra.mxu2 %v1787_v11  ;;  %v3202_v11 = vor.u32 %v4276_v58, %v3199_v59  ;;  %v3038_v27 = vor.u32 %v4235_v5, %v3035_v6  ;;  %v1793_v33 = vsel %vm1755_vm0, %v4034_v23, 0  ;;  %v3871_v35 = vld [vmem:[%s7186_s1 + $0x73c] sm:$0xf0]  ;;  %v4463_v40 = vld [vmem:[%s7186_s1 + $0x740] sm:$0xf0]  ;;  %v3870_v44 = vor.u32 %v4462_v32, %v3869_v31 }
  0x40   :  { %2089 = vmatpush.bf16.msra.mxu3 %v1790_v15  ;;  %4155 = vmatmul.msk.bf16.vlgmr.msrb.gmra.mxu0 %vm1748_vm1, %v4755_v37  ;;  %v4504_v15 = vld [vmem:[%s7186_s1 + $0x888] sm:$0x30]  ;;  %v3877_v39 = vld [vmem:[%s7186_s1 + $0x6a0] sm:$0xf]  ;;  %v3705_v46 = vld [vmem:[%s7186_s1 + $0x550] sm:$0xf] }
  0x41   :  { %2033 = vmatpush.bf16.msra.mxu0 %v3854_v10  ;;  %4157 = vmatmul.msk.bf16.vlgmr.msrb.gmra.mxu1 %vm1748_vm1, %v4755_v37  ;;  %v4483_v10 = vld [vmem:[%s7186_s1 + $0x7e4] sm:$0xf]  ;;  %v4401_v48 = vld [vmem:[%s7186_s1 + $0x554] sm:$0xf]  ;;  %v3707_v50 = vld [vmem:[%s7186_s1 + $0x5f4] sm:$0xf0] }
  0x42   :  { %2052 = vmatpush.bf16.msra.mxu1 %v3858_v14  ;;  %4159 = vmatmul.msk.bf16.vlgmr.msrb.gmra.mxu2 %vm1748_vm1, %v4755_v37  ;;  %v4041_v14 = vld [vmem:[%s7186_s1 + $0x7e8] sm:$0xf]  ;;  %v4038_v25 = vor.u32 %v4483_v10, %v4035_v13  ;;  %v3713_v52 = vld [vmem:[%s7186_s1 + $0x558] sm:$0xf]  ;;  %v4422_v53 = vld [vmem:[%s7186_s1 + $0x5f8] sm:$0xf0]  ;;  %v3710_v57 = vor.u32 %v4401_v48, %v3707_v50 }
  0x43   :  { %2071 = vmatpush.bf16.msra.mxu2 %v3862_v22  ;;  %4161 = vmatmul.msk.bf16.vlgmr.msrb.gmra.mxu3 %vm1748_vm1, %v4755_v37  ;;  %v3043_v22 = vld [vmem:[%s7186_s1 + $0xcc] sm:$0xf0]  ;;  %v4042_v26 = vor.u32 %v4504_v15, %v4041_v14  ;;  %v3715_v55 = vld [vmem:[%s7186_s1 + $0x5fc] sm:$0xf0]  ;;  %v3714_v58 = vor.u32 %v4422_v53, %v3713_v52  ;;  %v4360_v62 = vld [vmem:[%s7186_s1 + $0x40c] sm:$0xf] }
  0x44   :  { %2090 = vmatpush.bf16.msra.mxu3 %v3866_v24  ;;  %v3034_v24 = vor.u32 %v4255_v3, %v3033_v2  ;;  %v3543_v63 = vld [vmem:[%s7186_s1 + $0x4ac] sm:$0xf0]  ;;  %v4381_v1 = vld [vmem:[%s7186_s1 + $0x4b0] sm:$0xf0]  ;;  %v3551_v3 = vld [vmem:[%s7186_s1 + $0x4b4] sm:$0xf0] }
  0x45   :  { %2034 = vmatpush.bf16.msra.mxu0 %v3690_v29  ;;  %v4046_v29 = vor.u32 %v4484_v18, %v4043_v20  ;;  %v1799_v38 = vsel %vm1755_vm0, %v4042_v26, 0  ;;  %v3549_v0 = vld [vmem:[%s7186_s1 + $0x410] sm:$0xf]  ;;  %v4361_v2 = vld [vmem:[%s7186_s1 + $0x414] sm:$0xf]  ;;  %v3546_v5 = vor.u32 %v4360_v62, %v3543_v63 }
  0x46   :  { %2053 = vmatpush.bf16.msra.mxu1 %v3694_v30  ;;  %v3046_v30 = vor.u32 %v4236_v21, %v3043_v22  ;;  %v3377_v6 = vld [vmem:[%s7186_s1 + $0x2c0] sm:$0xf]  ;;  %v4339_v7 = vld [vmem:[%s7186_s1 + $0x360] sm:$0xf0]  ;;  %v3550_v9 = vor.u32 %v4381_v1, %v3549_v0  ;;  %v3379_v10 = vld [vmem:[%s7186_s1 + $0x364] sm:$0xf0] }
  0x47   :  { %2072 = vmatpush.bf16.msra.mxu2 %v3698_v34  ;;  %v4442_v34 = vld [vmem:[%s7186_s1 + $0x69c] sm:$0xf]  ;;  %v1802_v41 = vsel %vm1755_vm0, %v4046_v29, 0  ;;  %v4319_v8 = vld [vmem:[%s7186_s1 + $0x2c4] sm:$0xf] }
  0x48   :  { %2091 = vmatpush.bf16.msra.mxu3 %v3702_v36  ;;  %v1796_v36 = vsel %vm1755_vm0, %v4038_v25, 0  ;;  %v3874_v45 = vor.u32 %v4442_v34, %v3871_v35  ;;  %v4340_v13 = vld [vmem:[%s7186_s1 + $0x368] sm:$0xf0]  ;;  %v3387_v15 = vld [vmem:[%s7186_s1 + $0x36c] sm:$0xf0]  ;;  %v3382_v18 = vor.u32 %v4319_v8, %v3379_v10 }
  0x49   :  { %2035 = vmatpush.bf16.msra.mxu0 %v3526_v42  ;;  %v4443_v42 = vld [vmem:[%s7186_s1 + $0x6a4] sm:$0xf]  ;;  %v4320_v14 = vld [vmem:[%s7186_s1 + $0x2cc] sm:$0xf]  ;;  %v3213_v17 = vld [vmem:[%s7186_s1 + $0x178] sm:$0xf] }
  0x4a   :  { %2054 = vmatpush.bf16.msra.mxu1 %v3530_v43  ;;  %v3879_v43 = vld [vmem:[%s7186_s1 + $0x744] sm:$0xf0]  ;;  %v4298_v20 = vld [vmem:[%s7186_s1 + $0x218] sm:$0xf0]  ;;  %v3215_v22 = vld [vmem:[%s7186_s1 + $0x21c] sm:$0xf0] }
  0x4b   :  { %2073 = vmatpush.bf16.msra.mxu2 %v3534_v47  ;;  %v4421_v47 = vld [vmem:[%s7186_s1 + $0x5f0] sm:$0xf0]  ;;  %v3882_v51 = vor.u32 %v4443_v42, %v3879_v43  ;;  %v4278_v21 = vld [vmem:[%s7186_s1 + $0x17c] sm:$0xf]  ;;  %v3221_v25 = vld [vmem:[%s7186_s1 + $0x180] sm:$0xf]  ;;  %v3214_v31 = vor.u32 %v4298_v20, %v3213_v17 }
  0x4c   :  { %2092 = vmatpush.bf16.msra.mxu3 %v3538_v49  ;;  %v3878_v49 = vor.u32 %v4463_v40, %v3877_v39  ;;  %v4299_v26 = vld [vmem:[%s7186_s1 + $0x220] sm:$0xf0]  ;;  %v3049_v29 = vld [vmem:[%s7186_s1 + $0x30] sm:$0xf]  ;;  %v4237_v32 = vld [vmem:[%s7186_s1 + $0x34] sm:$0xf]  ;;  %v3218_v35 = vor.u32 %v4278_v21, %v3215_v22 }
  0x4d   :  { %2036 = vmatpush.bf16.msra.mxu0 %v3362_v54  ;;  %v4402_v54 = vld [vmem:[%s7186_s1 + $0x55c] sm:$0xf]  ;;  %v3057_v34 = vld [vmem:[%s7186_s1 + $0x38] sm:$0xf]  ;;  %v3059_v40 = vld [vmem:[%s7186_s1 + $0xdc] sm:$0xf0] }
  0x4e   :  { %2055 = vmatpush.bf16.msra.mxu1 %v3366_v56  ;;  %v3706_v56 = vor.u32 %v4421_v47, %v3705_v46  ;;  %v3718_v59 = vor.u32 %v4402_v54, %v3715_v55  ;;  %v4238_v39 = vld [vmem:[%s7186_s1 + $0x3c] sm:$0xf]  ;;  %v4049_v42 = vld [vmem:[%s7186_s1 + $0x7f0] sm:$0xf]  ;;  %v4505_v43 = vld [vmem:[%s7186_s1 + $0x890] sm:$0x30] }
  0x4f   :  { %2074 = vmatpush.bf16.msra.mxu2 %v3370_v60  ;;  %v3541_v60 = vld [vmem:[%s7186_s1 + $0x408] sm:$0xf]  ;;  %v4057_v46 = vld [vmem:[%s7186_s1 + $0x7f8] sm:$0xf]  ;;  %v4506_v47 = vld [vmem:[%s7186_s1 + $0x898] sm:$0x30]  ;;  %v4050_v53 = vor.u32 %v4505_v43, %v4049_v42  ;;  %v3062_v54 = vor.u32 %v4238_v39, %v3059_v40 }
  0x50   :  { %2093 = vmatpush.bf16.msra.mxu3 %v3374_v61  ;;  %4156 = vmatmul.msk.bf16.gmra.mxu0 %vm1748_vm1, %v4862_v19  ;;  %v4380_v61 = vld [vmem:[%s7186_s1 + $0x4a8] sm:$0xf0]  ;;  %v4059_v50 = vld [vmem:[%s7186_s1 + $0x89c] sm:$0x30]  ;;  %v3887_v62 = vld [vmem:[%s7186_s1 + $0x74c] sm:$0xf0] }
  0x51   :  { %2037 = vmatpush.bf16.msra.mxu0 %v3198_v4  ;;  %4158 = vmatmul.msk.bf16.gmra.mxu1 %vm1748_vm1, %v4862_v19  ;;  %v3542_v4 = vor.u32 %v4380_v61, %v3541_v60  ;;  %v1805_v60 = vsel %vm1755_vm0, %v4050_v53, 0  ;;  %v4444_v61 = vld [vmem:[%s7186_s1 + $0x6ac] sm:$0xf]  ;;  %v3893_v1 = vld [vmem:[%s7186_s1 + $0x6b0] sm:$0xf] }
  0x52   :  { %2056 = vmatpush.bf16.msra.mxu1 %v3202_v11  ;;  %4160 = vmatmul.msk.bf16.gmra.mxu2 %vm1748_vm1, %v4862_v19  ;;  %v3554_v11 = vor.u32 %v4361_v2, %v3551_v3  ;;  %v4465_v2 = vld [vmem:[%s7186_s1 + $0x750] sm:$0xf0]  ;;  %v3721_v8 = vld [vmem:[%s7186_s1 + $0x560] sm:$0xf]  ;;  %v4403_v10 = vld [vmem:[%s7186_s1 + $0x564] sm:$0xf] }
  0x53   :  { %2075 = vmatpush.bf16.msra.mxu2 %v3206_v12  ;;  %4162 = vmatmul.msk.bf16.gmra.mxu3 %vm1748_vm1, %v4862_v19  ;;  %v3385_v12 = vld [vmem:[%s7186_s1 + $0x2c8] sm:$0xf]  ;;  %v3731_v17 = vld [vmem:[%s7186_s1 + $0x60c] sm:$0xf0]  ;;  %v3557_v21 = vld [vmem:[%s7186_s1 + $0x418] sm:$0xf] }
  0x54   :  { %2094 = vmatpush.bf16.msra.mxu3 %v3210_v16  ;;  %v3378_v16 = vor.u32 %v4339_v7, %v3377_v6  ;;  %v3386_v23 = vor.u32 %v4340_v13, %v3385_v12  ;;  %v3890_v7 = vor.u32 %v4444_v61, %v3887_v62  ;;  %v3723_v12 = vld [vmem:[%s7186_s1 + $0x604] sm:$0xf0]  ;;  %v4382_v22 = vld [vmem:[%s7186_s1 + $0x4b8] sm:$0xf0]  ;;  %v3401_v40 = vld [vmem:[%s7186_s1 + $0x2d8] sm:$0xf] }
  0x55   :  { %2038 = vmatpush.bf16.msra.mxu0 %v3034_v24  ;;  %v3390_v24 = vor.u32 %v4320_v14, %v3387_v15  ;;  %v3729_v14 = vld [vmem:[%s7186_s1 + $0x568] sm:$0xf]  ;;  %v4424_v15 = vld [vmem:[%s7186_s1 + $0x608] sm:$0xf0]  ;;  %v3726_v20 = vor.u32 %v4403_v10, %v3723_v12  ;;  %v4322_v42 = vld [vmem:[%s7186_s1 + $0x2dc] sm:$0xf] }
  0x56   :  { %2057 = vmatpush.bf16.msra.mxu1 %v3038_v27  ;;  %v4279_v27 = vld [vmem:[%s7186_s1 + $0x184] sm:$0xf]  ;;  %v3403_v43 = vld [vmem:[%s7186_s1 + $0x37c] sm:$0xf0]  ;;  %v4301_v53 = vld [vmem:[%s7186_s1 + $0x230] sm:$0xf0] }
  0x57   :  { %2076 = vmatpush.bf16.msra.mxu2 %v3042_v28  ;;  %v3223_v28 = vld [vmem:[%s7186_s1 + $0x224] sm:$0xf0]  ;;  %v4065_v62 = vld [vmem:[%s7186_s1 + $0x800] sm:$0xf] }
  0x58   :  { %2095 = vmatpush.bf16.msra.mxu3 %v3046_v30  ;;  %v4257_v30 = vld [vmem:[%s7186_s1 + $0xd0] sm:$0xf0]  ;;  %v3073_v61 = vld [vmem:[%s7186_s1 + $0x48] sm:$0xf] }
  0x59   :  { %2108 = vmatpush.bf16.msrb.mxu0 %v1793_v33  ;;  %v3051_v33 = vld [vmem:[%s7186_s1 + $0xd4] sm:$0xf0]  ;;  %v3050_v48 = vor.u32 %v4257_v30, %v3049_v29  ;;  %v4363_v29 = vld [vmem:[%s7186_s1 + $0x424] sm:$0xf]  ;;  %v3567_v30 = vld [vmem:[%s7186_s1 + $0x4c4] sm:$0xf0] }
  0x5a   :  { %2127 = vmatpush.bf16.msrb.mxu1 %v1796_v36  ;;  %v3222_v36 = vor.u32 %v4299_v26, %v3221_v25  ;;  %v3559_v25 = vld [vmem:[%s7186_s1 + $0x4bc] sm:$0xf0]  ;;  %v3570_v39 = vor.u32 %v4363_v29, %v3567_v30  ;;  %v4467_v29 = vld [vmem:[%s7186_s1 + $0x760] sm:$0xf0] }
  0x5b   :  { %2146 = vmatpush.bf16.msrb.mxu2 %v1799_v38  ;;  %v4258_v38 = vld [vmem:[%s7186_s1 + $0xd8] sm:$0xf0]  ;;  %v4447_v30 = vld [vmem:[%s7186_s1 + $0x6c4] sm:$0xf] }
  0x5c   :  { %2165 = vmatpush.bf16.msrb.mxu3 %v1802_v41  ;;  %v3226_v41 = vor.u32 %v4279_v27, %v3223_v28  ;;  %v3058_v52 = vor.u32 %v4258_v38, %v3057_v34  ;;  %v3565_v27 = vld [vmem:[%s7186_s1 + $0x420] sm:$0xf]  ;;  %v4383_v28 = vld [vmem:[%s7186_s1 + $0x4c0] sm:$0xf0]  ;;  %v4341_v34 = vld [vmem:[%s7186_s1 + $0x370] sm:$0xf0] }
  0x5d   :  { %2109 = vmatpush.bf16.msrb.mxu0 %v3870_v44  ;;  %v4485_v44 = vld [vmem:[%s7186_s1 + $0x7f4] sm:$0xf]  ;;  %v3395_v38 = vld [vmem:[%s7186_s1 + $0x374] sm:$0xf0] }
  0x5e   :  { %2128 = vmatpush.bf16.msrb.mxu1 %v3874_v45  ;;  %v4051_v45 = vld [vmem:[%s7186_s1 + $0x894] sm:$0x30] }
  0x5f   :  { %2147 = vmatpush.bf16.msrb.mxu2 %v3878_v49  ;;  %v4486_v49 = vld [vmem:[%s7186_s1 + $0x7fc] sm:$0xf]  ;;  %v4054_v55 = vor.u32 %v4485_v44, %v4051_v45  ;;  %v3229_v45 = vld [vmem:[%s7186_s1 + $0x188] sm:$0xf] }
  0x60   :  { %2166 = vmatpush.bf16.msrb.mxu3 %v3882_v51  ;;  %4163 = vmatmul.msk.bf16.vlgmr.msra.gmra.mxu0 %vm1748_vm1, %v4755_v37  ;;  %v3054_v51 = vor.u32 %v4237_v32, %v3051_v33  ;;  %v3393_v33 = vld [vmem:[%s7186_s1 + $0x2d0] sm:$0xf] }
  0x61   :  { %2110 = vmatpush.bf16.msrb.mxu0 %v3706_v56  ;;  %4165 = vmatmul.msk.bf16.vlgmr.msra.gmra.mxu1 %vm1748_vm1, %v4755_v37  ;;  %v4058_v56 = vor.u32 %v4506_v47, %v4057_v46  ;;  %v1808_v63 = vsel %vm1755_vm0, %v4054_v55, 0  ;;  %v3394_v44 = vor.u32 %v4341_v34, %v3393_v33  ;;  %v4300_v47 = vld [vmem:[%s7186_s1 + $0x228] sm:$0xf0]  ;;  %v3239_v55 = vld [vmem:[%s7186_s1 + $0x234] sm:$0xf0] }
  0x62   :  { %2129 = vmatpush.bf16.msrb.mxu1 %v3710_v57  ;;  %4167 = vmatmul.msk.bf16.vlgmr.msra.gmra.mxu2 %vm1748_vm1, %v4755_v37  ;;  %v4062_v57 = vor.u32 %v4486_v49, %v4059_v50  ;;  %v3231_v49 = vld [vmem:[%s7186_s1 + $0x22c] sm:$0xf0] }
  0x63   :  { %2148 = vmatpush.bf16.msrb.mxu2 %v3714_v58  ;;  %4169 = vmatmul.msk.bf16.vlgmr.msra.gmra.mxu3 %vm1748_vm1, %v4755_v37  ;;  %v3885_v58 = vld [vmem:[%s7186_s1 + $0x6a8] sm:$0xf]  ;;  %v1811_v0 = vsel %vm1755_vm0, %v4058_v56, 0  ;;  %v3065_v56 = vld [vmem:[%s7186_s1 + $0x40] sm:$0xf] }
  0x64   :  { %2167 = vmatpush.bf16.msrb.mxu3 %v3718_v59  ;;  %v4464_v59 = vld [vmem:[%s7186_s1 + $0x748] sm:$0xf0]  ;;  %v1814_v3 = vsel %vm1755_vm0, %v4062_v57, 0  ;;  %v4259_v57 = vld [vmem:[%s7186_s1 + $0xe0] sm:$0xf0] }
  0x65   :  { %2111 = vmatpush.bf16.msrb.mxu0 %v3542_v4  ;;  %v4445_v4 = vld [vmem:[%s7186_s1 + $0x6b4] sm:$0xf]  ;;  %v3886_v6 = vor.u32 %v4464_v59, %v3885_v58  ;;  %v3230_v58 = vor.u32 %v4300_v47, %v3229_v45  ;;  %v4239_v59 = vld [vmem:[%s7186_s1 + $0x44] sm:$0xf]  ;;  %v3066_v12 = vor.u32 %v4259_v57, %v3065_v56  ;;  %v3737_v34 = vld [vmem:[%s7186_s1 + $0x570] sm:$0xf] }
  0x66   :  { %2130 = vmatpush.bf16.msrb.mxu1 %v3546_v5  ;;  %v3895_v5 = vld [vmem:[%s7186_s1 + $0x754] sm:$0xf0]  ;;  %v3573_v47 = vld [vmem:[%s7186_s1 + $0x428] sm:$0xf] }
  0x67   :  { %2149 = vmatpush.bf16.msrb.mxu2 %v3550_v9  ;;  %v4423_v9 = vld [vmem:[%s7186_s1 + $0x600] sm:$0xf0]  ;;  %v3898_v13 = vor.u32 %v4445_v4, %v3895_v5  ;;  %v4073_v5 = vld [vmem:[%s7186_s1 + $0x808] sm:$0xf] }
  0x68   :  { %2168 = vmatpush.bf16.msrb.mxu3 %v3554_v11  ;;  %v3894_v11 = vor.u32 %v4465_v2, %v3893_v1  ;;  %v4260_v1 = vld [vmem:[%s7186_s1 + $0xe8] sm:$0xf0]  ;;  %v4487_v2 = vld [vmem:[%s7186_s1 + $0x804] sm:$0xf] }
  0x69   :  { %2112 = vmatpush.bf16.msrb.mxu0 %v3378_v16  ;;  %v4404_v16 = vld [vmem:[%s7186_s1 + $0x56c] sm:$0xf] }
  0x6a   :  { %2131 = vmatpush.bf16.msrb.mxu1 %v3382_v18  ;;  %v3722_v18 = vor.u32 %v4423_v9, %v3721_v8  ;;  %v3734_v26 = vor.u32 %v4404_v16, %v3731_v17  ;;  %v4240_v8 = vld [vmem:[%s7186_s1 + $0x4c] sm:$0xf]  ;;  %v3075_v9 = vld [vmem:[%s7186_s1 + $0xec] sm:$0xf0]  ;;  %v3074_v16 = vor.u32 %v4260_v1, %v3073_v61 }
  0x6b   :  { %2150 = vmatpush.bf16.msrb.mxu2 %v3386_v23  ;;  %v4362_v23 = vld [vmem:[%s7186_s1 + $0x41c] sm:$0xf] }
  0x6c   :  { %2169 = vmatpush.bf16.msrb.mxu3 %v3390_v24  ;;  %v3730_v24 = vor.u32 %v4424_v15, %v3729_v14  ;;  %v3562_v32 = vor.u32 %v4362_v23, %v3559_v25  ;;  %v4446_v25 = vld [vmem:[%s7186_s1 + $0x6bc] sm:$0xf] }
  0x6d   :  { %2113 = vmatpush.bf16.msrb.mxu0 %v3214_v31  ;;  %v3558_v31 = vor.u32 %v4382_v22, %v3557_v21  ;;  %v3901_v22 = vld [vmem:[%s7186_s1 + $0x6b8] sm:$0xf] }
  0x6e   :  { %2132 = vmatpush.bf16.msrb.mxu1 %v3218_v35  ;;  %v4321_v35 = vld [vmem:[%s7186_s1 + $0x2d4] sm:$0xf] }
  0x6f   :  { %2151 = vmatpush.bf16.msrb.mxu2 %v3222_v36  ;;  %v3566_v36 = vor.u32 %v4383_v28, %v3565_v27  ;;  %v3398_v46 = vor.u32 %v4321_v35, %v3395_v38  ;;  %v3903_v27 = vld [vmem:[%s7186_s1 + $0x75c] sm:$0xf0]  ;;  %v4425_v35 = vld [vmem:[%s7186_s1 + $0x610] sm:$0xf0] }
  0x70   :  { %2170 = vmatpush.bf16.msrb.mxu3 %v3226_v41  ;;  %4164 = vmatmul.msk.bf16.gmra.mxu0 %vm1748_vm1, %v4862_v19  ;;  %v4342_v41 = vld [vmem:[%s7186_s1 + $0x378] sm:$0xf0]  ;;  %v3909_v28 = vld [vmem:[%s7186_s1 + $0x6c0] sm:$0xf]  ;;  %v3906_v33 = vor.u32 %v4446_v25, %v3903_v27  ;;  %v3738_v45 = vor.u32 %v4425_v35, %v3737_v34  ;;  %v4261_v25 = vld [vmem:[%s7186_s1 + $0xf0] sm:$0xf0] }
  0x71   :  { %2114 = vmatpush.bf16.msrb.mxu0 %v3050_v48  ;;  %4166 = vmatmul.msk.bf16.gmra.mxu1 %vm1748_vm1, %v4862_v19  ;;  %v4280_v48 = vld [vmem:[%s7186_s1 + $0x18c] sm:$0xf]  ;;  %v3402_v50 = vor.u32 %v4342_v41, %v3401_v40  ;;  %v3910_v38 = vor.u32 %v4467_v29, %v3909_v28  ;;  %v3745_v41 = vld [vmem:[%s7186_s1 + $0x578] sm:$0xf]  ;;  %v5666_v29 = vld [vmem:[%s7188_s0] sm:$0xff] }
  0x72   :  { %2133 = vmatpush.bf16.msrb.mxu1 %v3054_v51  ;;  %4168 = vmatmul.msk.bf16.gmra.mxu2 %vm1748_vm1, %v4862_v19  ;;  %v3406_v51 = vor.u32 %v4322_v42, %v3403_v43  ;;  %v4426_v42 = vld [vmem:[%s7186_s1 + $0x618] sm:$0xf0]  ;;  %v3083_v27 = vld [vmem:[%s7186_s1 + $0xf4] sm:$0xf0]  ;;  %v3091_v35 = vld [vmem:[%s7186_s1 + $0xfc] sm:$0xf0] }
  0x73   :  { %2152 = vmatpush.bf16.msrb.mxu2 %v3058_v52  ;;  %4170 = vmatmul.msk.bf16.gmra.mxu3 %vm1748_vm1, %v4862_v19  ;;  %v3237_v52 = vld [vmem:[%s7186_s1 + $0x190] sm:$0xf]  ;;  %v4406_v43 = vld [vmem:[%s7186_s1 + $0x57c] sm:$0xf] }
  0x74   :  { %2171 = vmatpush.bf16.msrb.mxu3 %v3062_v54  ;;  %v4281_v54 = vld [vmem:[%s7186_s1 + $0x194] sm:$0xf]  ;;  %v4242_v34 = vld [vmem:[%s7186_s1 + $0x5c] sm:$0xf] }
  0x75   :  { %2184 = vmatpush.bf16.msra.mxu0 %v1805_v60  ;;  %v3067_v60 = vld [vmem:[%s7186_s1 + $0xe4] sm:$0xf0]  ;;  %v3242_v4 = vor.u32 %v4281_v54, %v3239_v55  ;;  %v4365_v54 = vld [vmem:[%s7186_s1 + $0x434] sm:$0xf]  ;;  %v3583_v55 = vld [vmem:[%s7186_s1 + $0x4d4] sm:$0xf0] }
  0x76   :  { %2203 = vmatpush.bf16.msra.mxu1 %v1808_v63  ;;  %v3234_v63 = vor.u32 %v4280_v48, %v3231_v49  ;;  %v3070_v15 = vor.u32 %v4239_v59, %v3067_v60  ;;  %v4384_v48 = vld [vmem:[%s7186_s1 + $0x4c8] sm:$0xf0]  ;;  %v4343_v59 = vld [vmem:[%s7186_s1 + $0x380] sm:$0xf0] }
  0x77   :  { %2222 = vmatpush.bf16.msra.mxu2 %v1811_v0  ;;  %v3238_v0 = vor.u32 %v4301_v53, %v3237_v52  ;;  %v4364_v49 = vld [vmem:[%s7186_s1 + $0x42c] sm:$0xf]  ;;  %v3581_v52 = vld [vmem:[%s7186_s1 + $0x430] sm:$0xf]  ;;  %v4385_v53 = vld [vmem:[%s7186_s1 + $0x4d0] sm:$0xf0]  ;;  %v3574_v56 = vor.u32 %v4384_v48, %v3573_v47 }
  0x78   :  { %2241 = vmatpush.bf16.msra.mxu3 %v1814_v3  ;;  %v4067_v3 = vld [vmem:[%s7186_s1 + $0x8a4] sm:$0x30]  ;;  %v4323_v60 = vld [vmem:[%s7186_s1 + $0x2e4] sm:$0xf]  ;;  %v3582_v61 = vor.u32 %v4385_v53, %v3581_v52  ;;  %v4083_v47 = vld [vmem:[%s7186_s1 + $0x8b4] sm:$0x30] }
  0x79   :  { %2185 = vmatpush.bf16.msra.mxu0 %v3886_v6  ;;  %v4508_v6 = vld [vmem:[%s7186_s1 + $0x8a8] sm:$0x30]  ;;  %v4510_v52 = vld [vmem:[%s7186_s1 + $0x8b8] sm:$0x30] }
  0x7a   :  { %2204 = vmatpush.bf16.msra.mxu1 %v3890_v7  ;;  %v4488_v7 = vld [vmem:[%s7186_s1 + $0x80c] sm:$0xf]  ;;  %v4074_v14 = vor.u32 %v4508_v6, %v4073_v5  ;;  %v3245_v6 = vld [vmem:[%s7186_s1 + $0x198] sm:$0xf]  ;;  %v4490_v53 = vld [vmem:[%s7186_s1 + $0x81c] sm:$0xf] }
  0x7b   :  { %2223 = vmatpush.bf16.msra.mxu2 %v3894_v11  ;;  %v4075_v11 = vld [vmem:[%s7186_s1 + $0x8ac] sm:$0x30] }
  0x7c   :  { %2242 = vmatpush.bf16.msra.mxu3 %v3898_v13  ;;  %v4070_v13 = vor.u32 %v4487_v2, %v4067_v3  ;;  %v4078_v17 = vor.u32 %v4488_v7, %v4075_v11  ;;  %v1823_v23 = vsel %vm1755_vm0, %v4074_v14, 0  ;;  %v4324_v2 = vld [vmem:[%s7186_s1 + $0x2ec] sm:$0xf]  ;;  %v3419_v3 = vld [vmem:[%s7186_s1 + $0x38c] sm:$0xf0] }
  0x7d   :  { %2186 = vmatpush.bf16.msra.mxu0 %v3722_v18  ;;  %v3078_v18 = vor.u32 %v4240_v8, %v3075_v9  ;;  %v4302_v7 = vld [vmem:[%s7186_s1 + $0x238] sm:$0xf0]  ;;  %v3422_v11 = vor.u32 %v4324_v2, %v3419_v3  ;;  %v3917_v2 = vld [vmem:[%s7186_s1 + $0x6c8] sm:$0xf]  ;;  %v4468_v3 = vld [vmem:[%s7186_s1 + $0x768] sm:$0xf0] }
  0x7e   :  { %2205 = vmatpush.bf16.msra.mxu1 %v3726_v20  ;;  %v1820_v21 = vsel %vm1755_vm0, %v4070_v13, 0  ;;  %v4282_v8 = vld [vmem:[%s7186_s1 + $0x19c] sm:$0xf]  ;;  %v4303_v13 = vld [vmem:[%s7186_s1 + $0x240] sm:$0xf0] }
  0x7f   :  { %2224 = vmatpush.bf16.msra.mxu2 %v3730_v24  ;;  %v4466_v24 = vld [vmem:[%s7186_s1 + $0x758] sm:$0xf0] }
  0x80   :  { %2243 = vmatpush.bf16.msra.mxu3 %v3734_v26  ;;  %4171 = vmatmul.msk.bf16.vlgmr.msrb.gmra.mxu0 %vm1748_vm1, %v4755_v37  ;;  %v1826_v26 = vsel %vm1755_vm0, %v4078_v17, 0 }
  0x81   :  { %2187 = vmatpush.bf16.msra.mxu0 %v3558_v31  ;;  %4173 = vmatmul.msk.bf16.vlgmr.msrb.gmra.mxu1 %vm1748_vm1, %v4755_v37  ;;  %v3911_v31 = vld [vmem:[%s7186_s1 + $0x764] sm:$0xf0] }
  0x82   :  { %2206 = vmatpush.bf16.msra.mxu1 %v3562_v32  ;;  %4175 = vmatmul.msk.bf16.vlgmr.msrb.gmra.mxu2 %vm1748_vm1, %v4755_v37  ;;  %v3902_v32 = vor.u32 %v4466_v24, %v3901_v22  ;;  %v3914_v40 = vor.u32 %v4447_v30, %v3911_v31  ;;  %v3089_v31 = vld [vmem:[%s7186_s1 + $0x58] sm:$0xf] }
  0x83   :  { %2225 = vmatpush.bf16.msra.mxu2 %v3566_v36  ;;  %4177 = vmatmul.msk.bf16.vlgmr.msrb.gmra.mxu3 %vm1748_vm1, %v4755_v37  ;;  %v4507_v37 = vld [vmem:[%s7186_s1 + $0x8a0] sm:$0x30]  ;;  %v4405_v36 = vld [vmem:[%s7186_s1 + $0x574] sm:$0xf] }
  0x84   :  { %2244 = vmatpush.bf16.msra.mxu3 %v3570_v39  ;;  %v4066_v10 = vor.u32 %v4507_v37, %v4065_v62  ;;  %v3739_v39 = vld [vmem:[%s7186_s1 + $0x614] sm:$0xf0]  ;;  %v3411_v62 = vld [vmem:[%s7186_s1 + $0x384] sm:$0xf0]  ;;  %v3586_v37 = vor.u32 %v4365_v54, %v3583_v55 }
  0x85   :  { %2188 = vmatpush.bf16.msra.mxu0 %v3394_v44  ;;  %v3747_v44 = vld [vmem:[%s7186_s1 + $0x61c] sm:$0xf0]  ;;  %v3414_v5 = vor.u32 %v4323_v60, %v3411_v62 }
  0x86   :  { %2207 = vmatpush.bf16.msra.mxu1 %v3398_v46  ;;  %v1817_v20 = vsel %vm1755_vm0, %v4066_v10, 0  ;;  %v3742_v46 = vor.u32 %v4405_v36, %v3739_v39  ;;  %v3247_v10 = vld [vmem:[%s7186_s1 + $0x23c] sm:$0xf0] }
  0x87   :  { %2226 = vmatpush.bf16.msra.mxu2 %v3402_v50  ;;  %v3746_v50 = vor.u32 %v4426_v42, %v3745_v41  ;;  %v4081_v41 = vld [vmem:[%s7186_s1 + $0x810] sm:$0xf]  ;;  %v4509_v42 = vld [vmem:[%s7186_s1 + $0x8b0] sm:$0x30] }
  0x88   :  { %2245 = vmatpush.bf16.msra.mxu3 %v3406_v51  ;;  %v3750_v51 = vor.u32 %v4406_v43, %v3747_v44  ;;  %v3094_v44 = vor.u32 %v4242_v34, %v3091_v35  ;;  %v4408_v34 = vld [vmem:[%s7186_s1 + $0x58c] sm:$0xf] }
  0x89   :  { %2189 = vmatpush.bf16.msra.mxu0 %v3230_v58  ;;  %v3409_v58 = vld [vmem:[%s7186_s1 + $0x2e0] sm:$0xf] }
  0x8a   :  { %2208 = vmatpush.bf16.msra.mxu1 %v3234_v63  ;;  %v3417_v63 = vld [vmem:[%s7186_s1 + $0x2e8] sm:$0xf]  ;;  %v5617_v1 = vpop.permute.xlu0 %319 }
  0x8b   :  { %2227 = vmatpush.bf16.msra.mxu2 %v3238_v0  ;;  %v4344_v0 = vld [vmem:[%s7186_s1 + $0x388] sm:$0xf0] }
  0x8c   :  { %2246 = vmatpush.bf16.msra.mxu3 %v3242_v4  ;;  %v3410_v4 = vor.u32 %v4343_v59, %v3409_v58  ;;  %v3418_v9 = vor.u32 %v4344_v0, %v3417_v63  ;;  %v4091_v59 = vld [vmem:[%s7186_s1 + $0x8bc] sm:$0x30] }
  0x8d   :  { %2190 = vmatpush.bf16.msra.mxu0 %v3066_v12  ;;  %v3253_v12 = vld [vmem:[%s7186_s1 + $0x1a0] sm:$0xf] }
  0x8e   :  { %2209 = vmatpush.bf16.msra.mxu1 %v3070_v15  ;;  %v4283_v15 = vld [vmem:[%s7186_s1 + $0x1a4] sm:$0xf]  ;;  %v3254_v24 = vor.u32 %v4303_v13, %v3253_v12  ;;  %v3925_v12 = vld [vmem:[%s7186_s1 + $0x6d0] sm:$0xf]  ;;  %v4469_v13 = vld [vmem:[%s7186_s1 + $0x770] sm:$0xf0] }
  0x8f   :  { %2228 = vmatpush.bf16.msra.mxu2 %v3074_v16  ;;  %v3255_v16 = vld [vmem:[%s7186_s1 + $0x244] sm:$0xf0] }
  0x90   :  { %2247 = vmatpush.bf16.msra.mxu3 %v3078_v18  ;;  %4172 = vmatmul.msk.bf16.gmra.mxu0 %vm1748_vm1, %v4862_v19  ;;  %v3258_v30 = vor.u32 %v4283_v15, %v3255_v16  ;;  %v3753_v16 = vld [vmem:[%s7186_s1 + $0x580] sm:$0xf] }
  0x91   :  { %2260 = vmatpush.bf16.msrb.mxu0 %v1817_v20  ;;  %4174 = vmatmul.msk.bf16.gmra.mxu1 %vm1748_vm1, %v4862_v19  ;;  %v3246_v20 = vor.u32 %v4302_v7, %v3245_v6  ;;  %v3918_v6 = vor.u32 %v4468_v3, %v3917_v2  ;;  %v4448_v7 = vld [vmem:[%s7186_s1 + $0x6cc] sm:$0xf]  ;;  %v3427_v2 = vld [vmem:[%s7186_s1 + $0x394] sm:$0xf0] }
  0x92   :  { %2279 = vmatpush.bf16.msrb.mxu1 %v1820_v21  ;;  %4176 = vmatmul.msk.bf16.gmra.mxu2 %vm1748_vm1, %v4862_v19  ;;  %v3081_v21 = vld [vmem:[%s7186_s1 + $0x50] sm:$0xf] }
  0x93   :  { %2298 = vmatpush.bf16.msrb.mxu2 %v1823_v23  ;;  %4178 = vmatmul.msk.bf16.gmra.mxu3 %vm1748_vm1, %v4862_v19  ;;  %v3575_v19 = vld [vmem:[%s7186_s1 + $0x4cc] sm:$0xf0]  ;;  %v3250_v23 = vor.u32 %v4282_v8, %v3247_v10  ;;  %v3082_v36 = vor.u32 %v4261_v25, %v3081_v21  ;;  %v3927_v25 = vld [vmem:[%s7186_s1 + $0x774] sm:$0xf0] }
  0x94   :  { %2317 = vmatpush.bf16.msrb.mxu3 %v1826_v26  ;;  %v3578_v57 = vor.u32 %v4364_v49, %v3575_v19  ;;  %v4241_v26 = vld [vmem:[%s7186_s1 + $0x54] sm:$0xf]  ;;  %v3919_v8 = vld [vmem:[%s7186_s1 + $0x76c] sm:$0xf0] }
  0x95   :  { %2261 = vmatpush.bf16.msrb.mxu0 %v3902_v32  ;;  %v4262_v32 = vld [vmem:[%s7186_s1 + $0xf8] sm:$0xf0]  ;;  %v3086_v39 = vor.u32 %v4241_v26, %v3083_v27 }
  0x96   :  { %2280 = vmatpush.bf16.msrb.mxu1 %v3906_v33 }
  0x97   :  { %2299 = vmatpush.bf16.msrb.mxu2 %v3910_v38  ;;  %v5694_v38 = vpop.permute.xlu0 %324 }
  0x98   :  { %2318 = vmatpush.bf16.msrb.mxu3 %v3914_v40  ;;  %v3090_v40 = vor.u32 %v4262_v32, %v3089_v31  ;;  %v3761_v32 = vld [vmem:[%s7186_s1 + $0x588] sm:$0xf] }
  0x99   :  { %2262 = vmatpush.bf16.msrb.mxu0 %v3738_v45  ;;  %v4082_v45 = vor.u32 %v4509_v42, %v4081_v41  ;;  %v3763_v41 = vld [vmem:[%s7186_s1 + $0x62c] sm:$0xf0] }
  0x9a   :  { %2281 = vmatpush.bf16.msrb.mxu1 %v3742_v46  ;;  %v4489_v46 = vld [vmem:[%s7186_s1 + $0x814] sm:$0xf] }
  0x9b   :  { %2300 = vmatpush.bf16.msrb.mxu2 %v3746_v50  ;;  %v4086_v19 = vor.u32 %v4489_v46, %v4083_v47  ;;  %v4386_v46 = vld [vmem:[%s7186_s1 + $0x4d8] sm:$0xf0]  ;;  %v3766_v47 = vor.u32 %v4408_v34, %v3763_v41 }
  0x9c   :  { %2319 = vmatpush.bf16.msrb.mxu3 %v3750_v51  ;;  %v4089_v51 = vld [vmem:[%s7186_s1 + $0x818] sm:$0xf] }
  0x9d   :  { %2263 = vmatpush.bf16.msrb.mxu0 %v3574_v56  ;;  %v1888_v14 = vpop.f32.mrf.mxu0  ;;  %v4090_v58 = vor.u32 %v4510_v52, %v4089_v51  ;;  %v1832_v62 = vsel %vm1755_vm0, %v4086_v19, 0  ;;  %v3597_v51 = vld [vmem:[%s7186_s1 + $0x440] sm:$0xf]  ;;  %v4387_v52 = vld [vmem:[%s7186_s1 + $0x4e0] sm:$0xf0] }
  0x9e   :  { %2282 = vmatpush.bf16.msrb.mxu1 %v3578_v57  ;;  %v1889_v17 = vadd.f32 %v1888_v14, %v5617_v1  ;;  %v1907_v18 = vpop.f32.mrf.mxu1  ;;  %v1829_v57 = vsel %vm1755_vm0, %v4082_v45, 0  ;;  %v4449_v14 = vld [vmem:[%s7186_s1 + $0x6d4] sm:$0xf]  ;;  %v3589_v45 = vld [vmem:[%s7186_s1 + $0x438] sm:$0xf] }
  0x9f   :  { %2301 = vmatpush.bf16.msrb.mxu2 %v3582_v61  ;;  %v1908_v22 = vadd.f32 %v1907_v18, %v5617_v1  ;;  %v1835_v10 = vsel %vm1755_vm0, %v4090_v58, 0  ;;  %v3926_v18 = vor.u32 %v4469_v13, %v3925_v12  ;;  %v3930_v31 = vor.u32 %v4449_v14, %v3927_v25 }
  0xa0   :  { %2320 = vmatpush.bf16.msrb.mxu3 %v3586_v37  ;;  %v2658_v28 = vmax.f32 %v1889_v17, 0.0  ;;  %4179 = vmatmul.msk.bf16.vlgmr.msra.gmra.mxu0 %vm1748_vm1, %v5666_v29  ;;  %v4094_v37 = vor.u32 %v4490_v53, %v4091_v59  ;;  %v4427_v17 = vld [vmem:[%s7186_s1 + $0x620] sm:$0xf0]  ;;  %v3590_v19 = vor.u32 %v4386_v46, %v3589_v45  ;;  %v3425_v59 = vld [vmem:[%s7186_s1 + $0x2f0] sm:$0xf] }
  0xa1   :  { %2264 = vmatpush.bf16.msrb.mxu0 %v3410_v4  ;;  %v2659_v33 = vmax.f32 %v1908_v22, 0.0  ;;  %4181 = vmatmul.msk.bf16.vlgmr.msra.gmra.mxu1 %vm1748_vm1, %v5666_v29 }
  0xa2   :  { %2283 = vmatpush.bf16.msrb.mxu1 %v3414_v5  ;;  %4183 = vmatmul.msk.bf16.vlgmr.msra.gmra.mxu2 %vm1748_vm1, %v5666_v29  ;;  %2822 = vst [vmem:[%s7189_s3] sm:$0xff] %v2658_v28  ;;  %v5735_v5 = vpop.permute.xlu1 %329 }
  0xa3   :  { %2302 = vmatpush.bf16.msrb.mxu2 %v3418_v9  ;;  %4185 = vmatmul.msk.bf16.vlgmr.msra.gmra.mxu3 %vm1748_vm1, %v5666_v29  ;;  %2823 = vst [vmem:[%s7189_s3 + $0x8] sm:$0xff] %v2659_v33  ;;  %v3922_v9 = vor.u32 %v4448_v7, %v3919_v8  ;;  %v4428_v33 = vld [vmem:[%s7186_s1 + $0x628] sm:$0xf0]  ;;  %v3433_v8 = vld [vmem:[%s7186_s1 + $0x2f8] sm:$0xf] }
  0xa4   :  { %2321 = vmatpush.bf16.msrb.mxu3 %v3422_v11  ;;  %v1838_v11 = vsel %vm1755_vm0, %v4094_v37, 0 }
  0xa5   :  { %2265 = vmatpush.bf16.msrb.mxu0 %v3246_v20  ;;  %v1926_v43 = vpop.f32.mrf.mxu2  ;;  %v1890_v48 = vpop.f32.mrf.mxu0 }
  0xa6   :  { %2284 = vmatpush.bf16.msrb.mxu1 %v3250_v23  ;;  %v1927_v49 = vadd.f32 %v1926_v43, %v5617_v1  ;;  %v1945_v50 = vpop.f32.mrf.mxu3  ;;  %v1891_v54 = vadd.f32 %v1890_v48, %v5694_v38  ;;  %v1909_v55 = vpop.f32.mrf.mxu1  ;;  %v4407_v23 = vld [vmem:[%s7186_s1 + $0x584] sm:$0xf] }
  0xa7   :  { %2303 = vmatpush.bf16.msrb.mxu2 %v3254_v24  ;;  %v1946_v56 = vadd.f32 %v1945_v50, %v5617_v1  ;;  %v1910_v60 = vadd.f32 %v1909_v55, %v5694_v38  ;;  %v3755_v24 = vld [vmem:[%s7186_s1 + $0x624] sm:$0xf0]  ;;  %v3591_v50 = vld [vmem:[%s7186_s1 + $0x4dc] sm:$0xf0]  ;;  %v3598_v55 = vor.u32 %v4387_v52, %v3597_v51 }
  0xa8   :  { %2322 = vmatpush.bf16.msrb.mxu3 %v3258_v30  ;;  %v2660_v61 = vmax.f32 %v1927_v49, 0.0  ;;  %v2699_v63 = vmax.f32 %v1891_v54, 0.0  ;;  %v3754_v30 = vor.u32 %v4427_v17, %v3753_v16  ;;  %v4366_v49 = vld [vmem:[%s7186_s1 + $0x43c] sm:$0xf] }
  0xa9   :  { %2266 = vmatpush.bf16.msrb.mxu0 %v3082_v36  ;;  %v2661_v0 = vmax.f32 %v1946_v56, 0.0  ;;  %v2700_v4 = vmax.f32 %v1910_v60, 0.0  ;;  %v3594_v54 = vor.u32 %v4366_v49, %v3591_v50  ;;  %v4367_v56 = vld [vmem:[%s7186_s1 + $0x444] sm:$0xf]  ;;  %v4345_v60 = vld [vmem:[%s7186_s1 + $0x390] sm:$0xf0] }
  0xaa   :  { %2285 = vmatpush.bf16.msrb.mxu1 %v3086_v39  ;;  %2824 = vst [vmem:[%s7189_s3 + $0x10] sm:$0xff] %v2660_v61  ;;  %v3758_v39 = vor.u32 %v4407_v23, %v3755_v24  ;;  %v5834_v53 = vpop.permute.xlu1 %334  ;;  %v3426_v7 = vor.u32 %v4345_v60, %v3425_v59  ;;  %v4284_v23 = vld [vmem:[%s7186_s1 + $0x1ac] sm:$0xf]  ;;  %v3263_v24 = vld [vmem:[%s7186_s1 + $0x24c] sm:$0xf0] }
  0xab   :  { %2304 = vmatpush.bf16.msrb.mxu2 %v3090_v40  ;;  %2864 = vst [vmem:[%s7189_s3 + $0x148] sm:$0xff] %v2699_v63  ;;  %v3762_v40 = vor.u32 %v4428_v33, %v3761_v32  ;;  %v3271_v32 = vld [vmem:[%s7186_s1 + $0x254] sm:$0xf0]  ;;  %v3105_v49 = vld [vmem:[%s7186_s1 + $0x68] sm:$0xf] }
  0xac   :  { %2323 = vmatpush.bf16.msrb.mxu3 %v3094_v44  ;;  %2865 = vst [vmem:[%s7189_s3 + $0x150] sm:$0xff] %v2700_v4  ;;  %v5797_v44 = vld [vmem:[%s7188_s0 + $0x8] sm:$0xff] }
  0xad   :  { %2336 = vmatpush.bf16.msra.mxu0 %v1829_v57  ;;  %2825 = vst [vmem:[%s7189_s3 + $0x18] sm:$0xff] %v2661_v0  ;;  %v1928_v15 = vpop.f32.mrf.mxu2  ;;  %v1893_v20 = vpop.f32.mrf.mxu0  ;;  %v3599_v57 = vld [vmem:[%s7186_s1 + $0x4e4] sm:$0xf0]  ;;  %v4325_v0 = vld [vmem:[%s7186_s1 + $0x2f4] sm:$0xf] }
  0xae   :  { %2355 = vmatpush.bf16.msra.mxu1 %v1832_v62  ;;  %v1929_v21 = vadd.f32 %v1928_v15, %v5694_v38  ;;  %v1947_v22 = vpop.f32.mrf.mxu3  ;;  %v1894_v26 = vadd.f32 %v1893_v20, %v5735_v5  ;;  %v1912_v27 = vpop.f32.mrf.mxu1  ;;  %v3602_v61 = vor.u32 %v4367_v56, %v3599_v57  ;;  %v3430_v13 = vor.u32 %v4325_v0, %v3427_v2  ;;  %v3435_v15 = vld [vmem:[%s7186_s1 + $0x39c] sm:$0xf0]  ;;  %v4304_v20 = vld [vmem:[%s7186_s1 + $0x248] sm:$0xf0]  ;;  %v3107_v56 = vld [vmem:[%s7186_s1 + $0x10c] sm:$0xf0] }
  0xaf   :  { %2374 = vmatpush.bf16.msra.mxu2 %v1835_v10  ;;  %v1948_v28 = vadd.f32 %v1947_v22, %v5694_v38  ;;  %v1913_v35 = vadd.f32 %v1912_v27, %v5735_v5  ;;  %v4326_v10 = vld [vmem:[%s7186_s1 + $0x2fc] sm:$0xf]  ;;  %v4305_v27 = vld [vmem:[%s7186_s1 + $0x250] sm:$0xf0]  ;;  %v4264_v50 = vld [vmem:[%s7186_s1 + $0x108] sm:$0xf0] }
  0xb0   :  { %2393 = vmatpush.bf16.msra.mxu3 %v1838_v11  ;;  %v2701_v36 = vmax.f32 %v1929_v21, 0.0  ;;  %v2740_v42 = vmax.f32 %v1894_v26, 0.0  ;;  %4180 = vmatmul.msk.bf16.gmra.mxu0 %vm1748_vm1, %v5797_v44  ;;  %v3438_v21 = vor.u32 %v4326_v10, %v3435_v15  ;;  %v3269_v26 = vld [vmem:[%s7186_s1 + $0x1b0] sm:$0xf]  ;;  %v4491_v0 = vld [vmem:[%s7186_s1 + $0x824] sm:$0xf] }
  0xb1   :  { %2337 = vmatpush.bf16.msra.mxu0 %v3918_v6  ;;  %v2702_v43 = vmax.f32 %v1948_v28, 0.0  ;;  %v2741_v48 = vmax.f32 %v1913_v35, 0.0  ;;  %4182 = vmatmul.msk.bf16.gmra.mxu1 %vm1748_vm1, %v5797_v44  ;;  %v3266_v28 = vor.u32 %v4284_v23, %v3263_v24  ;;  %v3097_v35 = vld [vmem:[%s7186_s1 + $0x60] sm:$0xf]  ;;  %v4099_v2 = vld [vmem:[%s7186_s1 + $0x8c4] sm:$0x30] }
  0xb2   :  { %2356 = vmatpush.bf16.msra.mxu1 %v3922_v9  ;;  %2866 = vst [vmem:[%s7189_s3 + $0x158] sm:$0xff] %v2701_v36  ;;  %4184 = vmatmul.msk.bf16.gmra.mxu2 %vm1748_vm1, %v5797_v44  ;;  %v4346_v9 = vld [vmem:[%s7186_s1 + $0x398] sm:$0xf0]  ;;  %v4263_v36 = vld [vmem:[%s7186_s1 + $0x100] sm:$0xf0] }
  0xb3   :  { %2375 = vmatpush.bf16.msra.mxu2 %v3926_v18  ;;  %2905 = vst [vmem:[%s7189_s3 + $0x290] sm:$0xff] %v2740_v42  ;;  %4186 = vmatmul.msk.bf16.gmra.mxu3 %vm1748_vm1, %v5797_v44  ;;  %v3434_v14 = vor.u32 %v4346_v9, %v3433_v8  ;;  %v3261_v18 = vld [vmem:[%s7186_s1 + $0x1a8] sm:$0xf]  ;;  %v4243_v42 = vld [vmem:[%s7186_s1 + $0x64] sm:$0xf] }
  0xb4   :  { %2394 = vmatpush.bf16.msra.mxu3 %v3930_v31  ;;  %2906 = vst [vmem:[%s7189_s3 + $0x298] sm:$0xff] %v2741_v48  ;;  %v3262_v25 = vor.u32 %v4304_v20, %v3261_v18  ;;  %v4285_v31 = vld [vmem:[%s7186_s1 + $0x1b4] sm:$0xf]  ;;  %v3098_v48 = vor.u32 %v4263_v36, %v3097_v35  ;;  %v4105_v8 = vld [vmem:[%s7186_s1 + $0x828] sm:$0xf] }
  0xb5   :  { %2338 = vmatpush.bf16.msra.mxu0 %v3754_v30  ;;  %2867 = vst [vmem:[%s7189_s3 + $0x160] sm:$0xff] %v2702_v43  ;;  %v1931_v58 = vpop.f32.mrf.mxu2  ;;  %v1895_v62 = vpop.f32.mrf.mxu0  ;;  %v3270_v30 = vor.u32 %v4305_v27, %v3269_v26  ;;  %v3274_v34 = vor.u32 %v4285_v31, %v3271_v32  ;;  %v3099_v43 = vld [vmem:[%s7186_s1 + $0x104] sm:$0xf0]  ;;  %v4512_v9 = vld [vmem:[%s7186_s1 + $0x8c8] sm:$0x30] }
  0xb6   :  { %2357 = vmatpush.bf16.msra.mxu1 %v3758_v39  ;;  %v1932_v37 = vadd.f32 %v1931_v58, %v5735_v5  ;;  %v1950_v63 = vpop.f32.mrf.mxu3  ;;  %v1896_v3 = vadd.f32 %v1895_v62, %v5834_v53  ;;  %v1914_v4 = vpop.f32.mrf.mxu1  ;;  %v4511_v62 = vld [vmem:[%s7186_s1 + $0x8c0] sm:$0x30]  ;;  %v4492_v10 = vld [vmem:[%s7186_s1 + $0x82c] sm:$0xf]  ;;  %v4106_v15 = vor.u32 %v4512_v9, %v4105_v8  ;;  %v3933_v24 = vld [vmem:[%s7186_s1 + $0x6d8] sm:$0xf] }
  0xb7   :  { %2376 = vmatpush.bf16.msra.mxu2 %v3762_v40  ;;  %v1951_v6 = vadd.f32 %v1950_v63, %v5735_v5  ;;  %v1915_v11 = vadd.f32 %v1914_v4, %v5834_v53  ;;  %v4471_v35 = vld [vmem:[%s7186_s1 + $0x780] sm:$0xf0]  ;;  %v3613_v9 = vld [vmem:[%s7186_s1 + $0x450] sm:$0xf] }
  0xb8   :  { %2395 = vmatpush.bf16.msra.mxu3 %v3766_v47  ;;  %v2742_v12 = vmax.f32 %v1932_v37, 0.0  ;;  %v2781_v16 = vmax.f32 %v1896_v3, 0.0  ;;  %v1847_v32 = vsel %vm1755_vm0, %v4106_v15, 0  ;;  %v4451_v36 = vld [vmem:[%s7186_s1 + $0x6e4] sm:$0xf] }
  0xb9   :  { %2339 = vmatpush.bf16.msra.mxu0 %v3590_v19  ;;  %v2743_v17 = vmax.f32 %v1951_v6, 0.0  ;;  %v2782_v22 = vmax.f32 %v1915_v11, 0.0  ;;  %v4244_v19 = vld [vmem:[%s7186_s1 + $0x6c] sm:$0xf]  ;;  %v3441_v15 = vld [vmem:[%s7186_s1 + $0x300] sm:$0xf] }
  0xba   :  { %2358 = vmatpush.bf16.msra.mxu1 %v3594_v54  ;;  %2907 = vst [vmem:[%s7189_s3 + $0x2a0] sm:$0xff] %v2742_v12  ;;  %v3102_v54 = vor.u32 %v4243_v42, %v3099_v43  ;;  %v3110_v59 = vor.u32 %v4244_v19, %v3107_v56  ;;  %v4430_v56 = vld [vmem:[%s7186_s1 + $0x638] sm:$0xf0] }
  0xbb   :  { %2377 = vmatpush.bf16.msra.mxu2 %v3598_v55  ;;  %2946 = vst [vmem:[%s7189_s3 + $0x3d8] sm:$0xff] %v2781_v16  ;;  %v3106_v55 = vor.u32 %v4264_v50, %v3105_v49  ;;  %v4107_v16 = vld [vmem:[%s7186_s1 + $0x8cc] sm:$0x30]  ;;  %v3771_v49 = vld [vmem:[%s7186_s1 + $0x634] sm:$0xf0] }
  0xbc   :  { %2396 = vmatpush.bf16.msra.mxu3 %v3602_v61  ;;  %2947 = vst [vmem:[%s7189_s3 + $0x3e0] sm:$0xff] %v2782_v22  ;;  %v4097_v61 = vld [vmem:[%s7186_s1 + $0x820] sm:$0xf]  ;;  %v3943_v50 = vld [vmem:[%s7186_s1 + $0x784] sm:$0xf0] }
  0xbd   :  { %2340 = vmatpush.bf16.msra.mxu0 %v3426_v7  ;;  %2908 = vst [vmem:[%s7189_s3 + $0x2a8] sm:$0xff] %v2743_v17  ;;  %v1933_v33 = vpop.f32.mrf.mxu2  ;;  %v1964_v41 = vpop.f32.mrf.mxu0  ;;  %v4098_v63 = vor.u32 %v4511_v62, %v4097_v61  ;;  %v4102_v7 = vor.u32 %v4491_v0, %v4099_v2  ;;  %v3779_v61 = vld [vmem:[%s7186_s1 + $0x63c] sm:$0xf0]  ;;  %v4388_v0 = vld [vmem:[%s7186_s1 + $0x4e8] sm:$0xf0] }
  0xbe   :  { %2359 = vmatpush.bf16.msra.mxu1 %v3430_v13  ;;  %v1934_v39 = vadd.f32 %v1933_v33, %v5834_v53  ;;  %v1952_v40 = vpop.f32.mrf.mxu3  ;;  %v1965_v46 = vadd.f32 %v1964_v41, %v5617_v1  ;;  %v1983_v47 = vpop.f32.mrf.mxu1  ;;  %v4429_v41 = vld [vmem:[%s7186_s1 + $0x630] sm:$0xf0] }
  0xbf   :  { %2378 = vmatpush.bf16.msra.mxu2 %v3434_v14  ;;  %v1953_v45 = vadd.f32 %v1952_v40, %v5834_v53  ;;  %v1984_v52 = vadd.f32 %v1983_v47, %v5617_v1  ;;  %v1841_v14 = vsel %vm1755_vm0, %v4098_v63, 0  ;;  %v1844_v20 = vsel %vm1755_vm0, %v4102_v7, 0  ;;  %v3769_v40 = vld [vmem:[%s7186_s1 + $0x590] sm:$0xf]  ;;  %v3605_v63 = vld [vmem:[%s7186_s1 + $0x448] sm:$0xf] }
  0xc0   :  { %2397 = vmatpush.bf16.msra.mxu3 %v3438_v21  ;;  %v2783_v51 = vmax.f32 %v1934_v39, 0.0  ;;  %v2662_v58 = vmax.f32 %v1965_v46, 0.0  ;;  %4187 = vmatmul.msk.bf16.vlgmr.msrb.gmra.mxu0 %vm1748_vm1, %v5666_v29  ;;  %v4110_v21 = vor.u32 %v4492_v10, %v4107_v16  ;;  %v3770_v47 = vor.u32 %v4429_v41, %v3769_v40  ;;  %v3607_v7 = vld [vmem:[%s7186_s1 + $0x4ec] sm:$0xf0]  ;;  %v4389_v10 = vld [vmem:[%s7186_s1 + $0x4f0] sm:$0xf0] }
  0xc1   :  { %2341 = vmatpush.bf16.msra.mxu0 %v3262_v25  ;;  %v2784_v57 = vmax.f32 %v1953_v45, 0.0  ;;  %v2663_v60 = vmax.f32 %v1984_v52, 0.0  ;;  %4189 = vmatmul.msk.bf16.vlgmr.msrb.gmra.mxu1 %vm1748_vm1, %v5666_v29  ;;  %v4470_v25 = vld [vmem:[%s7186_s1 + $0x778] sm:$0xf0]  ;;  %v4347_v16 = vld [vmem:[%s7186_s1 + $0x3a0] sm:$0xf0] }
  0xc2   :  { %2360 = vmatpush.bf16.msra.mxu1 %v3266_v28  ;;  %2948 = vst [vmem:[%s7189_s3 + $0x3e8] sm:$0xff] %v2783_v51  ;;  %4191 = vmatmul.msk.bf16.vlgmr.msrb.gmra.mxu2 %vm1748_vm1, %v5666_v29  ;;  %v3934_v27 = vor.u32 %v4470_v25, %v3933_v24  ;;  %v4450_v28 = vld [vmem:[%s7186_s1 + $0x6dc] sm:$0xf]  ;;  %v1850_v33 = vsel %vm1755_vm0, %v4110_v21, 0  ;;  %v3443_v24 = vld [vmem:[%s7186_s1 + $0x3a4] sm:$0xf0] }
  0xc3   :  { %2379 = vmatpush.bf16.msra.mxu2 %v3270_v30  ;;  %2949 = vst [vmem:[%s7189_s3 + $0x3f0] sm:$0xff] %v2784_v57  ;;  %4193 = vmatmul.msk.bf16.vlgmr.msrb.gmra.mxu3 %vm1748_vm1, %v5666_v29  ;;  %v3935_v30 = vld [vmem:[%s7186_s1 + $0x77c] sm:$0xf0]  ;;  %v3277_v41 = vld [vmem:[%s7186_s1 + $0x1b8] sm:$0xf] }
  0xc4   :  { %2398 = vmatpush.bf16.msra.mxu3 %v3274_v34  ;;  %2826 = vst [vmem:[%s7189_s3 + $0x20] sm:$0xff] %v2662_v58  ;;  %v3938_v31 = vor.u32 %v4450_v28, %v3935_v30  ;;  %v3941_v34 = vld [vmem:[%s7186_s1 + $0x6e0] sm:$0xf]  ;;  %v3449_v30 = vld [vmem:[%s7186_s1 + $0x308] sm:$0xf] }
  0xc5   :  { %2342 = vmatpush.bf16.msra.mxu0 %v3098_v48  ;;  %2827 = vst [vmem:[%s7189_s3 + $0x28] sm:$0xff] %v2663_v60  ;;  %v2002_v37 = vpop.f32.mrf.mxu2  ;;  %v1966_v3 = vpop.f32.mrf.mxu0  ;;  %v3942_v42 = vor.u32 %v4471_v35, %v3941_v34  ;;  %v4409_v48 = vld [vmem:[%s7186_s1 + $0x594] sm:$0xf]  ;;  %v4410_v60 = vld [vmem:[%s7186_s1 + $0x59c] sm:$0xf] }
  0xc6   :  { %2361 = vmatpush.bf16.msra.mxu1 %v3102_v54  ;;  %v2003_v4 = vadd.f32 %v2002_v37, %v5617_v1  ;;  %v2021_v6 = vpop.f32.mrf.mxu3  ;;  %v1967_v11 = vadd.f32 %v1966_v3, %v5694_v38  ;;  %v1985_v12 = vpop.f32.mrf.mxu1  ;;  %v3774_v54 = vor.u32 %v4409_v48, %v3771_v49  ;;  %v4328_v35 = vld [vmem:[%s7186_s1 + $0x30c] sm:$0xf]  ;;  %v3279_v48 = vld [vmem:[%s7186_s1 + $0x25c] sm:$0xf0] }
  0xc7   :  { %2380 = vmatpush.bf16.msra.mxu2 %v3106_v55  ;;  %v2022_v13 = vadd.f32 %v2021_v6, %v5617_v1  ;;  %v1986_v17 = vadd.f32 %v1985_v12, %v5694_v38  ;;  %v3777_v55 = vld [vmem:[%s7186_s1 + $0x598] sm:$0xf]  ;;  %v4368_v6 = vld [vmem:[%s7186_s1 + $0x44c] sm:$0xf]  ;;  %v4369_v12 = vld [vmem:[%s7186_s1 + $0x454] sm:$0xf] }
  0xc8   :  { %2399 = vmatpush.bf16.msra.mxu3 %v3110_v59  ;;  %v2664_v18 = vmax.f32 %v2003_v4, 0.0  ;;  %v2703_v22 = vmax.f32 %v1967_v11, 0.0  ;;  %v3946_v59 = vor.u32 %v4451_v36, %v3943_v50  ;;  %v3778_v2 = vor.u32 %v4430_v56, %v3777_v55  ;;  %v3451_v36 = vld [vmem:[%s7186_s1 + $0x3ac] sm:$0xf0]  ;;  %v3285_v50 = vld [vmem:[%s7186_s1 + $0x1c0] sm:$0xf] }
  0xc9   :  { %2412 = vmatpush.bf16.msrb.mxu0 %v1841_v14  ;;  %v2665_v23 = vmax.f32 %v2022_v13, 0.0  ;;  %v2704_v26 = vmax.f32 %v1986_v17, 0.0  ;;  %v3606_v4 = vor.u32 %v4388_v0, %v3605_v63  ;;  %v3610_v8 = vor.u32 %v4368_v6, %v3607_v7  ;;  %v3615_v13 = vld [vmem:[%s7186_s1 + $0x4f4] sm:$0xf0]  ;;  %v4266_v7 = vld [vmem:[%s7186_s1 + $0x118] sm:$0xf0] }
  0xca   :  { %2431 = vmatpush.bf16.msrb.mxu1 %v1844_v20  ;;  %2828 = vst [vmem:[%s7189_s3 + $0x30] sm:$0xff] %v2664_v18  ;;  %v3782_v11 = vor.u32 %v4410_v60, %v3779_v61  ;;  %v3614_v17 = vor.u32 %v4389_v10, %v3613_v9  ;;  %v3618_v34 = vor.u32 %v4369_v12, %v3615_v13  ;;  %v3115_v63 = vld [vmem:[%s7186_s1 + $0x114] sm:$0xf0] }
  0xcb   :  { %2868 = vst [vmem:[%s7189_s3 + $0x168] sm:$0xff] %v2703_v22  ;;  %2450 = vmatpush.bf16.msrb.mxu2 %v1847_v32  ;;  %v3442_v22 = vor.u32 %v4347_v16, %v3441_v15  ;;  %v3121_v6 = vld [vmem:[%s7186_s1 + $0x78] sm:$0xf]  ;;  %v3123_v15 = vld [vmem:[%s7186_s1 + $0x11c] sm:$0xf0] }
  0xcc   :  { %2869 = vst [vmem:[%s7189_s3 + $0x170] sm:$0xff] %v2704_v26  ;;  %2469 = vmatpush.bf16.msrb.mxu3 %v1850_v33  ;;  %v3122_v13 = vor.u32 %v4266_v7, %v3121_v6  ;;  %v3959_v6 = vld [vmem:[%s7186_s1 + $0x794] sm:$0xf0] }
  0xcd   :  { %2413 = vmatpush.bf16.msrb.mxu0 %v3934_v27  ;;  %2829 = vst [vmem:[%s7189_s3 + $0x38] sm:$0xff] %v2665_v23  ;;  %v2004_v39 = vpop.f32.mrf.mxu2  ;;  %v1969_v43 = vpop.f32.mrf.mxu0  ;;  %v4327_v23 = vld [vmem:[%s7186_s1 + $0x304] sm:$0xf] }
  0xce   :  { %2432 = vmatpush.bf16.msrb.mxu1 %v3938_v31  ;;  %v2005_v45 = vadd.f32 %v2004_v39, %v5694_v38  ;;  %v2023_v46 = vpop.f32.mrf.mxu3  ;;  %v1970_v19 = vadd.f32 %v1969_v43, %v5735_v5  ;;  %v1988_v51 = vpop.f32.mrf.mxu1  ;;  %v3446_v28 = vor.u32 %v4327_v23, %v3443_v24  ;;  %v4348_v31 = vld [vmem:[%s7186_s1 + $0x3a8] sm:$0xf0]  ;;  %v4115_v23 = vld [vmem:[%s7186_s1 + $0x8d4] sm:$0x30] }
  0xcf   :  { %v2024_v52 = vadd.f32 %v2023_v46, %v5694_v38  ;;  %v1989_v57 = vadd.f32 %v1988_v51, %v5735_v5  ;;  %2451 = vmatpush.bf16.msrb.mxu2 %v3942_v42  ;;  %v4306_v42 = vld [vmem:[%s7186_s1 + $0x258] sm:$0xf0]  ;;  %v3450_v43 = vor.u32 %v4348_v31, %v3449_v30  ;;  %v3454_v51 = vor.u32 %v4328_v35, %v3451_v36 }
  0xd0   :  { %v2705_v58 = vmax.f32 %v2005_v45, 0.0  ;;  %v2744_v62 = vmax.f32 %v1970_v19, 0.0  ;;  %4188 = vmatmul.msk.bf16.gmra.mxu0 %vm1748_vm1, %v5797_v44  ;;  %2470 = vmatpush.bf16.msrb.mxu3 %v3946_v59  ;;  %v3278_v46 = vor.u32 %v4306_v42, %v3277_v41  ;;  %v4307_v19 = vld [vmem:[%s7186_s1 + $0x260] sm:$0xf0]  ;;  %v4514_v30 = vld [vmem:[%s7186_s1 + $0x8d8] sm:$0x30] }
  0xd1   :  { %2414 = vmatpush.bf16.msrb.mxu0 %v3770_v47  ;;  %v2706_v37 = vmax.f32 %v2024_v52, 0.0  ;;  %v2745_v3 = vmax.f32 %v1989_v57, 0.0  ;;  %4190 = vmatmul.msk.bf16.gmra.mxu1 %vm1748_vm1, %v5797_v44  ;;  %v4286_v47 = vld [vmem:[%s7186_s1 + $0x1bc] sm:$0xf]  ;;  %v4287_v52 = vld [vmem:[%s7186_s1 + $0x1c4] sm:$0xf]  ;;  %v3286_v56 = vor.u32 %v4307_v19, %v3285_v50 }
  0xd2   :  { %2433 = vmatpush.bf16.msrb.mxu1 %v3774_v54  ;;  %2870 = vst [vmem:[%s7189_s3 + $0x178] sm:$0xff] %v2705_v58  ;;  %4192 = vmatmul.msk.bf16.gmra.mxu2 %vm1748_vm1, %v5797_v44  ;;  %v3282_v49 = vor.u32 %v4286_v47, %v3279_v48  ;;  %v3287_v54 = vld [vmem:[%s7186_s1 + $0x264] sm:$0xf0]  ;;  %v3113_v57 = vld [vmem:[%s7186_s1 + $0x70] sm:$0xf] }
  0xd3   :  { %2909 = vst [vmem:[%s7189_s3 + $0x2b0] sm:$0xff] %v2744_v62  ;;  %4194 = vmatmul.msk.bf16.gmra.mxu3 %vm1748_vm1, %v5797_v44  ;;  %2452 = vmatpush.bf16.msrb.mxu2 %v3778_v2  ;;  %v4265_v58 = vld [vmem:[%s7186_s1 + $0x110] sm:$0xf0]  ;;  %v3290_v10 = vor.u32 %v4287_v52, %v3287_v54  ;;  %v4494_v31 = vld [vmem:[%s7186_s1 + $0x83c] sm:$0xf] }
  0xd4   :  { %2910 = vst [vmem:[%s7189_s3 + $0x2b8] sm:$0xff] %v2745_v3  ;;  %2471 = vmatpush.bf16.msrb.mxu3 %v3782_v11  ;;  %v3114_v62 = vor.u32 %v4265_v58, %v3113_v57  ;;  %v3949_v47 = vld [vmem:[%s7186_s1 + $0x6e8] sm:$0xf]  ;;  %v4472_v48 = vld [vmem:[%s7186_s1 + $0x788] sm:$0xf0] }
  0xd5   :  { %2415 = vmatpush.bf16.msrb.mxu0 %v3606_v4  ;;  %2871 = vst [vmem:[%s7189_s3 + $0x180] sm:$0xff] %v2706_v37  ;;  %v2007_v14 = vpop.f32.mrf.mxu2  ;;  %v1971_v18 = vpop.f32.mrf.mxu0  ;;  %v4245_v37 = vld [vmem:[%s7186_s1 + $0x74] sm:$0xf]  ;;  %v3950_v50 = vor.u32 %v4472_v48, %v3949_v47  ;;  %v4452_v19 = vld [vmem:[%s7186_s1 + $0x6ec] sm:$0xf] }
  0xd6   :  { %2434 = vmatpush.bf16.msrb.mxu1 %v3610_v8  ;;  %v2008_v20 = vadd.f32 %v2007_v14, %v5735_v5  ;;  %v2026_v21 = vpop.f32.mrf.mxu3  ;;  %v1972_v25 = vadd.f32 %v1971_v18, %v5834_v53  ;;  %v1990_v26 = vpop.f32.mrf.mxu1  ;;  %v3118_v4 = vor.u32 %v4245_v37, %v3115_v63  ;;  %v4246_v14 = vld [vmem:[%s7186_s1 + $0x7c] sm:$0xf]  ;;  %v4113_v18 = vld [vmem:[%s7186_s1 + $0x830] sm:$0xf]  ;;  %v4473_v57 = vld [vmem:[%s7186_s1 + $0x790] sm:$0xf0] }
  0xd7   :  { %v2027_v27 = vadd.f32 %v2026_v21, %v5735_v5  ;;  %v1991_v32 = vadd.f32 %v1990_v26, %v5834_v53  ;;  %2453 = vmatpush.bf16.msrb.mxu2 %v3614_v17  ;;  %v3126_v17 = vor.u32 %v4246_v14, %v3123_v15  ;;  %v4453_v58 = vld [vmem:[%s7186_s1 + $0x6f4] sm:$0xf] }
  0xd8   :  { %v2746_v33 = vmax.f32 %v2008_v20, 0.0  ;;  %v2785_v39 = vmax.f32 %v1972_v25, 0.0  ;;  %2472 = vmatpush.bf16.msrb.mxu3 %v3618_v34  ;;  %v4513_v20 = vld [vmem:[%s7186_s1 + $0x8d0] sm:$0x30]  ;;  %v3962_v15 = vor.u32 %v4453_v58, %v3959_v6 }
  0xd9   :  { %2416 = vmatpush.bf16.msrb.mxu0 %v3442_v22  ;;  %v2747_v40 = vmax.f32 %v2027_v27, 0.0  ;;  %v2786_v45 = vmax.f32 %v1991_v32, 0.0  ;;  %v4114_v21 = vor.u32 %v4513_v20, %v4113_v18  ;;  %v4493_v22 = vld [vmem:[%s7186_s1 + $0x834] sm:$0xf] }
  0xda   :  { %2435 = vmatpush.bf16.msrb.mxu1 %v3446_v28  ;;  %2911 = vst [vmem:[%s7189_s3 + $0x2c0] sm:$0xff] %v2746_v33  ;;  %v4118_v27 = vor.u32 %v4493_v22, %v4115_v23  ;;  %v4121_v28 = vld [vmem:[%s7186_s1 + $0x838] sm:$0xf] }
  0xdb   :  { %2950 = vst [vmem:[%s7189_s3 + $0x3f8] sm:$0xff] %v2785_v39  ;;  %2454 = vmatpush.bf16.msrb.mxu2 %v3450_v43  ;;  %v1853_v35 = vsel %vm1755_vm0, %v4114_v21, 0  ;;  %v4122_v36 = vor.u32 %v4514_v30, %v4121_v28  ;;  %v4123_v39 = vld [vmem:[%s7186_s1 + $0x8dc] sm:$0x30]  ;;  %v4390_v21 = vld [vmem:[%s7186_s1 + $0x4f8] sm:$0xf0] }
  0xdc   :  { %2951 = vst [vmem:[%s7189_s3 + $0x400] sm:$0xff] %v2786_v45  ;;  %2473 = vmatpush.bf16.msrb.mxu3 %v3454_v51  ;;  %v1856_v42 = vsel %vm1755_vm0, %v4118_v27, 0  ;;  %v4126_v43 = vor.u32 %v4494_v31, %v4123_v39  ;;  %v3951_v51 = vld [vmem:[%s7186_s1 + $0x78c] sm:$0xf0]  ;;  %v3629_v28 = vld [vmem:[%s7186_s1 + $0x460] sm:$0xf] }
  0xdd   :  { %2417 = vmatpush.bf16.msrb.mxu0 %v3278_v46  ;;  %2912 = vst [vmem:[%s7189_s3 + $0x2c8] sm:$0xff] %v2747_v40  ;;  %v2009_v55 = vpop.f32.mrf.mxu2  ;;  %v2040_v61 = vpop.f32.mrf.mxu0  ;;  %v3954_v52 = vor.u32 %v4452_v19, %v3951_v51  ;;  %v1859_v54 = vsel %vm1755_vm0, %v4122_v36, 0  ;;  %v4391_v30 = vld [vmem:[%s7186_s1 + $0x500] sm:$0xf0]  ;;  %v4350_v19 = vld [vmem:[%s7186_s1 + $0x3b8] sm:$0xf0] }
  0xde   :  { %2436 = vmatpush.bf16.msrb.mxu1 %v3282_v49  ;;  %v2010_v59 = vadd.f32 %v2009_v55, %v5834_v53  ;;  %v2028_v60 = vpop.f32.mrf.mxu3  ;;  %v2041_v2 = vadd.f32 %v2040_v61, %v5617_v1  ;;  %v2059_v3 = vpop.f32.mrf.mxu1  ;;  %v1862_v55 = vsel %vm1755_vm0, %v4126_v43, 0  ;;  %v4431_v61 = vld [vmem:[%s7186_s1 + $0x640] sm:$0xf0]  ;;  %v3630_v36 = vor.u32 %v4391_v30, %v3629_v28  ;;  %v4329_v43 = vld [vmem:[%s7186_s1 + $0x314] sm:$0xf] }
  0xdf   :  { %v2029_v0 = vadd.f32 %v2028_v60, %v5834_v53  ;;  %v2060_v9 = vadd.f32 %v2059_v3, %v5617_v1  ;;  %2455 = vmatpush.bf16.msrb.mxu2 %v3286_v56  ;;  %v3957_v56 = vld [vmem:[%s7186_s1 + $0x6f0] sm:$0xf]  ;;  %v3785_v60 = vld [vmem:[%s7186_s1 + $0x5a0] sm:$0xf]  ;;  %v4411_v3 = vld [vmem:[%s7186_s1 + $0x5a4] sm:$0xf] }
  0xe0   :  { %v2787_v8 = vmax.f32 %v2010_v59, 0.0  ;;  %v2666_v12 = vmax.f32 %v2041_v2, 0.0  ;;  %4195 = vmatmul.msk.bf16.vlgmr.msra.gmra.mxu0 %vm1748_vm1, %v5666_v29  ;;  %2474 = vmatpush.bf16.msrb.mxu3 %v3290_v10  ;;  %v3786_v2 = vor.u32 %v4431_v61, %v3785_v60  ;;  %v4308_v60 = vld [vmem:[%s7186_s1 + $0x268] sm:$0xf0] }
  0xe1   :  { %2418 = vmatpush.bf16.msrb.mxu0 %v3114_v62  ;;  %v2788_v11 = vmax.f32 %v2029_v0, 0.0  ;;  %v2667_v16 = vmax.f32 %v2060_v9, 0.0  ;;  %4197 = vmatmul.msk.bf16.vlgmr.msra.gmra.mxu1 %vm1748_vm1, %v5666_v29  ;;  %v3958_v62 = vor.u32 %v4473_v57, %v3957_v56  ;;  %v3467_v56 = vld [vmem:[%s7186_s1 + $0x3bc] sm:$0xf0] }
  0xe2   :  { %2952 = vst [vmem:[%s7189_s3 + $0x408] sm:$0xff] %v2787_v8  ;;  %4199 = vmatmul.msk.bf16.vlgmr.msra.gmra.mxu2 %vm1748_vm1, %v5666_v29  ;;  %2437 = vmatpush.bf16.msrb.mxu1 %v3118_v4  ;;  %v3787_v4 = vld [vmem:[%s7186_s1 + $0x644] sm:$0xf0] }
  0xe3   :  { %2953 = vst [vmem:[%s7189_s3 + $0x410] sm:$0xff] %v2788_v11  ;;  %4201 = vmatmul.msk.bf16.vlgmr.msra.gmra.mxu3 %vm1748_vm1, %v5666_v29  ;;  %2456 = vmatpush.bf16.msrb.mxu2 %v3122_v13  ;;  %v3790_v10 = vor.u32 %v4411_v3, %v3787_v4  ;;  %v3793_v11 = vld [vmem:[%s7186_s1 + $0x5a8] sm:$0xf]  ;;  %v3301_v3 = vld [vmem:[%s7186_s1 + $0x1d0] sm:$0xf] }
  0xe4   :  { %2830 = vst [vmem:[%s7189_s3 + $0x40] sm:$0xff] %v2666_v12  ;;  %2475 = vmatpush.bf16.msrb.mxu3 %v3126_v17  ;;  %v4432_v12 = vld [vmem:[%s7186_s1 + $0x648] sm:$0xf0]  ;;  %v3795_v17 = vld [vmem:[%s7186_s1 + $0x64c] sm:$0xf0] }
  0xe5   :  { %2831 = vst [vmem:[%s7189_s3 + $0x48] sm:$0xff] %v2667_v16  ;;  %v2078_v29 = vpop.f32.mrf.mxu2  ;;  %v2042_v24 = vpop.f32.mrf.mxu0  ;;  %2488 = vmatpush.bf16.msra.mxu0 %v1853_v35  ;;  %v4412_v16 = vld [vmem:[%s7186_s1 + $0x5ac] sm:$0xf]  ;;  %v3794_v22 = vor.u32 %v4432_v12, %v3793_v11  ;;  %v4349_v35 = vld [vmem:[%s7186_s1 + $0x3b0] sm:$0xf0] }
  0xe6   :  { %v2079_v25 = vadd.f32 %v2078_v29, %v5617_v1  ;;  %v2097_v26 = vpop.f32.mrf.mxu3  ;;  %v2043_v32 = vadd.f32 %v2042_v24, %v5694_v38  ;;  %v2061_v33 = vpop.f32.mrf.mxu1  ;;  %2507 = vmatpush.bf16.msra.mxu1 %v1856_v42  ;;  %v3621_v29 = vld [vmem:[%s7186_s1 + $0x458] sm:$0xf]  ;;  %v3798_v31 = vor.u32 %v4412_v16, %v3795_v17  ;;  %v4309_v4 = vld [vmem:[%s7186_s1 + $0x270] sm:$0xf0]  ;;  %v3129_v11 = vld [vmem:[%s7186_s1 + $0x80] sm:$0xf] }
  0xe7   :  { %v2098_v34 = vadd.f32 %v2097_v26, %v5617_v1  ;;  %v2062_v40 = vadd.f32 %v2061_v33, %v5694_v38  ;;  %2526 = vmatpush.bf16.msra.mxu2 %v1859_v54  ;;  %v3622_v24 = vor.u32 %v4390_v21, %v3621_v29  ;;  %v3623_v26 = vld [vmem:[%s7186_s1 + $0x4fc] sm:$0xf0]  ;;  %v4267_v12 = vld [vmem:[%s7186_s1 + $0x120] sm:$0xf0] }
  0xe8   :  { %v2668_v41 = vmax.f32 %v2079_v25, 0.0  ;;  %v2707_v45 = vmax.f32 %v2043_v32, 0.0  ;;  %2545 = vmatpush.bf16.msra.mxu3 %v1862_v55  ;;  %v4370_v25 = vld [vmem:[%s7186_s1 + $0x45c] sm:$0xf]  ;;  %v3631_v32 = vld [vmem:[%s7186_s1 + $0x504] sm:$0xf0]  ;;  %v3130_v16 = vor.u32 %v4267_v12, %v3129_v11 }
  0xe9   :  { %v2669_v46 = vmax.f32 %v2098_v34, 0.0  ;;  %v2708_v49 = vmax.f32 %v2062_v40, 0.0  ;;  %2489 = vmatpush.bf16.msra.mxu0 %v3950_v50  ;;  %v3626_v27 = vor.u32 %v4370_v25, %v3623_v26  ;;  %v3457_v34 = vld [vmem:[%s7186_s1 + $0x310] sm:$0xf]  ;;  %v3465_v50 = vld [vmem:[%s7186_s1 + $0x318] sm:$0xf] }
  0xea   :  { %2832 = vst [vmem:[%s7189_s3 + $0x50] sm:$0xff] %v2668_v41  ;;  %2508 = vmatpush.bf16.msra.mxu1 %v3954_v52  ;;  %v3458_v42 = vor.u32 %v4349_v35, %v3457_v34  ;;  %v4330_v55 = vld [vmem:[%s7186_s1 + $0x31c] sm:$0xf]  ;;  %v3466_v61 = vor.u32 %v4350_v19, %v3465_v50  ;;  %v4247_v17 = vld [vmem:[%s7186_s1 + $0x84] sm:$0xf] }
  0xeb   :  { %2872 = vst [vmem:[%s7189_s3 + $0x188] sm:$0xff] %v2707_v45  ;;  %2527 = vmatpush.bf16.msra.mxu2 %v3958_v62  ;;  %v3459_v45 = vld [vmem:[%s7186_s1 + $0x3b4] sm:$0xf0]  ;;  %v3470_v6 = vor.u32 %v4330_v55, %v3467_v56  ;;  %v4516_v50 = vld [vmem:[%s7186_s1 + $0x8e8] sm:$0x30] }
  0xec   :  { %2873 = vst [vmem:[%s7189_s3 + $0x190] sm:$0xff] %v2708_v49  ;;  %2546 = vmatpush.bf16.msra.mxu3 %v3962_v15  ;;  %v3462_v49 = vor.u32 %v4329_v43, %v3459_v45  ;;  %v4131_v43 = vld [vmem:[%s7186_s1 + $0x8e4] sm:$0x30]  ;;  %v4496_v19 = vld [vmem:[%s7186_s1 + $0x84c] sm:$0xf] }
  0xed   :  { %2833 = vst [vmem:[%s7189_s3 + $0x58] sm:$0xff] %v2669_v46  ;;  %v2080_v59 = vpop.f32.mrf.mxu2  ;;  %v2045_v37 = vpop.f32.mrf.mxu0  ;;  %2490 = vmatpush.bf16.msra.mxu0 %v3786_v2  ;;  %v4475_v11 = vld [vmem:[%s7186_s1 + $0x7a0] sm:$0xf0] }
  0xee   :  { %v2081_v63 = vadd.f32 %v2080_v59, %v5694_v38  ;;  %v2099_v0 = vpop.f32.mrf.mxu3  ;;  %v2046_v7 = vadd.f32 %v2045_v37, %v5735_v5  ;;  %v2064_v8 = vpop.f32.mrf.mxu1  ;;  %2509 = vmatpush.bf16.msra.mxu1 %v3790_v10  ;;  %v3293_v59 = vld [vmem:[%s7186_s1 + $0x1c8] sm:$0xf]  ;;  %v3302_v10 = vor.u32 %v4309_v4, %v3301_v3  ;;  %v4454_v4 = vld [vmem:[%s7186_s1 + $0x6fc] sm:$0xf]  ;;  %v4455_v12 = vld [vmem:[%s7186_s1 + $0x704] sm:$0xf] }
  0xef   :  { %v2100_v9 = vadd.f32 %v2099_v0, %v5694_v38  ;;  %v2065_v13 = vadd.f32 %v2064_v8, %v5735_v5  ;;  %2528 = vmatpush.bf16.msra.mxu2 %v3794_v22  ;;  %v3294_v37 = vor.u32 %v4308_v60, %v3293_v59  ;;  %v3295_v0 = vld [vmem:[%s7186_s1 + $0x26c] sm:$0xf0]  ;;  %v3303_v8 = vld [vmem:[%s7186_s1 + $0x274] sm:$0xf0] }
  0xf0   :  { %v2709_v14 = vmax.f32 %v2081_v63, 0.0  ;;  %v2748_v18 = vmax.f32 %v2046_v7, 0.0  ;;  %4196 = vmatmul.msk.bf16.gmra.mxu0 %vm1748_vm1, %v5797_v44  ;;  %2547 = vmatpush.bf16.msra.mxu3 %v3798_v31  ;;  %v4288_v63 = vld [vmem:[%s7186_s1 + $0x1cc] sm:$0xf]  ;;  %v4289_v7 = vld [vmem:[%s7186_s1 + $0x1d4] sm:$0xf] }
  0xf1   :  { %v2710_v20 = vmax.f32 %v2100_v9, 0.0  ;;  %v2749_v23 = vmax.f32 %v2065_v13, 0.0  ;;  %4198 = vmatmul.msk.bf16.gmra.mxu1 %vm1748_vm1, %v5797_v44  ;;  %2491 = vmatpush.bf16.msra.mxu0 %v3622_v24  ;;  %v3298_v2 = vor.u32 %v4288_v63, %v3295_v0  ;;  %v4268_v24 = vld [vmem:[%s7186_s1 + $0x128] sm:$0xf0]  ;;  %v6438_v31 = vld [vmem:[%s7188_s0] sm:$0xff] }
  0xf2   :  { %2874 = vst [vmem:[%s7189_s3 + $0x198] sm:$0xff] %v2709_v14  ;;  %4200 = vmatmul.msk.bf16.gmra.mxu2 %vm1748_vm1, %v5797_v44  ;;  %2510 = vmatpush.bf16.msra.mxu1 %v3626_v27  ;;  %v3306_v27 = vor.u32 %v4289_v7, %v3303_v8  ;;  %v3965_v63 = vld [vmem:[%s7186_s1 + $0x6f8] sm:$0xf]  ;;  %v4474_v0 = vld [vmem:[%s7186_s1 + $0x798] sm:$0xf0] }
  0xf3   :  { %2913 = vst [vmem:[%s7189_s3 + $0x2d0] sm:$0xff] %v2748_v18  ;;  %4202 = vmatmul.msk.bf16.gmra.mxu3 %vm1748_vm1, %v5797_v44  ;;  %v4371_v44 = vld [vmem:[%s7186_s1 + $0x464] sm:$0xf]  ;;  %2529 = vmatpush.bf16.msra.mxu2 %v3630_v36  ;;  %v3131_v18 = vld [vmem:[%s7186_s1 + $0x124] sm:$0xf0]  ;;  %v3966_v3 = vor.u32 %v4474_v0, %v3965_v63 }
  0xf4   :  { %2914 = vst [vmem:[%s7189_s3 + $0x2d8] sm:$0xff] %v2749_v23  ;;  %v3634_v54 = vor.u32 %v4371_v44, %v3631_v32  ;;  %v3134_v22 = vor.u32 %v4247_v17, %v3131_v18  ;;  %v3137_v23 = vld [vmem:[%s7186_s1 + $0x88] sm:$0xf]  ;;  %v4248_v32 = vld [vmem:[%s7186_s1 + $0x8c] sm:$0xf] }
  0xf5   :  { %2875 = vst [vmem:[%s7189_s3 + $0x1a0] sm:$0xff] %v2710_v20  ;;  %v2083_v33 = vpop.f32.mrf.mxu2  ;;  %v2047_v39 = vpop.f32.mrf.mxu0  ;;  %2492 = vmatpush.bf16.msra.mxu0 %v3458_v42  ;;  %v3138_v44 = vor.u32 %v4268_v24, %v3137_v23  ;;  %v4129_v36 = vld [vmem:[%s7186_s1 + $0x840] sm:$0xf]  ;;  %v4495_v42 = vld [vmem:[%s7186_s1 + $0x844] sm:$0xf] }
  0xf6   :  { %v2084_v40 = vadd.f32 %v2083_v33, %v5735_v5  ;;  %v2102_v41 = vpop.f32.mrf.mxu3  ;;  %v2048_v46 = vadd.f32 %v2047_v39, %v5834_v53  ;;  %v2066_v47 = vpop.f32.mrf.mxu1  ;;  %2511 = vmatpush.bf16.msra.mxu1 %v3462_v49  ;;  %2548 = vmatpush.bf16.msra.mxu3 %v3634_v54  ;;  %v3139_v33 = vld [vmem:[%s7186_s1 + $0x12c] sm:$0xf0]  ;;  %v4515_v39 = vld [vmem:[%s7186_s1 + $0x8e0] sm:$0x30]  ;;  %v4137_v49 = vld [vmem:[%s7186_s1 + $0x848] sm:$0xf] }
  0xf7   :  { %v2103_v48 = vadd.f32 %v2102_v41, %v5735_v5  ;;  %v2067_v51 = vadd.f32 %v2066_v47, %v5834_v53  ;;  %2530 = vmatpush.bf16.msra.mxu2 %v3466_v61  ;;  %v3142_v35 = vor.u32 %v4248_v32, %v3139_v33  ;;  %v4130_v41 = vor.u32 %v4515_v39, %v4129_v36  ;;  %v3975_v23 = vld [vmem:[%s7186_s1 + $0x7a4] sm:$0xf0] }
  0xf8   :  { %v2750_v52 = vmax.f32 %v2084_v40, 0.0  ;;  %v2789_v57 = vmax.f32 %v2048_v46, 0.0  ;;  %v4138_v56 = vor.u32 %v4516_v50, %v4137_v49  ;;  %v3978_v33 = vor.u32 %v4455_v12, %v3975_v23  ;;  %v3645_v50 = vld [vmem:[%s7186_s1 + $0x470] sm:$0xf]  ;;  %v3475_v63 = vld [vmem:[%s7186_s1 + $0x3c4] sm:$0xf0] }
  0xf9   :  { %v2751_v58 = vmax.f32 %v2103_v48, 0.0  ;;  %v2790_v62 = vmax.f32 %v2067_v51, 0.0  ;;  %2493 = vmatpush.bf16.msra.mxu0 %v3294_v37  ;;  %v4134_v48 = vor.u32 %v4495_v42, %v4131_v43  ;;  %v1865_v55 = vsel %vm1755_vm0, %v4130_v41, 0  ;;  %v3637_v41 = vld [vmem:[%s7186_s1 + $0x468] sm:$0xf] }
  0xfa   :  { %2915 = vst [vmem:[%s7189_s3 + $0x2e0] sm:$0xff] %v2750_v52  ;;  %2512 = vmatpush.bf16.msra.mxu1 %v3298_v2  ;;  %2549 = vmatpush.bf16.msra.mxu3 %v3470_v6  ;;  %v3967_v6 = vld [vmem:[%s7186_s1 + $0x79c] sm:$0xf0]  ;;  %v1871_v8 = vsel %vm1755_vm0, %v4138_v56, 0  ;;  %v4392_v42 = vld [vmem:[%s7186_s1 + $0x508] sm:$0xf0] }
  0xfb   :  { %2954 = vst [vmem:[%s7189_s3 + $0x418] sm:$0xff] %v2789_v57  ;;  %2531 = vmatpush.bf16.msra.mxu2 %v3302_v10  ;;  %v4139_v57 = vld [vmem:[%s7186_s1 + $0x8ec] sm:$0x30]  ;;  %v1868_v60 = vsel %vm1755_vm0, %v4134_v48, 0  ;;  %v3970_v7 = vor.u32 %v4454_v4, %v3967_v6  ;;  %v3973_v10 = vld [vmem:[%s7186_s1 + $0x700] sm:$0xf] }
  0xfc   :  { %2955 = vst [vmem:[%s7189_s3 + $0x420] sm:$0xff] %v2790_v62  ;;  %v4142_v61 = vor.u32 %v4496_v19, %v4139_v57  ;;  %v3639_v48 = vld [vmem:[%s7186_s1 + $0x50c] sm:$0xf0]  ;;  %v4393_v19 = vld [vmem:[%s7186_s1 + $0x510] sm:$0xf0] }
  0xfd   :  { %2916 = vst [vmem:[%s7189_s3 + $0x2e8] sm:$0xff] %v2751_v58  ;;  %v2085_v9 = vpop.f32.mrf.mxu2  ;;  %v2116_v15 = vpop.f32.mrf.mxu0  ;;  %2494 = vmatpush.bf16.msra.mxu0 %v3130_v16  ;;  %v3974_v16 = vor.u32 %v4475_v11, %v3973_v10  ;;  %v3473_v56 = vld [vmem:[%s7186_s1 + $0x320] sm:$0xf]  ;;  %v4351_v57 = vld [vmem:[%s7186_s1 + $0x3c0] sm:$0xf0] }
  0xfe   :  { %v2086_v13 = vadd.f32 %v2085_v9, %v5834_v53  ;;  %v2104_v14 = vpop.f32.mrf.mxu3  ;;  %v2117_v29 = vadd.f32 %v2116_v15, %v5617_v1  ;;  %v2135_v21 = vpop.f32.mrf.mxu1  ;;  %2513 = vmatpush.bf16.msra.mxu1 %v3134_v22  ;;  %2550 = vmatpush.bf16.msra.mxu3 %v3306_v27  ;;  %v1874_v9 = vsel %vm1755_vm0, %v4142_v61, 0  ;;  %v4433_v15 = vld [vmem:[%s7186_s1 + $0x650] sm:$0xf0]  ;;  %v3803_v22 = vld [vmem:[%s7186_s1 + $0x654] sm:$0xf0] }
  0xff   :  { %v2105_v20 = vadd.f32 %v2104_v14, %v5834_v53  ;;  %v2136_v26 = vadd.f32 %v2135_v21, %v5617_v1  ;;  %2532 = vmatpush.bf16.msra.mxu2 %v3138_v44  ;;  %v3801_v14 = vld [vmem:[%s7186_s1 + $0x5b0] sm:$0xf]  ;;  %v4413_v21 = vld [vmem:[%s7186_s1 + $0x5b4] sm:$0xf]  ;;  %v3481_v6 = vld [vmem:[%s7186_s1 + $0x328] sm:$0xf] }
 0x100   :  { %v2791_v25 = vmax.f32 %v2086_v13, 0.0  ;;  %v2670_v30 = vmax.f32 %v2117_v29, 0.0  ;;  %4203 = vmatmul.msk.bf16.vlgmr.msrb.gmra.mxu0 %vm1748_vm1, %v6438_v31  ;;  %v3802_v29 = vor.u32 %v4433_v15, %v3801_v14  ;;  %v3806_v27 = vor.u32 %v4413_v21, %v3803_v22  ;;  %v4332_v11 = vld [vmem:[%s7186_s1 + $0x32c] sm:$0xf]  ;;  %v3483_v12 = vld [vmem:[%s7186_s1 + $0x3cc] sm:$0xf0] }
 0x101   :  { %v2792_v28 = vmax.f32 %v2105_v20, 0.0  ;;  %v2671_v34 = vmax.f32 %v2136_v26, 0.0  ;;  %4205 = vmatmul.msk.bf16.vlgmr.msrb.gmra.mxu1 %vm1748_vm1, %v6438_v31  ;;  %2564 = vmatpush.bf16.msrb.mxu0 %v1865_v55  ;;  %v3309_v15 = vld [vmem:[%s7186_s1 + $0x1d8] sm:$0xf]  ;;  %v3311_v21 = vld [vmem:[%s7186_s1 + $0x27c] sm:$0xf0] }
 0x102   :  { %2956 = vst [vmem:[%s7189_s3 + $0x428] sm:$0xff] %v2791_v25  ;;  %4207 = vmatmul.msk.bf16.vlgmr.msrb.gmra.mxu2 %vm1748_vm1, %v6438_v31  ;;  %2551 = vmatpush.bf16.msra.mxu3 %v3142_v35  ;;  %v3811_v35 = vld [vmem:[%s7186_s1 + $0x65c] sm:$0xf0] }
 0x103   :  { %2957 = vst [vmem:[%s7189_s3 + $0x430] sm:$0xff] %v2792_v28  ;;  %4209 = vmatmul.msk.bf16.vlgmr.msrb.gmra.mxu3 %vm1748_vm1, %v6438_v31  ;;  %2583 = vmatpush.bf16.msrb.mxu1 %v1868_v60  ;;  %v3809_v28 = vld [vmem:[%s7186_s1 + $0x5b8] sm:$0xf]  ;;  %v3317_v23 = vld [vmem:[%s7186_s1 + $0x1e0] sm:$0xf] }
 0x104   :  { %2834 = vst [vmem:[%s7189_s3 + $0x60] sm:$0xff] %v2670_v30  ;;  %2602 = vmatpush.bf16.msrb.mxu2 %v1871_v8  ;;  %v4434_v30 = vld [vmem:[%s7186_s1 + $0x658] sm:$0xf0] }
 0x105   :  { %2835 = vst [vmem:[%s7189_s3 + $0x68] sm:$0xff] %v2671_v34  ;;  %v2154_v40 = vpop.f32.mrf.mxu2  ;;  %v2118_v45 = vpop.f32.mrf.mxu0  ;;  %2565 = vmatpush.bf16.msrb.mxu0 %v3966_v3  ;;  %v4414_v34 = vld [vmem:[%s7186_s1 + $0x5bc] sm:$0xf]  ;;  %v3810_v43 = vor.u32 %v4434_v30, %v3809_v28 }
 0x106   :  { %v2155_v46 = vadd.f32 %v2154_v40, %v5617_v1  ;;  %v2173_v47 = vpop.f32.mrf.mxu3  ;;  %v2119_v51 = vadd.f32 %v2118_v45, %v5694_v38  ;;  %v2137_v52 = vpop.f32.mrf.mxu1  ;;  %2621 = vmatpush.bf16.msrb.mxu3 %v1874_v9  ;;  %v6565_v40 = vld [vmem:[%s7188_s0 + $0x8] sm:$0xff] }
 0x107   :  { %v2174_v54 = vadd.f32 %v2173_v47, %v5617_v1  ;;  %v2138_v58 = vadd.f32 %v2137_v52, %v5694_v38  ;;  %2584 = vmatpush.bf16.msrb.mxu1 %v3970_v7  ;;  %v4372_v47 = vld [vmem:[%s7186_s1 + $0x46c] sm:$0xf]  ;;  %v4373_v52 = vld [vmem:[%s7186_s1 + $0x474] sm:$0xf] }
 0x108   :  { %v2672_v59 = vmax.f32 %v2155_v46, 0.0  ;;  %v2711_v62 = vmax.f32 %v2119_v51, 0.0  ;;  %2603 = vmatpush.bf16.msrb.mxu2 %v3974_v16  ;;  %v3638_v46 = vor.u32 %v4392_v42, %v3637_v41  ;;  %v3642_v49 = vor.u32 %v4372_v47, %v3639_v48  ;;  %v4352_v7 = vld [vmem:[%s7186_s1 + $0x3c8] sm:$0xf0]  ;;  %v4310_v16 = vld [vmem:[%s7186_s1 + $0x278] sm:$0xf0] }
 0x109   :  { %v2673_v37 = vmax.f32 %v2174_v54, 0.0  ;;  %v2712_v2 = vmax.f32 %v2138_v58, 0.0  ;;  %2566 = vmatpush.bf16.msrb.mxu0 %v3802_v29  ;;  %v3814_v51 = vor.u32 %v4414_v34, %v3811_v35  ;;  %v3647_v54 = vld [vmem:[%s7186_s1 + $0x514] sm:$0xf0]  ;;  %v3646_v58 = vor.u32 %v4393_v19, %v3645_v50  ;;  %v4290_v29 = vld [vmem:[%s7186_s1 + $0x1dc] sm:$0xf] }
 0x10a   :  { %2836 = vst [vmem:[%s7189_s3 + $0x70] sm:$0xff] %v2672_v59  ;;  %2622 = vmatpush.bf16.msrb.mxu3 %v3978_v33  ;;  %v3650_v10 = vor.u32 %v4373_v52, %v3647_v54  ;;  %v3314_v22 = vor.u32 %v4290_v29, %v3311_v21  ;;  %v3147_v41 = vld [vmem:[%s7186_s1 + $0x134] sm:$0xf0]  ;;  %v4270_v48 = vld [vmem:[%s7186_s1 + $0x138] sm:$0xf0] }
 0x10b   :  { %2876 = vst [vmem:[%s7189_s3 + $0x1a8] sm:$0xff] %v2711_v62  ;;  %2585 = vmatpush.bf16.msrb.mxu1 %v3806_v27  ;;  %v3474_v62 = vor.u32 %v4351_v57, %v3473_v56  ;;  %v3319_v27 = vld [vmem:[%s7186_s1 + $0x284] sm:$0xf0]  ;;  %v3153_v47 = vld [vmem:[%s7186_s1 + $0x98] sm:$0xf] }
 0x10c   :  { %2877 = vst [vmem:[%s7189_s3 + $0x1b0] sm:$0xff] %v2712_v2  ;;  %2604 = vmatpush.bf16.msrb.mxu2 %v3810_v43  ;;  %v3154_v54 = vor.u32 %v4270_v48, %v3153_v47  ;;  %v3155_v56 = vld [vmem:[%s7186_s1 + $0x13c] sm:$0xf0] }
 0x10d   :  { %2837 = vst [vmem:[%s7189_s3 + $0x78] sm:$0xff] %v2673_v37  ;;  %v2156_v13 = vpop.f32.mrf.mxu2  ;;  %v2121_v17 = vpop.f32.mrf.mxu0  ;;  %2567 = vmatpush.bf16.msrb.mxu0 %v3638_v46  ;;  %v4331_v37 = vld [vmem:[%s7186_s1 + $0x324] sm:$0xf] }
 0x10e   :  { %v2157_v18 = vadd.f32 %v2156_v13, %v5694_v38  ;;  %v2175_v20 = vpop.f32.mrf.mxu3  ;;  %v2122_v24 = vadd.f32 %v2121_v17, %v5735_v5  ;;  %v2140_v25 = vpop.f32.mrf.mxu1  ;;  %v3478_v4 = vor.u32 %v4331_v37, %v3475_v63  ;;  %2623 = vmatpush.bf16.msrb.mxu3 %v3814_v51  ;;  %v3482_v17 = vor.u32 %v4352_v7, %v3481_v6 }
 0x10f   :  { %v2176_v26 = vadd.f32 %v2175_v20, %v5694_v38  ;;  %v2141_v44 = vadd.f32 %v2140_v25, %v5735_v5  ;;  %2586 = vmatpush.bf16.msrb.mxu1 %v3642_v49  ;;  %v3310_v20 = vor.u32 %v4310_v16, %v3309_v15  ;;  %v3486_v25 = vor.u32 %v4332_v11, %v3483_v12  ;;  %v3981_v11 = vld [vmem:[%s7186_s1 + $0x708] sm:$0xf]  ;;  %v4476_v12 = vld [vmem:[%s7186_s1 + $0x7a8] sm:$0xf0]  ;;  %v3817_v16 = vld [vmem:[%s7186_s1 + $0x5c0] sm:$0xf] }
 0x110   :  { %v2713_v32 = vmax.f32 %v2157_v18, 0.0  ;;  %v2752_v36 = vmax.f32 %v2122_v24, 0.0  ;;  %4204 = vmatmul.msk.bf16.gmra.mxu0 %vm1748_vm1, %v6565_v40  ;;  %2605 = vmatpush.bf16.msrb.mxu2 %v3646_v58  ;;  %v4311_v24 = vld [vmem:[%s7186_s1 + $0x280] sm:$0xf0] }
 0x111   :  { %v2714_v39 = vmax.f32 %v2176_v26, 0.0  ;;  %v2753_v45 = vmax.f32 %v2141_v44, 0.0  ;;  %4206 = vmatmul.msk.bf16.gmra.mxu1 %vm1748_vm1, %v6565_v40  ;;  %2568 = vmatpush.bf16.msrb.mxu0 %v3474_v62  ;;  %v4291_v26 = vld [vmem:[%s7186_s1 + $0x1e4] sm:$0xf]  ;;  %v3318_v30 = vor.u32 %v4311_v24, %v3317_v23  ;;  %v3145_v44 = vld [vmem:[%s7186_s1 + $0x90] sm:$0xf] }
 0x112   :  { %2878 = vst [vmem:[%s7189_s3 + $0x1b8] sm:$0xff] %v2713_v32  ;;  %4208 = vmatmul.msk.bf16.gmra.mxu2 %vm1748_vm1, %v6565_v40  ;;  %2624 = vmatpush.bf16.msrb.mxu3 %v3650_v10  ;;  %v4269_v32 = vld [vmem:[%s7186_s1 + $0x130] sm:$0xf0]  ;;  %v3322_v19 = vor.u32 %v4291_v26, %v3319_v27 }
 0x113   :  { %2917 = vst [vmem:[%s7189_s3 + $0x2f0] sm:$0xff] %v2752_v36  ;;  %4210 = vmatmul.msk.bf16.gmra.mxu3 %vm1748_vm1, %v6565_v40  ;;  %2587 = vmatpush.bf16.msrb.mxu1 %v3478_v4  ;;  %v3146_v36 = vor.u32 %v4269_v32, %v3145_v44  ;;  %v4394_v44 = vld [vmem:[%s7186_s1 + $0x518] sm:$0xf0] }
 0x114   :  { %2918 = vst [vmem:[%s7189_s3 + $0x2f8] sm:$0xff] %v2753_v45  ;;  %2606 = vmatpush.bf16.msrb.mxu2 %v3482_v17  ;;  %v4435_v17 = vld [vmem:[%s7186_s1 + $0x660] sm:$0xf0] }
 0x115   :  { %2879 = vst [vmem:[%s7189_s3 + $0x1c0] sm:$0xff] %v2714_v39  ;;  %v2159_v55 = vpop.f32.mrf.mxu2  ;;  %v2123_v59 = vpop.f32.mrf.mxu0  ;;  %2569 = vmatpush.bf16.msrb.mxu0 %v3310_v20  ;;  %v4249_v39 = vld [vmem:[%s7186_s1 + $0x94] sm:$0xf]  ;;  %v3818_v21 = vor.u32 %v4435_v17, %v3817_v16 }
 0x116   :  { %v2160_v60 = vadd.f32 %v2159_v55, %v5735_v5  ;;  %v2178_v61 = vpop.f32.mrf.mxu3  ;;  %v2124_v0 = vadd.f32 %v2123_v59, %v5834_v53  ;;  %v2142_v2 = vpop.f32.mrf.mxu1  ;;  %v3150_v46 = vor.u32 %v4249_v39, %v3147_v41  ;;  %2625 = vmatpush.bf16.msrb.mxu3 %v3486_v25  ;;  %v4250_v55 = vld [vmem:[%s7186_s1 + $0x9c] sm:$0xf]  ;;  %v4145_v59 = vld [vmem:[%s7186_s1 + $0x850] sm:$0xf] }
 0x117   :  { %v2179_v3 = vadd.f32 %v2178_v61, %v5735_v5  ;;  %v2143_v8 = vadd.f32 %v2142_v2, %v5834_v53  ;;  %2588 = vmatpush.bf16.msrb.mxu1 %v3314_v22  ;;  %v3158_v58 = vor.u32 %v4250_v55, %v3155_v56 }
 0x118   :  { %v2754_v9 = vmax.f32 %v2160_v60, 0.0  ;;  %v2793_v13 = vmax.f32 %v2124_v0, 0.0  ;;  %2607 = vmatpush.bf16.msrb.mxu2 %v3318_v30  ;;  %v4517_v60 = vld [vmem:[%s7186_s1 + $0x8f0] sm:$0x30]  ;;  %v3653_v30 = vld [vmem:[%s7186_s1 + $0x478] sm:$0xf] }
 0x119   :  { %v2755_v14 = vmax.f32 %v2179_v3, 0.0  ;;  %v2794_v18 = vmax.f32 %v2143_v8, 0.0  ;;  %2570 = vmatpush.bf16.msrb.mxu0 %v3146_v36  ;;  %v4146_v62 = vor.u32 %v4517_v60, %v4145_v59  ;;  %v4353_v36 = vld [vmem:[%s7186_s1 + $0x3d0] sm:$0xf0] }
 0x11a   :  { %2919 = vst [vmem:[%s7189_s3 + $0x300] sm:$0xff] %v2754_v9  ;;  %2626 = vmatpush.bf16.msrb.mxu3 %v3322_v19 }
 0x11b   :  { %2958 = vst [vmem:[%s7189_s3 + $0x438] sm:$0xff] %v2793_v13  ;;  %2589 = vmatpush.bf16.msrb.mxu1 %v3150_v46  ;;  %v1877_v6 = vsel %vm1755_vm0, %v4146_v62, 0 }
 0x11c   :  { %2959 = vst [vmem:[%s7189_s3 + $0x440] sm:$0xff] %v2794_v18  ;;  %2608 = vmatpush.bf16.msrb.mxu2 %v3154_v54 }
 0x11d   :  { %2920 = vst [vmem:[%s7189_s3 + $0x308] sm:$0xff] %v2755_v14  ;;  %v2161_v28 = vpop.f32.mrf.mxu2  ;;  %v2192_v35 = vpop.f32.mrf.mxu0  ;;  %v3982_v14 = vor.u32 %v4476_v12, %v3981_v11 }
 0x11e   :  { %v2162_v33 = vadd.f32 %v2161_v28, %v5834_v53  ;;  %v2180_v34 = vpop.f32.mrf.mxu3  ;;  %v2193_v43 = vadd.f32 %v2192_v35, %v5617_v1  ;;  %v2211_v45 = vpop.f32.mrf.mxu1  ;;  %2627 = vmatpush.bf16.msrb.mxu3 %v3158_v58  ;;  %v3489_v35 = vld [vmem:[%s7186_s1 + $0x330] sm:$0xf]  ;;  %v4271_v58 = vld [vmem:[%s7186_s1 + $0x140] sm:$0xf0] }
 0x11f   :  { %v2181_v42 = vadd.f32 %v2180_v34, %v5834_v53  ;;  %v2212_v50 = vadd.f32 %v2211_v45, %v5617_v1 }
 0x120   :  { %v2795_v49 = vmax.f32 %v2162_v33, 0.0  ;;  %v2674_v52 = vmax.f32 %v2193_v43, 0.0  ;;  %4211 = vmatmul.msk.bf16.vlgmr.msra.gmra.mxu0 %vm1748_vm1, %v6438_v31  ;;  %v3654_v33 = vor.u32 %v4394_v44, %v3653_v30  ;;  %v3490_v43 = vor.u32 %v4353_v36, %v3489_v35 }
 0x121   :  { %v2796_v51 = vmax.f32 %v2181_v42, 0.0  ;;  %v2675_v57 = vmax.f32 %v2212_v50, 0.0  ;;  %4213 = vmatmul.msk.bf16.vlgmr.msra.gmra.mxu1 %vm1748_vm1, %v6438_v31  ;;  %2640 = vmatpush.bf16.msra.mxu0 %v1877_v6 }
 0x122   :  { %2960 = vst [vmem:[%s7189_s3 + $0x448] sm:$0xff] %v2795_v49  ;;  %4215 = vmatmul.msk.bf16.vlgmr.msra.gmra.mxu2 %vm1748_vm1, %v6438_v31  ;;  %4518 = vmatpush.bf16.msra.mxu1 %v1877_v6 }
 0x123   :  { %2961 = vst [vmem:[%s7189_s3 + $0x450] sm:$0xff] %v2796_v51  ;;  %4217 = vmatmul.msk.bf16.vlgmr.msra.gmra.mxu3 %vm1748_vm1, %v6438_v31  ;;  %v3325_v51 = vld [vmem:[%s7186_s1 + $0x1e8] sm:$0xf] }
 0x124   :  { %2838 = vst [vmem:[%s7189_s3 + $0x80] sm:$0xff] %v2674_v52  ;;  %v4312_v52 = vld [vmem:[%s7186_s1 + $0x288] sm:$0xf0] }
 0x125   :  { %2839 = vst [vmem:[%s7189_s3 + $0x88] sm:$0xff] %v2675_v57  ;;  %v2230_v61 = vpop.f32.mrf.mxu2  ;;  %v2194_v37 = vpop.f32.mrf.mxu0  ;;  %2641 = vmatpush.bf16.msra.mxu0 %v3982_v14  ;;  %v3326_v55 = vor.u32 %v4312_v52, %v3325_v51  ;;  %v3161_v57 = vld [vmem:[%s7186_s1 + $0xa0] sm:$0xf] }
 0x126   :  { %v2231_v63 = vadd.f32 %v2230_v61, %v5617_v1  ;;  %v2249_v0 = vpop.f32.mrf.mxu3  ;;  %v2195_v2 = vadd.f32 %v2194_v37, %v5694_v38  ;;  %v2213_v3 = vpop.f32.mrf.mxu1  ;;  %4519 = vmatpush.bf16.msra.mxu1 %v3982_v14  ;;  %v3162_v62 = vor.u32 %v4271_v58, %v3161_v57 }
 0x127   :  { %v2250_v4 = vadd.f32 %v2249_v0, %v5617_v1  ;;  %v2214_v7 = vadd.f32 %v2213_v3, %v5694_v38 }
 0x128   :  { %v2676_v8 = vmax.f32 %v2231_v63, 0.0  ;;  %v2715_v9 = vmax.f32 %v2195_v2, 0.0 }
 0x129   :  { %v2677_v10 = vmax.f32 %v2250_v4, 0.0  ;;  %v2716_v13 = vmax.f32 %v2214_v7, 0.0  ;;  %2642 = vmatpush.bf16.msra.mxu0 %v3818_v21 }
 0x12a   :  { %2840 = vst [vmem:[%s7189_s3 + $0x90] sm:$0xff] %v2676_v8  ;;  %4520 = vmatpush.bf16.msra.mxu1 %v3818_v21 }
 0x12b   :  { %2880 = vst [vmem:[%s7189_s3 + $0x1c8] sm:$0xff] %v2715_v9 }
 0x12c   :  { %2881 = vst [vmem:[%s7189_s3 + $0x1d0] sm:$0xff] %v2716_v13 }
 0x12d   :  { %2841 = vst [vmem:[%s7189_s3 + $0x98] sm:$0xff] %v2677_v10  ;;  %v2232_v15 = vpop.f32.mrf.mxu2  ;;  %v2197_v18 = vpop.f32.mrf.mxu0  ;;  %2643 = vmatpush.bf16.msra.mxu0 %v3654_v33 }
 0x12e   :  { %v2233_v20 = vadd.f32 %v2232_v15, %v5694_v38  ;;  %v2251_v29 = vpop.f32.mrf.mxu3  ;;  %v2198_v22 = vadd.f32 %v2197_v18, %v5735_v5  ;;  %v2216_v23 = vpop.f32.mrf.mxu1  ;;  %4521 = vmatpush.bf16.msra.mxu1 %v3654_v33 }
 0x12f   :  { %v2252_v24 = vadd.f32 %v2251_v29, %v5694_v38  ;;  %v2217_v25 = vadd.f32 %v2216_v23, %v5735_v5 }
 0x130   :  { %v2717_v26 = vmax.f32 %v2233_v20, 0.0  ;;  %v2756_v27 = vmax.f32 %v2198_v22, 0.0  ;;  %4212 = vmatmul.msk.bf16.gmra.mxu0 %vm1748_vm1, %v6565_v40 }
 0x131   :  { %v2718_v28 = vmax.f32 %v2252_v24, 0.0  ;;  %v2757_v32 = vmax.f32 %v2217_v25, 0.0  ;;  %4214 = vmatmul.msk.bf16.gmra.mxu1 %vm1748_vm1, %v6565_v40  ;;  %2644 = vmatpush.bf16.msra.mxu0 %v3490_v43 }
 0x132   :  { %2882 = vst [vmem:[%s7189_s3 + $0x1d8] sm:$0xff] %v2717_v26  ;;  %4216 = vmatmul.msk.bf16.gmra.mxu2 %vm1748_vm1, %v6565_v40  ;;  %4522 = vmatpush.bf16.msra.mxu1 %v3490_v43 }
 0x133   :  { %2921 = vst [vmem:[%s7189_s3 + $0x310] sm:$0xff] %v2756_v27  ;;  %4218 = vmatmul.msk.bf16.gmra.mxu3 %vm1748_vm1, %v6565_v40 }
 0x134   :  { %2922 = vst [vmem:[%s7189_s3 + $0x318] sm:$0xff] %v2757_v32 }
 0x135   :  { %2883 = vst [vmem:[%s7189_s3 + $0x1e0] sm:$0xff] %v2718_v28  ;;  %v2235_v34 = vpop.f32.mrf.mxu2  ;;  %v2199_v39 = vpop.f32.mrf.mxu0  ;;  %2645 = vmatpush.bf16.msra.mxu0 %v3326_v55 }
 0x136   :  { %v2236_v41 = vadd.f32 %v2235_v34, %v5735_v5  ;;  %v2254_v42 = vpop.f32.mrf.mxu3  ;;  %v2200_v45 = vadd.f32 %v2199_v39, %v5834_v53  ;;  %v2218_v46 = vpop.f32.mrf.mxu1  ;;  %4523 = vmatpush.bf16.msra.mxu1 %v3326_v55 }
 0x137   :  { %v2255_v47 = vadd.f32 %v2254_v42, %v5735_v5  ;;  %v2219_v48 = vadd.f32 %v2218_v46, %v5834_v53 }
 0x138   :  { %v2758_v49 = vmax.f32 %v2236_v41, 0.0  ;;  %v2797_v50 = vmax.f32 %v2200_v45, 0.0 }
 0x139   :  { %v2759_v19 = vmax.f32 %v2255_v47, 0.0  ;;  %v2798_v54 = vmax.f32 %v2219_v48, 0.0  ;;  %2646 = vmatpush.bf16.msra.mxu0 %v3162_v62 }
 0x13a   :  { %2923 = vst [vmem:[%s7189_s3 + $0x320] sm:$0xff] %v2758_v49  ;;  %4524 = vmatpush.bf16.msra.mxu1 %v3162_v62 }
 0x13b   :  { %2962 = vst [vmem:[%s7189_s3 + $0x458] sm:$0xff] %v2797_v50 }
 0x13c   :  { %2963 = vst [vmem:[%s7189_s3 + $0x460] sm:$0xff] %v2798_v54 }
 0x13d   :  { %2924 = vst [vmem:[%s7189_s3 + $0x328] sm:$0xff] %v2759_v19  ;;  %v2237_v56 = vpop.f32.mrf.mxu2  ;;  %v2268_v61 = vpop.f32.mrf.mxu0 }
 0x13e   :  { %v2238_v59 = vadd.f32 %v2237_v56, %v5834_v53  ;;  %v2256_v60 = vpop.f32.mrf.mxu3  ;;  %v2269_v63 = vadd.f32 %v2268_v61, %v5617_v1  ;;  %v2287_v0 = vpop.f32.mrf.mxu1 }
 0x13f   :  { %v2257_v37 = vadd.f32 %v2256_v60, %v5834_v53  ;;  %v2288_v3 = vadd.f32 %v2287_v0, %v5617_v1 }
 0x140   :  { %v2799_v2 = vmax.f32 %v2238_v59, 0.0  ;;  %v2678_v6 = vmax.f32 %v2269_v63, 0.0  ;;  %4219 = vmatmul.msk.bf16.vlgmr.msrb.gmra.mxu0 %vm1748_vm1, %v6438_v31 }
 0x141   :  { %v2800_v4 = vmax.f32 %v2257_v37, 0.0  ;;  %v2679_v7 = vmax.f32 %v2288_v3, 0.0  ;;  %4221 = vmatmul.msk.bf16.vlgmr.msrb.gmra.mxu1 %vm1748_vm1, %v6438_v31 }
 0x142   :  { %2964 = vst [vmem:[%s7189_s3 + $0x468] sm:$0xff] %v2799_v2  ;;  %4223 = vmatmul.msk.bf16.vlgmr.msrb.gmra.mxu2 %vm1748_vm1, %v6438_v31 }
 0x143   :  { %2965 = vst [vmem:[%s7189_s3 + $0x470] sm:$0xff] %v2800_v4  ;;  %4225 = vmatmul.msk.bf16.vlgmr.msrb.gmra.mxu3 %vm1748_vm1, %v6438_v31 }
 0x144   :  { %2842 = vst [vmem:[%s7189_s3 + $0xa0] sm:$0xff] %v2678_v6 }
 0x145   :  { %2843 = vst [vmem:[%s7189_s3 + $0xa8] sm:$0xff] %v2679_v7  ;;  %v2306_v8 = vpop.f32.mrf.mxu2  ;;  %v2270_v9 = vpop.f32.mrf.mxu0 }
 0x146   :  { %v2307_v10 = vadd.f32 %v2306_v8, %v5617_v1  ;;  %v2325_v11 = vpop.f32.mrf.mxu3  ;;  %v2271_v12 = vadd.f32 %v2270_v9, %v5694_v38  ;;  %v2289_v13 = vpop.f32.mrf.mxu1 }
 0x147   :  { %v2326_v14 = vadd.f32 %v2325_v11, %v5617_v1  ;;  %v2290_v15 = vadd.f32 %v2289_v13, %v5694_v38 }
 0x148   :  { %v2680_v16 = vmax.f32 %v2307_v10, 0.0  ;;  %v2719_v17 = vmax.f32 %v2271_v12, 0.0 }
 0x149   :  { %v2681_v18 = vmax.f32 %v2326_v14, 0.0  ;;  %v2720_v20 = vmax.f32 %v2290_v15, 0.0 }
 0x14a   :  { %2844 = vst [vmem:[%s7189_s3 + $0xb0] sm:$0xff] %v2680_v16 }
 0x14b   :  { %2884 = vst [vmem:[%s7189_s3 + $0x1e8] sm:$0xff] %v2719_v17 }
 0x14c   :  { %2885 = vst [vmem:[%s7189_s3 + $0x1f0] sm:$0xff] %v2720_v20 }
 0x14d   :  { %2845 = vst [vmem:[%s7189_s3 + $0xb8] sm:$0xff] %v2681_v18  ;;  %v2308_v29 = vpop.f32.mrf.mxu2  ;;  %v2273_v21 = vpop.f32.mrf.mxu0 }
 0x14e   :  { %v2309_v22 = vadd.f32 %v2308_v29, %v5694_v38  ;;  %v2327_v23 = vpop.f32.mrf.mxu3  ;;  %v2274_v24 = vadd.f32 %v2273_v21, %v5735_v5  ;;  %v2292_v25 = vpop.f32.mrf.mxu1 }
 0x14f   :  { %v2328_v26 = vadd.f32 %v2327_v23, %v5694_v38  ;;  %v2293_v27 = vadd.f32 %v2292_v25, %v5735_v5 }
 0x150   :  { %v2721_v28 = vmax.f32 %v2309_v22, 0.0  ;;  %v2760_v30 = vmax.f32 %v2274_v24, 0.0  ;;  %4220 = vmatmul.msk.bf16.gmra.mxu0 %vm1748_vm1, %v6565_v40 }
 0x151   :  { %v2722_v44 = vmax.f32 %v2328_v26, 0.0  ;;  %v2761_v32 = vmax.f32 %v2293_v27, 0.0  ;;  %4222 = vmatmul.msk.bf16.gmra.mxu1 %vm1748_vm1, %v6565_v40 }
 0x152   :  { %2886 = vst [vmem:[%s7189_s3 + $0x1f8] sm:$0xff] %v2721_v28  ;;  %4224 = vmatmul.msk.bf16.gmra.mxu2 %vm1748_vm1, %v6565_v40 }
 0x153   :  { %2925 = vst [vmem:[%s7189_s3 + $0x330] sm:$0xff] %v2760_v30  ;;  %4226 = vmatmul.msk.bf16.gmra.mxu3 %vm1748_vm1, %v6565_v40 }
 0x154   :  { %2926 = vst [vmem:[%s7189_s3 + $0x338] sm:$0xff] %v2761_v32 }
 0x155   :  { %2887 = vst [vmem:[%s7189_s3 + $0x200] sm:$0xff] %v2722_v44  ;;  %v2311_v33 = vpop.f32.mrf.mxu2  ;;  %v2275_v34 = vpop.f32.mrf.mxu0 }
 0x156   :  { %v2312_v35 = vadd.f32 %v2311_v33, %v5735_v5  ;;  %v2330_v36 = vpop.f32.mrf.mxu3  ;;  %v2276_v39 = vadd.f32 %v2275_v34, %v5834_v53  ;;  %v2294_v41 = vpop.f32.mrf.mxu1 }
 0x157   :  { %v2331_v42 = vadd.f32 %v2330_v36, %v5735_v5  ;;  %v2295_v43 = vadd.f32 %v2294_v41, %v5834_v53 }
 0x158   :  { %v2762_v45 = vmax.f32 %v2312_v35, 0.0  ;;  %v2801_v46 = vmax.f32 %v2276_v39, 0.0 }
 0x159   :  { %v2763_v47 = vmax.f32 %v2331_v42, 0.0  ;;  %v2802_v48 = vmax.f32 %v2295_v43, 0.0 }
 0x15a   :  { %2927 = vst [vmem:[%s7189_s3 + $0x340] sm:$0xff] %v2762_v45 }
 0x15b   :  { %2966 = vst [vmem:[%s7189_s3 + $0x478] sm:$0xff] %v2801_v46 }
 0x15c   :  { %2967 = vst [vmem:[%s7189_s3 + $0x480] sm:$0xff] %v2802_v48 }
 0x15d   :  { %2928 = vst [vmem:[%s7189_s3 + $0x348] sm:$0xff] %v2763_v47  ;;  %v2313_v49 = vpop.f32.mrf.mxu2  ;;  %v2344_v51 = vpop.f32.mrf.mxu0 }
 0x15e   :  { %v2314_v50 = vadd.f32 %v2313_v49, %v5834_v53  ;;  %v2332_v19 = vpop.f32.mrf.mxu3  ;;  %v2345_v54 = vadd.f32 %v2344_v51, %v5617_v1  ;;  %v2363_v55 = vpop.f32.mrf.mxu1 }
 0x15f   :  { %v2333_v52 = vadd.f32 %v2332_v19, %v5834_v53  ;;  %v2364_v57 = vadd.f32 %v2363_v55, %v5617_v1 }
 0x160   :  { %v2803_v56 = vmax.f32 %v2314_v50, 0.0  ;;  %v2682_v59 = vmax.f32 %v2345_v54, 0.0  ;;  %4227 = vmatmul.msk.bf16.vlgmr.msra.gmra.mxu0 %vm1748_vm1, %v6438_v31 }
 0x161   :  { %v2804_v58 = vmax.f32 %v2333_v52, 0.0  ;;  %v2683_v60 = vmax.f32 %v2364_v57, 0.0  ;;  %4228 = vmatmul.msk.bf16.vlgmr.msra.gmra.mxu1 %vm1748_vm1, %v6565_v40 }
 0x162   :  { %2968 = vst [vmem:[%s7189_s3 + $0x488] sm:$0xff] %v2803_v56 }
 0x163   :  { %2969 = vst [vmem:[%s7189_s3 + $0x490] sm:$0xff] %v2804_v58 }
 0x164   :  { %2846 = vst [vmem:[%s7189_s3 + $0xc0] sm:$0xff] %v2682_v59 }
 0x165   :  { %2847 = vst [vmem:[%s7189_s3 + $0xc8] sm:$0xff] %v2683_v60  ;;  %v2382_v31 = vpop.f32.mrf.mxu2  ;;  %v2346_v61 = vpop.f32.mrf.mxu0 }
 0x166   :  { %v2383_v62 = vadd.f32 %v2382_v31, %v5617_v1  ;;  %v2401_v37 = vpop.f32.mrf.mxu3  ;;  %v2347_v63 = vadd.f32 %v2346_v61, %v5694_v38  ;;  %v2365_v40 = vpop.f32.mrf.mxu1 }
 0x167   :  { %v2402_v0 = vadd.f32 %v2401_v37, %v5617_v1  ;;  %v2366_v2 = vadd.f32 %v2365_v40, %v5694_v38 }
 0x168   :  { %v2684_v3 = vmax.f32 %v2383_v62, 0.0  ;;  %v2723_v4 = vmax.f32 %v2347_v63, 0.0 }
 0x169   :  { %v2685_v6 = vmax.f32 %v2402_v0, 0.0  ;;  %v2724_v7 = vmax.f32 %v2366_v2, 0.0 }
 0x16a   :  { %2848 = vst [vmem:[%s7189_s3 + $0xd0] sm:$0xff] %v2684_v3 }
 0x16b   :  { %2888 = vst [vmem:[%s7189_s3 + $0x208] sm:$0xff] %v2723_v4 }
 0x16c   :  { %2889 = vst [vmem:[%s7189_s3 + $0x210] sm:$0xff] %v2724_v7 }
 0x16d   :  { %2849 = vst [vmem:[%s7189_s3 + $0xd8] sm:$0xff] %v2685_v6  ;;  %v2384_v8 = vpop.f32.mrf.mxu2  ;;  %v2349_v9 = vpop.f32.mrf.mxu0 }
 0x16e   :  { %v2385_v10 = vadd.f32 %v2384_v8, %v5694_v38  ;;  %v2403_v11 = vpop.f32.mrf.mxu3  ;;  %v2350_v12 = vadd.f32 %v2349_v9, %v5735_v5  ;;  %v2368_v13 = vpop.f32.mrf.mxu1 }
 0x16f   :  { %v2404_v14 = vadd.f32 %v2403_v11, %v5694_v38  ;;  %v2369_v15 = vadd.f32 %v2368_v13, %v5735_v5 }
 0x170   :  { %v2725_v16 = vmax.f32 %v2385_v10, 0.0  ;;  %v2764_v17 = vmax.f32 %v2350_v12, 0.0 }
 0x171   :  { %v2726_v18 = vmax.f32 %v2404_v14, 0.0  ;;  %v2765_v20 = vmax.f32 %v2369_v15, 0.0 }
 0x172   :  { %2890 = vst [vmem:[%s7189_s3 + $0x218] sm:$0xff] %v2725_v16 }
 0x173   :  { %2929 = vst [vmem:[%s7189_s3 + $0x350] sm:$0xff] %v2764_v17 }
 0x174   :  { %2930 = vst [vmem:[%s7189_s3 + $0x358] sm:$0xff] %v2765_v20 }
 0x175   :  { %2891 = vst [vmem:[%s7189_s3 + $0x220] sm:$0xff] %v2726_v18  ;;  %v2387_v29 = vpop.f32.mrf.mxu2  ;;  %v2351_v21 = vpop.f32.mrf.mxu0 }
 0x176   :  { %v2388_v22 = vadd.f32 %v2387_v29, %v5735_v5  ;;  %v2406_v23 = vpop.f32.mrf.mxu3  ;;  %v2352_v24 = vadd.f32 %v2351_v21, %v5834_v53  ;;  %v2370_v25 = vpop.f32.mrf.mxu1 }
 0x177   :  { %v2407_v26 = vadd.f32 %v2406_v23, %v5735_v5  ;;  %v2371_v27 = vadd.f32 %v2370_v25, %v5834_v53 }
 0x178   :  { %v2766_v28 = vmax.f32 %v2388_v22, 0.0  ;;  %v2805_v30 = vmax.f32 %v2352_v24, 0.0 }
 0x179   :  { %v2767_v44 = vmax.f32 %v2407_v26, 0.0  ;;  %v2806_v32 = vmax.f32 %v2371_v27, 0.0 }
 0x17a   :  { %2931 = vst [vmem:[%s7189_s3 + $0x360] sm:$0xff] %v2766_v28 }
 0x17b   :  { %2970 = vst [vmem:[%s7189_s3 + $0x498] sm:$0xff] %v2805_v30 }
 0x17c   :  { %2971 = vst [vmem:[%s7189_s3 + $0x4a0] sm:$0xff] %v2806_v32 }
 0x17d   :  { %2932 = vst [vmem:[%s7189_s3 + $0x368] sm:$0xff] %v2767_v44  ;;  %v2389_v33 = vpop.f32.mrf.mxu2  ;;  %v2420_v36 = vpop.f32.mrf.mxu0 }
 0x17e   :  { %v2390_v34 = vadd.f32 %v2389_v33, %v5834_v53  ;;  %v2408_v35 = vpop.f32.mrf.mxu3  ;;  %v2421_v41 = vadd.f32 %v2420_v36, %v5617_v1  ;;  %v2439_v42 = vpop.f32.mrf.mxu1 }
 0x17f   :  { %v2409_v39 = vadd.f32 %v2408_v35, %v5834_v53  ;;  %v2440_v45 = vadd.f32 %v2439_v42, %v5617_v1 }
 0x180   :  { %v2807_v43 = vmax.f32 %v2390_v34, 0.0  ;;  %v2686_v47 = vmax.f32 %v2421_v41, 0.0 }
 0x181   :  { %v2808_v46 = vmax.f32 %v2409_v39, 0.0  ;;  %v2687_v48 = vmax.f32 %v2440_v45, 0.0 }
 0x182   :  { %2972 = vst [vmem:[%s7189_s3 + $0x4a8] sm:$0xff] %v2807_v43 }
 0x183   :  { %2973 = vst [vmem:[%s7189_s3 + $0x4b0] sm:$0xff] %v2808_v46 }
 0x184   :  { %2850 = vst [vmem:[%s7189_s3 + $0xe0] sm:$0xff] %v2686_v47 }
 0x185   :  { %2851 = vst [vmem:[%s7189_s3 + $0xe8] sm:$0xff] %v2687_v48  ;;  %v2458_v49 = vpop.f32.mrf.mxu2  ;;  %v2422_v50 = vpop.f32.mrf.mxu0 }
 0x186   :  { %v2459_v19 = vadd.f32 %v2458_v49, %v5617_v1  ;;  %v2477_v51 = vpop.f32.mrf.mxu3  ;;  %v2423_v52 = vadd.f32 %v2422_v50, %v5694_v38  ;;  %v2441_v54 = vpop.f32.mrf.mxu1 }
 0x187   :  { %v2478_v55 = vadd.f32 %v2477_v51, %v5617_v1  ;;  %v2442_v56 = vadd.f32 %v2441_v54, %v5694_v38 }
 0x188   :  { %v2688_v57 = vmax.f32 %v2459_v19, 0.0  ;;  %v2727_v58 = vmax.f32 %v2423_v52, 0.0 }
 0x189   :  { %v2689_v59 = vmax.f32 %v2478_v55, 0.0  ;;  %v2728_v60 = vmax.f32 %v2442_v56, 0.0 }
 0x18a   :  { %2852 = vst [vmem:[%s7189_s3 + $0xf0] sm:$0xff] %v2688_v57 }
 0x18b   :  { %2892 = vst [vmem:[%s7189_s3 + $0x228] sm:$0xff] %v2727_v58 }
 0x18c   :  { %2893 = vst [vmem:[%s7189_s3 + $0x230] sm:$0xff] %v2728_v60 }
 0x18d   :  { %2853 = vst [vmem:[%s7189_s3 + $0xf8] sm:$0xff] %v2689_v59  ;;  %v2460_v31 = vpop.f32.mrf.mxu2  ;;  %v2425_v61 = vpop.f32.mrf.mxu0 }
 0x18e   :  { %v2461_v62 = vadd.f32 %v2460_v31, %v5694_v38  ;;  %v2479_v37 = vpop.f32.mrf.mxu3  ;;  %v2426_v63 = vadd.f32 %v2425_v61, %v5735_v5  ;;  %v2444_v40 = vpop.f32.mrf.mxu1 }
 0x18f   :  { %v2480_v0 = vadd.f32 %v2479_v37, %v5694_v38  ;;  %v2445_v2 = vadd.f32 %v2444_v40, %v5735_v5 }
 0x190   :  { %v2729_v3 = vmax.f32 %v2461_v62, 0.0  ;;  %v2768_v4 = vmax.f32 %v2426_v63, 0.0 }
 0x191   :  { %v2730_v6 = vmax.f32 %v2480_v0, 0.0  ;;  %v2769_v7 = vmax.f32 %v2445_v2, 0.0 }
 0x192   :  { %2894 = vst [vmem:[%s7189_s3 + $0x238] sm:$0xff] %v2729_v3 }
 0x193   :  { %2933 = vst [vmem:[%s7189_s3 + $0x370] sm:$0xff] %v2768_v4 }
 0x194   :  { %2934 = vst [vmem:[%s7189_s3 + $0x378] sm:$0xff] %v2769_v7 }
 0x195   :  { %2895 = vst [vmem:[%s7189_s3 + $0x240] sm:$0xff] %v2730_v6  ;;  %v2463_v8 = vpop.f32.mrf.mxu2  ;;  %v2427_v9 = vpop.f32.mrf.mxu0 }
 0x196   :  { %v2464_v10 = vadd.f32 %v2463_v8, %v5735_v5  ;;  %v2482_v11 = vpop.f32.mrf.mxu3  ;;  %v2428_v12 = vadd.f32 %v2427_v9, %v5834_v53  ;;  %v2446_v13 = vpop.f32.mrf.mxu1 }
 0x197   :  { %v2483_v14 = vadd.f32 %v2482_v11, %v5735_v5  ;;  %v2447_v15 = vadd.f32 %v2446_v13, %v5834_v53 }
 0x198   :  { %v2770_v16 = vmax.f32 %v2464_v10, 0.0  ;;  %v2809_v17 = vmax.f32 %v2428_v12, 0.0 }
 0x199   :  { %v2771_v18 = vmax.f32 %v2483_v14, 0.0  ;;  %v2810_v20 = vmax.f32 %v2447_v15, 0.0 }
 0x19a   :  { %2935 = vst [vmem:[%s7189_s3 + $0x380] sm:$0xff] %v2770_v16 }
 0x19b   :  { %2974 = vst [vmem:[%s7189_s3 + $0x4b8] sm:$0xff] %v2809_v17 }
 0x19c   :  { %2975 = vst [vmem:[%s7189_s3 + $0x4c0] sm:$0xff] %v2810_v20 }
 0x19d   :  { %2936 = vst [vmem:[%s7189_s3 + $0x388] sm:$0xff] %v2771_v18  ;;  %v2465_v29 = vpop.f32.mrf.mxu2  ;;  %v2496_v23 = vpop.f32.mrf.mxu0 }
 0x19e   :  { %v2466_v21 = vadd.f32 %v2465_v29, %v5834_v53  ;;  %v2484_v22 = vpop.f32.mrf.mxu3  ;;  %v2497_v25 = vadd.f32 %v2496_v23, %v5617_v1  ;;  %v2515_v26 = vpop.f32.mrf.mxu1 }
 0x19f   :  { %v2485_v24 = vadd.f32 %v2484_v22, %v5834_v53  ;;  %v2516_v28 = vadd.f32 %v2515_v26, %v5617_v1 }
 0x1a0   :  { %v2811_v27 = vmax.f32 %v2466_v21, 0.0  ;;  %v2690_v44 = vmax.f32 %v2497_v25, 0.0 }
 0x1a1   :  { %v2812_v30 = vmax.f32 %v2485_v24, 0.0  ;;  %v2691_v32 = vmax.f32 %v2516_v28, 0.0 }
 0x1a2   :  { %2976 = vst [vmem:[%s7189_s3 + $0x4c8] sm:$0xff] %v2811_v27 }
 0x1a3   :  { %2977 = vst [vmem:[%s7189_s3 + $0x4d0] sm:$0xff] %v2812_v30 }
 0x1a4   :  { %2854 = vst [vmem:[%s7189_s3 + $0x100] sm:$0xff] %v2690_v44 }
 0x1a5   :  { %2855 = vst [vmem:[%s7189_s3 + $0x108] sm:$0xff] %v2691_v32  ;;  %v2534_v33 = vpop.f32.mrf.mxu2  ;;  %v2498_v34 = vpop.f32.mrf.mxu0 }
 0x1a6   :  { %v2535_v35 = vadd.f32 %v2534_v33, %v5617_v1  ;;  %v2553_v36 = vpop.f32.mrf.mxu3  ;;  %v2499_v39 = vadd.f32 %v2498_v34, %v5694_v38  ;;  %v2517_v41 = vpop.f32.mrf.mxu1 }
 0x1a7   :  { %v2554_v42 = vadd.f32 %v2553_v36, %v5617_v1  ;;  %v2518_v43 = vadd.f32 %v2517_v41, %v5694_v38 }
 0x1a8   :  { %v2692_v45 = vmax.f32 %v2535_v35, 0.0  ;;  %v2731_v46 = vmax.f32 %v2499_v39, 0.0 }
 0x1a9   :  { %v2693_v47 = vmax.f32 %v2554_v42, 0.0  ;;  %v2732_v48 = vmax.f32 %v2518_v43, 0.0 }
 0x1aa   :  { %2856 = vst [vmem:[%s7189_s3 + $0x110] sm:$0xff] %v2692_v45 }
 0x1ab   :  { %2896 = vst [vmem:[%s7189_s3 + $0x248] sm:$0xff] %v2731_v46 }
 0x1ac   :  { %2897 = vst [vmem:[%s7189_s3 + $0x250] sm:$0xff] %v2732_v48 }
 0x1ad   :  { %2857 = vst [vmem:[%s7189_s3 + $0x118] sm:$0xff] %v2693_v47  ;;  %v2536_v49 = vpop.f32.mrf.mxu2  ;;  %v2501_v50 = vpop.f32.mrf.mxu0 }
 0x1ae   :  { %v2537_v19 = vadd.f32 %v2536_v49, %v5694_v38  ;;  %v2555_v51 = vpop.f32.mrf.mxu3  ;;  %v2502_v52 = vadd.f32 %v2501_v50, %v5735_v5  ;;  %v2520_v54 = vpop.f32.mrf.mxu1 }
 0x1af   :  { %v2556_v55 = vadd.f32 %v2555_v51, %v5694_v38  ;;  %v2521_v56 = vadd.f32 %v2520_v54, %v5735_v5 }
 0x1b0   :  { %v2733_v57 = vmax.f32 %v2537_v19, 0.0  ;;  %v2772_v58 = vmax.f32 %v2502_v52, 0.0 }
 0x1b1   :  { %v2734_v59 = vmax.f32 %v2556_v55, 0.0  ;;  %v2773_v60 = vmax.f32 %v2521_v56, 0.0 }
 0x1b2   :  { %2898 = vst [vmem:[%s7189_s3 + $0x258] sm:$0xff] %v2733_v57 }
 0x1b3   :  { %2937 = vst [vmem:[%s7189_s3 + $0x390] sm:$0xff] %v2772_v58 }
 0x1b4   :  { %2938 = vst [vmem:[%s7189_s3 + $0x398] sm:$0xff] %v2773_v60 }
 0x1b5   :  { %2899 = vst [vmem:[%s7189_s3 + $0x260] sm:$0xff] %v2734_v59  ;;  %v2539_v31 = vpop.f32.mrf.mxu2  ;;  %v2503_v61 = vpop.f32.mrf.mxu0 }
 0x1b6   :  { %v2540_v62 = vadd.f32 %v2539_v31, %v5735_v5  ;;  %v2558_v37 = vpop.f32.mrf.mxu3  ;;  %v2504_v63 = vadd.f32 %v2503_v61, %v5834_v53  ;;  %v2522_v40 = vpop.f32.mrf.mxu1 }
 0x1b7   :  { %v2559_v0 = vadd.f32 %v2558_v37, %v5735_v5  ;;  %v2523_v2 = vadd.f32 %v2522_v40, %v5834_v53 }
 0x1b8   :  { %v2774_v3 = vmax.f32 %v2540_v62, 0.0  ;;  %v2813_v4 = vmax.f32 %v2504_v63, 0.0 }
 0x1b9   :  { %v2775_v6 = vmax.f32 %v2559_v0, 0.0  ;;  %v2814_v7 = vmax.f32 %v2523_v2, 0.0 }
 0x1ba   :  { %2939 = vst [vmem:[%s7189_s3 + $0x3a0] sm:$0xff] %v2774_v3 }
 0x1bb   :  { %2978 = vst [vmem:[%s7189_s3 + $0x4d8] sm:$0xff] %v2813_v4 }
 0x1bc   :  { %2979 = vst [vmem:[%s7189_s3 + $0x4e0] sm:$0xff] %v2814_v7 }
 0x1bd   :  { %2940 = vst [vmem:[%s7189_s3 + $0x3a8] sm:$0xff] %v2775_v6  ;;  %v2541_v8 = vpop.f32.mrf.mxu2  ;;  %v2572_v11 = vpop.f32.mrf.mxu0 }
 0x1be   :  { %v2542_v9 = vadd.f32 %v2541_v8, %v5834_v53  ;;  %v2560_v10 = vpop.f32.mrf.mxu3  ;;  %v2573_v13 = vadd.f32 %v2572_v11, %v5617_v1  ;;  %v2591_v14 = vpop.f32.mrf.mxu1 }
 0x1bf   :  { %v2561_v12 = vadd.f32 %v2560_v10, %v5834_v53  ;;  %v2592_v16 = vadd.f32 %v2591_v14, %v5617_v1 }
 0x1c0   :  { %v2815_v15 = vmax.f32 %v2542_v9, 0.0  ;;  %v2694_v18 = vmax.f32 %v2573_v13, 0.0 }
 0x1c1   :  { %v2816_v17 = vmax.f32 %v2561_v12, 0.0  ;;  %v2695_v20 = vmax.f32 %v2592_v16, 0.0 }
 0x1c2   :  { %2980 = vst [vmem:[%s7189_s3 + $0x4e8] sm:$0xff] %v2815_v15 }
 0x1c3   :  { %2981 = vst [vmem:[%s7189_s3 + $0x4f0] sm:$0xff] %v2816_v17 }
 0x1c4   :  { %2858 = vst [vmem:[%s7189_s3 + $0x120] sm:$0xff] %v2694_v18 }
 0x1c5   :  { %2859 = vst [vmem:[%s7189_s3 + $0x128] sm:$0xff] %v2695_v20  ;;  %v2610_v29 = vpop.f32.mrf.mxu2  ;;  %v2574_v21 = vpop.f32.mrf.mxu0 }
 0x1c6   :  { %v2611_v22 = vadd.f32 %v2610_v29, %v5617_v1  ;;  %v2629_v23 = vpop.f32.mrf.mxu3  ;;  %v2575_v24 = vadd.f32 %v2574_v21, %v5694_v38  ;;  %v2593_v25 = vpop.f32.mrf.mxu1 }
 0x1c7   :  { %v2630_v26 = vadd.f32 %v2629_v23, %v5617_v1  ;;  %v2594_v27 = vadd.f32 %v2593_v25, %v5694_v38 }
 0x1c8   :  { %v2696_v28 = vmax.f32 %v2611_v22, 0.0  ;;  %v2735_v30 = vmax.f32 %v2575_v24, 0.0 }
 0x1c9   :  { %v2697_v44 = vmax.f32 %v2630_v26, 0.0  ;;  %v2736_v32 = vmax.f32 %v2594_v27, 0.0 }
 0x1ca   :  { %2860 = vst [vmem:[%s7189_s3 + $0x130] sm:$0xff] %v2696_v28 }
 0x1cb   :  { %2900 = vst [vmem:[%s7189_s3 + $0x268] sm:$0xff] %v2735_v30 }
 0x1cc   :  { %2901 = vst [vmem:[%s7189_s3 + $0x270] sm:$0xff] %v2736_v32 }
 0x1cd   :  { %2861 = vst [vmem:[%s7189_s3 + $0x138] sm:$0xff] %v2697_v44  ;;  %v2612_v33 = vpop.f32.mrf.mxu2  ;;  %v2577_v34 = vpop.f32.mrf.mxu0 }
 0x1ce   :  { %v2613_v35 = vadd.f32 %v2612_v33, %v5694_v38  ;;  %v2631_v36 = vpop.f32.mrf.mxu3  ;;  %v2578_v39 = vadd.f32 %v2577_v34, %v5735_v5  ;;  %v2596_v41 = vpop.f32.mrf.mxu1 }
 0x1cf   :  { %v2632_v42 = vadd.f32 %v2631_v36, %v5694_v38  ;;  %v2597_v43 = vadd.f32 %v2596_v41, %v5735_v5 }
 0x1d0   :  { %v2737_v45 = vmax.f32 %v2613_v35, 0.0  ;;  %v2776_v46 = vmax.f32 %v2578_v39, 0.0 }
 0x1d1   :  { %v2738_v47 = vmax.f32 %v2632_v42, 0.0  ;;  %v2777_v48 = vmax.f32 %v2597_v43, 0.0 }
 0x1d2   :  { %2902 = vst [vmem:[%s7189_s3 + $0x278] sm:$0xff] %v2737_v45 }
 0x1d3   :  { %2941 = vst [vmem:[%s7189_s3 + $0x3b0] sm:$0xff] %v2776_v46 }
 0x1d4   :  { %2942 = vst [vmem:[%s7189_s3 + $0x3b8] sm:$0xff] %v2777_v48 }
 0x1d5   :  { %2903 = vst [vmem:[%s7189_s3 + $0x280] sm:$0xff] %v2738_v47  ;;  %v2615_v49 = vpop.f32.mrf.mxu2  ;;  %v2579_v50 = vpop.f32.mrf.mxu0 }
 0x1d6   :  { %v2616_v19 = vadd.f32 %v2615_v49, %v5735_v5  ;;  %v2634_v51 = vpop.f32.mrf.mxu3  ;;  %v2580_v52 = vadd.f32 %v2579_v50, %v5834_v53  ;;  %v2598_v54 = vpop.f32.mrf.mxu1 }
 0x1d7   :  { %v2635_v55 = vadd.f32 %v2634_v51, %v5735_v5  ;;  %v2599_v56 = vadd.f32 %v2598_v54, %v5834_v53 }
 0x1d8   :  { %v2778_v57 = vmax.f32 %v2616_v19, 0.0  ;;  %v2817_v58 = vmax.f32 %v2580_v52, 0.0 }
 0x1d9   :  { %v2779_v59 = vmax.f32 %v2635_v55, 0.0  ;;  %v2818_v60 = vmax.f32 %v2599_v56, 0.0 }
 0x1da   :  { %2943 = vst [vmem:[%s7189_s3 + $0x3c0] sm:$0xff] %v2778_v57 }
 0x1db   :  { %2982 = vst [vmem:[%s7189_s3 + $0x4f8] sm:$0xff] %v2817_v58 }
 0x1dc   :  { %2983 = vst [vmem:[%s7189_s3 + $0x500] sm:$0xff] %v2818_v60 }
 0x1dd   :  { %2944 = vst [vmem:[%s7189_s3 + $0x3c8] sm:$0xff] %v2779_v59  ;;  %v2617_v31 = vpop.f32.mrf.mxu2  ;;  %v2648_v37 = vpop.f32.mrf.mxu0 }
 0x1de   :  { %v2618_v61 = vadd.f32 %v2617_v31, %v5834_v53  ;;  %v2636_v62 = vpop.f32.mrf.mxu3  ;;  %v2649_v40 = vadd.f32 %v2648_v37, %v5617_v1  ;;  %v2653_v0 = vpop.f32.mrf.mxu1 }
 0x1df   :  { %v2637_v63 = vadd.f32 %v2636_v62, %v5834_v53  ;;  %v2654_v3 = vadd.f32 %v2653_v0, %v5735_v5 }
 0x1e0   :  { %v2819_v2 = vmax.f32 %v2618_v61, 0.0  ;;  %v2698_v6 = vmax.f32 %v2649_v40, 0.0 }
 0x1e1   :  { %v2820_v4 = vmax.f32 %v2637_v63, 0.0  ;;  %v2780_v7 = vmax.f32 %v2654_v3, 0.0 }
 0x1e2   :  { %2984 = vst [vmem:[%s7189_s3 + $0x508] sm:$0xff] %v2819_v2 }
 0x1e3   :  { %2985 = vst [vmem:[%s7189_s3 + $0x510] sm:$0xff] %v2820_v4 }
 0x1e4   :  { %2863 = vst.msk [vmem:[%s7189_s3 + $0x140] sm:$0xff] %vm2862_vm2, %v2698_v6 }
 0x1e5   :  { %2945 = vst.msk [vmem:[%s7189_s3 + $0x3d0] sm:$0xff] %vm2862_vm2, %v2780_v7  ;;  %v2650_v1 = vpop.f32.mrf.mxu0 }
 0x1e6   :  { %v2651_v5 = vadd.f32 %v2650_v1, %v5694_v38  ;;  %v2655_v8 = vpop.f32.mrf.mxu1 }
 0x1e7   :  { %v2656_v9 = vadd.f32 %v2655_v8, %v5834_v53 }
 0x1e8   :  { %v2739_v10 = vmax.f32 %v2651_v5, 0.0 }
 0x1e9   :  { %v2821_v11 = vmax.f32 %v2656_v9, 0.0 }
 0x1ea   :  { %2904 = vst.msk [vmem:[%s7189_s3 + $0x288] sm:$0xff] %vm2862_vm2, %v2739_v10 }
 0x1eb   :  { %2986 = vst.msk [vmem:[%s7189_s3 + $0x518] sm:$0xff] %vm2862_vm2, %v2821_v11 }

</bundles_post_ra>
